<compile_context>
chip_gen: v7x
topology: tpu7x:2x2x1
jax: 0.10.0
libtpu: 0.0.40
codegen_flags: <defaults>
</compile_context>

<pallas_src>
import math

import jax
import jax.numpy as jnp
from jax import lax
from jax.experimental import pallas as pl
from jax.experimental.pallas import tpu as pltpu

LN_EPS = 1e-5
_INV_SQRT2 = 1.0 / math.sqrt(2.0)
_NUM_ACTIONS = 13
_PAD_OUT = 128  # lane-dense output slab width of the REM-block kernel
_VMEM = pl.BlockSpec(memory_space=pltpu.MemorySpace.VMEM)


def _round_up(x, m):
    return ((x + m - 1) // m) * m


# --------------------------------------------------------------------------- #
# math helpers (used inside kernels and in the pure-JAX reference)
# --------------------------------------------------------------------------- #
def _gelu(x):
    # PyTorch nn.GELU() default: exact erf form.
    return 0.5 * x * (1.0 + lax.erf(x * _INV_SQRT2))


def _layernorm(x, gamma, beta):
    mean = jnp.mean(x, axis=-1, keepdims=True)
    var = jnp.mean((x - mean) ** 2, axis=-1, keepdims=True)
    return (x - mean) * lax.rsqrt(var + LN_EPS) * gamma + beta


def _ln_valid(x, n_valid, gamma, beta):
    # LayerNorm over the first `n_valid` lanes of a zero-padded buffer: the pad
    # lanes are exactly zero, so plain full-width sums equal sums over the valid
    # region; variance via E[x^2] - mean^2 (clamped) avoids a masked second pass.
    inv_n = 1.0 / n_valid
    mean = jnp.sum(x, axis=-1, keepdims=True) * inv_n
    ex2 = jnp.sum(x * x, axis=-1, keepdims=True) * inv_n
    var = jnp.maximum(ex2 - mean * mean, 0.0)
    return (x - mean) * lax.rsqrt(var + LN_EPS) * gamma + beta


def _hp_dot(a, b):
    return jnp.dot(a, b, precision=jax.lax.Precision.HIGHEST)


# --------------------------------------------------------------------------- #
# Kernel 1: click MLPs + masked 2-layer GRU + in-kernel actions3 assembly
# --------------------------------------------------------------------------- #
def _make_prep_kernel(treedef, n_leaves, seq_len):
    def kernel(click_ref, nclick_ref, eye_ref, len_ref, pp_ref, *rest):
        p = jax.tree_util.tree_unflatten(treedef, rest[:n_leaves])
        out_ref = rest[n_leaves]
        Bp = click_ref.shape[0]

        def mlp(x_ref, mp):
            h = jnp.dot(x_ref[...], mp["w"][...],
                        preferred_element_type=jnp.float32) + mp["b"][...]
            return _gelu(_layernorm(h, mp["g"][...], mp["be"][...]))

        click_enc = mlp(click_ref, p["click"])      # [Bp, E]
        nclick_enc = mlp(nclick_ref, p["clickN"])   # [Bp, E]

        l0, l1 = p["gru"]["l0"], p["gru"]["l1"]
        H = l0["wh"].shape[0]
        E = nclick_enc.shape[-1]
        lens = len_ref[...]                          # [Bp, 1] int32

        # Hoisted layer-0 input projection: one [T*Bp, E] @ [E, 3H] matmul for the
        # time-varying (eye) part; the click contribution is time-invariant.
        xi_all = jnp.dot(eye_ref[...], l0["wi_eye"][...],
                         preferred_element_type=jnp.float32)          # [T*Bp, 3H]
        ci = jnp.dot(click_enc, l0["wi_click"][...],
                     preferred_element_type=jnp.float32) + l0["bi"][...]

        wh0, bh0 = l0["wh"][...], l0["bh"][...]
        wi1, bi1 = l1["wi"][...], l1["bi"][...]
        wh1, bh1 = l1["wh"][...], l1["bh"][...]

        def gru_update(gi, gh, h):
            # PyTorch gate order (r, z, n) inside the fused 3H axis.
            r = jax.nn.sigmoid(gi[:, :H] + gh[:, :H])
            z = jax.nn.sigmoid(gi[:, H:2 * H] + gh[:, H:2 * H])
            n = jnp.tanh(gi[:, 2 * H:] + r * gh[:, 2 * H:])
            return (1.0 - z) * n + z * h

        h0 = jnp.zeros((Bp, H), jnp.float32)
        h1 = jnp.zeros((Bp, H), jnp.float32)
        # Static unroll: seq_len is small here.  For long sequences switch to a
        # fori_loop over a VMEM-staged xi_all to bound vreg pressure.
        for t in range(seq_len):
            valid = lens > t                          # packed-sequence mask
            gi0 = xi_all[t * Bp:(t + 1) * Bp, :] + ci
            gh0 = jnp.dot(h0, wh0, preferred_element_type=jnp.float32) + bh0
            h0 = jnp.where(valid, gru_update(gi0, gh0, h0), h0)
            gi1 = jnp.dot(h0, wi1, preferred_element_type=jnp.float32) + bi1
            gh1 = jnp.dot(h1, wh1, preferred_element_type=jnp.float32) + bh1
            h1 = jnp.where(valid, gru_update(gi1, gh1, h1), h1)

        # actions3 = concat([h1, nclick_enc, h0, h1], -1) + person_pos, built with
        # tiny 0/1 placement matmuls: keeps the final store a single lane-dense
        # unmasked [Bp, 128] write and avoids unaligned lane concatenation.
        W = out_ref.shape[1]

        def placer(width, offsets):
            r = lax.broadcasted_iota(jnp.int32, (width, W), 0)
            c = lax.broadcasted_iota(jnp.int32, (width, W), 1)
            m = c == (r + offsets[0])
            for off in offsets[1:]:
                m = m | (c == (r + off))
            return m.astype(jnp.float32)

        a3 = (jnp.dot(h1, placer(H, (0, 2 * H + E)),
                      preferred_element_type=jnp.float32)
              + jnp.dot(nclick_enc, placer(E, (H,)),
                        preferred_element_type=jnp.float32)
              + jnp.dot(h0, placer(H, (H + E,)),
                        preferred_element_type=jnp.float32)
              + pp_ref[...])
        out_ref[...] = a3.astype(out_ref.dtype)

    return kernel


def prep_forward(click_x, nclick_x, eye_flat, lens, person_pos, prep_params):
    Bp = click_x.shape[0]
    seq_len = eye_flat.shape[0] // Bp
    out_w = person_pos.shape[1]
    flat, treedef = jax.tree_util.tree_flatten(prep_params)
    kernel = _make_prep_kernel(treedef, len(flat), seq_len)
    return pl.pallas_call(
        kernel,
        out_shape=jax.ShapeDtypeStruct((Bp, out_w), jnp.float32),
        in_specs=[_VMEM] * (5 + len(flat)),
        out_specs=_VMEM,
    )(click_x, nclick_x, eye_flat, lens, person_pos, *flat)


# --------------------------------------------------------------------------- #
# Kernel 2: REMMultiBlocks, one grid step per block (parallel across TCs)
# --------------------------------------------------------------------------- #
def _make_rem_kernel(treedef, n_leaves, d0, ex_n, head_width):
    def kernel(a3_ref, *rest):
        p = jax.tree_util.tree_unflatten(treedef, rest[:n_leaves])
        out_ref = rest[n_leaves]

        a3 = a3_ref[...]                     # [Bp, F0_PAD]; pad lanes are zero
        Bp = a3.shape[0]
        f_pad = p["layers"][0]["w2"].shape[-1]

        # Growing activation lives in ONE fixed-width zero-padded buffer; pad
        # lanes stay exactly zero (zero-padded gamma/beta + GELU(0)=0), so every
        # layer is a single full-width matmul with the padded weights.
        if f_pad > a3.shape[1]:
            x1 = jnp.concatenate(
                [a3, jnp.zeros((Bp, f_pad - a3.shape[1]), jnp.float32)], axis=-1)
        else:
            x1 = a3

        for l, lyr in enumerate(p["layers"]):
            d_in = d0 + l * ex_n             # valid input width of this layer
            h = jnp.dot(x1, lyr["w1"][...],
                        preferred_element_type=jnp.float32) + lyr["b1"][...]
            h = _gelu(_ln_valid(h, 2 * d_in, lyr["g1"][...], lyr["be1"][...]))
            y = jnp.dot(h, lyr["w2"][...],
                        preferred_element_type=jnp.float32) + lyr["b2"][...]
            z = jnp.dot(a3, lyr["ws2"][...],
                        preferred_element_type=jnp.float32) + lyr["bs2"][...]
            x1 = _gelu(_ln_valid(x1 + y + z, d_in + ex_n,
                                 lyr["go"][...], lyr["bo"][...]))

        def head(cp):
            hh = jnp.dot(x1, cp["wA"][...],
                         preferred_element_type=jnp.float32) + cp["bA"][...]
            hh = _gelu(_ln_valid(hh, head_width, cp["g"][...], cp["be"][...]))
            o = jnp.dot(hh, cp["wB"][...],
                        preferred_element_type=jnp.float32) + cp["bB"][...]
            return o + jnp.dot(x1, cp["wS"][...],
                               preferred_element_type=jnp.float32) + cp["bS"][...]

        # value head is broadcast-tiled / adv head zero-padded to 128 at pack time
        # -> full-width lane-dense store; wrapper slices [:, :13].
        out_ref[...] = (head(p["value"]) + head(p["adv"])).astype(out_ref.dtype)

    return kernel


def rem_blocks_forward(a3, packed, d0, ex_n):
    Bp, f0_pad = a3.shape
    flat, treedef = jax.tree_util.tree_flatten(packed)
    nb = flat[0].shape[0]
    num_layer = len(packed["layers"])
    head_width = (d0 + num_layer * ex_n) // 2
    kernel = _make_rem_kernel(treedef, len(flat), d0, ex_n, head_width)

    a3_spec = pl.BlockSpec((Bp, f0_pad), lambda i: (0, 0))
    w_specs = [pl.BlockSpec((None,) + tuple(leaf.shape[1:]), lambda i: (i, 0, 0))
               for leaf in flat]
    return pl.pallas_call(
        kernel,
        out_shape=jax.ShapeDtypeStruct((nb, Bp, _PAD_OUT), jnp.float32),
        grid=(nb,),
        in_specs=[a3_spec] + w_specs,
        out_specs=pl.BlockSpec((None, Bp, _PAD_OUT), lambda i: (i, 0, 0)),
        compiler_params=pltpu.CompilerParams(
            dimension_semantics=("parallel",)),
    )(a3, *flat)


# --------------------------------------------------------------------------- #
# Parameter construction (unpadded, PyTorch-like) + packing (padded / stacked)
# --------------------------------------------------------------------------- #
def _linear_init(key, fan_in, fan_out):
    bound = 1.0 / math.sqrt(fan_in)
    kw, kb = jax.random.split(key)
    w = jax.random.uniform(kw, (fan_in, fan_out), jnp.float32, -bound, bound)
    b = jax.random.uniform(kb, (1, fan_out), jnp.float32, -bound, bound)
    return w, b


def init_click_mlp_params(key, embed_n):
    w, b = _linear_init(key, 3 * embed_n, embed_n)
    return dict(w=w, b=b,
                g=jnp.ones((1, embed_n), jnp.float32),
                be=jnp.zeros((1, embed_n), jnp.float32))


def init_gru_params(key, embed_n, hidden):
    # Gate weights fused along the output axis in PyTorch order (r, z, n).
    bound = 1.0 / math.sqrt(hidden)
    u = lambda k, shape: jax.random.uniform(k, shape, jnp.float32, -bound, bound)
    ks = jax.random.split(key, 9)
    H3 = 3 * hidden
    l0 = dict(wi_eye=u(ks[0], (embed_n, H3)),     # rows [0:E)  of W_ih (eye part)
              wi_click=u(ks[1], (embed_n, H3)),   # rows [E:2E) of W_ih (click part)
              bi=u(ks[2], (1, H3)),
              wh=u(ks[3], (hidden, H3)),
              bh=u(ks[4], (1, H3)))
    l1 = dict(wi=u(ks[5], (hidden, H3)), bi=u(ks[6], (1, H3)),
              wh=u(ks[7], (hidden, H3)), bh=u(ks[8], (1, H3)))
    return dict(l0=l0, l1=l1)


def init_rem_block_params(key, d0, ex_n, num_layer, n_actions=_NUM_ACTIONS):
    keys = jax.random.split(key, num_layer + 2)
    layers = []
    for l in range(num_layer):
        D = d0 + l * ex_n
        k = jax.random.split(keys[l], 3)
        w1, b1 = _linear_init(k[0], D, 2 * D)
        w2, b2 = _linear_init(k[1], 2 * D, D)
        ws2, bs2 = _linear_init(k[2], d0, ex_n)            # identity == d0
        layers.append(dict(w1=w1, b1=b1,
                           g1=jnp.ones((1, 2 * D), jnp.float32),
                           be1=jnp.zeros((1, 2 * D), jnp.float32),
                           w2=w2, b2=b2, ws2=ws2, bs2=bs2,
                           go=jnp.ones((1, D + ex_n), jnp.float32),
                           bo=jnp.zeros((1, D + ex_n), jnp.float32)))
    F = d0 + num_layer * ex_n

    def cls(k, out_n):
        kk = jax.random.split(k, 3)
        wA, bA = _linear_init(kk[0], F, F // 2)
        wB, bB = _linear_init(kk[1], F // 2, out_n)
        wS, bS = _linear_init(kk[2], F, out_n)
        return dict(wA=wA, bA=bA,
                    g=jnp.ones((1, F // 2), jnp.float32),
                    be=jnp.zeros((1, F // 2), jnp.float32),
                    wB=wB, bB=bB, wS=wS, bS=bS)

    return dict(layers=tuple(layers),
                value=cls(keys[num_layer], 1),
                adv=cls(keys[num_layer + 1], n_actions))


def pack_rem_blocks(rem_blocks, d0, ex_n, pad_out=_PAD_OUT):
    """Zero-pad every REM-block weight to full lane-tile widths and stack blocks."""
    num_layer = len(rem_blocks[0]["layers"])
    F = d0 + num_layer * ex_n
    f_pad = _round_up(F, 128)
    f0_pad = _round_up(d0, 128)
    fh_pad = _round_up(F // 2, 128)

    def pad2(a, rows, cols):
        return jnp.pad(a, ((0, rows - a.shape[0]), (0, cols - a.shape[1])))

    def pack_block(bp):
        layers = []
        for l, lyr in enumerate(bp["layers"]):
            D = d0 + l * ex_n
            h_pad = _round_up(2 * D, 128)
            layers.append(dict(
                w1=pad2(lyr["w1"], f_pad, h_pad),
                b1=pad2(lyr["b1"], 1, h_pad),
                g1=pad2(lyr["g1"], 1, h_pad),   # zero-padded gamma keeps pad lanes 0
                be1=pad2(lyr["be1"], 1, h_pad),
                w2=pad2(lyr["w2"], h_pad, f_pad),
                b2=pad2(lyr["b2"], 1, f_pad),
                # s2 output lands at columns [D, D+ex_n) of the padded layer output.
                ws2=jnp.pad(lyr["ws2"], ((0, f0_pad - d0), (D, f_pad - D - ex_n))),
                bs2=jnp.pad(lyr["bs2"], ((0, 0), (D, f_pad - D - ex_n))),
                go=pad2(lyr["go"], 1, f_pad),
                bo=pad2(lyr["bo"], 1, f_pad)))

        def pack_head(cp, broadcast_value):
            if broadcast_value:
                # out_n == 1: replicate the single column so the in-kernel full-width
                # add realizes PyTorch's [B,1] + [B,13] broadcast.
                exp_w = lambda a, rows: jnp.tile(pad2(a, rows, a.shape[1]),
                                                 (1, pad_out))
                wB, bB = exp_w(cp["wB"], fh_pad), jnp.tile(cp["bB"], (1, pad_out))
                wS, bS = exp_w(cp["wS"], f_pad), jnp.tile(cp["bS"], (1, pad_out))
            else:
                wB, bB = pad2(cp["wB"], fh_pad, pad_out), pad2(cp["bB"], 1, pad_out)
                wS, bS = pad2(cp["wS"], f_pad, pad_out), pad2(cp["bS"], 1, pad_out)
            return dict(wA=pad2(cp["wA"], f_pad, fh_pad),
                        bA=pad2(cp["bA"], 1, fh_pad),
                        g=pad2(cp["g"], 1, fh_pad), be=pad2(cp["be"], 1, fh_pad),
                        wB=wB, bB=bB, wS=wS, bS=bS)

        return dict(layers=tuple(layers),
                    value=pack_head(bp["value"], True),
                    adv=pack_head(bp["adv"], False))

    packed = [pack_block(bp) for bp in rem_blocks]
    return jax.tree_util.tree_map(lambda *xs: jnp.stack(xs, axis=0), *packed)


def init_remnet_params(key, embed_n=32, rnn_layer=2, rem_blocks_num=2):
    ks = jax.random.split(key, 7 + rem_blocks_num)
    rem_blocks = tuple(
        init_rem_block_params(ks[7 + i], 4 * embed_n, embed_n, rnn_layer)
        for i in range(rem_blocks_num))
    return dict(
        emb_click=jax.random.normal(ks[0], (12, embed_n), jnp.float32),
        emb_eye=jax.random.normal(ks[1], (16, embed_n), jnp.float32),
        emb_pos=jax.random.normal(ks[2], (3, embed_n), jnp.float32),
        emb_person=jax.random.normal(ks[3], (100, 4 * embed_n), jnp.float32),
        clickMLP=init_click_mlp_params(ks[4], embed_n),
        clickMLPN=init_click_mlp_params(ks[5], embed_n),
        gru=init_gru_params(ks[6], embed_n, embed_n),
        remBlocks=rem_blocks,                                  # unpadded (reference)
        rem_packed=pack_rem_blocks(rem_blocks, 4 * embed_n, embed_n),
    )


# --------------------------------------------------------------------------- #
# Full forward (embedding gathers + tiny glue in JAX, heavy math in 2 kernels)
# --------------------------------------------------------------------------- #
@jax.jit
def remnet_forward(params, clickList, eyeList, newClickList, lengths, person, scene):
    del scene                                 # sceneEmbed is never used in forward
    B = clickList.shape[0]
    E = params["emb_click"].shape[1]
    T = eyeList.shape[-1]
    Bp = max(8, _round_up(B, 8))              # f32 sublane minimum
    f0_pad = _round_up(4 * E, 128)

    pos = params["emb_pos"]                                               # [3, E]
    ce = (jnp.take(params["emb_click"], clickList.reshape(B, 3), axis=0)
          + pos).reshape(B, 3 * E)
    nce = (jnp.take(params["emb_click"], newClickList.reshape(B, 3), axis=0)
           + pos).reshape(B, 3 * E)
    eye = jnp.take(params["emb_eye"], eyeList.reshape(B, T), axis=0)      # [B,T,E]
    pp = jnp.take(params["emb_person"], person.reshape(B), axis=0)        # [B,4E]
    lens = lengths.reshape(B, 1).astype(jnp.int32)

    # Pad the batch to a sublane multiple; padded rows carry length 0, so the GRU
    # masking keeps their hidden state at zero and they are sliced off at the end.
    rpad = Bp - B
    pad_rows = lambda a: jnp.pad(a, ((0, rpad),) + ((0, 0),) * (a.ndim - 1))
    ce_p, nce_p, lens_p = pad_rows(ce), pad_rows(nce), pad_rows(lens)
    pp_p = jnp.pad(pp, ((0, rpad), (0, f0_pad - 4 * E)))
    eye_flat = jnp.transpose(pad_rows(eye), (1, 0, 2)).reshape(T * Bp, E)

    prep_params = dict(click=params["clickMLP"], clickN=params["clickMLPN"],
                       gru=params["gru"])
    a3 = prep_forward(ce_p, nce_p, eye_flat, lens_p, pp_p, prep_params)   # [Bp,128]

    out = rem_blocks_forward(a3, params["rem_packed"], 4 * E, E)          # [nb,Bp,128]
    nb = out.shape[0]
    return [out[i, :B, :_NUM_ACTIONS].reshape(B, 1, _NUM_ACTIONS) for i in range(nb)]


# --------------------------------------------------------------------------- #
# Pure-JAX reference (unpadded weights, concat-based, like the PyTorch module)
# --------------------------------------------------------------------------- #
def _reference_forward(params, clickList, eyeList, newClickList, lengths, person, scene):
    del scene
    B = clickList.shape[0]
    E = params["emb_click"].shape[1]
    T = eyeList.shape[-1]
    pos = params["emb_pos"]

    def click_mlp(x, p):
        return _gelu(_layernorm(_hp_dot(x, p["w"]) + p["b"], p["g"], p["be"]))

    ce = jnp.take(params["emb_click"], clickList.reshape(B, 3), axis=0) + pos
    nce = jnp.take(params["emb_click"], newClickList.reshape(B, 3), axis=0) + pos
    click_enc = click_mlp(ce.reshape(B, 3 * E), params["clickMLP"])
    nclick_enc = click_mlp(nce.reshape(B, 3 * E), params["clickMLPN"])

    eye = jnp.take(params["emb_eye"], eyeList.reshape(B, T), axis=0)
    lens = lengths.reshape(B, 1).astype(jnp.int32)

    gp = params["gru"]
    H = gp["l0"]["wh"].shape[0]
    wi0 = jnp.concatenate([gp["l0"]["wi_eye"], gp["l0"]["wi_click"]], axis=0)

    def cell(x, h, wi, bi, wh, bh):
        gi = _hp_dot(x, wi) + bi
        gh = _hp_dot(h, wh) + bh
        r = jax.nn.sigmoid(gi[:, :H] + gh[:, :H])
        z = jax.nn.sigmoid(gi[:, H:2 * H] + gh[:, H:2 * H])
        n = jnp.tanh(gi[:, 2 * H:] + r * gh[:, 2 * H:])
        return (1.0 - z) * n + z * h

    h0 = jnp.zeros((B, H), jnp.float32)
    h1 = jnp.zeros((B, H), jnp.float32)
    for t in range(T):
        x_t = jnp.concatenate([eye[:, t, :], click_enc], axis=-1)
        valid = lens > t
        h0 = jnp.where(valid, cell(x_t, h0, wi0, gp["l0"]["bi"],
                                   gp["l0"]["wh"], gp["l0"]["bh"]), h0)
        h1 = jnp.where(valid, cell(h0, h1, gp["l1"]["wi"], gp["l1"]["bi"],
                                   gp["l1"]["wh"], gp["l1"]["bh"]), h1)

    person_pos = jnp.take(params["emb_person"], person.reshape(B), axis=0)
    actions3 = jnp.concatenate([h1, nclick_enc, h0, h1], axis=-1) + person_pos

    outs = []
    for bp in params["remBlocks"]:
        x1 = actions3
        for lyr in bp["layers"]:
            h = _gelu(_layernorm(_hp_dot(x1, lyr["w1"]) + lyr["b1"],
                                 lyr["g1"], lyr["be1"]))
            y = _hp_dot(h, lyr["w2"]) + lyr["b2"]
            z = _hp_dot(actions3, lyr["ws2"]) + lyr["bs2"]
            x1 = _gelu(_layernorm(jnp.concatenate([x1 + y, z], axis=-1),
                                  lyr["go"], lyr["bo"]))

        def head(cp, x1=x1):
            hh = _gelu(_layernorm(_hp_dot(x1, cp["wA"]) + cp["bA"], cp["g"], cp["be"]))
            return _hp_dot(hh, cp["wB"]) + cp["bB"] + _hp_dot(x1, cp["wS"]) + cp["bS"]

        o = head(bp["value"]) + head(bp["adv"])       # [B,1] + [B,13] broadcast
        outs.append(o[:, :_NUM_ACTIONS].reshape(B, 1, _NUM_ACTIONS))
    return outs


# --------------------------------------------------------------------------- #
if __name__ == "__main__":
    # Small, module-consistent configuration (4*embed_n = 128 -> lane aligned).
    embed_n = 32
    rnn_layer = 2
    rem_blocks_num = 2
    B, T = 2, 6

    root = jax.random.PRNGKey(0)
    kp, k1, k2, k3, k4, k5 = jax.random.split(root, 6)
    params = init_remnet_params(kp, embed_n, rnn_layer, rem_blocks_num)

    clickList = jax.random.randint(k1, (B, 1, 3), 0, 12)
    newClickList = jax.random.randint(k2, (B, 1, 3), 0, 12)
    eyeList = jax.random.randint(k3, (B, 1, T), 0, 16)
    person = jax.random.randint(k4, (B, 1, 1), 0, 100)
    scene = jax.random.randint(k5, (B, 1, 1), 0, 10)   # unused in forward (as in PyTorch)
    lengths = jnp.array([T, T // 2], dtype=jnp.int32)

    outs = remnet_forward(params, clickList, eyeList, newClickList,
                          lengths, person, scene)
    outs = jax.block_until_ready(outs)

    assert len(outs) == rem_blocks_num
    for o in outs:
        assert o.shape == (B, 1, _NUM_ACTIONS), o.shape
        assert bool(jnp.all(jnp.isfinite(o)))

    # Numerical check against a pure-JAX reference of the same forward math.
    refs = _reference_forward(params, clickList, eyeList, newClickList,
                              lengths, person, scene)
    for o, r in zip(outs, refs):
        err = float(jnp.max(jnp.abs(o - r)))
        assert err < 1e-1, f"mismatch vs reference: max abs err = {err}"

    print("KERNEL_OK")
</pallas_src>

<mosaic_0001>
module attributes {stable_mosaic.version = 11 : i64} {
  func.func @kernel(%arg0: memref<8x96xf32, #tpu.memory_space<vmem>>, %arg1: memref<8x96xf32, #tpu.memory_space<vmem>>, %arg2: memref<48x32xf32, #tpu.memory_space<vmem>>, %arg3: memref<8x1xi32, #tpu.memory_space<vmem>>, %arg4: memref<8x128xf32, #tpu.memory_space<vmem>>, %arg5: memref<1x32xf32, #tpu.memory_space<vmem>>, %arg6: memref<1x32xf32, #tpu.memory_space<vmem>>, %arg7: memref<1x32xf32, #tpu.memory_space<vmem>>, %arg8: memref<96x32xf32, #tpu.memory_space<vmem>>, %arg9: memref<1x32xf32, #tpu.memory_space<vmem>>, %arg10: memref<1x32xf32, #tpu.memory_space<vmem>>, %arg11: memref<1x32xf32, #tpu.memory_space<vmem>>, %arg12: memref<96x32xf32, #tpu.memory_space<vmem>>, %arg13: memref<1x96xf32, #tpu.memory_space<vmem>>, %arg14: memref<1x96xf32, #tpu.memory_space<vmem>>, %arg15: memref<32x96xf32, #tpu.memory_space<vmem>>, %arg16: memref<32x96xf32, #tpu.memory_space<vmem>>, %arg17: memref<32x96xf32, #tpu.memory_space<vmem>>, %arg18: memref<1x96xf32, #tpu.memory_space<vmem>>, %arg19: memref<1x96xf32, #tpu.memory_space<vmem>>, %arg20: memref<32x96xf32, #tpu.memory_space<vmem>>, %arg21: memref<32x96xf32, #tpu.memory_space<vmem>>, %arg22: memref<8x128xf32, #tpu.memory_space<vmem>>) attributes {dimension_semantics = [], scalar_prefetch = 0 : i64, scratch_operands = 0 : i64, tpu.core_type = #tpu.core_type<tc>} {
    %c0 = arith.constant 0 : index
    %c0_0 = arith.constant 0 : index
    %0 = vector.load %arg0[%c0, %c0_0] : memref<8x96xf32, #tpu.memory_space<vmem>>, vector<8x96xf32>
    %c0_1 = arith.constant 0 : index
    %c0_2 = arith.constant 0 : index
    %1 = vector.load %arg8[%c0_1, %c0_2] : memref<96x32xf32, #tpu.memory_space<vmem>>, vector<96x32xf32>
    %cst = arith.constant dense<0.000000e+00> : vector<8x32xf32>
    %2 = tpu.matmul %0, %1, %cst {dimension_numbers = #tpu.dot_dimension_numbers<[1], [0], [0], [1], [0, 0, 1, 1], [], []>} : vector<8x96xf32>, vector<96x32xf32>, vector<8x32xf32> -> vector<8x32xf32>
    %c0_3 = arith.constant 0 : index
    %c0_4 = arith.constant 0 : index
    %3 = vector.load %arg5[%c0_3, %c0_4] : memref<1x32xf32, #tpu.memory_space<vmem>>, vector<1x32xf32>
    %4 = vector.broadcast %3 : vector<1x32xf32> to vector<8x32xf32>
    %5 = arith.addf %2, %4 : vector<8x32xf32>
    %c0_5 = arith.constant 0 : index
    %c0_6 = arith.constant 0 : index
    %6 = vector.load %arg7[%c0_5, %c0_6] : memref<1x32xf32, #tpu.memory_space<vmem>>, vector<1x32xf32>
    %c0_7 = arith.constant 0 : index
    %c0_8 = arith.constant 0 : index
    %7 = vector.load %arg6[%c0_7, %c0_8] : memref<1x32xf32, #tpu.memory_space<vmem>>, vector<1x32xf32>
    %cst_9 = arith.constant dense<0.000000e+00> : vector<8xf32>
    %8 = vector.multi_reduction <add>, %5, %cst_9 [1] : vector<8x32xf32> to vector<8xf32>
    %9 = vector.shape_cast %8 : vector<8xf32> to vector<8x1xf32>
    %cst_10 = arith.constant 3.200000e+01 : f32
    %10 = vector.broadcast %cst_10 : f32 to vector<8x1xf32>
    %11 = arith.divf %9, %10 : vector<8x1xf32>
    %12 = vector.broadcast %11 : vector<8x1xf32> to vector<8x32xf32>
    %13 = arith.subf %5, %12 : vector<8x32xf32>
    %14 = arith.mulf %13, %13 : vector<8x32xf32>
    %cst_11 = arith.constant dense<0.000000e+00> : vector<8xf32>
    %15 = vector.multi_reduction <add>, %14, %cst_11 [1] : vector<8x32xf32> to vector<8xf32>
    %16 = vector.shape_cast %15 : vector<8xf32> to vector<8x1xf32>
    %cst_12 = arith.constant 3.200000e+01 : f32
    %17 = vector.broadcast %cst_12 : f32 to vector<8x1xf32>
    %18 = arith.divf %16, %17 : vector<8x1xf32>
    %19 = vector.broadcast %11 : vector<8x1xf32> to vector<8x32xf32>
    %20 = arith.subf %5, %19 : vector<8x32xf32>
    %cst_13 = arith.constant 9.99999974E-6 : f32
    %21 = vector.broadcast %cst_13 : f32 to vector<8x1xf32>
    %22 = arith.addf %18, %21 : vector<8x1xf32>
    %23 = math.rsqrt %22 : vector<8x1xf32>
    %24 = vector.broadcast %23 : vector<8x1xf32> to vector<8x32xf32>
    %25 = arith.mulf %20, %24 : vector<8x32xf32>
    %26 = vector.broadcast %6 : vector<1x32xf32> to vector<8x32xf32>
    %27 = arith.mulf %25, %26 : vector<8x32xf32>
    %28 = vector.broadcast %7 : vector<1x32xf32> to vector<8x32xf32>
    %29 = arith.addf %27, %28 : vector<8x32xf32>
    %cst_14 = arith.constant 5.000000e-01 : f32
    %30 = vector.broadcast %cst_14 : f32 to vector<8x32xf32>
    %31 = arith.mulf %30, %29 : vector<8x32xf32>
    %cst_15 = arith.constant 0.707106769 : f32
    %32 = vector.broadcast %cst_15 : f32 to vector<8x32xf32>
    %33 = arith.mulf %29, %32 : vector<8x32xf32>
    %34 = math.erf %33 : vector<8x32xf32>
    %cst_16 = arith.constant 1.000000e+00 : f32
    %35 = vector.broadcast %cst_16 : f32 to vector<8x32xf32>
    %36 = arith.addf %35, %34 : vector<8x32xf32>
    %37 = arith.mulf %31, %36 : vector<8x32xf32>
    %c0_17 = arith.constant 0 : index
    %c0_18 = arith.constant 0 : index
    %38 = vector.load %arg1[%c0_17, %c0_18] : memref<8x96xf32, #tpu.memory_space<vmem>>, vector<8x96xf32>
    %c0_19 = arith.constant 0 : index
    %c0_20 = arith.constant 0 : index
    %39 = vector.load %arg12[%c0_19, %c0_20] : memref<96x32xf32, #tpu.memory_space<vmem>>, vector<96x32xf32>
    %cst_21 = arith.constant dense<0.000000e+00> : vector<8x32xf32>
    %40 = tpu.matmul %38, %39, %cst_21 {dimension_numbers = #tpu.dot_dimension_numbers<[1], [0], [0], [1], [0, 0, 1, 1], [], []>} : vector<8x96xf32>, vector<96x32xf32>, vector<8x32xf32> -> vector<8x32xf32>
    %c0_22 = arith.constant 0 : index
    %c0_23 = arith.constant 0 : index
    %41 = vector.load %arg9[%c0_22, %c0_23] : memref<1x32xf32, #tpu.memory_space<vmem>>, vector<1x32xf32>
    %42 = vector.broadcast %41 : vector<1x32xf32> to vector<8x32xf32>
    %43 = arith.addf %40, %42 : vector<8x32xf32>
    %c0_24 = arith.constant 0 : index
    %c0_25 = arith.constant 0 : index
    %44 = vector.load %arg11[%c0_24, %c0_25] : memref<1x32xf32, #tpu.memory_space<vmem>>, vector<1x32xf32>
    %c0_26 = arith.constant 0 : index
    %c0_27 = arith.constant 0 : index
    %45 = vector.load %arg10[%c0_26, %c0_27] : memref<1x32xf32, #tpu.memory_space<vmem>>, vector<1x32xf32>
    %cst_28 = arith.constant dense<0.000000e+00> : vector<8xf32>
    %46 = vector.multi_reduction <add>, %43, %cst_28 [1] : vector<8x32xf32> to vector<8xf32>
    %47 = vector.shape_cast %46 : vector<8xf32> to vector<8x1xf32>
    %cst_29 = arith.constant 3.200000e+01 : f32
    %48 = vector.broadcast %cst_29 : f32 to vector<8x1xf32>
    %49 = arith.divf %47, %48 : vector<8x1xf32>
    %50 = vector.broadcast %49 : vector<8x1xf32> to vector<8x32xf32>
    %51 = arith.subf %43, %50 : vector<8x32xf32>
    %52 = arith.mulf %51, %51 : vector<8x32xf32>
    %cst_30 = arith.constant dense<0.000000e+00> : vector<8xf32>
    %53 = vector.multi_reduction <add>, %52, %cst_30 [1] : vector<8x32xf32> to vector<8xf32>
    %54 = vector.shape_cast %53 : vector<8xf32> to vector<8x1xf32>
    %cst_31 = arith.constant 3.200000e+01 : f32
    %55 = vector.broadcast %cst_31 : f32 to vector<8x1xf32>
    %56 = arith.divf %54, %55 : vector<8x1xf32>
    %57 = vector.broadcast %49 : vector<8x1xf32> to vector<8x32xf32>
    %58 = arith.subf %43, %57 : vector<8x32xf32>
    %cst_32 = arith.constant 9.99999974E-6 : f32
    %59 = vector.broadcast %cst_32 : f32 to vector<8x1xf32>
    %60 = arith.addf %56, %59 : vector<8x1xf32>
    %61 = math.rsqrt %60 : vector<8x1xf32>
    %62 = vector.broadcast %61 : vector<8x1xf32> to vector<8x32xf32>
    %63 = arith.mulf %58, %62 : vector<8x32xf32>
    %64 = vector.broadcast %44 : vector<1x32xf32> to vector<8x32xf32>
    %65 = arith.mulf %63, %64 : vector<8x32xf32>
    %66 = vector.broadcast %45 : vector<1x32xf32> to vector<8x32xf32>
    %67 = arith.addf %65, %66 : vector<8x32xf32>
    %cst_33 = arith.constant 5.000000e-01 : f32
    %68 = vector.broadcast %cst_33 : f32 to vector<8x32xf32>
    %69 = arith.mulf %68, %67 : vector<8x32xf32>
    %cst_34 = arith.constant 0.707106769 : f32
    %70 = vector.broadcast %cst_34 : f32 to vector<8x32xf32>
    %71 = arith.mulf %67, %70 : vector<8x32xf32>
    %72 = math.erf %71 : vector<8x32xf32>
    %cst_35 = arith.constant 1.000000e+00 : f32
    %73 = vector.broadcast %cst_35 : f32 to vector<8x32xf32>
    %74 = arith.addf %73, %72 : vector<8x32xf32>
    %75 = arith.mulf %69, %74 : vector<8x32xf32>
    %c0_36 = arith.constant 0 : index
    %c0_37 = arith.constant 0 : index
    %76 = vector.load %arg3[%c0_36, %c0_37] : memref<8x1xi32, #tpu.memory_space<vmem>>, vector<8x1xi32>
    %c0_38 = arith.constant 0 : index
    %c0_39 = arith.constant 0 : index
    %77 = vector.load %arg2[%c0_38, %c0_39] : memref<48x32xf32, #tpu.memory_space<vmem>>, vector<48x32xf32>
    %c0_40 = arith.constant 0 : index
    %c0_41 = arith.constant 0 : index
    %78 = vector.load %arg17[%c0_40, %c0_41] : memref<32x96xf32, #tpu.memory_space<vmem>>, vector<32x96xf32>
    %cst_42 = arith.constant dense<0.000000e+00> : vector<48x96xf32>
    %79 = tpu.matmul %77, %78, %cst_42 {dimension_numbers = #tpu.dot_dimension_numbers<[1], [0], [0], [1], [0, 0, 1, 1], [], []>} : vector<48x32xf32>, vector<32x96xf32>, vector<48x96xf32> -> vector<48x96xf32>
    %c0_43 = arith.constant 0 : index
    %c0_44 = arith.constant 0 : index
    %80 = vector.load %arg16[%c0_43, %c0_44] : memref<32x96xf32, #tpu.memory_space<vmem>>, vector<32x96xf32>
    %cst_45 = arith.constant dense<0.000000e+00> : vector<8x96xf32>
    %81 = tpu.matmul %37, %80, %cst_45 {dimension_numbers = #tpu.dot_dimension_numbers<[1], [0], [0], [1], [0, 0, 1, 1], [], []>} : vector<8x32xf32>, vector<32x96xf32>, vector<8x96xf32> -> vector<8x96xf32>
    %c0_46 = arith.constant 0 : index
    %c0_47 = arith.constant 0 : index
    %82 = vector.load %arg14[%c0_46, %c0_47] : memref<1x96xf32, #tpu.memory_space<vmem>>, vector<1x96xf32>
    %83 = vector.broadcast %82 : vector<1x96xf32> to vector<8x96xf32>
    %84 = arith.addf %81, %83 : vector<8x96xf32>
    %c0_48 = arith.constant 0 : index
    %c0_49 = arith.constant 0 : index
    %85 = vector.load %arg15[%c0_48, %c0_49] : memref<32x96xf32, #tpu.memory_space<vmem>>, vector<32x96xf32>
    %c0_50 = arith.constant 0 : index
    %c0_51 = arith.constant 0 : index
    %86 = vector.load %arg13[%c0_50, %c0_51] : memref<1x96xf32, #tpu.memory_space<vmem>>, vector<1x96xf32>
    %c0_52 = arith.constant 0 : index
    %c0_53 = arith.constant 0 : index
    %87 = vector.load %arg21[%c0_52, %c0_53] : memref<32x96xf32, #tpu.memory_space<vmem>>, vector<32x96xf32>
    %c0_54 = arith.constant 0 : index
    %c0_55 = arith.constant 0 : index
    %88 = vector.load %arg19[%c0_54, %c0_55] : memref<1x96xf32, #tpu.memory_space<vmem>>, vector<1x96xf32>
    %c0_56 = arith.constant 0 : index
    %c0_57 = arith.constant 0 : index
    %89 = vector.load %arg20[%c0_56, %c0_57] : memref<32x96xf32, #tpu.memory_space<vmem>>, vector<32x96xf32>
    %c0_58 = arith.constant 0 : index
    %c0_59 = arith.constant 0 : index
    %90 = vector.load %arg18[%c0_58, %c0_59] : memref<1x96xf32, #tpu.memory_space<vmem>>, vector<1x96xf32>
    %cst_60 = arith.constant 0.000000e+00 : f32
    %91 = vector.broadcast %cst_60 : f32 to vector<8x32xf32>
    %cst_61 = arith.constant 0.000000e+00 : f32
    %92 = vector.broadcast %cst_61 : f32 to vector<8x32xf32>
    %c0_i32 = arith.constant 0 : i32
    %93 = vector.broadcast %c0_i32 : i32 to vector<8x1xi32>
    %94 = arith.cmpi sgt, %76, %93 : vector<8x1xi32>
    %95 = vector.extract_strided_slice %79 {offsets = [0, 0], sizes = [8, 96], strides = [1, 1]} : vector<48x96xf32> to vector<8x96xf32>
    %96 = arith.addf %95, %84 : vector<8x96xf32>
    %cst_62 = arith.constant dense<0.000000e+00> : vector<8x96xf32>
    %97 = tpu.matmul %91, %85, %cst_62 {dimension_numbers = #tpu.dot_dimension_numbers<[1], [0], [0], [1], [0, 0, 1, 1], [], []>} : vector<8x32xf32>, vector<32x96xf32>, vector<8x96xf32> -> vector<8x96xf32>
    %98 = vector.broadcast %86 : vector<1x96xf32> to vector<8x96xf32>
    %99 = arith.addf %97, %98 : vector<8x96xf32>
    %100 = vector.extract_strided_slice %96 {offsets = [0, 0], sizes = [8, 32], strides = [1, 1]} : vector<8x96xf32> to vector<8x32xf32>
    %101 = vector.extract_strided_slice %99 {offsets = [0, 0], sizes = [8, 32], strides = [1, 1]} : vector<8x96xf32> to vector<8x32xf32>
    %102 = arith.addf %100, %101 : vector<8x32xf32>
    %103 = arith.negf %102 : vector<8x32xf32>
    %104 = math.exp %103 : vector<8x32xf32>
    %cst_63 = arith.constant 1.000000e+00 : f32
    %105 = vector.broadcast %cst_63 : f32 to vector<8x32xf32>
    %106 = arith.addf %105, %104 : vector<8x32xf32>
    %107 = arith.divf %105, %106 : vector<8x32xf32>
    %108 = vector.extract_strided_slice %96 {offsets = [0, 32], sizes = [8, 32], strides = [1, 1]} : vector<8x96xf32> to vector<8x32xf32>
    %109 = vector.extract_strided_slice %99 {offsets = [0, 32], sizes = [8, 32], strides = [1, 1]} : vector<8x96xf32> to vector<8x32xf32>
    %110 = arith.addf %108, %109 : vector<8x32xf32>
    %111 = arith.negf %110 : vector<8x32xf32>
    %112 = math.exp %111 : vector<8x32xf32>
    %cst_64 = arith.constant 1.000000e+00 : f32
    %113 = vector.broadcast %cst_64 : f32 to vector<8x32xf32>
    %114 = arith.addf %113, %112 : vector<8x32xf32>
    %115 = arith.divf %113, %114 : vector<8x32xf32>
    %116 = vector.extract_strided_slice %96 {offsets = [0, 64], sizes = [8, 32], strides = [1, 1]} : vector<8x96xf32> to vector<8x32xf32>
    %117 = vector.extract_strided_slice %99 {offsets = [0, 64], sizes = [8, 32], strides = [1, 1]} : vector<8x96xf32> to vector<8x32xf32>
    %118 = arith.mulf %107, %117 : vector<8x32xf32>
    %119 = arith.addf %116, %118 : vector<8x32xf32>
    %120 = math.tanh %119 : vector<8x32xf32>
    %cst_65 = arith.constant 1.000000e+00 : f32
    %121 = vector.broadcast %cst_65 : f32 to vector<8x32xf32>
    %122 = arith.subf %121, %115 : vector<8x32xf32>
    %123 = arith.mulf %122, %120 : vector<8x32xf32>
    %124 = arith.mulf %115, %91 : vector<8x32xf32>
    %125 = arith.addf %123, %124 : vector<8x32xf32>
    %126 = vector.shape_cast %94 : vector<8x1xi1> to vector<8x1xi1>
    %127 = vector.broadcast %126 : vector<8x1xi1> to vector<8x32xi1>
    %128 = arith.select %127, %125, %91 : vector<8x32xi1>, vector<8x32xf32>
    %cst_66 = arith.constant dense<0.000000e+00> : vector<8x96xf32>
    %129 = tpu.matmul %128, %87, %cst_66 {dimension_numbers = #tpu.dot_dimension_numbers<[1], [0], [0], [1], [0, 0, 1, 1], [], []>} : vector<8x32xf32>, vector<32x96xf32>, vector<8x96xf32> -> vector<8x96xf32>
    %130 = vector.broadcast %88 : vector<1x96xf32> to vector<8x96xf32>
    %131 = arith.addf %129, %130 : vector<8x96xf32>
    %cst_67 = arith.constant dense<0.000000e+00> : vector<8x96xf32>
    %132 = tpu.matmul %92, %89, %cst_67 {dimension_numbers = #tpu.dot_dimension_numbers<[1], [0], [0], [1], [0, 0, 1, 1], [], []>} : vector<8x32xf32>, vector<32x96xf32>, vector<8x96xf32> -> vector<8x96xf32>
    %133 = vector.broadcast %90 : vector<1x96xf32> to vector<8x96xf32>
    %134 = arith.addf %132, %133 : vector<8x96xf32>
    %135 = vector.extract_strided_slice %131 {offsets = [0, 0], sizes = [8, 32], strides = [1, 1]} : vector<8x96xf32> to vector<8x32xf32>
    %136 = vector.extract_strided_slice %134 {offsets = [0, 0], sizes = [8, 32], strides = [1, 1]} : vector<8x96xf32> to vector<8x32xf32>
    %137 = arith.addf %135, %136 : vector<8x32xf32>
    %138 = arith.negf %137 : vector<8x32xf32>
    %139 = math.exp %138 : vector<8x32xf32>
    %cst_68 = arith.constant 1.000000e+00 : f32
    %140 = vector.broadcast %cst_68 : f32 to vector<8x32xf32>
    %141 = arith.addf %140, %139 : vector<8x32xf32>
    %142 = arith.divf %140, %141 : vector<8x32xf32>
    %143 = vector.extract_strided_slice %131 {offsets = [0, 32], sizes = [8, 32], strides = [1, 1]} : vector<8x96xf32> to vector<8x32xf32>
    %144 = vector.extract_strided_slice %134 {offsets = [0, 32], sizes = [8, 32], strides = [1, 1]} : vector<8x96xf32> to vector<8x32xf32>
    %145 = arith.addf %143, %144 : vector<8x32xf32>
    %146 = arith.negf %145 : vector<8x32xf32>
    %147 = math.exp %146 : vector<8x32xf32>
    %cst_69 = arith.constant 1.000000e+00 : f32
    %148 = vector.broadcast %cst_69 : f32 to vector<8x32xf32>
    %149 = arith.addf %148, %147 : vector<8x32xf32>
    %150 = arith.divf %148, %149 : vector<8x32xf32>
    %151 = vector.extract_strided_slice %131 {offsets = [0, 64], sizes = [8, 32], strides = [1, 1]} : vector<8x96xf32> to vector<8x32xf32>
    %152 = vector.extract_strided_slice %134 {offsets = [0, 64], sizes = [8, 32], strides = [1, 1]} : vector<8x96xf32> to vector<8x32xf32>
    %153 = arith.mulf %142, %152 : vector<8x32xf32>
    %154 = arith.addf %151, %153 : vector<8x32xf32>
    %155 = math.tanh %154 : vector<8x32xf32>
    %cst_70 = arith.constant 1.000000e+00 : f32
    %156 = vector.broadcast %cst_70 : f32 to vector<8x32xf32>
    %157 = arith.subf %156, %150 : vector<8x32xf32>
    %158 = arith.mulf %157, %155 : vector<8x32xf32>
    %159 = arith.mulf %150, %92 : vector<8x32xf32>
    %160 = arith.addf %158, %159 : vector<8x32xf32>
    %161 = vector.shape_cast %94 : vector<8x1xi1> to vector<8x1xi1>
    %162 = vector.broadcast %161 : vector<8x1xi1> to vector<8x32xi1>
    %163 = arith.select %162, %160, %92 : vector<8x32xi1>, vector<8x32xf32>
    %c1_i32 = arith.constant 1 : i32
    %164 = vector.broadcast %c1_i32 : i32 to vector<8x1xi32>
    %165 = arith.cmpi sgt, %76, %164 : vector<8x1xi32>
    %166 = vector.extract_strided_slice %79 {offsets = [8, 0], sizes = [8, 96], strides = [1, 1]} : vector<48x96xf32> to vector<8x96xf32>
    %167 = arith.addf %166, %84 : vector<8x96xf32>
    %cst_71 = arith.constant dense<0.000000e+00> : vector<8x96xf32>
    %168 = tpu.matmul %128, %85, %cst_71 {dimension_numbers = #tpu.dot_dimension_numbers<[1], [0], [0], [1], [0, 0, 1, 1], [], []>} : vector<8x32xf32>, vector<32x96xf32>, vector<8x96xf32> -> vector<8x96xf32>
    %169 = vector.broadcast %86 : vector<1x96xf32> to vector<8x96xf32>
    %170 = arith.addf %168, %169 : vector<8x96xf32>
    %171 = vector.extract_strided_slice %167 {offsets = [0, 0], sizes = [8, 32], strides = [1, 1]} : vector<8x96xf32> to vector<8x32xf32>
    %172 = vector.extract_strided_slice %170 {offsets = [0, 0], sizes = [8, 32], strides = [1, 1]} : vector<8x96xf32> to vector<8x32xf32>
    %173 = arith.addf %171, %172 : vector<8x32xf32>
    %174 = arith.negf %173 : vector<8x32xf32>
    %175 = math.exp %174 : vector<8x32xf32>
    %cst_72 = arith.constant 1.000000e+00 : f32
    %176 = vector.broadcast %cst_72 : f32 to vector<8x32xf32>
    %177 = arith.addf %176, %175 : vector<8x32xf32>
    %178 = arith.divf %176, %177 : vector<8x32xf32>
    %179 = vector.extract_strided_slice %167 {offsets = [0, 32], sizes = [8, 32], strides = [1, 1]} : vector<8x96xf32> to vector<8x32xf32>
    %180 = vector.extract_strided_slice %170 {offsets = [0, 32], sizes = [8, 32], strides = [1, 1]} : vector<8x96xf32> to vector<8x32xf32>
    %181 = arith.addf %179, %180 : vector<8x32xf32>
    %182 = arith.negf %181 : vector<8x32xf32>
    %183 = math.exp %182 : vector<8x32xf32>
    %cst_73 = arith.constant 1.000000e+00 : f32
    %184 = vector.broadcast %cst_73 : f32 to vector<8x32xf32>
    %185 = arith.addf %184, %183 : vector<8x32xf32>
    %186 = arith.divf %184, %185 : vector<8x32xf32>
    %187 = vector.extract_strided_slice %167 {offsets = [0, 64], sizes = [8, 32], strides = [1, 1]} : vector<8x96xf32> to vector<8x32xf32>
    %188 = vector.extract_strided_slice %170 {offsets = [0, 64], sizes = [8, 32], strides = [1, 1]} : vector<8x96xf32> to vector<8x32xf32>
    %189 = arith.mulf %178, %188 : vector<8x32xf32>
    %190 = arith.addf %187, %189 : vector<8x32xf32>
    %191 = math.tanh %190 : vector<8x32xf32>
    %cst_74 = arith.constant 1.000000e+00 : f32
    %192 = vector.broadcast %cst_74 : f32 to vector<8x32xf32>
    %193 = arith.subf %192, %186 : vector<8x32xf32>
    %194 = arith.mulf %193, %191 : vector<8x32xf32>
    %195 = arith.mulf %186, %128 : vector<8x32xf32>
    %196 = arith.addf %194, %195 : vector<8x32xf32>
    %197 = vector.shape_cast %165 : vector<8x1xi1> to vector<8x1xi1>
    %198 = vector.broadcast %197 : vector<8x1xi1> to vector<8x32xi1>
    %199 = arith.select %198, %196, %128 : vector<8x32xi1>, vector<8x32xf32>
    %cst_75 = arith.constant dense<0.000000e+00> : vector<8x96xf32>
    %200 = tpu.matmul %199, %87, %cst_75 {dimension_numbers = #tpu.dot_dimension_numbers<[1], [0], [0], [1], [0, 0, 1, 1], [], []>} : vector<8x32xf32>, vector<32x96xf32>, vector<8x96xf32> -> vector<8x96xf32>
    %201 = vector.broadcast %88 : vector<1x96xf32> to vector<8x96xf32>
    %202 = arith.addf %200, %201 : vector<8x96xf32>
    %cst_76 = arith.constant dense<0.000000e+00> : vector<8x96xf32>
    %203 = tpu.matmul %163, %89, %cst_76 {dimension_numbers = #tpu.dot_dimension_numbers<[1], [0], [0], [1], [0, 0, 1, 1], [], []>} : vector<8x32xf32>, vector<32x96xf32>, vector<8x96xf32> -> vector<8x96xf32>
    %204 = vector.broadcast %90 : vector<1x96xf32> to vector<8x96xf32>
    %205 = arith.addf %203, %204 : vector<8x96xf32>
    %206 = vector.extract_strided_slice %202 {offsets = [0, 0], sizes = [8, 32], strides = [1, 1]} : vector<8x96xf32> to vector<8x32xf32>
    %207 = vector.extract_strided_slice %205 {offsets = [0, 0], sizes = [8, 32], strides = [1, 1]} : vector<8x96xf32> to vector<8x32xf32>
    %208 = arith.addf %206, %207 : vector<8x32xf32>
    %209 = arith.negf %208 : vector<8x32xf32>
    %210 = math.exp %209 : vector<8x32xf32>
    %cst_77 = arith.constant 1.000000e+00 : f32
    %211 = vector.broadcast %cst_77 : f32 to vector<8x32xf32>
    %212 = arith.addf %211, %210 : vector<8x32xf32>
    %213 = arith.divf %211, %212 : vector<8x32xf32>
    %214 = vector.extract_strided_slice %202 {offsets = [0, 32], sizes = [8, 32], strides = [1, 1]} : vector<8x96xf32> to vector<8x32xf32>
    %215 = vector.extract_strided_slice %205 {offsets = [0, 32], sizes = [8, 32], strides = [1, 1]} : vector<8x96xf32> to vector<8x32xf32>
    %216 = arith.addf %214, %215 : vector<8x32xf32>
    %217 = arith.negf %216 : vector<8x32xf32>
    %218 = math.exp %217 : vector<8x32xf32>
    %cst_78 = arith.constant 1.000000e+00 : f32
    %219 = vector.broadcast %cst_78 : f32 to vector<8x32xf32>
    %220 = arith.addf %219, %218 : vector<8x32xf32>
    %221 = arith.divf %219, %220 : vector<8x32xf32>
    %222 = vector.extract_strided_slice %202 {offsets = [0, 64], sizes = [8, 32], strides = [1, 1]} : vector<8x96xf32> to vector<8x32xf32>
    %223 = vector.extract_strided_slice %205 {offsets = [0, 64], sizes = [8, 32], strides = [1, 1]} : vector<8x96xf32> to vector<8x32xf32>
    %224 = arith.mulf %213, %223 : vector<8x32xf32>
    %225 = arith.addf %222, %224 : vector<8x32xf32>
    %226 = math.tanh %225 : vector<8x32xf32>
    %cst_79 = arith.constant 1.000000e+00 : f32
    %227 = vector.broadcast %cst_79 : f32 to vector<8x32xf32>
    %228 = arith.subf %227, %221 : vector<8x32xf32>
    %229 = arith.mulf %228, %226 : vector<8x32xf32>
    %230 = arith.mulf %221, %163 : vector<8x32xf32>
    %231 = arith.addf %229, %230 : vector<8x32xf32>
    %232 = vector.shape_cast %165 : vector<8x1xi1> to vector<8x1xi1>
    %233 = vector.broadcast %232 : vector<8x1xi1> to vector<8x32xi1>
    %234 = arith.select %233, %231, %163 : vector<8x32xi1>, vector<8x32xf32>
    %c2_i32 = arith.constant 2 : i32
    %235 = vector.broadcast %c2_i32 : i32 to vector<8x1xi32>
    %236 = arith.cmpi sgt, %76, %235 : vector<8x1xi32>
    %237 = vector.extract_strided_slice %79 {offsets = [16, 0], sizes = [8, 96], strides = [1, 1]} : vector<48x96xf32> to vector<8x96xf32>
    %238 = arith.addf %237, %84 : vector<8x96xf32>
    %cst_80 = arith.constant dense<0.000000e+00> : vector<8x96xf32>
    %239 = tpu.matmul %199, %85, %cst_80 {dimension_numbers = #tpu.dot_dimension_numbers<[1], [0], [0], [1], [0, 0, 1, 1], [], []>} : vector<8x32xf32>, vector<32x96xf32>, vector<8x96xf32> -> vector<8x96xf32>
    %240 = vector.broadcast %86 : vector<1x96xf32> to vector<8x96xf32>
    %241 = arith.addf %239, %240 : vector<8x96xf32>
    %242 = vector.extract_strided_slice %238 {offsets = [0, 0], sizes = [8, 32], strides = [1, 1]} : vector<8x96xf32> to vector<8x32xf32>
    %243 = vector.extract_strided_slice %241 {offsets = [0, 0], sizes = [8, 32], strides = [1, 1]} : vector<8x96xf32> to vector<8x32xf32>
    %244 = arith.addf %242, %243 : vector<8x32xf32>
    %245 = arith.negf %244 : vector<8x32xf32>
    %246 = math.exp %245 : vector<8x32xf32>
    %cst_81 = arith.constant 1.000000e+00 : f32
    %247 = vector.broadcast %cst_81 : f32 to vector<8x32xf32>
    %248 = arith.addf %247, %246 : vector<8x32xf32>
    %249 = arith.divf %247, %248 : vector<8x32xf32>
    %250 = vector.extract_strided_slice %238 {offsets = [0, 32], sizes = [8, 32], strides = [1, 1]} : vector<8x96xf32> to vector<8x32xf32>
    %251 = vector.extract_strided_slice %241 {offsets = [0, 32], sizes = [8, 32], strides = [1, 1]} : vector<8x96xf32> to vector<8x32xf32>
    %252 = arith.addf %250, %251 : vector<8x32xf32>
    %253 = arith.negf %252 : vector<8x32xf32>
    %254 = math.exp %253 : vector<8x32xf32>
    %cst_82 = arith.constant 1.000000e+00 : f32
    %255 = vector.broadcast %cst_82 : f32 to vector<8x32xf32>
    %256 = arith.addf %255, %254 : vector<8x32xf32>
    %257 = arith.divf %255, %256 : vector<8x32xf32>
    %258 = vector.extract_strided_slice %238 {offsets = [0, 64], sizes = [8, 32], strides = [1, 1]} : vector<8x96xf32> to vector<8x32xf32>
    %259 = vector.extract_strided_slice %241 {offsets = [0, 64], sizes = [8, 32], strides = [1, 1]} : vector<8x96xf32> to vector<8x32xf32>
    %260 = arith.mulf %249, %259 : vector<8x32xf32>
    %261 = arith.addf %258, %260 : vector<8x32xf32>
    %262 = math.tanh %261 : vector<8x32xf32>
    %cst_83 = arith.constant 1.000000e+00 : f32
    %263 = vector.broadcast %cst_83 : f32 to vector<8x32xf32>
    %264 = arith.subf %263, %257 : vector<8x32xf32>
    %265 = arith.mulf %264, %262 : vector<8x32xf32>
    %266 = arith.mulf %257, %199 : vector<8x32xf32>
    %267 = arith.addf %265, %266 : vector<8x32xf32>
    %268 = vector.shape_cast %236 : vector<8x1xi1> to vector<8x1xi1>
    %269 = vector.broadcast %268 : vector<8x1xi1> to vector<8x32xi1>
    %270 = arith.select %269, %267, %199 : vector<8x32xi1>, vector<8x32xf32>
    %cst_84 = arith.constant dense<0.000000e+00> : vector<8x96xf32>
    %271 = tpu.matmul %270, %87, %cst_84 {dimension_numbers = #tpu.dot_dimension_numbers<[1], [0], [0], [1], [0, 0, 1, 1], [], []>} : vector<8x32xf32>, vector<32x96xf32>, vector<8x96xf32> -> vector<8x96xf32>
    %272 = vector.broadcast %88 : vector<1x96xf32> to vector<8x96xf32>
    %273 = arith.addf %271, %272 : vector<8x96xf32>
    %cst_85 = arith.constant dense<0.000000e+00> : vector<8x96xf32>
    %274 = tpu.matmul %234, %89, %cst_85 {dimension_numbers = #tpu.dot_dimension_numbers<[1], [0], [0], [1], [0, 0, 1, 1], [], []>} : vector<8x32xf32>, vector<32x96xf32>, vector<8x96xf32> -> vector<8x96xf32>
    %275 = vector.broadcast %90 : vector<1x96xf32> to vector<8x96xf32>
    %276 = arith.addf %274, %275 : vector<8x96xf32>
    %277 = vector.extract_strided_slice %273 {offsets = [0, 0], sizes = [8, 32], strides = [1, 1]} : vector<8x96xf32> to vector<8x32xf32>
    %278 = vector.extract_strided_slice %276 {offsets = [0, 0], sizes = [8, 32], strides = [1, 1]} : vector<8x96xf32> to vector<8x32xf32>
    %279 = arith.addf %277, %278 : vector<8x32xf32>
    %280 = arith.negf %279 : vector<8x32xf32>
    %281 = math.exp %280 : vector<8x32xf32>
    %cst_86 = arith.constant 1.000000e+00 : f32
    %282 = vector.broadcast %cst_86 : f32 to vector<8x32xf32>
    %283 = arith.addf %282, %281 : vector<8x32xf32>
    %284 = arith.divf %282, %283 : vector<8x32xf32>
    %285 = vector.extract_strided_slice %273 {offsets = [0, 32], sizes = [8, 32], strides = [1, 1]} : vector<8x96xf32> to vector<8x32xf32>
    %286 = vector.extract_strided_slice %276 {offsets = [0, 32], sizes = [8, 32], strides = [1, 1]} : vector<8x96xf32> to vector<8x32xf32>
    %287 = arith.addf %285, %286 : vector<8x32xf32>
    %288 = arith.negf %287 : vector<8x32xf32>
    %289 = math.exp %288 : vector<8x32xf32>
    %cst_87 = arith.constant 1.000000e+00 : f32
    %290 = vector.broadcast %cst_87 : f32 to vector<8x32xf32>
    %291 = arith.addf %290, %289 : vector<8x32xf32>
    %292 = arith.divf %290, %291 : vector<8x32xf32>
    %293 = vector.extract_strided_slice %273 {offsets = [0, 64], sizes = [8, 32], strides = [1, 1]} : vector<8x96xf32> to vector<8x32xf32>
    %294 = vector.extract_strided_slice %276 {offsets = [0, 64], sizes = [8, 32], strides = [1, 1]} : vector<8x96xf32> to vector<8x32xf32>
    %295 = arith.mulf %284, %294 : vector<8x32xf32>
    %296 = arith.addf %293, %295 : vector<8x32xf32>
    %297 = math.tanh %296 : vector<8x32xf32>
    %cst_88 = arith.constant 1.000000e+00 : f32
    %298 = vector.broadcast %cst_88 : f32 to vector<8x32xf32>
    %299 = arith.subf %298, %292 : vector<8x32xf32>
    %300 = arith.mulf %299, %297 : vector<8x32xf32>
    %301 = arith.mulf %292, %234 : vector<8x32xf32>
    %302 = arith.addf %300, %301 : vector<8x32xf32>
    %303 = vector.shape_cast %236 : vector<8x1xi1> to vector<8x1xi1>
    %304 = vector.broadcast %303 : vector<8x1xi1> to vector<8x32xi1>
    %305 = arith.select %304, %302, %234 : vector<8x32xi1>, vector<8x32xf32>
    %c3_i32 = arith.constant 3 : i32
    %306 = vector.broadcast %c3_i32 : i32 to vector<8x1xi32>
    %307 = arith.cmpi sgt, %76, %306 : vector<8x1xi32>
    %308 = vector.extract_strided_slice %79 {offsets = [24, 0], sizes = [8, 96], strides = [1, 1]} : vector<48x96xf32> to vector<8x96xf32>
    %309 = arith.addf %308, %84 : vector<8x96xf32>
    %cst_89 = arith.constant dense<0.000000e+00> : vector<8x96xf32>
    %310 = tpu.matmul %270, %85, %cst_89 {dimension_numbers = #tpu.dot_dimension_numbers<[1], [0], [0], [1], [0, 0, 1, 1], [], []>} : vector<8x32xf32>, vector<32x96xf32>, vector<8x96xf32> -> vector<8x96xf32>
    %311 = vector.broadcast %86 : vector<1x96xf32> to vector<8x96xf32>
    %312 = arith.addf %310, %311 : vector<8x96xf32>
    %313 = vector.extract_strided_slice %309 {offsets = [0, 0], sizes = [8, 32], strides = [1, 1]} : vector<8x96xf32> to vector<8x32xf32>
    %314 = vector.extract_strided_slice %312 {offsets = [0, 0], sizes = [8, 32], strides = [1, 1]} : vector<8x96xf32> to vector<8x32xf32>
    %315 = arith.addf %313, %314 : vector<8x32xf32>
    %316 = arith.negf %315 : vector<8x32xf32>
    %317 = math.exp %316 : vector<8x32xf32>
    %cst_90 = arith.constant 1.000000e+00 : f32
    %318 = vector.broadcast %cst_90 : f32 to vector<8x32xf32>
    %319 = arith.addf %318, %317 : vector<8x32xf32>
    %320 = arith.divf %318, %319 : vector<8x32xf32>
    %321 = vector.extract_strided_slice %309 {offsets = [0, 32], sizes = [8, 32], strides = [1, 1]} : vector<8x96xf32> to vector<8x32xf32>
    %322 = vector.extract_strided_slice %312 {offsets = [0, 32], sizes = [8, 32], strides = [1, 1]} : vector<8x96xf32> to vector<8x32xf32>
    %323 = arith.addf %321, %322 : vector<8x32xf32>
    %324 = arith.negf %323 : vector<8x32xf32>
    %325 = math.exp %324 : vector<8x32xf32>
    %cst_91 = arith.constant 1.000000e+00 : f32
    %326 = vector.broadcast %cst_91 : f32 to vector<8x32xf32>
    %327 = arith.addf %326, %325 : vector<8x32xf32>
    %328 = arith.divf %326, %327 : vector<8x32xf32>
    %329 = vector.extract_strided_slice %309 {offsets = [0, 64], sizes = [8, 32], strides = [1, 1]} : vector<8x96xf32> to vector<8x32xf32>
    %330 = vector.extract_strided_slice %312 {offsets = [0, 64], sizes = [8, 32], strides = [1, 1]} : vector<8x96xf32> to vector<8x32xf32>
    %331 = arith.mulf %320, %330 : vector<8x32xf32>
    %332 = arith.addf %329, %331 : vector<8x32xf32>
    %333 = math.tanh %332 : vector<8x32xf32>
    %cst_92 = arith.constant 1.000000e+00 : f32
    %334 = vector.broadcast %cst_92 : f32 to vector<8x32xf32>
    %335 = arith.subf %334, %328 : vector<8x32xf32>
    %336 = arith.mulf %335, %333 : vector<8x32xf32>
    %337 = arith.mulf %328, %270 : vector<8x32xf32>
    %338 = arith.addf %336, %337 : vector<8x32xf32>
    %339 = vector.shape_cast %307 : vector<8x1xi1> to vector<8x1xi1>
    %340 = vector.broadcast %339 : vector<8x1xi1> to vector<8x32xi1>
    %341 = arith.select %340, %338, %270 : vector<8x32xi1>, vector<8x32xf32>
    %cst_93 = arith.constant dense<0.000000e+00> : vector<8x96xf32>
    %342 = tpu.matmul %341, %87, %cst_93 {dimension_numbers = #tpu.dot_dimension_numbers<[1], [0], [0], [1], [0, 0, 1, 1], [], []>} : vector<8x32xf32>, vector<32x96xf32>, vector<8x96xf32> -> vector<8x96xf32>
    %343 = vector.broadcast %88 : vector<1x96xf32> to vector<8x96xf32>
    %344 = arith.addf %342, %343 : vector<8x96xf32>
    %cst_94 = arith.constant dense<0.000000e+00> : vector<8x96xf32>
    %345 = tpu.matmul %305, %89, %cst_94 {dimension_numbers = #tpu.dot_dimension_numbers<[1], [0], [0], [1], [0, 0, 1, 1], [], []>} : vector<8x32xf32>, vector<32x96xf32>, vector<8x96xf32> -> vector<8x96xf32>
    %346 = vector.broadcast %90 : vector<1x96xf32> to vector<8x96xf32>
    %347 = arith.addf %345, %346 : vector<8x96xf32>
    %348 = vector.extract_strided_slice %344 {offsets = [0, 0], sizes = [8, 32], strides = [1, 1]} : vector<8x96xf32> to vector<8x32xf32>
    %349 = vector.extract_strided_slice %347 {offsets = [0, 0], sizes = [8, 32], strides = [1, 1]} : vector<8x96xf32> to vector<8x32xf32>
    %350 = arith.addf %348, %349 : vector<8x32xf32>
    %351 = arith.negf %350 : vector<8x32xf32>
    %352 = math.exp %351 : vector<8x32xf32>
    %cst_95 = arith.constant 1.000000e+00 : f32
    %353 = vector.broadcast %cst_95 : f32 to vector<8x32xf32>
    %354 = arith.addf %353, %352 : vector<8x32xf32>
    %355 = arith.divf %353, %354 : vector<8x32xf32>
    %356 = vector.extract_strided_slice %344 {offsets = [0, 32], sizes = [8, 32], strides = [1, 1]} : vector<8x96xf32> to vector<8x32xf32>
    %357 = vector.extract_strided_slice %347 {offsets = [0, 32], sizes = [8, 32], strides = [1, 1]} : vector<8x96xf32> to vector<8x32xf32>
    %358 = arith.addf %356, %357 : vector<8x32xf32>
    %359 = arith.negf %358 : vector<8x32xf32>
    %360 = math.exp %359 : vector<8x32xf32>
    %cst_96 = arith.constant 1.000000e+00 : f32
    %361 = vector.broadcast %cst_96 : f32 to vector<8x32xf32>
    %362 = arith.addf %361, %360 : vector<8x32xf32>
    %363 = arith.divf %361, %362 : vector<8x32xf32>
    %364 = vector.extract_strided_slice %344 {offsets = [0, 64], sizes = [8, 32], strides = [1, 1]} : vector<8x96xf32> to vector<8x32xf32>
    %365 = vector.extract_strided_slice %347 {offsets = [0, 64], sizes = [8, 32], strides = [1, 1]} : vector<8x96xf32> to vector<8x32xf32>
    %366 = arith.mulf %355, %365 : vector<8x32xf32>
    %367 = arith.addf %364, %366 : vector<8x32xf32>
    %368 = math.tanh %367 : vector<8x32xf32>
    %cst_97 = arith.constant 1.000000e+00 : f32
    %369 = vector.broadcast %cst_97 : f32 to vector<8x32xf32>
    %370 = arith.subf %369, %363 : vector<8x32xf32>
    %371 = arith.mulf %370, %368 : vector<8x32xf32>
    %372 = arith.mulf %363, %305 : vector<8x32xf32>
    %373 = arith.addf %371, %372 : vector<8x32xf32>
    %374 = vector.shape_cast %307 : vector<8x1xi1> to vector<8x1xi1>
    %375 = vector.broadcast %374 : vector<8x1xi1> to vector<8x32xi1>
    %376 = arith.select %375, %373, %305 : vector<8x32xi1>, vector<8x32xf32>
    %c4_i32 = arith.constant 4 : i32
    %377 = vector.broadcast %c4_i32 : i32 to vector<8x1xi32>
    %378 = arith.cmpi sgt, %76, %377 : vector<8x1xi32>
    %379 = vector.extract_strided_slice %79 {offsets = [32, 0], sizes = [8, 96], strides = [1, 1]} : vector<48x96xf32> to vector<8x96xf32>
    %380 = arith.addf %379, %84 : vector<8x96xf32>
    %cst_98 = arith.constant dense<0.000000e+00> : vector<8x96xf32>
    %381 = tpu.matmul %341, %85, %cst_98 {dimension_numbers = #tpu.dot_dimension_numbers<[1], [0], [0], [1], [0, 0, 1, 1], [], []>} : vector<8x32xf32>, vector<32x96xf32>, vector<8x96xf32> -> vector<8x96xf32>
    %382 = vector.broadcast %86 : vector<1x96xf32> to vector<8x96xf32>
    %383 = arith.addf %381, %382 : vector<8x96xf32>
    %384 = vector.extract_strided_slice %380 {offsets = [0, 0], sizes = [8, 32], strides = [1, 1]} : vector<8x96xf32> to vector<8x32xf32>
    %385 = vector.extract_strided_slice %383 {offsets = [0, 0], sizes = [8, 32], strides = [1, 1]} : vector<8x96xf32> to vector<8x32xf32>
    %386 = arith.addf %384, %385 : vector<8x32xf32>
    %387 = arith.negf %386 : vector<8x32xf32>
    %388 = math.exp %387 : vector<8x32xf32>
    %cst_99 = arith.constant 1.000000e+00 : f32
    %389 = vector.broadcast %cst_99 : f32 to vector<8x32xf32>
    %390 = arith.addf %389, %388 : vector<8x32xf32>
    %391 = arith.divf %389, %390 : vector<8x32xf32>
    %392 = vector.extract_strided_slice %380 {offsets = [0, 32], sizes = [8, 32], strides = [1, 1]} : vector<8x96xf32> to vector<8x32xf32>
    %393 = vector.extract_strided_slice %383 {offsets = [0, 32], sizes = [8, 32], strides = [1, 1]} : vector<8x96xf32> to vector<8x32xf32>
    %394 = arith.addf %392, %393 : vector<8x32xf32>
    %395 = arith.negf %394 : vector<8x32xf32>
    %396 = math.exp %395 : vector<8x32xf32>
    %cst_100 = arith.constant 1.000000e+00 : f32
    %397 = vector.broadcast %cst_100 : f32 to vector<8x32xf32>
    %398 = arith.addf %397, %396 : vector<8x32xf32>
    %399 = arith.divf %397, %398 : vector<8x32xf32>
    %400 = vector.extract_strided_slice %380 {offsets = [0, 64], sizes = [8, 32], strides = [1, 1]} : vector<8x96xf32> to vector<8x32xf32>
    %401 = vector.extract_strided_slice %383 {offsets = [0, 64], sizes = [8, 32], strides = [1, 1]} : vector<8x96xf32> to vector<8x32xf32>
    %402 = arith.mulf %391, %401 : vector<8x32xf32>
    %403 = arith.addf %400, %402 : vector<8x32xf32>
    %404 = math.tanh %403 : vector<8x32xf32>
    %cst_101 = arith.constant 1.000000e+00 : f32
    %405 = vector.broadcast %cst_101 : f32 to vector<8x32xf32>
    %406 = arith.subf %405, %399 : vector<8x32xf32>
    %407 = arith.mulf %406, %404 : vector<8x32xf32>
    %408 = arith.mulf %399, %341 : vector<8x32xf32>
    %409 = arith.addf %407, %408 : vector<8x32xf32>
    %410 = vector.shape_cast %378 : vector<8x1xi1> to vector<8x1xi1>
    %411 = vector.broadcast %410 : vector<8x1xi1> to vector<8x32xi1>
    %412 = arith.select %411, %409, %341 : vector<8x32xi1>, vector<8x32xf32>
    %cst_102 = arith.constant dense<0.000000e+00> : vector<8x96xf32>
    %413 = tpu.matmul %412, %87, %cst_102 {dimension_numbers = #tpu.dot_dimension_numbers<[1], [0], [0], [1], [0, 0, 1, 1], [], []>} : vector<8x32xf32>, vector<32x96xf32>, vector<8x96xf32> -> vector<8x96xf32>
    %414 = vector.broadcast %88 : vector<1x96xf32> to vector<8x96xf32>
    %415 = arith.addf %413, %414 : vector<8x96xf32>
    %cst_103 = arith.constant dense<0.000000e+00> : vector<8x96xf32>
    %416 = tpu.matmul %376, %89, %cst_103 {dimension_numbers = #tpu.dot_dimension_numbers<[1], [0], [0], [1], [0, 0, 1, 1], [], []>} : vector<8x32xf32>, vector<32x96xf32>, vector<8x96xf32> -> vector<8x96xf32>
    %417 = vector.broadcast %90 : vector<1x96xf32> to vector<8x96xf32>
    %418 = arith.addf %416, %417 : vector<8x96xf32>
    %419 = vector.extract_strided_slice %415 {offsets = [0, 0], sizes = [8, 32], strides = [1, 1]} : vector<8x96xf32> to vector<8x32xf32>
    %420 = vector.extract_strided_slice %418 {offsets = [0, 0], sizes = [8, 32], strides = [1, 1]} : vector<8x96xf32> to vector<8x32xf32>
    %421 = arith.addf %419, %420 : vector<8x32xf32>
    %422 = arith.negf %421 : vector<8x32xf32>
    %423 = math.exp %422 : vector<8x32xf32>
    %cst_104 = arith.constant 1.000000e+00 : f32
    %424 = vector.broadcast %cst_104 : f32 to vector<8x32xf32>
    %425 = arith.addf %424, %423 : vector<8x32xf32>
    %426 = arith.divf %424, %425 : vector<8x32xf32>
    %427 = vector.extract_strided_slice %415 {offsets = [0, 32], sizes = [8, 32], strides = [1, 1]} : vector<8x96xf32> to vector<8x32xf32>
    %428 = vector.extract_strided_slice %418 {offsets = [0, 32], sizes = [8, 32], strides = [1, 1]} : vector<8x96xf32> to vector<8x32xf32>
    %429 = arith.addf %427, %428 : vector<8x32xf32>
    %430 = arith.negf %429 : vector<8x32xf32>
    %431 = math.exp %430 : vector<8x32xf32>
    %cst_105 = arith.constant 1.000000e+00 : f32
    %432 = vector.broadcast %cst_105 : f32 to vector<8x32xf32>
    %433 = arith.addf %432, %431 : vector<8x32xf32>
    %434 = arith.divf %432, %433 : vector<8x32xf32>
    %435 = vector.extract_strided_slice %415 {offsets = [0, 64], sizes = [8, 32], strides = [1, 1]} : vector<8x96xf32> to vector<8x32xf32>
    %436 = vector.extract_strided_slice %418 {offsets = [0, 64], sizes = [8, 32], strides = [1, 1]} : vector<8x96xf32> to vector<8x32xf32>
    %437 = arith.mulf %426, %436 : vector<8x32xf32>
    %438 = arith.addf %435, %437 : vector<8x32xf32>
    %439 = math.tanh %438 : vector<8x32xf32>
    %cst_106 = arith.constant 1.000000e+00 : f32
    %440 = vector.broadcast %cst_106 : f32 to vector<8x32xf32>
    %441 = arith.subf %440, %434 : vector<8x32xf32>
    %442 = arith.mulf %441, %439 : vector<8x32xf32>
    %443 = arith.mulf %434, %376 : vector<8x32xf32>
    %444 = arith.addf %442, %443 : vector<8x32xf32>
    %445 = vector.shape_cast %378 : vector<8x1xi1> to vector<8x1xi1>
    %446 = vector.broadcast %445 : vector<8x1xi1> to vector<8x32xi1>
    %447 = arith.select %446, %444, %376 : vector<8x32xi1>, vector<8x32xf32>
    %c5_i32 = arith.constant 5 : i32
    %448 = vector.broadcast %c5_i32 : i32 to vector<8x1xi32>
    %449 = arith.cmpi sgt, %76, %448 : vector<8x1xi32>
    %450 = vector.extract_strided_slice %79 {offsets = [40, 0], sizes = [8, 96], strides = [1, 1]} : vector<48x96xf32> to vector<8x96xf32>
    %451 = arith.addf %450, %84 : vector<8x96xf32>
    %cst_107 = arith.constant dense<0.000000e+00> : vector<8x96xf32>
    %452 = tpu.matmul %412, %85, %cst_107 {dimension_numbers = #tpu.dot_dimension_numbers<[1], [0], [0], [1], [0, 0, 1, 1], [], []>} : vector<8x32xf32>, vector<32x96xf32>, vector<8x96xf32> -> vector<8x96xf32>
    %453 = vector.broadcast %86 : vector<1x96xf32> to vector<8x96xf32>
    %454 = arith.addf %452, %453 : vector<8x96xf32>
    %455 = vector.extract_strided_slice %451 {offsets = [0, 0], sizes = [8, 32], strides = [1, 1]} : vector<8x96xf32> to vector<8x32xf32>
    %456 = vector.extract_strided_slice %454 {offsets = [0, 0], sizes = [8, 32], strides = [1, 1]} : vector<8x96xf32> to vector<8x32xf32>
    %457 = arith.addf %455, %456 : vector<8x32xf32>
    %458 = arith.negf %457 : vector<8x32xf32>
    %459 = math.exp %458 : vector<8x32xf32>
    %cst_108 = arith.constant 1.000000e+00 : f32
    %460 = vector.broadcast %cst_108 : f32 to vector<8x32xf32>
    %461 = arith.addf %460, %459 : vector<8x32xf32>
    %462 = arith.divf %460, %461 : vector<8x32xf32>
    %463 = vector.extract_strided_slice %451 {offsets = [0, 32], sizes = [8, 32], strides = [1, 1]} : vector<8x96xf32> to vector<8x32xf32>
    %464 = vector.extract_strided_slice %454 {offsets = [0, 32], sizes = [8, 32], strides = [1, 1]} : vector<8x96xf32> to vector<8x32xf32>
    %465 = arith.addf %463, %464 : vector<8x32xf32>
    %466 = arith.negf %465 : vector<8x32xf32>
    %467 = math.exp %466 : vector<8x32xf32>
    %cst_109 = arith.constant 1.000000e+00 : f32
    %468 = vector.broadcast %cst_109 : f32 to vector<8x32xf32>
    %469 = arith.addf %468, %467 : vector<8x32xf32>
    %470 = arith.divf %468, %469 : vector<8x32xf32>
    %471 = vector.extract_strided_slice %451 {offsets = [0, 64], sizes = [8, 32], strides = [1, 1]} : vector<8x96xf32> to vector<8x32xf32>
    %472 = vector.extract_strided_slice %454 {offsets = [0, 64], sizes = [8, 32], strides = [1, 1]} : vector<8x96xf32> to vector<8x32xf32>
    %473 = arith.mulf %462, %472 : vector<8x32xf32>
    %474 = arith.addf %471, %473 : vector<8x32xf32>
    %475 = math.tanh %474 : vector<8x32xf32>
    %cst_110 = arith.constant 1.000000e+00 : f32
    %476 = vector.broadcast %cst_110 : f32 to vector<8x32xf32>
    %477 = arith.subf %476, %470 : vector<8x32xf32>
    %478 = arith.mulf %477, %475 : vector<8x32xf32>
    %479 = arith.mulf %470, %412 : vector<8x32xf32>
    %480 = arith.addf %478, %479 : vector<8x32xf32>
    %481 = vector.shape_cast %449 : vector<8x1xi1> to vector<8x1xi1>
    %482 = vector.broadcast %481 : vector<8x1xi1> to vector<8x32xi1>
    %483 = arith.select %482, %480, %412 : vector<8x32xi1>, vector<8x32xf32>
    %cst_111 = arith.constant dense<0.000000e+00> : vector<8x96xf32>
    %484 = tpu.matmul %483, %87, %cst_111 {dimension_numbers = #tpu.dot_dimension_numbers<[1], [0], [0], [1], [0, 0, 1, 1], [], []>} : vector<8x32xf32>, vector<32x96xf32>, vector<8x96xf32> -> vector<8x96xf32>
    %485 = vector.broadcast %88 : vector<1x96xf32> to vector<8x96xf32>
    %486 = arith.addf %484, %485 : vector<8x96xf32>
    %cst_112 = arith.constant dense<0.000000e+00> : vector<8x96xf32>
    %487 = tpu.matmul %447, %89, %cst_112 {dimension_numbers = #tpu.dot_dimension_numbers<[1], [0], [0], [1], [0, 0, 1, 1], [], []>} : vector<8x32xf32>, vector<32x96xf32>, vector<8x96xf32> -> vector<8x96xf32>
    %488 = vector.broadcast %90 : vector<1x96xf32> to vector<8x96xf32>
    %489 = arith.addf %487, %488 : vector<8x96xf32>
    %490 = vector.extract_strided_slice %486 {offsets = [0, 0], sizes = [8, 32], strides = [1, 1]} : vector<8x96xf32> to vector<8x32xf32>
    %491 = vector.extract_strided_slice %489 {offsets = [0, 0], sizes = [8, 32], strides = [1, 1]} : vector<8x96xf32> to vector<8x32xf32>
    %492 = arith.addf %490, %491 : vector<8x32xf32>
    %493 = arith.negf %492 : vector<8x32xf32>
    %494 = math.exp %493 : vector<8x32xf32>
    %cst_113 = arith.constant 1.000000e+00 : f32
    %495 = vector.broadcast %cst_113 : f32 to vector<8x32xf32>
    %496 = arith.addf %495, %494 : vector<8x32xf32>
    %497 = arith.divf %495, %496 : vector<8x32xf32>
    %498 = vector.extract_strided_slice %486 {offsets = [0, 32], sizes = [8, 32], strides = [1, 1]} : vector<8x96xf32> to vector<8x32xf32>
    %499 = vector.extract_strided_slice %489 {offsets = [0, 32], sizes = [8, 32], strides = [1, 1]} : vector<8x96xf32> to vector<8x32xf32>
    %500 = arith.addf %498, %499 : vector<8x32xf32>
    %501 = arith.negf %500 : vector<8x32xf32>
    %502 = math.exp %501 : vector<8x32xf32>
    %cst_114 = arith.constant 1.000000e+00 : f32
    %503 = vector.broadcast %cst_114 : f32 to vector<8x32xf32>
    %504 = arith.addf %503, %502 : vector<8x32xf32>
    %505 = arith.divf %503, %504 : vector<8x32xf32>
    %506 = vector.extract_strided_slice %486 {offsets = [0, 64], sizes = [8, 32], strides = [1, 1]} : vector<8x96xf32> to vector<8x32xf32>
    %507 = vector.extract_strided_slice %489 {offsets = [0, 64], sizes = [8, 32], strides = [1, 1]} : vector<8x96xf32> to vector<8x32xf32>
    %508 = arith.mulf %497, %507 : vector<8x32xf32>
    %509 = arith.addf %506, %508 : vector<8x32xf32>
    %510 = math.tanh %509 : vector<8x32xf32>
    %cst_115 = arith.constant 1.000000e+00 : f32
    %511 = vector.broadcast %cst_115 : f32 to vector<8x32xf32>
    %512 = arith.subf %511, %505 : vector<8x32xf32>
    %513 = arith.mulf %512, %510 : vector<8x32xf32>
    %514 = arith.mulf %505, %447 : vector<8x32xf32>
    %515 = arith.addf %513, %514 : vector<8x32xf32>
    %516 = vector.shape_cast %449 : vector<8x1xi1> to vector<8x1xi1>
    %517 = vector.broadcast %516 : vector<8x1xi1> to vector<8x32xi1>
    %518 = arith.select %517, %515, %447 : vector<8x32xi1>, vector<8x32xf32>
    %519 = tpu.iota {dimensions = array<i32: 0>} : vector<32x128xi32>
    %520 = tpu.iota {dimensions = array<i32: 1>} : vector<32x128xi32>
    %c0_i32_116 = arith.constant 0 : i32
    %521 = vector.broadcast %c0_i32_116 : i32 to vector<32x128xi32>
    %522 = arith.addi %519, %521 : vector<32x128xi32>
    %523 = arith.cmpi eq, %520, %522 : vector<32x128xi32>
    %c96_i32 = arith.constant 96 : i32
    %524 = vector.broadcast %c96_i32 : i32 to vector<32x128xi32>
    %525 = arith.addi %519, %524 : vector<32x128xi32>
    %526 = arith.cmpi eq, %520, %525 : vector<32x128xi32>
    %527 = arith.ori %523, %526 : vector<32x128xi1>
    %528 = arith.extui %527 : vector<32x128xi1> to vector<32x128xi32>
    %529 = arith.sitofp %528 : vector<32x128xi32> to vector<32x128xf32>
    %cst_117 = arith.constant dense<0.000000e+00> : vector<8x128xf32>
    %530 = tpu.matmul %518, %529, %cst_117 {dimension_numbers = #tpu.dot_dimension_numbers<[1], [0], [0], [1], [0, 0, 1, 1], [], []>} : vector<8x32xf32>, vector<32x128xf32>, vector<8x128xf32> -> vector<8x128xf32>
    %531 = tpu.iota {dimensions = array<i32: 0>} : vector<32x128xi32>
    %532 = tpu.iota {dimensions = array<i32: 1>} : vector<32x128xi32>
    %c32_i32 = arith.constant 32 : i32
    %533 = vector.broadcast %c32_i32 : i32 to vector<32x128xi32>
    %534 = arith.addi %531, %533 : vector<32x128xi32>
    %535 = arith.cmpi eq, %532, %534 : vector<32x128xi32>
    %536 = arith.extui %535 : vector<32x128xi1> to vector<32x128xi32>
    %537 = arith.sitofp %536 : vector<32x128xi32> to vector<32x128xf32>
    %cst_118 = arith.constant dense<0.000000e+00> : vector<8x128xf32>
    %538 = tpu.matmul %75, %537, %cst_118 {dimension_numbers = #tpu.dot_dimension_numbers<[1], [0], [0], [1], [0, 0, 1, 1], [], []>} : vector<8x32xf32>, vector<32x128xf32>, vector<8x128xf32> -> vector<8x128xf32>
    %539 = arith.addf %530, %538 : vector<8x128xf32>
    %540 = tpu.iota {dimensions = array<i32: 0>} : vector<32x128xi32>
    %541 = tpu.iota {dimensions = array<i32: 1>} : vector<32x128xi32>
    %c64_i32 = arith.constant 64 : i32
    %542 = vector.broadcast %c64_i32 : i32 to vector<32x128xi32>
    %543 = arith.addi %540, %542 : vector<32x128xi32>
    %544 = arith.cmpi eq, %541, %543 : vector<32x128xi32>
    %545 = arith.extui %544 : vector<32x128xi1> to vector<32x128xi32>
    %546 = arith.sitofp %545 : vector<32x128xi32> to vector<32x128xf32>
    %cst_119 = arith.constant dense<0.000000e+00> : vector<8x128xf32>
    %547 = tpu.matmul %483, %546, %cst_119 {dimension_numbers = #tpu.dot_dimension_numbers<[1], [0], [0], [1], [0, 0, 1, 1], [], []>} : vector<8x32xf32>, vector<32x128xf32>, vector<8x128xf32> -> vector<8x128xf32>
    %548 = arith.addf %539, %547 : vector<8x128xf32>
    %c0_120 = arith.constant 0 : index
    %c0_121 = arith.constant 0 : index
    %549 = vector.load %arg4[%c0_120, %c0_121] : memref<8x128xf32, #tpu.memory_space<vmem>>, vector<8x128xf32>
    %550 = arith.addf %548, %549 : vector<8x128xf32>
    %c0_122 = arith.constant 0 : index
    %c0_123 = arith.constant 0 : index
    %551 = vector.load %arg22[%c0_122, %c0_123] : memref<8x128xf32, #tpu.memory_space<vmem>>, vector<8x128xf32>
    tpu.vector_store %arg22[%c0_122, %c0_123], %550 {strides = array<i32>} : memref<8x128xf32, #tpu.memory_space<vmem>>, vector<8x128xf32>,
    return
  }
}

module attributes {stable_mosaic.version = 11 : i64} {
  func.func @kernel(%arg0: i32, %arg1: memref<8x128xf32, #tpu.memory_space<vmem>>, %arg2: memref<1x1x128xf32, #tpu.memory_space<vmem>>, %arg3: memref<1x1x128xf32, #tpu.memory_space<vmem>>, %arg4: memref<1x1x128xf32, #tpu.memory_space<vmem>>, %arg5: memref<1x1x128xf32, #tpu.memory_space<vmem>>, %arg6: memref<1x1x128xf32, #tpu.memory_space<vmem>>, %arg7: memref<1x256x128xf32, #tpu.memory_space<vmem>>, %arg8: memref<1x128x128xf32, #tpu.memory_space<vmem>>, %arg9: memref<1x256x128xf32, #tpu.memory_space<vmem>>, %arg10: memref<1x1x256xf32, #tpu.memory_space<vmem>>, %arg11: memref<1x1x256xf32, #tpu.memory_space<vmem>>, %arg12: memref<1x1x256xf32, #tpu.memory_space<vmem>>, %arg13: memref<1x1x256xf32, #tpu.memory_space<vmem>>, %arg14: memref<1x1x256xf32, #tpu.memory_space<vmem>>, %arg15: memref<1x1x256xf32, #tpu.memory_space<vmem>>, %arg16: memref<1x1x256xf32, #tpu.memory_space<vmem>>, %arg17: memref<1x256x256xf32, #tpu.memory_space<vmem>>, %arg18: memref<1x256x256xf32, #tpu.memory_space<vmem>>, %arg19: memref<1x128x256xf32, #tpu.memory_space<vmem>>, %arg20: memref<1x1x384xf32, #tpu.memory_space<vmem>>, %arg21: memref<1x1x256xf32, #tpu.memory_space<vmem>>, %arg22: memref<1x1x384xf32, #tpu.memory_space<vmem>>, %arg23: memref<1x1x256xf32, #tpu.memory_space<vmem>>, %arg24: memref<1x1x256xf32, #tpu.memory_space<vmem>>, %arg25: memref<1x1x384xf32, #tpu.memory_space<vmem>>, %arg26: memref<1x1x256xf32, #tpu.memory_space<vmem>>, %arg27: memref<1x256x384xf32, #tpu.memory_space<vmem>>, %arg28: memref<1x384x256xf32, #tpu.memory_space<vmem>>, %arg29: memref<1x128x256xf32, #tpu.memory_space<vmem>>, %arg30: memref<1x1x128xf32, #tpu.memory_space<vmem>>, %arg31: memref<1x1x128xf32, #tpu.memory_space<vmem>>, %arg32: memref<1x1x128xf32, #tpu.memory_space<vmem>>, %arg33: memref<1x1x128xf32, #tpu.memory_space<vmem>>, %arg34: memref<1x1x128xf32, #tpu.memory_space<vmem>>, %arg35: memref<1x256x128xf32, #tpu.memory_space<vmem>>, %arg36: memref<1x128x128xf32, #tpu.memory_space<vmem>>, %arg37: memref<1x256x128xf32, #tpu.memory_space<vmem>>, %arg38: memref<1x8x128xf32, #tpu.memory_space<vmem>>) attributes {dimension_semantics = [#tpu.dimension_semantics<parallel>], iteration_bounds = array<i64: 2>, scalar_prefetch = 0 : i64, scratch_operands = 0 : i64, tpu.core_type = #tpu.core_type<tc>, window_params = [{pipeline_mode = #tpu.pipeline_mode<synchronous>, transform_indices = @transform_0, window_bounds = array<i64: 8, 128>}, {transform_indices = @transform_1, window_bounds = array<i64: 1, 1, 128>}, {transform_indices = @transform_2, window_bounds = array<i64: 1, 1, 128>}, {transform_indices = @transform_3, window_bounds = array<i64: 1, 1, 128>}, {transform_indices = @transform_4, window_bounds = array<i64: 1, 1, 128>}, {transform_indices = @transform_5, window_bounds = array<i64: 1, 1, 128>}, {transform_indices = @transform_6, window_bounds = array<i64: 1, 256, 128>}, {transform_indices = @transform_7, window_bounds = array<i64: 1, 128, 128>}, {transform_indices = @transform_8, window_bounds = array<i64: 1, 256, 128>}, {transform_indices = @transform_9, window_bounds = array<i64: 1, 1, 256>}, {transform_indices = @transform_10, window_bounds = array<i64: 1, 1, 256>}, {transform_indices = @transform_11, window_bounds = array<i64: 1, 1, 256>}, {transform_indices = @transform_12, window_bounds = array<i64: 1, 1, 256>}, {transform_indices = @transform_13, window_bounds = array<i64: 1, 1, 256>}, {transform_indices = @transform_14, window_bounds = array<i64: 1, 1, 256>}, {transform_indices = @transform_15, window_bounds = array<i64: 1, 1, 256>}, {transform_indices = @transform_16, window_bounds = array<i64: 1, 256, 256>}, {transform_indices = @transform_17, window_bounds = array<i64: 1, 256, 256>}, {transform_indices = @transform_18, window_bounds = array<i64: 1, 128, 256>}, {transform_indices = @transform_19, window_bounds = array<i64: 1, 1, 384>}, {transform_indices = @transform_20, window_bounds = array<i64: 1, 1, 256>}, {transform_indices = @transform_21, window_bounds = array<i64: 1, 1, 384>}, {transform_indices = @transform_22, window_bounds = array<i64: 1, 1, 256>}, {transform_indices = @transform_23, window_bounds = array<i64: 1, 1, 256>}, {transform_indices = @transform_24, window_bounds = array<i64: 1, 1, 384>}, {transform_indices = @transform_25, window_bounds = array<i64: 1, 1, 256>}, {transform_indices = @transform_26, window_bounds = array<i64: 1, 256, 384>}, {transform_indices = @transform_27, window_bounds = array<i64: 1, 384, 256>}, {transform_indices = @transform_28, window_bounds = array<i64: 1, 128, 256>}, {transform_indices = @transform_29, window_bounds = array<i64: 1, 1, 128>}, {transform_indices = @transform_30, window_bounds = array<i64: 1, 1, 128>}, {transform_indices = @transform_31, window_bounds = array<i64: 1, 1, 128>}, {transform_indices = @transform_32, window_bounds = array<i64: 1, 1, 128>}, {transform_indices = @transform_33, window_bounds = array<i64: 1, 1, 128>}, {transform_indices = @transform_34, window_bounds = array<i64: 1, 256, 128>}, {transform_indices = @transform_35, window_bounds = array<i64: 1, 128, 128>}, {transform_indices = @transform_36, window_bounds = array<i64: 1, 256, 128>}, {transform_indices = @transform_37, window_bounds = array<i64: 1, 8, 128>}]} {
    %c0 = arith.constant 0 : index
    %c0_0 = arith.constant 0 : index
    %0 = vector.load %arg1[%c0, %c0_0] : memref<8x128xf32, #tpu.memory_space<vmem>>, vector<8x128xf32>
    %cst = arith.constant 0.000000e+00 : f32
    %1 = vector.broadcast %cst : f32 to vector<8x128xf32>
    %2 = tpu.concatenate %0, %1 in 1 : vector<8x128xf32>, vector<8x128xf32> -> vector<8x256xf32>
    %c0_1 = arith.constant 0 : index
    %c0_2 = arith.constant 0 : index
    %c0_3 = arith.constant 0 : index
    %3 = vector.load %arg17[%c0_1, %c0_2, %c0_3] : memref<1x256x256xf32, #tpu.memory_space<vmem>>, vector<1x256x256xf32>
    %4 = vector.shape_cast %3 : vector<1x256x256xf32> to vector<256x256xf32>
    %cst_4 = arith.constant dense<0.000000e+00> : vector<8x256xf32>
    %5 = tpu.matmul %2, %4, %cst_4 {dimension_numbers = #tpu.dot_dimension_numbers<[1], [0], [0], [1], [0, 0, 1, 1], [], []>} : vector<8x256xf32>, vector<256x256xf32>, vector<8x256xf32> -> vector<8x256xf32>
    %c0_5 = arith.constant 0 : index
    %c0_6 = arith.constant 0 : index
    %c0_7 = arith.constant 0 : index
    %6 = vector.load %arg10[%c0_5, %c0_6, %c0_7] : memref<1x1x256xf32, #tpu.memory_space<vmem>>, vector<1x1x256xf32>
    %7 = vector.shape_cast %6 : vector<1x1x256xf32> to vector<1x256xf32>
    %8 = vector.broadcast %7 : vector<1x256xf32> to vector<8x256xf32>
    %9 = arith.addf %5, %8 : vector<8x256xf32>
    %c0_8 = arith.constant 0 : index
    %c0_9 = arith.constant 0 : index
    %c0_10 = arith.constant 0 : index
    %10 = vector.load %arg15[%c0_8, %c0_9, %c0_10] : memref<1x1x256xf32, #tpu.memory_space<vmem>>, vector<1x1x256xf32>
    %11 = vector.shape_cast %10 : vector<1x1x256xf32> to vector<1x256xf32>
    %c0_11 = arith.constant 0 : index
    %c0_12 = arith.constant 0 : index
    %c0_13 = arith.constant 0 : index
    %12 = vector.load %arg12[%c0_11, %c0_12, %c0_13] : memref<1x1x256xf32, #tpu.memory_space<vmem>>, vector<1x1x256xf32>
    %13 = vector.shape_cast %12 : vector<1x1x256xf32> to vector<1x256xf32>
    %cst_14 = arith.constant dense<0.000000e+00> : vector<8xf32>
    %14 = vector.multi_reduction <add>, %9, %cst_14 [1] : vector<8x256xf32> to vector<8xf32>
    %15 = vector.shape_cast %14 : vector<8xf32> to vector<8x1xf32>
    %cst_15 = arith.constant 3.906250e-03 : f32
    %16 = vector.broadcast %cst_15 : f32 to vector<8x1xf32>
    %17 = arith.mulf %15, %16 : vector<8x1xf32>
    %18 = arith.mulf %9, %9 : vector<8x256xf32>
    %cst_16 = arith.constant dense<0.000000e+00> : vector<8xf32>
    %19 = vector.multi_reduction <add>, %18, %cst_16 [1] : vector<8x256xf32> to vector<8xf32>
    %20 = vector.shape_cast %19 : vector<8xf32> to vector<8x1xf32>
    %cst_17 = arith.constant 3.906250e-03 : f32
    %21 = vector.broadcast %cst_17 : f32 to vector<8x1xf32>
    %22 = arith.mulf %20, %21 : vector<8x1xf32>
    %23 = arith.mulf %17, %17 : vector<8x1xf32>
    %24 = arith.subf %22, %23 : vector<8x1xf32>
    %cst_18 = arith.constant 0.000000e+00 : f32
    %25 = vector.broadcast %cst_18 : f32 to vector<8x1xf32>
    %26 = arith.maximumf %24, %25 : vector<8x1xf32>
    %27 = vector.broadcast %17 : vector<8x1xf32> to vector<8x256xf32>
    %28 = arith.subf %9, %27 : vector<8x256xf32>
    %cst_19 = arith.constant 9.99999974E-6 : f32
    %29 = vector.broadcast %cst_19 : f32 to vector<8x1xf32>
    %30 = arith.addf %26, %29 : vector<8x1xf32>
    %31 = math.rsqrt %30 : vector<8x1xf32>
    %32 = vector.broadcast %31 : vector<8x1xf32> to vector<8x256xf32>
    %33 = arith.mulf %28, %32 : vector<8x256xf32>
    %34 = vector.broadcast %11 : vector<1x256xf32> to vector<8x256xf32>
    %35 = arith.mulf %33, %34 : vector<8x256xf32>
    %36 = vector.broadcast %13 : vector<1x256xf32> to vector<8x256xf32>
    %37 = arith.addf %35, %36 : vector<8x256xf32>
    %cst_20 = arith.constant 5.000000e-01 : f32
    %38 = vector.broadcast %cst_20 : f32 to vector<8x256xf32>
    %39 = arith.mulf %38, %37 : vector<8x256xf32>
    %cst_21 = arith.constant 0.707106769 : f32
    %40 = vector.broadcast %cst_21 : f32 to vector<8x256xf32>
    %41 = arith.mulf %37, %40 : vector<8x256xf32>
    %42 = math.erf %41 : vector<8x256xf32>
    %cst_22 = arith.constant 1.000000e+00 : f32
    %43 = vector.broadcast %cst_22 : f32 to vector<8x256xf32>
    %44 = arith.addf %43, %42 : vector<8x256xf32>
    %45 = arith.mulf %39, %44 : vector<8x256xf32>
    %c0_23 = arith.constant 0 : index
    %c0_24 = arith.constant 0 : index
    %c0_25 = arith.constant 0 : index
    %46 = vector.load %arg18[%c0_23, %c0_24, %c0_25] : memref<1x256x256xf32, #tpu.memory_space<vmem>>, vector<1x256x256xf32>
    %47 = vector.shape_cast %46 : vector<1x256x256xf32> to vector<256x256xf32>
    %cst_26 = arith.constant dense<0.000000e+00> : vector<8x256xf32>
    %48 = tpu.matmul %45, %47, %cst_26 {dimension_numbers = #tpu.dot_dimension_numbers<[1], [0], [0], [1], [0, 0, 1, 1], [], []>} : vector<8x256xf32>, vector<256x256xf32>, vector<8x256xf32> -> vector<8x256xf32>
    %c0_27 = arith.constant 0 : index
    %c0_28 = arith.constant 0 : index
    %c0_29 = arith.constant 0 : index
    %49 = vector.load %arg11[%c0_27, %c0_28, %c0_29] : memref<1x1x256xf32, #tpu.memory_space<vmem>>, vector<1x1x256xf32>
    %50 = vector.shape_cast %49 : vector<1x1x256xf32> to vector<1x256xf32>
    %51 = vector.broadcast %50 : vector<1x256xf32> to vector<8x256xf32>
    %52 = arith.addf %48, %51 : vector<8x256xf32>
    %c0_30 = arith.constant 0 : index
    %c0_31 = arith.constant 0 : index
    %c0_32 = arith.constant 0 : index
    %53 = vector.load %arg19[%c0_30, %c0_31, %c0_32] : memref<1x128x256xf32, #tpu.memory_space<vmem>>, vector<1x128x256xf32>
    %54 = vector.shape_cast %53 : vector<1x128x256xf32> to vector<128x256xf32>
    %cst_33 = arith.constant dense<0.000000e+00> : vector<8x256xf32>
    %55 = tpu.matmul %0, %54, %cst_33 {dimension_numbers = #tpu.dot_dimension_numbers<[1], [0], [0], [1], [0, 0, 1, 1], [], []>} : vector<8x128xf32>, vector<128x256xf32>, vector<8x256xf32> -> vector<8x256xf32>
    %c0_34 = arith.constant 0 : index
    %c0_35 = arith.constant 0 : index
    %c0_36 = arith.constant 0 : index
    %56 = vector.load %arg14[%c0_34, %c0_35, %c0_36] : memref<1x1x256xf32, #tpu.memory_space<vmem>>, vector<1x1x256xf32>
    %57 = vector.shape_cast %56 : vector<1x1x256xf32> to vector<1x256xf32>
    %58 = vector.broadcast %57 : vector<1x256xf32> to vector<8x256xf32>
    %59 = arith.addf %55, %58 : vector<8x256xf32>
    %60 = arith.addf %2, %52 : vector<8x256xf32>
    %61 = arith.addf %60, %59 : vector<8x256xf32>
    %c0_37 = arith.constant 0 : index
    %c0_38 = arith.constant 0 : index
    %c0_39 = arith.constant 0 : index
    %62 = vector.load %arg16[%c0_37, %c0_38, %c0_39] : memref<1x1x256xf32, #tpu.memory_space<vmem>>, vector<1x1x256xf32>
    %63 = vector.shape_cast %62 : vector<1x1x256xf32> to vector<1x256xf32>
    %c0_40 = arith.constant 0 : index
    %c0_41 = arith.constant 0 : index
    %c0_42 = arith.constant 0 : index
    %64 = vector.load %arg13[%c0_40, %c0_41, %c0_42] : memref<1x1x256xf32, #tpu.memory_space<vmem>>, vector<1x1x256xf32>
    %65 = vector.shape_cast %64 : vector<1x1x256xf32> to vector<1x256xf32>
    %cst_43 = arith.constant dense<0.000000e+00> : vector<8xf32>
    %66 = vector.multi_reduction <add>, %61, %cst_43 [1] : vector<8x256xf32> to vector<8xf32>
    %67 = vector.shape_cast %66 : vector<8xf32> to vector<8x1xf32>
    %cst_44 = arith.constant 6.250000e-03 : f32
    %68 = vector.broadcast %cst_44 : f32 to vector<8x1xf32>
    %69 = arith.mulf %67, %68 : vector<8x1xf32>
    %70 = arith.mulf %61, %61 : vector<8x256xf32>
    %cst_45 = arith.constant dense<0.000000e+00> : vector<8xf32>
    %71 = vector.multi_reduction <add>, %70, %cst_45 [1] : vector<8x256xf32> to vector<8xf32>
    %72 = vector.shape_cast %71 : vector<8xf32> to vector<8x1xf32>
    %cst_46 = arith.constant 6.250000e-03 : f32
    %73 = vector.broadcast %cst_46 : f32 to vector<8x1xf32>
    %74 = arith.mulf %72, %73 : vector<8x1xf32>
    %75 = arith.mulf %69, %69 : vector<8x1xf32>
    %76 = arith.subf %74, %75 : vector<8x1xf32>
    %cst_47 = arith.constant 0.000000e+00 : f32
    %77 = vector.broadcast %cst_47 : f32 to vector<8x1xf32>
    %78 = arith.maximumf %76, %77 : vector<8x1xf32>
    %79 = vector.broadcast %69 : vector<8x1xf32> to vector<8x256xf32>
    %80 = arith.subf %61, %79 : vector<8x256xf32>
    %cst_48 = arith.constant 9.99999974E-6 : f32
    %81 = vector.broadcast %cst_48 : f32 to vector<8x1xf32>
    %82 = arith.addf %78, %81 : vector<8x1xf32>
    %83 = math.rsqrt %82 : vector<8x1xf32>
    %84 = vector.broadcast %83 : vector<8x1xf32> to vector<8x256xf32>
    %85 = arith.mulf %80, %84 : vector<8x256xf32>
    %86 = vector.broadcast %63 : vector<1x256xf32> to vector<8x256xf32>
    %87 = arith.mulf %85, %86 : vector<8x256xf32>
    %88 = vector.broadcast %65 : vector<1x256xf32> to vector<8x256xf32>
    %89 = arith.addf %87, %88 : vector<8x256xf32>
    %cst_49 = arith.constant 5.000000e-01 : f32
    %90 = vector.broadcast %cst_49 : f32 to vector<8x256xf32>
    %91 = arith.mulf %90, %89 : vector<8x256xf32>
    %cst_50 = arith.constant 0.707106769 : f32
    %92 = vector.broadcast %cst_50 : f32 to vector<8x256xf32>
    %93 = arith.mulf %89, %92 : vector<8x256xf32>
    %94 = math.erf %93 : vector<8x256xf32>
    %cst_51 = arith.constant 1.000000e+00 : f32
    %95 = vector.broadcast %cst_51 : f32 to vector<8x256xf32>
    %96 = arith.addf %95, %94 : vector<8x256xf32>
    %97 = arith.mulf %91, %96 : vector<8x256xf32>
    %c0_52 = arith.constant 0 : index
    %c0_53 = arith.constant 0 : index
    %c0_54 = arith.constant 0 : index
    %98 = vector.load %arg27[%c0_52, %c0_53, %c0_54] : memref<1x256x384xf32, #tpu.memory_space<vmem>>, vector<1x256x384xf32>
    %99 = vector.shape_cast %98 : vector<1x256x384xf32> to vector<256x384xf32>
    %cst_55 = arith.constant dense<0.000000e+00> : vector<8x384xf32>
    %100 = tpu.matmul %97, %99, %cst_55 {dimension_numbers = #tpu.dot_dimension_numbers<[1], [0], [0], [1], [0, 0, 1, 1], [], []>} : vector<8x256xf32>, vector<256x384xf32>, vector<8x384xf32> -> vector<8x384xf32>
    %c0_56 = arith.constant 0 : index
    %c0_57 = arith.constant 0 : index
    %c0_58 = arith.constant 0 : index
    %101 = vector.load %arg20[%c0_56, %c0_57, %c0_58] : memref<1x1x384xf32, #tpu.memory_space<vmem>>, vector<1x1x384xf32>
    %102 = vector.shape_cast %101 : vector<1x1x384xf32> to vector<1x384xf32>
    %103 = vector.broadcast %102 : vector<1x384xf32> to vector<8x384xf32>
    %104 = arith.addf %100, %103 : vector<8x384xf32>
    %c0_59 = arith.constant 0 : index
    %c0_60 = arith.constant 0 : index
    %c0_61 = arith.constant 0 : index
    %105 = vector.load %arg25[%c0_59, %c0_60, %c0_61] : memref<1x1x384xf32, #tpu.memory_space<vmem>>, vector<1x1x384xf32>
    %106 = vector.shape_cast %105 : vector<1x1x384xf32> to vector<1x384xf32>
    %c0_62 = arith.constant 0 : index
    %c0_63 = arith.constant 0 : index
    %c0_64 = arith.constant 0 : index
    %107 = vector.load %arg22[%c0_62, %c0_63, %c0_64] : memref<1x1x384xf32, #tpu.memory_space<vmem>>, vector<1x1x384xf32>
    %108 = vector.shape_cast %107 : vector<1x1x384xf32> to vector<1x384xf32>
    %cst_65 = arith.constant dense<0.000000e+00> : vector<8xf32>
    %109 = vector.multi_reduction <add>, %104, %cst_65 [1] : vector<8x384xf32> to vector<8xf32>
    %110 = vector.shape_cast %109 : vector<8xf32> to vector<8x1xf32>
    %cst_66 = arith.constant 3.125000e-03 : f32
    %111 = vector.broadcast %cst_66 : f32 to vector<8x1xf32>
    %112 = arith.mulf %110, %111 : vector<8x1xf32>
    %113 = arith.mulf %104, %104 : vector<8x384xf32>
    %cst_67 = arith.constant dense<0.000000e+00> : vector<8xf32>
    %114 = vector.multi_reduction <add>, %113, %cst_67 [1] : vector<8x384xf32> to vector<8xf32>
    %115 = vector.shape_cast %114 : vector<8xf32> to vector<8x1xf32>
    %cst_68 = arith.constant 3.125000e-03 : f32
    %116 = vector.broadcast %cst_68 : f32 to vector<8x1xf32>
    %117 = arith.mulf %115, %116 : vector<8x1xf32>
    %118 = arith.mulf %112, %112 : vector<8x1xf32>
    %119 = arith.subf %117, %118 : vector<8x1xf32>
    %cst_69 = arith.constant 0.000000e+00 : f32
    %120 = vector.broadcast %cst_69 : f32 to vector<8x1xf32>
    %121 = arith.maximumf %119, %120 : vector<8x1xf32>
    %122 = vector.broadcast %112 : vector<8x1xf32> to vector<8x384xf32>
    %123 = arith.subf %104, %122 : vector<8x384xf32>
    %cst_70 = arith.constant 9.99999974E-6 : f32
    %124 = vector.broadcast %cst_70 : f32 to vector<8x1xf32>
    %125 = arith.addf %121, %124 : vector<8x1xf32>
    %126 = math.rsqrt %125 : vector<8x1xf32>
    %127 = vector.broadcast %126 : vector<8x1xf32> to vector<8x384xf32>
    %128 = arith.mulf %123, %127 : vector<8x384xf32>
    %129 = vector.broadcast %106 : vector<1x384xf32> to vector<8x384xf32>
    %130 = arith.mulf %128, %129 : vector<8x384xf32>
    %131 = vector.broadcast %108 : vector<1x384xf32> to vector<8x384xf32>
    %132 = arith.addf %130, %131 : vector<8x384xf32>
    %cst_71 = arith.constant 5.000000e-01 : f32
    %133 = vector.broadcast %cst_71 : f32 to vector<8x384xf32>
    %134 = arith.mulf %133, %132 : vector<8x384xf32>
    %cst_72 = arith.constant 0.707106769 : f32
    %135 = vector.broadcast %cst_72 : f32 to vector<8x384xf32>
    %136 = arith.mulf %132, %135 : vector<8x384xf32>
    %137 = math.erf %136 : vector<8x384xf32>
    %cst_73 = arith.constant 1.000000e+00 : f32
    %138 = vector.broadcast %cst_73 : f32 to vector<8x384xf32>
    %139 = arith.addf %138, %137 : vector<8x384xf32>
    %140 = arith.mulf %134, %139 : vector<8x384xf32>
    %c0_74 = arith.constant 0 : index
    %c0_75 = arith.constant 0 : index
    %c0_76 = arith.constant 0 : index
    %141 = vector.load %arg28[%c0_74, %c0_75, %c0_76] : memref<1x384x256xf32, #tpu.memory_space<vmem>>, vector<1x384x256xf32>
    %142 = vector.shape_cast %141 : vector<1x384x256xf32> to vector<384x256xf32>
    %cst_77 = arith.constant dense<0.000000e+00> : vector<8x256xf32>
    %143 = tpu.matmul %140, %142, %cst_77 {dimension_numbers = #tpu.dot_dimension_numbers<[1], [0], [0], [1], [0, 0, 1, 1], [], []>} : vector<8x384xf32>, vector<384x256xf32>, vector<8x256xf32> -> vector<8x256xf32>
    %c0_78 = arith.constant 0 : index
    %c0_79 = arith.constant 0 : index
    %c0_80 = arith.constant 0 : index
    %144 = vector.load %arg21[%c0_78, %c0_79, %c0_80] : memref<1x1x256xf32, #tpu.memory_space<vmem>>, vector<1x1x256xf32>
    %145 = vector.shape_cast %144 : vector<1x1x256xf32> to vector<1x256xf32>
    %146 = vector.broadcast %145 : vector<1x256xf32> to vector<8x256xf32>
    %147 = arith.addf %143, %146 : vector<8x256xf32>
    %c0_81 = arith.constant 0 : index
    %c0_82 = arith.constant 0 : index
    %c0_83 = arith.constant 0 : index
    %148 = vector.load %arg29[%c0_81, %c0_82, %c0_83] : memref<1x128x256xf32, #tpu.memory_space<vmem>>, vector<1x128x256xf32>
    %149 = vector.shape_cast %148 : vector<1x128x256xf32> to vector<128x256xf32>
    %cst_84 = arith.constant dense<0.000000e+00> : vector<8x256xf32>
    %150 = tpu.matmul %0, %149, %cst_84 {dimension_numbers = #tpu.dot_dimension_numbers<[1], [0], [0], [1], [0, 0, 1, 1], [], []>} : vector<8x128xf32>, vector<128x256xf32>, vector<8x256xf32> -> vector<8x256xf32>
    %c0_85 = arith.constant 0 : index
    %c0_86 = arith.constant 0 : index
    %c0_87 = arith.constant 0 : index
    %151 = vector.load %arg24[%c0_85, %c0_86, %c0_87] : memref<1x1x256xf32, #tpu.memory_space<vmem>>, vector<1x1x256xf32>
    %152 = vector.shape_cast %151 : vector<1x1x256xf32> to vector<1x256xf32>
    %153 = vector.broadcast %152 : vector<1x256xf32> to vector<8x256xf32>
    %154 = arith.addf %150, %153 : vector<8x256xf32>
    %155 = arith.addf %97, %147 : vector<8x256xf32>
    %156 = arith.addf %155, %154 : vector<8x256xf32>
    %c0_88 = arith.constant 0 : index
    %c0_89 = arith.constant 0 : index
    %c0_90 = arith.constant 0 : index
    %157 = vector.load %arg26[%c0_88, %c0_89, %c0_90] : memref<1x1x256xf32, #tpu.memory_space<vmem>>, vector<1x1x256xf32>
    %158 = vector.shape_cast %157 : vector<1x1x256xf32> to vector<1x256xf32>
    %c0_91 = arith.constant 0 : index
    %c0_92 = arith.constant 0 : index
    %c0_93 = arith.constant 0 : index
    %159 = vector.load %arg23[%c0_91, %c0_92, %c0_93] : memref<1x1x256xf32, #tpu.memory_space<vmem>>, vector<1x1x256xf32>
    %160 = vector.shape_cast %159 : vector<1x1x256xf32> to vector<1x256xf32>
    %cst_94 = arith.constant dense<0.000000e+00> : vector<8xf32>
    %161 = vector.multi_reduction <add>, %156, %cst_94 [1] : vector<8x256xf32> to vector<8xf32>
    %162 = vector.shape_cast %161 : vector<8xf32> to vector<8x1xf32>
    %cst_95 = arith.constant 0.00520833349 : f32
    %163 = vector.broadcast %cst_95 : f32 to vector<8x1xf32>
    %164 = arith.mulf %162, %163 : vector<8x1xf32>
    %165 = arith.mulf %156, %156 : vector<8x256xf32>
    %cst_96 = arith.constant dense<0.000000e+00> : vector<8xf32>
    %166 = vector.multi_reduction <add>, %165, %cst_96 [1] : vector<8x256xf32> to vector<8xf32>
    %167 = vector.shape_cast %166 : vector<8xf32> to vector<8x1xf32>
    %cst_97 = arith.constant 0.00520833349 : f32
    %168 = vector.broadcast %cst_97 : f32 to vector<8x1xf32>
    %169 = arith.mulf %167, %168 : vector<8x1xf32>
    %170 = arith.mulf %164, %164 : vector<8x1xf32>
    %171 = arith.subf %169, %170 : vector<8x1xf32>
    %cst_98 = arith.constant 0.000000e+00 : f32
    %172 = vector.broadcast %cst_98 : f32 to vector<8x1xf32>
    %173 = arith.maximumf %171, %172 : vector<8x1xf32>
    %174 = vector.broadcast %164 : vector<8x1xf32> to vector<8x256xf32>
    %175 = arith.subf %156, %174 : vector<8x256xf32>
    %cst_99 = arith.constant 9.99999974E-6 : f32
    %176 = vector.broadcast %cst_99 : f32 to vector<8x1xf32>
    %177 = arith.addf %173, %176 : vector<8x1xf32>
    %178 = math.rsqrt %177 : vector<8x1xf32>
    %179 = vector.broadcast %178 : vector<8x1xf32> to vector<8x256xf32>
    %180 = arith.mulf %175, %179 : vector<8x256xf32>
    %181 = vector.broadcast %158 : vector<1x256xf32> to vector<8x256xf32>
    %182 = arith.mulf %180, %181 : vector<8x256xf32>
    %183 = vector.broadcast %160 : vector<1x256xf32> to vector<8x256xf32>
    %184 = arith.addf %182, %183 : vector<8x256xf32>
    %cst_100 = arith.constant 5.000000e-01 : f32
    %185 = vector.broadcast %cst_100 : f32 to vector<8x256xf32>
    %186 = arith.mulf %185, %184 : vector<8x256xf32>
    %cst_101 = arith.constant 0.707106769 : f32
    %187 = vector.broadcast %cst_101 : f32 to vector<8x256xf32>
    %188 = arith.mulf %184, %187 : vector<8x256xf32>
    %189 = math.erf %188 : vector<8x256xf32>
    %cst_102 = arith.constant 1.000000e+00 : f32
    %190 = vector.broadcast %cst_102 : f32 to vector<8x256xf32>
    %191 = arith.addf %190, %189 : vector<8x256xf32>
    %192 = arith.mulf %186, %191 : vector<8x256xf32>
    %c0_103 = arith.constant 0 : index
    %c0_104 = arith.constant 0 : index
    %c0_105 = arith.constant 0 : index
    %193 = vector.load %arg35[%c0_103, %c0_104, %c0_105] : memref<1x256x128xf32, #tpu.memory_space<vmem>>, vector<1x256x128xf32>
    %194 = vector.shape_cast %193 : vector<1x256x128xf32> to vector<256x128xf32>
    %cst_106 = arith.constant dense<0.000000e+00> : vector<8x128xf32>
    %195 = tpu.matmul %192, %194, %cst_106 {dimension_numbers = #tpu.dot_dimension_numbers<[1], [0], [0], [1], [0, 0, 1, 1], [], []>} : vector<8x256xf32>, vector<256x128xf32>, vector<8x128xf32> -> vector<8x128xf32>
    %c0_107 = arith.constant 0 : index
    %c0_108 = arith.constant 0 : index
    %c0_109 = arith.constant 0 : index
    %196 = vector.load %arg30[%c0_107, %c0_108, %c0_109] : memref<1x1x128xf32, #tpu.memory_space<vmem>>, vector<1x1x128xf32>
    %197 = vector.shape_cast %196 : vector<1x1x128xf32> to vector<1x128xf32>
    %198 = vector.broadcast %197 : vector<1x128xf32> to vector<8x128xf32>
    %199 = arith.addf %195, %198 : vector<8x128xf32>
    %c0_110 = arith.constant 0 : index
    %c0_111 = arith.constant 0 : index
    %c0_112 = arith.constant 0 : index
    %200 = vector.load %arg34[%c0_110, %c0_111, %c0_112] : memref<1x1x128xf32, #tpu.memory_space<vmem>>, vector<1x1x128xf32>
    %201 = vector.shape_cast %200 : vector<1x1x128xf32> to vector<1x128xf32>
    %c0_113 = arith.constant 0 : index
    %c0_114 = arith.constant 0 : index
    %c0_115 = arith.constant 0 : index
    %202 = vector.load %arg33[%c0_113, %c0_114, %c0_115] : memref<1x1x128xf32, #tpu.memory_space<vmem>>, vector<1x1x128xf32>
    %203 = vector.shape_cast %202 : vector<1x1x128xf32> to vector<1x128xf32>
    %cst_116 = arith.constant dense<0.000000e+00> : vector<8xf32>
    %204 = vector.multi_reduction <add>, %199, %cst_116 [1] : vector<8x128xf32> to vector<8xf32>
    %205 = vector.shape_cast %204 : vector<8xf32> to vector<8x1xf32>
    %cst_117 = arith.constant 0.010416667 : f32
    %206 = vector.broadcast %cst_117 : f32 to vector<8x1xf32>
    %207 = arith.mulf %205, %206 : vector<8x1xf32>
    %208 = arith.mulf %199, %199 : vector<8x128xf32>
    %cst_118 = arith.constant dense<0.000000e+00> : vector<8xf32>
    %209 = vector.multi_reduction <add>, %208, %cst_118 [1] : vector<8x128xf32> to vector<8xf32>
    %210 = vector.shape_cast %209 : vector<8xf32> to vector<8x1xf32>
    %cst_119 = arith.constant 0.010416667 : f32
    %211 = vector.broadcast %cst_119 : f32 to vector<8x1xf32>
    %212 = arith.mulf %210, %211 : vector<8x1xf32>
    %213 = arith.mulf %207, %207 : vector<8x1xf32>
    %214 = arith.subf %212, %213 : vector<8x1xf32>
    %cst_120 = arith.constant 0.000000e+00 : f32
    %215 = vector.broadcast %cst_120 : f32 to vector<8x1xf32>
    %216 = arith.maximumf %214, %215 : vector<8x1xf32>
    %217 = vector.broadcast %207 : vector<8x1xf32> to vector<8x128xf32>
    %218 = arith.subf %199, %217 : vector<8x128xf32>
    %cst_121 = arith.constant 9.99999974E-6 : f32
    %219 = vector.broadcast %cst_121 : f32 to vector<8x1xf32>
    %220 = arith.addf %216, %219 : vector<8x1xf32>
    %221 = math.rsqrt %220 : vector<8x1xf32>
    %222 = vector.broadcast %221 : vector<8x1xf32> to vector<8x128xf32>
    %223 = arith.mulf %218, %222 : vector<8x128xf32>
    %224 = vector.broadcast %201 : vector<1x128xf32> to vector<8x128xf32>
    %225 = arith.mulf %223, %224 : vector<8x128xf32>
    %226 = vector.broadcast %203 : vector<1x128xf32> to vector<8x128xf32>
    %227 = arith.addf %225, %226 : vector<8x128xf32>
    %cst_122 = arith.constant 5.000000e-01 : f32
    %228 = vector.broadcast %cst_122 : f32 to vector<8x128xf32>
    %229 = arith.mulf %228, %227 : vector<8x128xf32>
    %cst_123 = arith.constant 0.707106769 : f32
    %230 = vector.broadcast %cst_123 : f32 to vector<8x128xf32>
    %231 = arith.mulf %227, %230 : vector<8x128xf32>
    %232 = math.erf %231 : vector<8x128xf32>
    %cst_124 = arith.constant 1.000000e+00 : f32
    %233 = vector.broadcast %cst_124 : f32 to vector<8x128xf32>
    %234 = arith.addf %233, %232 : vector<8x128xf32>
    %235 = arith.mulf %229, %234 : vector<8x128xf32>
    %c0_125 = arith.constant 0 : index
    %c0_126 = arith.constant 0 : index
    %c0_127 = arith.constant 0 : index
    %236 = vector.load %arg36[%c0_125, %c0_126, %c0_127] : memref<1x128x128xf32, #tpu.memory_space<vmem>>, vector<1x128x128xf32>
    %237 = vector.shape_cast %236 : vector<1x128x128xf32> to vector<128x128xf32>
    %cst_128 = arith.constant dense<0.000000e+00> : vector<8x128xf32>
    %238 = tpu.matmul %235, %237, %cst_128 {dimension_numbers = #tpu.dot_dimension_numbers<[1], [0], [0], [1], [0, 0, 1, 1], [], []>} : vector<8x128xf32>, vector<128x128xf32>, vector<8x128xf32> -> vector<8x128xf32>
    %c0_129 = arith.constant 0 : index
    %c0_130 = arith.constant 0 : index
    %c0_131 = arith.constant 0 : index
    %239 = vector.load %arg31[%c0_129, %c0_130, %c0_131] : memref<1x1x128xf32, #tpu.memory_space<vmem>>, vector<1x1x128xf32>
    %240 = vector.shape_cast %239 : vector<1x1x128xf32> to vector<1x128xf32>
    %241 = vector.broadcast %240 : vector<1x128xf32> to vector<8x128xf32>
    %242 = arith.addf %238, %241 : vector<8x128xf32>
    %c0_132 = arith.constant 0 : index
    %c0_133 = arith.constant 0 : index
    %c0_134 = arith.constant 0 : index
    %243 = vector.load %arg37[%c0_132, %c0_133, %c0_134] : memref<1x256x128xf32, #tpu.memory_space<vmem>>, vector<1x256x128xf32>
    %244 = vector.shape_cast %243 : vector<1x256x128xf32> to vector<256x128xf32>
    %cst_135 = arith.constant dense<0.000000e+00> : vector<8x128xf32>
    %245 = tpu.matmul %192, %244, %cst_135 {dimension_numbers = #tpu.dot_dimension_numbers<[1], [0], [0], [1], [0, 0, 1, 1], [], []>} : vector<8x256xf32>, vector<256x128xf32>, vector<8x128xf32> -> vector<8x128xf32>
    %246 = arith.addf %242, %245 : vector<8x128xf32>
    %c0_136 = arith.constant 0 : index
    %c0_137 = arith.constant 0 : index
    %c0_138 = arith.constant 0 : index
    %247 = vector.load %arg32[%c0_136, %c0_137, %c0_138] : memref<1x1x128xf32, #tpu.memory_space<vmem>>, vector<1x1x128xf32>
    %248 = vector.shape_cast %247 : vector<1x1x128xf32> to vector<1x128xf32>
    %249 = vector.broadcast %248 : vector<1x128xf32> to vector<8x128xf32>
    %250 = arith.addf %246, %249 : vector<8x128xf32>
    %c0_139 = arith.constant 0 : index
    %c0_140 = arith.constant 0 : index
    %c0_141 = arith.constant 0 : index
    %251 = vector.load %arg7[%c0_139, %c0_140, %c0_141] : memref<1x256x128xf32, #tpu.memory_space<vmem>>, vector<1x256x128xf32>
    %252 = vector.shape_cast %251 : vector<1x256x128xf32> to vector<256x128xf32>
    %cst_142 = arith.constant dense<0.000000e+00> : vector<8x128xf32>
    %253 = tpu.matmul %192, %252, %cst_142 {dimension_numbers = #tpu.dot_dimension_numbers<[1], [0], [0], [1], [0, 0, 1, 1], [], []>} : vector<8x256xf32>, vector<256x128xf32>, vector<8x128xf32> -> vector<8x128xf32>
    %c0_143 = arith.constant 0 : index
    %c0_144 = arith.constant 0 : index
    %c0_145 = arith.constant 0 : index
    %254 = vector.load %arg2[%c0_143, %c0_144, %c0_145] : memref<1x1x128xf32, #tpu.memory_space<vmem>>, vector<1x1x128xf32>
    %255 = vector.shape_cast %254 : vector<1x1x128xf32> to vector<1x128xf32>
    %256 = vector.broadcast %255 : vector<1x128xf32> to vector<8x128xf32>
    %257 = arith.addf %253, %256 : vector<8x128xf32>
    %c0_146 = arith.constant 0 : index
    %c0_147 = arith.constant 0 : index
    %c0_148 = arith.constant 0 : index
    %258 = vector.load %arg6[%c0_146, %c0_147, %c0_148] : memref<1x1x128xf32, #tpu.memory_space<vmem>>, vector<1x1x128xf32>
    %259 = vector.shape_cast %258 : vector<1x1x128xf32> to vector<1x128xf32>
    %c0_149 = arith.constant 0 : index
    %c0_150 = arith.constant 0 : index
    %c0_151 = arith.constant 0 : index
    %260 = vector.load %arg5[%c0_149, %c0_150, %c0_151] : memref<1x1x128xf32, #tpu.memory_space<vmem>>, vector<1x1x128xf32>
    %261 = vector.shape_cast %260 : vector<1x1x128xf32> to vector<1x128xf32>
    %cst_152 = arith.constant dense<0.000000e+00> : vector<8xf32>
    %262 = vector.multi_reduction <add>, %257, %cst_152 [1] : vector<8x128xf32> to vector<8xf32>
    %263 = vector.shape_cast %262 : vector<8xf32> to vector<8x1xf32>
    %cst_153 = arith.constant 0.010416667 : f32
    %264 = vector.broadcast %cst_153 : f32 to vector<8x1xf32>
    %265 = arith.mulf %263, %264 : vector<8x1xf32>
    %266 = arith.mulf %257, %257 : vector<8x128xf32>
    %cst_154 = arith.constant dense<0.000000e+00> : vector<8xf32>
    %267 = vector.multi_reduction <add>, %266, %cst_154 [1] : vector<8x128xf32> to vector<8xf32>
    %268 = vector.shape_cast %267 : vector<8xf32> to vector<8x1xf32>
    %cst_155 = arith.constant 0.010416667 : f32
    %269 = vector.broadcast %cst_155 : f32 to vector<8x1xf32>
    %270 = arith.mulf %268, %269 : vector<8x1xf32>
    %271 = arith.mulf %265, %265 : vector<8x1xf32>
    %272 = arith.subf %270, %271 : vector<8x1xf32>
    %cst_156 = arith.constant 0.000000e+00 : f32
    %273 = vector.broadcast %cst_156 : f32 to vector<8x1xf32>
    %274 = arith.maximumf %272, %273 : vector<8x1xf32>
    %275 = vector.broadcast %265 : vector<8x1xf32> to vector<8x128xf32>
    %276 = arith.subf %257, %275 : vector<8x128xf32>
    %cst_157 = arith.constant 9.99999974E-6 : f32
    %277 = vector.broadcast %cst_157 : f32 to vector<8x1xf32>
    %278 = arith.addf %274, %277 : vector<8x1xf32>
    %279 = math.rsqrt %278 : vector<8x1xf32>
    %280 = vector.broadcast %279 : vector<8x1xf32> to vector<8x128xf32>
    %281 = arith.mulf %276, %280 : vector<8x128xf32>
    %282 = vector.broadcast %259 : vector<1x128xf32> to vector<8x128xf32>
    %283 = arith.mulf %281, %282 : vector<8x128xf32>
    %284 = vector.broadcast %261 : vector<1x128xf32> to vector<8x128xf32>
    %285 = arith.addf %283, %284 : vector<8x128xf32>
    %cst_158 = arith.constant 5.000000e-01 : f32
    %286 = vector.broadcast %cst_158 : f32 to vector<8x128xf32>
    %287 = arith.mulf %286, %285 : vector<8x128xf32>
    %cst_159 = arith.constant 0.707106769 : f32
    %288 = vector.broadcast %cst_159 : f32 to vector<8x128xf32>
    %289 = arith.mulf %285, %288 : vector<8x128xf32>
    %290 = math.erf %289 : vector<8x128xf32>
    %cst_160 = arith.constant 1.000000e+00 : f32
    %291 = vector.broadcast %cst_160 : f32 to vector<8x128xf32>
    %292 = arith.addf %291, %290 : vector<8x128xf32>
    %293 = arith.mulf %287, %292 : vector<8x128xf32>
    %c0_161 = arith.constant 0 : index
    %c0_162 = arith.constant 0 : index
    %c0_163 = arith.constant 0 : index
    %294 = vector.load %arg8[%c0_161, %c0_162, %c0_163] : memref<1x128x128xf32, #tpu.memory_space<vmem>>, vector<1x128x128xf32>
    %295 = vector.shape_cast %294 : vector<1x128x128xf32> to vector<128x128xf32>
    %cst_164 = arith.constant dense<0.000000e+00> : vector<8x128xf32>
    %296 = tpu.matmul %293, %295, %cst_164 {dimension_numbers = #tpu.dot_dimension_numbers<[1], [0], [0], [1], [0, 0, 1, 1], [], []>} : vector<8x128xf32>, vector<128x128xf32>, vector<8x128xf32> -> vector<8x128xf32>
    %c0_165 = arith.constant 0 : index
    %c0_166 = arith.constant 0 : index
    %c0_167 = arith.constant 0 : index
    %297 = vector.load %arg3[%c0_165, %c0_166, %c0_167] : memref<1x1x128xf32, #tpu.memory_space<vmem>>, vector<1x1x128xf32>
    %298 = vector.shape_cast %297 : vector<1x1x128xf32> to vector<1x128xf32>
    %299 = vector.broadcast %298 : vector<1x128xf32> to vector<8x128xf32>
    %300 = arith.addf %296, %299 : vector<8x128xf32>
    %c0_168 = arith.constant 0 : index
    %c0_169 = arith.constant 0 : index
    %c0_170 = arith.constant 0 : index
    %301 = vector.load %arg9[%c0_168, %c0_169, %c0_170] : memref<1x256x128xf32, #tpu.memory_space<vmem>>, vector<1x256x128xf32>
    %302 = vector.shape_cast %301 : vector<1x256x128xf32> to vector<256x128xf32>
    %cst_171 = arith.constant dense<0.000000e+00> : vector<8x128xf32>
    %303 = tpu.matmul %192, %302, %cst_171 {dimension_numbers = #tpu.dot_dimension_numbers<[1], [0], [0], [1], [0, 0, 1, 1], [], []>} : vector<8x256xf32>, vector<256x128xf32>, vector<8x128xf32> -> vector<8x128xf32>
    %304 = arith.addf %300, %303 : vector<8x128xf32>
    %c0_172 = arith.constant 0 : index
    %c0_173 = arith.constant 0 : index
    %c0_174 = arith.constant 0 : index
    %305 = vector.load %arg4[%c0_172, %c0_173, %c0_174] : memref<1x1x128xf32, #tpu.memory_space<vmem>>, vector<1x1x128xf32>
    %306 = vector.shape_cast %305 : vector<1x1x128xf32> to vector<1x128xf32>
    %307 = vector.broadcast %306 : vector<1x128xf32> to vector<8x128xf32>
    %308 = arith.addf %304, %307 : vector<8x128xf32>
    %309 = arith.addf %250, %308 : vector<8x128xf32>
    %c0_175 = arith.constant 0 : index
    %c0_176 = arith.constant 0 : index
    %c0_177 = arith.constant 0 : index
    %310 = vector.load %arg38[%c0_175, %c0_176, %c0_177] : memref<1x8x128xf32, #tpu.memory_space<vmem>>, vector<1x8x128xf32>
    %311 = vector.shape_cast %310 : vector<1x8x128xf32> to vector<8x128xf32>
    %312 = vector.shape_cast %309 : vector<8x128xf32> to vector<1x8x128xf32>
    tpu.vector_store %arg38[%c0_175, %c0_176, %c0_177], %312 {strides = array<i32>} : memref<1x8x128xf32, #tpu.memory_space<vmem>>, vector<1x8x128xf32>,
    return
  }
  func.func @transform_0(%arg0: i32) -> (i32, i32) {
    %c0_i32 = arith.constant 0 : i32
    %c0_i32_0 = arith.constant 0 : i32
    %c0_i32_1 = arith.constant 0 : i32
    return %c0_i32, %c0_i32_0 : i32, i32
  }
  func.func @transform_1(%arg0: i32) -> (i32, i32, i32) {
    %c0_i32 = arith.constant 0 : i32
    %c0_i32_0 = arith.constant 0 : i32
    %c0_i32_1 = arith.constant 0 : i32
    return %arg0, %c0_i32, %c0_i32_0 : i32, i32, i32
  }
  func.func @transform_2(%arg0: i32) -> (i32, i32, i32) {
    %c0_i32 = arith.constant 0 : i32
    %c0_i32_0 = arith.constant 0 : i32
    %c0_i32_1 = arith.constant 0 : i32
    return %arg0, %c0_i32, %c0_i32_0 : i32, i32, i32
  }
  func.func @transform_3(%arg0: i32) -> (i32, i32, i32) {
    %c0_i32 = arith.constant 0 : i32
    %c0_i32_0 = arith.constant 0 : i32
    %c0_i32_1 = arith.constant 0 : i32
    return %arg0, %c0_i32, %c0_i32_0 : i32, i32, i32
  }
  func.func @transform_4(%arg0: i32) -> (i32, i32, i32) {
    %c0_i32 = arith.constant 0 : i32
    %c0_i32_0 = arith.constant 0 : i32
    %c0_i32_1 = arith.constant 0 : i32
    return %arg0, %c0_i32, %c0_i32_0 : i32, i32, i32
  }
  func.func @transform_5(%arg0: i32) -> (i32, i32, i32) {
    %c0_i32 = arith.constant 0 : i32
    %c0_i32_0 = arith.constant 0 : i32
    %c0_i32_1 = arith.constant 0 : i32
    return %arg0, %c0_i32, %c0_i32_0 : i32, i32, i32
  }
  func.func @transform_6(%arg0: i32) -> (i32, i32, i32) {
    %c0_i32 = arith.constant 0 : i32
    %c0_i32_0 = arith.constant 0 : i32
    %c0_i32_1 = arith.constant 0 : i32
    return %arg0, %c0_i32, %c0_i32_0 : i32, i32, i32
  }
  func.func @transform_7(%arg0: i32) -> (i32, i32, i32) {
    %c0_i32 = arith.constant 0 : i32
    %c0_i32_0 = arith.constant 0 : i32
    %c0_i32_1 = arith.constant 0 : i32
    return %arg0, %c0_i32, %c0_i32_0 : i32, i32, i32
  }
  func.func @transform_8(%arg0: i32) -> (i32, i32, i32) {
    %c0_i32 = arith.constant 0 : i32
    %c0_i32_0 = arith.constant 0 : i32
    %c0_i32_1 = arith.constant 0 : i32
    return %arg0, %c0_i32, %c0_i32_0 : i32, i32, i32
  }
  func.func @transform_9(%arg0: i32) -> (i32, i32, i32) {
    %c0_i32 = arith.constant 0 : i32
    %c0_i32_0 = arith.constant 0 : i32
    %c0_i32_1 = arith.constant 0 : i32
    return %arg0, %c0_i32, %c0_i32_0 : i32, i32, i32
  }
  func.func @transform_10(%arg0: i32) -> (i32, i32, i32) {
    %c0_i32 = arith.constant 0 : i32
    %c0_i32_0 = arith.constant 0 : i32
    %c0_i32_1 = arith.constant 0 : i32
    return %arg0, %c0_i32, %c0_i32_0 : i32, i32, i32
  }
  func.func @transform_11(%arg0: i32) -> (i32, i32, i32) {
    %c0_i32 = arith.constant 0 : i32
    %c0_i32_0 = arith.constant 0 : i32
    %c0_i32_1 = arith.constant 0 : i32
    return %arg0, %c0_i32, %c0_i32_0 : i32, i32, i32
  }
  func.func @transform_12(%arg0: i32) -> (i32, i32, i32) {
    %c0_i32 = arith.constant 0 : i32
    %c0_i32_0 = arith.constant 0 : i32
    %c0_i32_1 = arith.constant 0 : i32
    return %arg0, %c0_i32, %c0_i32_0 : i32, i32, i32
  }
  func.func @transform_13(%arg0: i32) -> (i32, i32, i32) {
    %c0_i32 = arith.constant 0 : i32
    %c0_i32_0 = arith.constant 0 : i32
    %c0_i32_1 = arith.constant 0 : i32
    return %arg0, %c0_i32, %c0_i32_0 : i32, i32, i32
  }
  func.func @transform_14(%arg0: i32) -> (i32, i32, i32) {
    %c0_i32 = arith.constant 0 : i32
    %c0_i32_0 = arith.constant 0 : i32
    %c0_i32_1 = arith.constant 0 : i32
    return %arg0, %c0_i32, %c0_i32_0 : i32, i32, i32
  }
  func.func @transform_15(%arg0: i32) -> (i32, i32, i32) {
    %c0_i32 = arith.constant 0 : i32
    %c0_i32_0 = arith.constant 0 : i32
    %c0_i32_1 = arith.constant 0 : i32
    return %arg0, %c0_i32, %c0_i32_0 : i32, i32, i32
  }
  func.func @transform_16(%arg0: i32) -> (i32, i32, i32) {
    %c0_i32 = arith.constant 0 : i32
    %c0_i32_0 = arith.constant 0 : i32
    %c0_i32_1 = arith.constant 0 : i32
    return %arg0, %c0_i32, %c0_i32_0 : i32, i32, i32
  }
  func.func @transform_17(%arg0: i32) -> (i32, i32, i32) {
    %c0_i32 = arith.constant 0 : i32
    %c0_i32_0 = arith.constant 0 : i32
    %c0_i32_1 = arith.constant 0 : i32
    return %arg0, %c0_i32, %c0_i32_0 : i32, i32, i32
  }
  func.func @transform_18(%arg0: i32) -> (i32, i32, i32) {
    %c0_i32 = arith.constant 0 : i32
    %c0_i32_0 = arith.constant 0 : i32
    %c0_i32_1 = arith.constant 0 : i32
    return %arg0, %c0_i32, %c0_i32_0 : i32, i32, i32
  }
  func.func @transform_19(%arg0: i32) -> (i32, i32, i32) {
    %c0_i32 = arith.constant 0 : i32
    %c0_i32_0 = arith.constant 0 : i32
    %c0_i32_1 = arith.constant 0 : i32
    return %arg0, %c0_i32, %c0_i32_0 : i32, i32, i32
  }
  func.func @transform_20(%arg0: i32) -> (i32, i32, i32) {
    %c0_i32 = arith.constant 0 : i32
    %c0_i32_0 = arith.constant 0 : i32
    %c0_i32_1 = arith.constant 0 : i32
    return %arg0, %c0_i32, %c0_i32_0 : i32, i32, i32
  }
  func.func @transform_21(%arg0: i32) -> (i32, i32, i32) {
    %c0_i32 = arith.constant 0 : i32
    %c0_i32_0 = arith.constant 0 : i32
    %c0_i32_1 = arith.constant 0 : i32
    return %arg0, %c0_i32, %c0_i32_0 : i32, i32, i32
  }
  func.func @transform_22(%arg0: i32) -> (i32, i32, i32) {
    %c0_i32 = arith.constant 0 : i32
    %c0_i32_0 = arith.constant 0 : i32
    %c0_i32_1 = arith.constant 0 : i32
    return %arg0, %c0_i32, %c0_i32_0 : i32, i32, i32
  }
  func.func @transform_23(%arg0: i32) -> (i32, i32, i32) {
    %c0_i32 = arith.constant 0 : i32
    %c0_i32_0 = arith.constant 0 : i32
    %c0_i32_1 = arith.constant 0 : i32
    return %arg0, %c0_i32, %c0_i32_0 : i32, i32, i32
  }
  func.func @transform_24(%arg0: i32) -> (i32, i32, i32) {
    %c0_i32 = arith.constant 0 : i32
    %c0_i32_0 = arith.constant 0 : i32
    %c0_i32_1 = arith.constant 0 : i32
    return %arg0, %c0_i32, %c0_i32_0 : i32, i32, i32
  }
  func.func @transform_25(%arg0: i32) -> (i32, i32, i32) {
    %c0_i32 = arith.constant 0 : i32
    %c0_i32_0 = arith.constant 0 : i32
    %c0_i32_1 = arith.constant 0 : i32
    return %arg0, %c0_i32, %c0_i32_0 : i32, i32, i32
  }
  func.func @transform_26(%arg0: i32) -> (i32, i32, i32) {
    %c0_i32 = arith.constant 0 : i32
    %c0_i32_0 = arith.constant 0 : i32
    %c0_i32_1 = arith.constant 0 : i32
    return %arg0, %c0_i32, %c0_i32_0 : i32, i32, i32
  }
  func.func @transform_27(%arg0: i32) -> (i32, i32, i32) {
    %c0_i32 = arith.constant 0 : i32
    %c0_i32_0 = arith.constant 0 : i32
    %c0_i32_1 = arith.constant 0 : i32
    return %arg0, %c0_i32, %c0_i32_0 : i32, i32, i32
  }
  func.func @transform_28(%arg0: i32) -> (i32, i32, i32) {
    %c0_i32 = arith.constant 0 : i32
    %c0_i32_0 = arith.constant 0 : i32
    %c0_i32_1 = arith.constant 0 : i32
    return %arg0, %c0_i32, %c0_i32_0 : i32, i32, i32
  }
  func.func @transform_29(%arg0: i32) -> (i32, i32, i32) {
    %c0_i32 = arith.constant 0 : i32
    %c0_i32_0 = arith.constant 0 : i32
    %c0_i32_1 = arith.constant 0 : i32
    return %arg0, %c0_i32, %c0_i32_0 : i32, i32, i32
  }
  func.func @transform_30(%arg0: i32) -> (i32, i32, i32) {
    %c0_i32 = arith.constant 0 : i32
    %c0_i32_0 = arith.constant 0 : i32
    %c0_i32_1 = arith.constant 0 : i32
    return %arg0, %c0_i32, %c0_i32_0 : i32, i32, i32
  }
  func.func @transform_31(%arg0: i32) -> (i32, i32, i32) {
    %c0_i32 = arith.constant 0 : i32
    %c0_i32_0 = arith.constant 0 : i32
    %c0_i32_1 = arith.constant 0 : i32
    return %arg0, %c0_i32, %c0_i32_0 : i32, i32, i32
  }
  func.func @transform_32(%arg0: i32) -> (i32, i32, i32) {
    %c0_i32 = arith.constant 0 : i32
    %c0_i32_0 = arith.constant 0 : i32
    %c0_i32_1 = arith.constant 0 : i32
    return %arg0, %c0_i32, %c0_i32_0 : i32, i32, i32
  }
  func.func @transform_33(%arg0: i32) -> (i32, i32, i32) {
    %c0_i32 = arith.constant 0 : i32
    %c0_i32_0 = arith.constant 0 : i32
    %c0_i32_1 = arith.constant 0 : i32
    return %arg0, %c0_i32, %c0_i32_0 : i32, i32, i32
  }
  func.func @transform_34(%arg0: i32) -> (i32, i32, i32) {
    %c0_i32 = arith.constant 0 : i32
    %c0_i32_0 = arith.constant 0 : i32
    %c0_i32_1 = arith.constant 0 : i32
    return %arg0, %c0_i32, %c0_i32_0 : i32, i32, i32
  }
  func.func @transform_35(%arg0: i32) -> (i32, i32, i32) {
    %c0_i32 = arith.constant 0 : i32
    %c0_i32_0 = arith.constant 0 : i32
    %c0_i32_1 = arith.constant 0 : i32
    return %arg0, %c0_i32, %c0_i32_0 : i32, i32, i32
  }
  func.func @transform_36(%arg0: i32) -> (i32, i32, i32) {
    %c0_i32 = arith.constant 0 : i32
    %c0_i32_0 = arith.constant 0 : i32
    %c0_i32_1 = arith.constant 0 : i32
    return %arg0, %c0_i32, %c0_i32_0 : i32, i32, i32
  }
  func.func @transform_37(%arg0: i32) -> (i32, i32, i32) {
    %c0_i32 = arith.constant 0 : i32
    %c0_i32_0 = arith.constant 0 : i32
    %c0_i32_1 = arith.constant 0 : i32
    return %arg0, %c0_i32, %c0_i32_0 : i32, i32, i32
  }
}

</mosaic_0001>

<bundles_post_ra>
// kernel: remnet_forward.2
= control target key start
LH: loop header
LB: loop body
LE: loop exit
PB: predicated region body
PF: predicated region fallthrough
CT: control target
= control target key end

     0   :  { %s4774_s0 = inlined_call_operand.vmem [shape: f32[8,96], index: 0, kind: input, shape index: {}]   ;;  %s4775_s1 = inlined_call_operand.vmem [shape: f32[8,96], index: 1, kind: input, shape index: {}]   ;;  %s4776_s2 = inlined_call_operand.vmem [shape: f32[48,32], index: 2, kind: input, shape index: {}]   ;;  %s4777_s3 = inlined_call_operand.vmem [shape: s32[8,1], index: 3, kind: input, shape index: {}]   ;;  %s4778_s4 = inlined_call_operand.vmem [shape: f32[8,128], index: 4, kind: input, shape index: {}]   ;;  %s4779_s5 = inlined_call_operand.hbm [shape: f32[1,32], index: 5, kind: input, shape index: {}]   ;;  %s4780_s6 = inlined_call_operand.hbm [shape: f32[1,32], index: 6, kind: input, shape index: {}]   ;;  %s4781_s7 = inlined_call_operand.hbm [shape: f32[1,32], index: 7, kind: input, shape index: {}]   ;;  %s4782_s8 = inlined_call_operand.vmem [shape: f32[96,32], index: 8, kind: input, shape index: {}]   ;;  %s4783_s9 = inlined_call_operand.hbm [shape: f32[1,32], index: 9, kind: input, shape index: {}]   ;;  %s4784_s10 = inlined_call_operand.hbm [shape: f32[1,32], index: 10, kind: input, shape index: {}]   ;;  %s4785_s11 = inlined_call_operand.hbm [shape: f32[1,32], index: 11, kind: input, shape index: {}]   ;;  %s4786_s12 = inlined_call_operand.vmem [shape: f32[96,32], index: 12, kind: input, shape index: {}]   ;;  %s4787_s13 = inlined_call_operand.hbm [shape: f32[1,96], index: 13, kind: input, shape index: {}]   ;;  %s4788_s14 = inlined_call_operand.hbm [shape: f32[1,96], index: 14, kind: input, shape index: {}]   ;;  %s4789_s15 = inlined_call_operand.hbm [shape: f32[32,96], index: 15, kind: input, shape index: {}]   ;;  %s4790_s16 = inlined_call_operand.hbm [shape: f32[32,96], index: 16, kind: input, shape index: {}]   ;;  %s4791_s17 = inlined_call_operand.hbm [shape: f32[32,96], index: 17, kind: input, shape index: {}]   ;;  %s4792_s18 = inlined_call_operand.hbm [shape: f32[1,96], index: 18, kind: input, shape index: {}]   ;;  %s4793_s19 = inlined_call_operand.hbm [shape: f32[1,96], index: 19, kind: input, shape index: {}]   ;;  %s4794_s20 = inlined_call_operand.hbm [shape: f32[32,96], index: 20, kind: input, shape index: {}]   ;;  %s4795_s21 = inlined_call_operand.hbm [shape: f32[32,96], index: 21, kind: input, shape index: {}]   ;;  %s4796_s22 = inlined_call_operand.vmem [shape: f32[8,128], index: 22, kind: output, shape index: {}]  }
   0x1   :  { %4803 = sst [smem:[#allocation33_spill]] %s4774_s0 }
   0x2   :  { %4804 = sst [smem:[#allocation34_spill]] %s4775_s1 }
   0x3   :  { %4805 = sst [smem:[#allocation35_spill]] %s4776_s2 }
   0x4   :  { %4806 = sst [smem:[#allocation36_spill]] %s4777_s3 }
   0x5   :  { %4807 = sst [smem:[#allocation37_spill]] %s4778_s4 }
   0x6   :  { %4808 = sst [smem:[#allocation38_spill]] %s4779_s5 }
   0x7   :  { %4809 = sst [smem:[#allocation39_spill]] %s4780_s6 }
   0x8   :  { %27 = vsyncpa [#allocation3], 0 }
   0x9   :  { %28 = vsyncpa [#allocation5], 0 }
   0xa   :  { %29 = vsyncpa [#allocation8], 0 }
   0xb   :  { %30 = vsyncpa [#allocation11], 0 }
   0xc   :  { %31 = vsyncpa [#allocation14], 0 }
   0xd   :  { %32 = vsyncpa [#allocation17], 0 }
   0xe   :  { %33 = vsyncpa [#allocation20], 0 }
   0xf   :  { %34 = vsyncpa [#allocation23], 0  ;;  %s3894_s3 = smov [#allocation4]   ;;  %s3895_s29 = smov [#allocation7]  }
  0x10   :  { %s61_s28 = sshll.u32 %s3894_s3, 4  ;;  %s83_s30 = sshll.u32 %s3895_s29, 4  ;;  %s62_s28 = int_to_ptr.vmem [resolvable:$true] %s61_s28  ;;  %s84_s30 = int_to_ptr.vmem [resolvable:$true] %s83_s30 }
  0x11   :  { %s4810_s23 = sld [smem:[#allocation39_spill]] }
  0x17   :  { %s3548_s1 = scalar_lea.hbm %s4810_s23, 16 }
  0x18   :  { %p3549_p0 = scmp.ne.s32.totalorder %s4810_s23, %s3548_s1  ;;  %p3552_p1 = scmp.lt.u32.totalorder %s3548_s1, %s4810_s23 }
  0x1a   :  { %p3554_p2 = pnand %p3552_p1, %p3549_p0 }
  0x1c   :  { %3557 = shalt.err (!%p3554_p2)
}
  0x1d   :  { %s3558_s26 = scalar_lea.vmem %s62_s28, 16  ;;  %s3562_s2 = scalar_lea.vmem %s62_s28, 32 }
  0x1e   :  { %p3559_p3 = scmp.ne.s32.totalorder %s62_s28, %s3558_s26  ;;  %p3563_p4 = scmp.lt.s32.totalorder %s62_s28, %s62_s28 }
  0x1f   :  { %p3564_p5 = scmp.lt.s32.totalorder %s3562_s2, %s3558_s26 }
  0x21   :  { %p3565_p6 = por %p3564_p5, %p3563_p4 }
  0x23   :  { %p3566_p7 = pnand %p3565_p6, %p3559_p3 }
  0x25   :  { %3569 = shalt.err (!%p3566_p7)
}
  0x26   :  { %64 = dma.hbm_to_vmem [thread:$0]  %s4810_s23, 16, %s62_s28, [#allocation5]  }
  0x27   :  { %s3570_s0 = scalar_lea.hbm %s4783_s9, 16 }
  0x28   :  { %p3571_p8 = scmp.ne.s32.totalorder %s4783_s9, %s3570_s0  ;;  %p3574_p9 = scmp.lt.u32.totalorder %s3570_s0, %s4783_s9 }
  0x2a   :  { %p3576_p10 = pnand %p3574_p9, %p3571_p8 }
  0x2c   :  { %3579 = shalt.err (!%p3576_p10)
}
  0x2d   :  { %s3580_s25 = scalar_lea.vmem %s84_s30, 16  ;;  %s3584_s26 = scalar_lea.vmem %s84_s30, 32 }
  0x2e   :  { %p3581_p11 = scmp.ne.s32.totalorder %s84_s30, %s3580_s25  ;;  %p3585_p12 = scmp.lt.s32.totalorder %s84_s30, %s84_s30 }
  0x2f   :  { %p3586_p13 = scmp.lt.s32.totalorder %s3584_s26, %s3580_s25 }
  0x31   :  { %p3587_p0 = por %p3586_p13, %p3585_p12 }
  0x33   :  { %p3588_p1 = pnand %p3587_p0, %p3581_p11 }
  0x35   :  { %3591 = shalt.err (!%p3588_p1)
}
  0x36   :  { %86 = dma.hbm_to_vmem [thread:$0]  %s4783_s9, 16, %s84_s30, [#allocation8]  }
  0x37   :  { %s3896_s2 = smov [#allocation10]   ;;  %s3897_s3 = smov [#allocation13]  }
  0x38   :  { %s103_s27 = sshll.u32 %s3896_s2, 4  ;;  %s125_s29 = sshll.u32 %s3897_s3, 4  ;;  %s104_s27 = int_to_ptr.vmem [resolvable:$true] %s103_s27  ;;  %s126_s29 = int_to_ptr.vmem [resolvable:$true] %s125_s29 }
  0x39   :  { %s3592_s5 = scalar_lea.hbm %s4785_s11, 16 }
  0x3a   :  { %p3593_p2 = scmp.ne.s32.totalorder %s4785_s11, %s3592_s5  ;;  %p3596_p3 = scmp.lt.u32.totalorder %s3592_s5, %s4785_s11 }
  0x3c   :  { %p3598_p4 = pnand %p3596_p3, %p3593_p2 }
  0x3e   :  { %3601 = shalt.err (!%p3598_p4)
}
  0x3f   :  { %s3602_s9 = scalar_lea.vmem %s104_s27, 16  ;;  %s3606_s30 = scalar_lea.vmem %s104_s27, 32 }
  0x40   :  { %p3603_p5 = scmp.ne.s32.totalorder %s104_s27, %s3602_s9  ;;  %p3607_p6 = scmp.lt.s32.totalorder %s104_s27, %s104_s27 }
  0x41   :  { %p3608_p7 = scmp.lt.s32.totalorder %s3606_s30, %s3602_s9 }
  0x43   :  { %p3609_p8 = por %p3608_p7, %p3607_p6 }
  0x45   :  { %p3610_p9 = pnand %p3609_p8, %p3603_p5 }
  0x47   :  { %3613 = shalt.err (!%p3610_p9)
}
  0x48   :  { %106 = dma.hbm_to_vmem [thread:$0]  %s4785_s11, 16, %s104_s27, [#allocation11]  }
  0x49   :  { %s3614_s3 = scalar_lea.hbm %s4788_s14, 16 }
  0x4a   :  { %p3615_p10 = scmp.ne.s32.totalorder %s4788_s14, %s3614_s3  ;;  %p3618_p11 = scmp.lt.u32.totalorder %s3614_s3, %s4788_s14 }
  0x4c   :  { %p3620_p12 = pnand %p3618_p11, %p3615_p10 }
  0x4e   :  { %3623 = shalt.err (!%p3620_p12)
}
  0x4f   :  { %s3624_s24 = scalar_lea.vmem %s126_s29, 16  ;;  %s3628_s6 = scalar_lea.vmem %s126_s29, 32 }
  0x50   :  { %p3625_p13 = scmp.ne.s32.totalorder %s126_s29, %s3624_s24  ;;  %p3629_p0 = scmp.lt.s32.totalorder %s126_s29, %s126_s29 }
  0x51   :  { %p3630_p1 = scmp.lt.s32.totalorder %s3628_s6, %s3624_s24 }
  0x53   :  { %p3631_p2 = por %p3630_p1, %p3629_p0 }
  0x55   :  { %p3632_p3 = pnand %p3631_p2, %p3625_p13 }
  0x57   :  { %3635 = shalt.err (!%p3632_p3)
}
  0x58   :  { %128 = dma.hbm_to_vmem [thread:$0]  %s4788_s14, 16, %s126_s29, [#allocation14]  }
  0x59   :  { %s3898_s25 = smov [#allocation16]   ;;  %s3899_s30 = smov [#allocation19]  }
  0x5a   :  { %s146_s9 = sshll.u32 %s3898_s25, 4  ;;  %s171_s26 = sshll.u32 %s3899_s30, 4  ;;  %s147_s9 = int_to_ptr.vmem [resolvable:$true] %s146_s9  ;;  %s4081_s26 = int_to_ptr.vmem [resolvable:$true] %s171_s26 }
  0x5b   :  { %s3636_s2 = scalar_lea.hbm %s4790_s16, 512 }
  0x5c   :  { %p3637_p4 = scmp.ne.s32.totalorder %s4790_s16, %s3636_s2  ;;  %p3640_p5 = scmp.lt.u32.totalorder %s3636_s2, %s4790_s16 }
  0x5e   :  { %p3642_p6 = pnand %p3640_p5, %p3637_p4 }
  0x60   :  { %3645 = shalt.err (!%p3642_p6)
}
  0x61   :  { %s3646_s14 = scalar_lea.vmem %s147_s9, 512  ;;  %p3651_p8 = scmp.lt.s32.totalorder %s147_s9, %s147_s9 }
  0x62   :  { %p3647_p7 = scmp.ne.s32.totalorder %s147_s9, %s3646_s14  ;;  %p3652_p9 = scmp.lt.s32.totalorder %s3646_s14, %s3646_s14 }
  0x64   :  { %p3653_p10 = por %p3652_p9, %p3651_p8 }
  0x66   :  { %p3654_p11 = pnand %p3653_p10, %p3647_p7 }
  0x68   :  { %3657 = shalt.err (!%p3654_p11)
}
  0x69   :  { %s3900_s29 = smov 128   ;;  %s3901_s1 = smov 8  }
  0x6a   :  { %152 = dma.hbm_to_vmem [thread:$0]  %s4790_s16, 512, %s147_s9, [#allocation17], %s3900_s29, %s3900_s29, %s3901_s1  }
  0x6b   :  { %s3658_s25 = scalar_lea.hbm %s4792_s18, 16 }
  0x6c   :  { %p3659_p12 = scmp.ne.s32.totalorder %s4792_s18, %s3658_s25  ;;  %p3662_p13 = scmp.lt.u32.totalorder %s3658_s25, %s4792_s18 }
  0x6e   :  { %p3664_p0 = pnand %p3662_p13, %p3659_p12 }
  0x70   :  { %3667 = shalt.err (!%p3664_p0)
}
  0x71   :  { %s3668_s3 = scalar_lea.vmem %s4081_s26, 16  ;;  %s3672_s16 = scalar_lea.vmem %s4081_s26, 32 }
  0x72   :  { %p3669_p1 = scmp.ne.s32.totalorder %s4081_s26, %s3668_s3  ;;  %p3673_p2 = scmp.lt.s32.totalorder %s4081_s26, %s4081_s26 }
  0x73   :  { %p3674_p3 = scmp.lt.s32.totalorder %s3672_s16, %s3668_s3 }
  0x75   :  { %p3675_p4 = por %p3674_p3, %p3673_p2 }
  0x77   :  { %p3676_p5 = pnand %p3675_p4, %p3669_p1 }
  0x79   :  { %3679 = shalt.err (!%p3676_p5)
}
  0x7a   :  { %174 = dma.hbm_to_vmem [thread:$0]  %s4792_s18, 16, %s4081_s26, [#allocation20]  }
  0x7b   :  { %s3902_s0 = smov [#allocation22]   ;;  %s3903_s14 = smov [#allocation2]  }
  0x7c   :  { %s190_s5 = sshll.u32 %s3902_s0, 4  ;;  %s51_s24 = sshll.u32 %s3903_s14, 4  ;;  %s191_s5 = int_to_ptr.vmem [resolvable:$true] %s190_s5  ;;  %s52_s24 = int_to_ptr.vmem [resolvable:$true] %s51_s24 }
  0x7d   :  { %s3680_s27 = scalar_lea.hbm %s4794_s20, 512 }
  0x7e   :  { %p3681_p6 = scmp.ne.s32.totalorder %s4794_s20, %s3680_s27  ;;  %p3684_p7 = scmp.lt.u32.totalorder %s3680_s27, %s4794_s20 }
  0x80   :  { %p3686_p8 = pnand %p3684_p7, %p3681_p6 }
  0x82   :  { %3689 = shalt.err (!%p3686_p8)
}
  0x83   :  { %s3690_s18 = scalar_lea.vmem %s191_s5, 512  ;;  %p3695_p10 = scmp.lt.s32.totalorder %s191_s5, %s191_s5 }
  0x84   :  { %p3691_p9 = scmp.ne.s32.totalorder %s191_s5, %s3690_s18  ;;  %p3696_p11 = scmp.lt.s32.totalorder %s3690_s18, %s3690_s18 }
  0x86   :  { %p3697_p12 = por %p3696_p11, %p3695_p10 }
  0x88   :  { %p3698_p13 = pnand %p3697_p12, %p3691_p9 }
  0x8a   :  { %3701 = shalt.err (!%p3698_p13)
}
  0x8b   :  { %196 = dma.hbm_to_vmem [thread:$0]  %s4794_s20, 512, %s191_s5, [#allocation23], %s3900_s29, %s3900_s29, %s3901_s1  }
  0x8c   :  { %s4811_s9 = sld [smem:[#allocation38_spill]] }
  0x92   :  { %s3702_s4 = scalar_lea.hbm %s4811_s9, 16 }
  0x93   :  { %p3703_p0 = scmp.ne.s32.totalorder %s4811_s9, %s3702_s4  ;;  %p3706_p1 = scmp.lt.u32.totalorder %s3702_s4, %s4811_s9 }
  0x95   :  { %p3708_p2 = pnand %p3706_p1, %p3703_p0 }
  0x97   :  { %3711 = shalt.err (!%p3708_p2)
}
  0x98   :  { %s3712_s27 = scalar_lea.vmem %s52_s24, 16  ;;  %s3716_s25 = scalar_lea.vmem %s52_s24, 32 }
  0x99   :  { %p3713_p3 = scmp.ne.s32.totalorder %s52_s24, %s3712_s27  ;;  %p3717_p4 = scmp.lt.s32.totalorder %s52_s24, %s52_s24 }
  0x9a   :  { %p3718_p5 = scmp.lt.s32.totalorder %s3716_s25, %s3712_s27 }
  0x9c   :  { %p3719_p6 = por %p3718_p5, %p3717_p4 }
  0x9e   :  { %p3720_p7 = pnand %p3719_p6, %p3713_p3 }
  0xa0   :  { %3723 = shalt.err (!%p3720_p7)
}
  0xa1   :  { %54 = dma.hbm_to_vmem [thread:$0]  %s4811_s9, 16, %s52_s24, [#allocation3]  }
  0xa2   :  { %s3904_s30 = smov [#allocation6]   ;;  %s3905_s23 = smov [#allocation9]  }
  0xa3   :  { %s71_s28 = sshll.u32 %s3904_s30, 4  ;;  %s93_s18 = sshll.u32 %s3905_s23, 4  ;;  %s72_s28 = int_to_ptr.vmem [resolvable:$true] %s71_s28  ;;  %s94_s18 = int_to_ptr.vmem [resolvable:$true] %s93_s18 }
  0xa4   :  { %s3724_s3 = scalar_lea.hbm %s4781_s7, 16 }
  0xa5   :  { %p3725_p8 = scmp.ne.s32.totalorder %s4781_s7, %s3724_s3  ;;  %p3728_p9 = scmp.lt.u32.totalorder %s3724_s3, %s4781_s7 }
  0xa7   :  { %p3730_p10 = pnand %p3728_p9, %p3725_p8 }
  0xa9   :  { %3733 = shalt.err (!%p3730_p10)
}
  0xaa   :  { %s3734_s24 = scalar_lea.vmem %s72_s28, 16  ;;  %s3738_s9 = scalar_lea.vmem %s72_s28, 32 }
  0xab   :  { %p3735_p11 = scmp.ne.s32.totalorder %s72_s28, %s3734_s24  ;;  %p3739_p12 = scmp.lt.s32.totalorder %s72_s28, %s72_s28 }
  0xac   :  { %p3740_p13 = scmp.lt.s32.totalorder %s3738_s9, %s3734_s24 }
  0xae   :  { %p3741_p0 = por %p3740_p13, %p3739_p12 }
  0xb0   :  { %p3742_p1 = pnand %p3741_p0, %p3735_p11 }
  0xb2   :  { %3745 = shalt.err (!%p3742_p1)
}
  0xb3   :  { %74 = dma.hbm_to_vmem [thread:$0]  %s4781_s7, 16, %s72_s28, [#allocation5]  }
  0xb4   :  { %s3746_s20 = scalar_lea.hbm %s4784_s10, 16 }
  0xb5   :  { %p3747_p2 = scmp.ne.s32.totalorder %s4784_s10, %s3746_s20  ;;  %p3750_p3 = scmp.lt.u32.totalorder %s3746_s20, %s4784_s10 }
  0xb7   :  { %p3752_p4 = pnand %p3750_p3, %p3747_p2 }
  0xb9   :  { %3755 = shalt.err (!%p3752_p4)
}
  0xba   :  { %s3756_s2 = scalar_lea.vmem %s94_s18, 16  ;;  %s3760_s3 = scalar_lea.vmem %s94_s18, 32 }
  0xbb   :  { %p3757_p5 = scmp.ne.s32.totalorder %s94_s18, %s3756_s2  ;;  %p3761_p6 = scmp.lt.s32.totalorder %s94_s18, %s94_s18 }
  0xbc   :  { %p3762_p7 = scmp.lt.s32.totalorder %s3760_s3, %s3756_s2 }
  0xbe   :  { %p3763_p8 = por %p3762_p7, %p3761_p6 }
  0xc0   :  { %p3764_p9 = pnand %p3763_p8, %p3757_p5 }
  0xc2   :  { %3767 = shalt.err (!%p3764_p9)
}
  0xc3   :  { %96 = dma.hbm_to_vmem [thread:$0]  %s4784_s10, 16, %s94_s18, [#allocation8]  }
  0xc4   :  { %s3906_s16 = smov [#allocation12]   ;;  %s3907_s0 = smov [#allocation15]  }
  0xc5   :  { %s115_s4 = sshll.u32 %s3906_s16, 4  ;;  %s134_s14 = sshll.u32 %s3907_s0, 4  ;;  %s116_s4 = int_to_ptr.vmem [resolvable:$true] %s115_s4  ;;  %s4167_s14 = int_to_ptr.vmem [resolvable:$true] %s134_s14 }
  0xc6   :  { %s3768_s6 = scalar_lea.hbm %s4787_s13, 16 }
  0xc7   :  { %p3769_p10 = scmp.ne.s32.totalorder %s4787_s13, %s3768_s6  ;;  %p3772_p11 = scmp.lt.u32.totalorder %s3768_s6, %s4787_s13 }
  0xc9   :  { %p3774_p12 = pnand %p3772_p11, %p3769_p10 }
  0xcb   :  { %3777 = shalt.err (!%p3774_p12)
}
  0xcc   :  { %s3778_s10 = scalar_lea.vmem %s116_s4, 16  ;;  %s3782_s18 = scalar_lea.vmem %s116_s4, 32 }
  0xcd   :  { %p3779_p13 = scmp.ne.s32.totalorder %s116_s4, %s3778_s10  ;;  %p3783_p0 = scmp.lt.s32.totalorder %s116_s4, %s116_s4 }
  0xce   :  { %p3784_p1 = scmp.lt.s32.totalorder %s3782_s18, %s3778_s10 }
  0xd0   :  { %p3785_p2 = por %p3784_p1, %p3783_p0 }
  0xd2   :  { %p3786_p3 = pnand %p3785_p2, %p3779_p13 }
  0xd4   :  { %3789 = shalt.err (!%p3786_p3)
}
  0xd5   :  { %118 = dma.hbm_to_vmem [thread:$0]  %s4787_s13, 16, %s116_s4, [#allocation11]  }
  0xd6   :  { %s3790_s2 = scalar_lea.hbm %s4789_s15, 512 }
  0xd7   :  { %p3791_p4 = scmp.ne.s32.totalorder %s4789_s15, %s3790_s2  ;;  %p3794_p5 = scmp.lt.u32.totalorder %s3790_s2, %s4789_s15 }
  0xd9   :  { %p3796_p6 = pnand %p3794_p5, %p3791_p4 }
  0xdb   :  { %3799 = shalt.err (!%p3796_p6)
}
  0xdc   :  { %s3800_s0 = scalar_lea.vmem %s4167_s14, 512  ;;  %p3805_p8 = scmp.lt.s32.totalorder %s4167_s14, %s4167_s14 }
  0xdd   :  { %p3801_p7 = scmp.ne.s32.totalorder %s4167_s14, %s3800_s0  ;;  %p3806_p9 = scmp.lt.s32.totalorder %s3800_s0, %s3800_s0 }
  0xdf   :  { %p3807_p10 = por %p3806_p9, %p3805_p8 }
  0xe1   :  { %p3808_p11 = pnand %p3807_p10, %p3801_p7 }
  0xe3   :  { %3811 = shalt.err (!%p3808_p11)
}
  0xe4   :  { %140 = dma.hbm_to_vmem [thread:$0]  %s4789_s15, 512, %s4167_s14, [#allocation14], %s3900_s29, %s3900_s29, %s3901_s1  }
  0xe5   :  { %s3908_s24 = smov [#allocation18]   ;;  %s3909_s6 = smov [#allocation21]  }
  0xe6   :  { %s158_s9 = sshll.u32 %s3908_s24, 4  ;;  %s181_s11 = sshll.u32 %s3909_s6, 4  ;;  %s159_s9 = int_to_ptr.vmem [resolvable:$true] %s158_s9  ;;  %s182_s11 = int_to_ptr.vmem [resolvable:$true] %s181_s11 }
  0xe7   :  { %s3812_s20 = scalar_lea.hbm %s4791_s17, 512 }
  0xe8   :  { %p3813_p12 = scmp.ne.s32.totalorder %s4791_s17, %s3812_s20  ;;  %p3816_p13 = scmp.lt.u32.totalorder %s3812_s20, %s4791_s17 }
  0xea   :  { %p3818_p0 = pnand %p3816_p13, %p3813_p12 }
  0xec   :  { %3821 = shalt.err (!%p3818_p0)
}
  0xed   :  { %s3822_s15 = scalar_lea.vmem %s159_s9, 512  ;;  %p3827_p2 = scmp.lt.s32.totalorder %s159_s9, %s159_s9 }
  0xee   :  { %p3823_p1 = scmp.ne.s32.totalorder %s159_s9, %s3822_s15  ;;  %p3828_p3 = scmp.lt.s32.totalorder %s3822_s15, %s3822_s15 }
  0xf0   :  { %p3829_p4 = por %p3828_p3, %p3827_p2 }
  0xf2   :  { %p3830_p5 = pnand %p3829_p4, %p3823_p1 }
  0xf4   :  { %3833 = shalt.err (!%p3830_p5)
}
  0xf5   :  { %164 = dma.hbm_to_vmem [thread:$0]  %s4791_s17, 512, %s159_s9, [#allocation17], %s3900_s29, %s3900_s29, %s3901_s1  }
  0xf6   :  { %s3834_s3 = scalar_lea.hbm %s4793_s19, 16 }
  0xf7   :  { %p3835_p6 = scmp.ne.s32.totalorder %s4793_s19, %s3834_s3  ;;  %p3838_p7 = scmp.lt.u32.totalorder %s3834_s3, %s4793_s19 }
  0xf9   :  { %p3840_p8 = pnand %p3838_p7, %p3835_p6 }
  0xfb   :  { %3843 = shalt.err (!%p3840_p8)
}
  0xfc   :  { %s3844_s13 = scalar_lea.vmem %s182_s11, 16  ;;  %s3848_s4 = scalar_lea.vmem %s182_s11, 32 }
  0xfd   :  { %p3845_p9 = scmp.ne.s32.totalorder %s182_s11, %s3844_s13  ;;  %p3849_p10 = scmp.lt.s32.totalorder %s182_s11, %s182_s11 }
  0xfe   :  { %p3850_p11 = scmp.lt.s32.totalorder %s3848_s4, %s3844_s13 }
 0x100   :  { %p3851_p12 = por %p3850_p11, %p3849_p10 }
 0x102   :  { %p3852_p13 = pnand %p3851_p12, %p3845_p9 }
 0x104   :  { %3855 = shalt.err (!%p3852_p13)
}
 0x105   :  { %184 = dma.hbm_to_vmem [thread:$0]  %s4793_s19, 16, %s182_s11, [#allocation20]  }
 0x106   :  { %s3910_s9 = smov [#allocation24]   ;;  %s3856_s20 = scalar_lea.hbm %s4795_s21, 512 }
 0x107   :  { %s202_s6 = sshll.u32 %s3910_s9, 4  ;;  %p3857_p0 = scmp.ne.s32.totalorder %s4795_s21, %s3856_s20  ;;  %s203_s6 = int_to_ptr.vmem [resolvable:$true] %s202_s6 }
 0x108   :  { %p3860_p1 = scmp.lt.u32.totalorder %s3856_s20, %s4795_s21 }
 0x10a   :  { %p3862_p2 = pnand %p3860_p1, %p3857_p0 }
 0x10c   :  { %3865 = shalt.err (!%p3862_p2)
}
 0x10d   :  { %s3866_s15 = scalar_lea.vmem %s203_s6, 512  ;;  %p3871_p4 = scmp.lt.s32.totalorder %s203_s6, %s203_s6 }
 0x10e   :  { %p3867_p3 = scmp.ne.s32.totalorder %s203_s6, %s3866_s15  ;;  %p3872_p5 = scmp.lt.s32.totalorder %s3866_s15, %s3866_s15 }
 0x110   :  { %p3873_p6 = por %p3872_p5, %p3871_p4 }
 0x112   :  { %p3874_p7 = pnand %p3873_p6, %p3867_p3 }
 0x114   :  { %3877 = shalt.err (!%p3874_p7)
}
 0x115   :  { %208 = dma.hbm_to_vmem [thread:$0]  %s4795_s21, 512, %s203_s6, [#allocation23], %s3900_s29, %s3900_s29, %s3901_s1  }
 0x116   :  { %3878 = dma.done.wait [#allocation3], 16  }
 0x117   :  { %3879 = vsyncadd [#allocation3], 4294967280 }
 0x118   :  { %3880 = dma.done.wait [#allocation5], 32  }
 0x119   :  { %3881 = vsyncadd [#allocation5], 4294967264 }
 0x11a   :  { %3882 = dma.done.wait [#allocation8], 32  }
 0x11b   :  { %3883 = vsyncadd [#allocation8], 4294967264 }
 0x11c   :  { %3884 = dma.done.wait [#allocation11], 32  }
 0x11d   :  { %3885 = vsyncadd [#allocation11], 4294967264 }
 0x11e   :  { %3886 = dma.done.wait [#allocation14], 528  }
 0x11f   :  { %3887 = vsyncadd [#allocation14], 4294966768 }
 0x120   :  { %3888 = dma.done.wait [#allocation17], 1024  }
 0x121   :  { %3889 = vsyncadd [#allocation17], 4294966272 }
 0x122   :  { %3890 = dma.done.wait [#allocation20], 32  }
 0x123   :  { %3891 = vsyncadd [#allocation20], 4294967264 }
 0x124   :  { %3892 = dma.done.wait [#allocation23], 1024  }
 0x125   :  { %3893 = vsyncadd [#allocation23], 4294966272  ;;  %v3911_v0 = vmov 0.0|0.0   ;;  %vm4800_vm0 = vmmov 0   ;;  %v3913_v1 = vmov 0.0   ;;  %v255_v2 = vld [vmem:[%s4782_s8] sm:$0xff] }
 0x126   :  { %3266 = vmatprep.subr.bf16.mxu0 %v3911_v0  ;;  %2977 = vmatprep.mubr.msk.f32.mxu0 %vm4800_vm0, %v3913_v1  ;;  %v256_v3 = vld [vmem:[%s4782_s8 + $0x8] sm:$0xff]  ;;  %v257_v4 = vld [vmem:[%s4782_s8 + $0x10] sm:$0xff]  ;;  %v258_v6 = vld [vmem:[%s4782_s8 + $0x18] sm:$0xff]  ;;  %s4812_s19 = sld [smem:[#allocation33_spill]]  ;;  %vm274_vm1 = vcmask 785408   ;;  %vm4801_vm2 = vcmask 261120  }
 0x127   :  { %3284 = vmatprep.subr.bf16.mxu1 %v3911_v0  ;;  %3004 = vmatprep.mubr.msk.f32.mxu1 %vm4800_vm0, %v3913_v1  ;;  %v3267_v5 = vpack.c.bf16 %v256_v3, %v255_v2  ;;  %v3270_v7 = vpack.c.bf16 %v258_v6, %v257_v4  ;;  %v259_v8 = vld [vmem:[%s4782_s8 + $0x20] sm:$0xff]  ;;  %v260_v9 = vld [vmem:[%s4782_s8 + $0x28] sm:$0xff]  ;;  %v261_v11 = vld [vmem:[%s4782_s8 + $0x30] sm:$0xff]  ;;  %s4813_s30 = sld [smem:[#allocation35_spill]]  ;;  %s3914_s7 = smov 64  }
 0x128   :  { %v3273_v10 = vpack.c.bf16 %v260_v9, %v259_v8  ;;  %v262_v12 = vld [vmem:[%s4782_s8 + $0x38] sm:$0xff]  ;;  %v263_v14 = vld [vmem:[%s4782_s8 + $0x40] sm:$0xff]  ;;  %v264_v15 = vld [vmem:[%s4782_s8 + $0x48] sm:$0xff]  ;;  %s4815_s0 = sld [smem:[#allocation36_spill]]  ;;  %s3916_s13 = smov 96  }
 0x129   :  { %3268 = vmatpush3.bf16.msra.mxu0 %v3267_v5  ;;  %v3276_v13 = vpack.c.bf16 %v262_v12, %v261_v11  ;;  %v3279_v16 = vpack.c.bf16 %v264_v15, %v263_v14  ;;  %v265_v17 = vld [vmem:[%s4782_s8 + $0x50] sm:$0xff]  ;;  %v266_v18 = vld [vmem:[%s4782_s8 + $0x58] sm:$0xff]  ;;  %v2733_v21 = vld [vmem:[#allocation2] ss:$0 sm:$0xff]  ;;  %s4825_s24 = sld [smem:[#allocation37_spill]] }
 0x12a   :  { %3269 = vmatprep.subr.bf16.mxu0 %v3911_v0  ;;  %v3282_v19 = vpack.c.bf16 %v266_v18, %v265_v17  ;;  %v385_v31 = vld [vmem:[%s4786_s12] sm:$0xff]  ;;  %v386_v32 = vld [vmem:[%s4786_s12 + $0x8] sm:$0xff]  ;;  %v387_v34 = vld [vmem:[%s4786_s12 + $0x10] sm:$0xff] }
 0x12b   :  { %v3285_v33 = vpack.c.bf16 %v386_v32, %v385_v31  ;;  %v388_v35 = vld [vmem:[%s4786_s12 + $0x18] sm:$0xff]  ;;  %v389_v37 = vld [vmem:[%s4786_s12 + $0x20] sm:$0xff]  ;;  %v390_v38 = vld [vmem:[%s4786_s12 + $0x28] sm:$0xff] }
 0x12c   :  { %v254_v20 = vld [vmem:[%s4812_s19] sm:$0xff]  ;;  %v3288_v36 = vpack.c.bf16 %v388_v35, %v387_v34  ;;  %v3291_v39 = vpack.c.bf16 %v390_v38, %v389_v37  ;;  %v391_v40 = vld [vmem:[%s4786_s12 + $0x30] sm:$0xff]  ;;  %v392_v41 = vld [vmem:[%s4786_s12 + $0x38] sm:$0xff]  ;;  %s4814_s19 = sld [smem:[#allocation34_spill]] }
 0x12d   :  { %3271 = vmatpush3.bf16.msra.mxu0 %v3270_v7  ;;  %3286 = vmatpush3.bf16.msra.mxu1 %v3285_v33  ;;  %v3294_v42 = vpack.c.bf16 %v392_v41, %v391_v40  ;;  %v393_v43 = vld [vmem:[%s4786_s12 + $0x40] sm:$0xff]  ;;  %v394_v44 = vld [vmem:[%s4786_s12 + $0x48] sm:$0xff]  ;;  %v518_v45 = vld [vmem:[#allocation18] sm:$0xff] }
 0x12e   :  { %3272 = vmatprep.subr.bf16.mxu0 %v3911_v0  ;;  %3287 = vmatprep.subr.bf16.mxu1 %v3911_v0  ;;  %v3297_v46 = vpack.c.bf16 %v394_v44, %v393_v43  ;;  %v519_v47 = vld [vmem:[#allocation18 + $0x8] sm:$0xff]  ;;  %v395_v48 = vld [vmem:[%s4786_s12 + $0x50] sm:$0xff]  ;;  %v520_v51 = vld [vmem:[#allocation18 + $0x10] sm:$0xff] }
 0x12f   :  { %v3302_v49 = vpack.c.bf16 %v519_v47, %v518_v45  ;;  %v396_v50 = vld [vmem:[%s4786_s12 + $0x58] sm:$0xff]  ;;  %v521_v52 = vld [vmem:[#allocation18 + $0x18] sm:$0xff]  ;;  %v512_v54 = vld [vmem:[%s4813_s30] sm:$0xff] }
 0x130   :  { %v3306_v53 = vpack.c.bf16 %v521_v52, %v520_v51  ;;  %v3300_v55 = vpack.c.bf16 %v396_v50, %v395_v48  ;;  %v635_v56 = vld [vmem:[#allocation16] sm:$0xff]  ;;  %v636_v57 = vld [vmem:[#allocation16 + $0x8] sm:$0xff]  ;;  %v513_v60 = vld [vmem:[%s4813_s30 + $0x8] sm:$0xff] }
 0x131   :  { %3274 = vmatpush3.bf16.msra.mxu0 %v3273_v10  ;;  %3289 = vmatpush3.bf16.msra.mxu1 %v3288_v36  ;;  %v3311_v59 = vpack.c.bf16 %v636_v57, %v635_v56  ;;  %v514_v61 = vld [vmem:[%s4813_s30 + $0x10] sm:$0xff]  ;;  %v637_v62 = vld [vmem:[#allocation16 + $0x10] sm:$0xff]  ;;  %v638_v63 = vld [vmem:[#allocation16 + $0x18] sm:$0xff] }
 0x132   :  { %3275 = vmatprep.subr.bf16.mxu0 %v3911_v0  ;;  %3290 = vmatprep.subr.bf16.mxu1 %v3911_v0  ;;  %v384_v58 = vld [vmem:[%s4814_s19] sm:$0xff]  ;;  %v3314_v2 = vpack.c.bf16 %v638_v63, %v637_v62  ;;  %v515_v3 = vld [vmem:[%s4813_s30 + $0x18] sm:$0xff]  ;;  %v517_v5 = vld [vmem:[%s4813_s30 + $0x28] sm:$0xff] }
 0x133   :  { %v516_v4 = vld [vmem:[%s4813_s30 + $0x20] sm:$0xff]  ;;  %v720_v17 = vld [vmem:[#allocation15 + $0x8] sm:$0xff]  ;;  %v2747_v34 = vld [vmem:[#allocation13] ss:$0 sm:$0xff] }
 0x134   :  { %v2735_v10 = vld [vmem:[#allocation6] ss:$0 sm:$0xff]  ;;  %v2736_v12 = vld [vmem:[#allocation4] ss:$0 sm:$0xff]  ;;  %v4404_v44 = vld [vmem:[#allocation12] ss:$0 sm:$0xff] }
 0x135   :  { %3277 = vmatpush3.bf16.msra.mxu0 %v3276_v13  ;;  %3292 = vmatpush3.bf16.msra.mxu1 %v3291_v39  ;;  %v4411_v52 = vld [vmem:[%s4815_s0] sm:$0xff] }
 0x136   :  { %3278 = vmatprep.subr.bf16.mxu0 %v3911_v0  ;;  %3293 = vmatprep.subr.bf16.mxu1 %v3911_v0  ;;  %vm734_vm3 = vcmp.gt.s32.totalorder %v4411_v52, 0  ;;  %v731_v62 = vld [vmem:[#allocation22 + $0x10] sm:$0xff]  ;;  %vm1031_vm5 = vcmp.gt.s32.totalorder %v4411_v52, 1  ;;  %vm1312_vm7 = vcmp.gt.s32.totalorder %v4411_v52, 2  ;;  %vm1593_vm9 = vcmp.gt.s32.totalorder %v4411_v52, 3 }
 0x137   :  { %vm1874_vm11 = vcmp.gt.s32.totalorder %v4411_v52, 4  ;;  %vm2155_vm13 = vcmp.gt.s32.totalorder %v4411_v52, 5 }
 0x139   :  { %3280 = vmatpush3.bf16.msra.mxu0 %v3279_v16  ;;  %3295 = vmatpush3.bf16.msra.mxu1 %v3294_v42  ;;  %v719_v16 = vld [vmem:[#allocation15] sm:$0xff] }
 0x13a   :  { %3281 = vmatprep.subr.bf16.mxu0 %v3911_v0  ;;  %3296 = vmatprep.subr.bf16.mxu1 %v3911_v0 }
 0x13d   :  { %3283 = vmatpush3.bf16.msra.mxu0 %v3282_v19  ;;  %3298 = vmatpush3.bf16.msra.mxu1 %v3297_v46 }
 0x13e   :  { %3303 = vmatprep.subr.bf16.mxu0 %v3302_v49  ;;  %3299 = vmatprep.subr.bf16.mxu1 %v3911_v0 }
 0x140   :  { %2978 = vmatmul.mubr.msk.f32.vlgmr.msra.gmra.mrb[0].mxu0 %vm274_vm1, %v254_v20 }
 0x141   :  { %3015 = vmatprep.mubr.msk.f32.mxu0 %vm4801_vm2, %v512_v54  ;;  %3305 = vmatpush3.bf16.msra.mxu0 %v3302_v49 }
 0x142   :  { %3307 = vmatprep.subr.bf16.mxu0 %v3306_v53  ;;  %3301 = vmatpush3.bf16.msra.mxu1 %v3300_v55 }
 0x143   :  { %3310 = vmatprep.subr.bf16.mxu1 %v3911_v0 }
 0x145   :  { %3309 = vmatpush3.bf16.msra.mxu0 %v3306_v53  ;;  %3005 = vmatmul.mubr.msk.f32.vlgmr.msra.gmra.mrb[0].mxu1 %vm274_vm1, %v384_v58  ;;  %v3915_v53 = vmov 0  }
 0x146   :  { %3322 = vmatprep.subr.bf16.mxu0 %v3911_v0  ;;  %3312 = vmatpush3.bf16.msra.mxu1 %v3311_v59  ;;  %v841_v54 = vsel %vm734_vm3, 1, %v3915_v53 }
 0x147   :  { %3313 = vmatprep.subr.bf16.mxu1 %v3911_v0  ;;  %3032 = vmatprep.mubr.msk.f32.mxu1 %vm4800_vm0, %v3913_v1 }
 0x148   :  { %3016 = vmatmul.mubr.msk.f32.vlgmr.msra.gmra.mrb[2].mxu0 %vm4801_vm2, %v513_v60  ;;  %3466 = vset.pattern.permute.xlu0 %v3915_v53  ;;  %v729_v60 = vld [vmem:[#allocation22] sm:$0xff] }
 0x149   :  { %3018 = vmatprep.mubr.msk.f32.mxu0 %vm4801_vm2, %v514_v61  ;;  %3467 = vset.pattern.permute.xlu1 %v3915_v53  ;;  %v730_v61 = vld [vmem:[#allocation22 + $0x8] sm:$0xff] }
 0x14a   :  { %3315 = vmatpush3.bf16.msra.mxu1 %v3314_v2  ;;  %v4418_v63 = vpack.c.bf16 %v730_v61, %v729_v60  ;;  %v732_v2 = vld [vmem:[#allocation22 + $0x18] sm:$0xff] }
 0x14b   :  { %3316 = vmatprep.subr.bf16.mxu1 %v3911_v0 }
 0x14c   :  { %3019 = vmatmul.mubr.msk.f32.gmra.mrb[4].mxu0 %vm4801_vm2, %v515_v3  ;;  %v724_v3 = vld [vmem:[#allocation24] sm:$0xff] }
 0x14d   :  { %3021 = vmatprep.mubr.msk.f32.mxu0 %vm4801_vm2, %v516_v4  ;;  %v725_v4 = vld [vmem:[#allocation24 + $0x8] sm:$0xff] }
 0x150   :  { %3022 = vmatmul.mubr.msk.f32.gmra.mrb[6].mxu0 %vm4801_vm2, %v517_v5  ;;  %v4420_v5 = vpack.c.bf16 %v725_v4, %v724_v3 }
 0x151   :  { %3054 = vmatprep.mubr.msk.f32.mxu0 %vm4800_vm0, %v3913_v1 }
 0x152   :  { %3324 = vmatpush3.bf16.msra.mxu0 %v4420_v5 }
 0x153   :  { %3325 = vmatprep.subr.bf16.mxu0 %v3911_v0 }
 0x213   :  { %v344_v22 = vpop.f32.mrb[0].mxu0 }
 0x214   :  { %v345_v23 = vadd.f32 %v2733_v21, %v344_v22  ;;  %v2979_v24 = vpop.f32.mrb[1].mxu0  ;;  %v4378_v21 = vpack.c.bf16 %v720_v17, %v719_v16 }
 0x215   :  { %v722_v24 = vld [vmem:[#allocation15 + $0x18] sm:$0xff] }
 0x216   :  { %v351_v25 = vsel %vm4801_vm2, %v345_v23, 0.0 }
 0x217   :  { %352 = vadd.xlane.f32.xlu0 %v351_v25 }
 0x2a4   :  { %v353_v26 = vpop.xlane.xlu0 %352 }
 0x2a5   :  { %v355_v27 = vmul.f32 0.03125, %v353_v26  ;;  %v4392_v26 = vpop.f32.mrb[0].mxu1 }
 0x2a7   :  { %v4295_v28 = vsub.f32 %v345_v23, %v355_v27  ;;  %v721_v23 = vld [vmem:[#allocation15 + $0x10] sm:$0xff]  ;;  %v3017_v27 = vpop.f32.mrb[2].mxu0 }
 0x2a8   :  { %v4382_v25 = vpack.c.bf16 %v722_v24, %v721_v23  ;;  %v4469_v24 = vld [vmem:[#allocation21] ss:$0 sm:$0xff] }
 0x2a9   :  { %v357_v29 = vmul.f32 %v4295_v28, %v4295_v28 }
 0x2ab   :  { %v358_v30 = vsel %vm4801_vm2, %v357_v29, 0.0  ;;  %v606_v29 = vpop.f32.mrb[3].mxu0 }
 0x2ac   :  { %359 = vadd.xlane.f32.xlu0 %v358_v30  ;;  %v3020_v30 = vpop.f32.mrb[4].mxu0 }
 0x2ad   :  { %v616_v31 = vpop.f32.mrb[5].mxu0 }
 0x2ae   :  { %v3023_v32 = vpop.f32.mrb[6].mxu0 }
 0x2af   :  { %v626_v33 = vpop.f32.mrb[7].mxu0 }
 0x2c2   :  { %843 = vperm.xlu0 %3466, %v841_v54  }
 0x339   :  { %v360_v6 = vpop.xlane.xlu0 %359 }
 0x33a   :  { %v361_v7 = vmul.f32 0.03125, %v360_v6  ;;  %v726_v6 = vld [vmem:[#allocation24 + $0x10] sm:$0xff] }
 0x33c   :  { %v362_v8 = vadd.f32 1e-05, %v361_v7  ;;  %v727_v7 = vld [vmem:[#allocation24 + $0x18] sm:$0xff] }
 0x33e   :  { %3468 = vrsqrt.f32 %v362_v8  ;;  %v4423_v8 = vpack.c.bf16 %v732_v2, %v731_v62 }
 0x348   :  { %v3469_v9 = vpop.eup %3468 }
 0x349   :  { %v364_v11 = vmul.f32 %v3469_v9, %v4295_v28  ;;  %v3006_v28 = vpop.f32.mrb[1].mxu1  ;;  %v4427_v9 = vpack.c.bf16 %v727_v7, %v726_v6 }
 0x34b   :  { %v371_v13 = vmul.f32 %v2735_v10, %v364_v11  ;;  %3327 = vmatpush3.bf16.msra.mxu0 %v4427_v9 }
 0x34c   :  { %3334 = vmatprep.subr.bf16.mxu0 %v3911_v0 }
 0x34d   :  { %v378_v14 = vadd.f32 %v2736_v12, %v371_v13  ;;  %v4442_v12 = vpop.permute.xlu0 %843 }
 0x34e   :  { %vm845_vm4 = vcmp.eq.s32.totalorder %v4442_v12, 1 }
 0x34f   :  { %v380_v15 = vmul.f32 0.70710677, %v378_v14  ;;  %v379_v19 = vmul.f32 0.5, %v378_v14 }
 0x351   :  { %3470 = verf.f32 %v380_v15 }
 0x35b   :  { %v3471_v18 = vpop.eup %3470 }
 0x35c   :  { %v382_v20 = vadd.f32 1.0, %v3471_v18  ;;  %v4451_v18 = vld [vmem:[#allocation19] ss:$0 sm:$0xff] }
 0x35e   :  { %v383_v22 = vmul.f32 %v382_v20, %v379_v19 }
 0x360   :  { %3033 = vmatmul.mubr.msk.f32.vlgmr.msra.gmra.mrb[2].mxu1 %vm4801_vm2, %v383_v22 }
 0x361   :  { %3318 = vmatpush3.bf16.msra.mxu1 %v4378_v21  ;;  %3043 = vmatprep.mubr.msk.f32.mxu1 %vm4800_vm0, %v3913_v1 }
 0x362   :  { %3319 = vmatprep.subr.bf16.mxu1 %v3911_v0 }
 0x365   :  { %3321 = vmatpush3.bf16.msra.mxu1 %v4382_v25 }
 0x366   :  { %3328 = vmatprep.subr.bf16.mxu1 %v3911_v0 }
 0x368   :  { %3044 = vmatmul.mubr.f32.vlgmr.msra.gmra.mrb[4].mxu1 %v3913_v1 }
 0x369   :  { %3065 = vmatprep.mubr.msk.f32.mxu1 %vm4800_vm0, %v3913_v1  ;;  %3330 = vmatpush3.bf16.msra.mxu1 %v4418_v63 }
 0x36a   :  { %3331 = vmatprep.subr.bf16.mxu1 %v3911_v0 }
 0x36d   :  { %3333 = vmatpush3.bf16.msra.mxu1 %v4423_v8 }
 0x36e   :  { %3340 = vmatprep.subr.bf16.mxu1 %v3911_v0 }
 0x370   :  { %3066 = vmatmul.mubr.f32.vlgmr.msra.gmra.mrb[6].mxu1 %v3913_v1 }
 0x371   :  { %3342 = vmatpush3.bf16.msra.mxu1 %v4420_v5  ;;  %3087 = vmatprep.mubr.msk.f32.mxu1 %vm4800_vm0, %v3913_v1 }
 0x372   :  { %3343 = vmatprep.subr.bf16.mxu1 %v3911_v0 }
 0x375   :  { %3345 = vmatpush3.bf16.msra.mxu1 %v4427_v9 }
 0x376   :  { %3352 = vmatprep.subr.bf16.mxu1 %v3911_v0 }
 0x433   :  { %v715_v35 = vpop.f32.mrb[2].mxu1 }
 0x434   :  { %v716_v36 = vadd.f32 %v2747_v34, %v715_v35  ;;  %v3034_v37 = vpop.f32.mrb[3].mxu1 }
 0x436   :  { %v4394_v38 = vadd.f32 %v3023_v32, %v716_v36  ;;  %v4396_v39 = vadd.f32 %v716_v36, %v626_v33  ;;  %v735_v40 = vadd.f32 %v716_v36, %v606_v29  ;;  %v4398_v41 = vadd.f32 %v3017_v27, %v716_v36 }
 0x437   :  { %v4400_v42 = vadd.f32 %v716_v36, %v616_v31  ;;  %v4402_v43 = vadd.f32 %v3020_v30, %v716_v36 }
 0x43b   :  { %v811_v45 = vpop.f32.mrb[4].mxu1 }
 0x43c   :  { %v812_v46 = vadd.f32 %v4404_v44, %v811_v45  ;;  %v3045_v47 = vpop.f32.mrb[5].mxu1 }
 0x43e   :  { %823 = vrot.lane.b32.xlu1 %v812_v46, %s3914_s7  ;;  %v815_v48 = vadd.f32 %v812_v46, %v735_v40 }
 0x440   :  { %v2750_v49 = vmul.f32 -1.442695, %v815_v48 }
 0x442   :  { %3472 = vpow2.f32 %v2750_v49 }
 0x443   :  { %v1000_v19 = vpop.f32.mrb[6].mxu1 }
 0x444   :  { %v1001_v20 = vadd.f32 %v4451_v18, %v1000_v19  ;;  %v3067_v22 = vpop.f32.mrb[7].mxu1 }
 0x44c   :  { %v3473_v50 = vpop.eup %3472 }
 0x44d   :  { %v819_v51 = vadd.f32 1.0, %v3473_v50 }
 0x44f   :  { %3474 = vrcp.f32 %v819_v51 }
 0x459   :  { %v3475_v55 = vpop.eup %3474 }
 0x45a   :  { %v833_v11 = vsub.f32 1.0, %v3475_v55  ;;  %v839_v14 = vmul.f32 0.0, %v3475_v55 }
 0x4b0   :  { %v824_v56 = vpop.permute.xlu1 %823 }
 0x4b1   :  { %v826_v57 = vmul.f32 %v3475_v55, %v824_v56  ;;  %v1129_v55 = vsel %vm1031_vm5, 1, %v3915_v53 }
 0x4b3   :  { %828 = vrot.lane.b32.xlu1 %v826_v57, %s3914_s7 }
 0x525   :  { %v829_v58 = vpop.permute.xlu1 %828 }
 0x526   :  { %v831_v59 = vadd.f32 %v829_v58, %v735_v40 }
 0x528   :  { %3476 = vtanh.f32 %v831_v59 }
 0x532   :  { %v3477_v10 = vpop.eup %3476 }
 0x533   :  { %835 = vrot.lane.b32.xlu1 %v3477_v10, %s3916_s13 }
 0x5a5   :  { %v836_v13 = vpop.permute.xlu1 %835 }
 0x5a6   :  { %v838_v15 = vmul.f32 %v836_v13, %v833_v11 }
 0x5a8   :  { %v840_v16 = vadd.f32 %v839_v14, %v838_v15 }
 0x5aa   :  { %v4447_v17 = vsel %vm845_vm4, %v840_v16, 0.0 }
 0x5ab   :  { %854 = vrot.lane.b32.xlu1 %v4447_v17, %s3916_s13 }
 0x5af   :  { %1012 = vrot.lane.b32.xlu1 %v1001_v20, %s3914_s7 }
 0x61d   :  { %v855_v23 = vpop.permute.xlu1 %854 }
 0x61e   :  { %3055 = vmatmul.mubr.msk.f32.vlgmr.msra.gmra.mrb[8].mxu0 %vm4801_vm2, %v855_v23 }
 0x61f   :  { %3336 = vmatpush3.bf16.msra.mxu0 %v4378_v21  ;;  %3076 = vmatprep.mubr.msk.f32.mxu0 %vm4800_vm0, %v3913_v1 }
 0x620   :  { %3337 = vmatprep.subr.bf16.mxu0 %v3911_v0 }
 0x621   :  { %v1013_v37 = vpop.permute.xlu1 %1012 }
 0x623   :  { %3339 = vmatpush3.bf16.msra.mxu0 %v4382_v25 }
 0x624   :  { %3346 = vmatprep.subr.bf16.mxu0 %v3911_v0 }
 0x626   :  { %3077 = vmatmul.mubr.msk.f32.vlgmr.msra.gmra.mrb[10].mxu0 %vm4801_vm2, %v855_v23 }
 0x627   :  { %3348 = vmatpush3.bf16.msra.mxu0 %v4418_v63  ;;  %3098 = vmatprep.mubr.msk.f32.mxu0 %vm4800_vm0, %v3913_v1 }
 0x628   :  { %3349 = vmatprep.subr.bf16.mxu0 %v3911_v0 }
 0x62b   :  { %3351 = vmatpush3.bf16.msra.mxu0 %v4423_v8 }
 0x62c   :  { %3358 = vmatprep.subr.bf16.mxu0 %v3911_v0 }
 0x6f1   :  { %v924_v27 = vpop.f32.mrb[8].mxu0 }
 0x6f2   :  { %v925_v28 = vadd.f32 %v4469_v24, %v924_v27  ;;  %v3056_v29 = vpop.f32.mrb[9].mxu0 }
 0x6f4   :  { %v1004_v30 = vadd.f32 %v1001_v20, %v925_v28 }
 0x6f6   :  { %v2754_v31 = vmul.f32 -1.442695, %v1004_v30 }
 0x6f8   :  { %3478 = vpow2.f32 %v2754_v31 }
 0x6f9   :  { %v1099_v32 = vpop.f32.mrb[10].mxu0 }
 0x6fa   :  { %v1100_v33 = vadd.f32 %v4404_v44, %v1099_v32  ;;  %v3078_v34 = vpop.f32.mrb[11].mxu0 }
 0x6fc   :  { %1111 = vrot.lane.b32.xlu1 %v1100_v33, %s3914_s7  ;;  %v1103_v46 = vadd.f32 %v1100_v33, %v4398_v41 }
 0x6fe   :  { %v2756_v47 = vmul.f32 -1.442695, %v1103_v46 }
 0x702   :  { %v3479_v35 = vpop.eup %3478 }
 0x703   :  { %v1008_v36 = vadd.f32 1.0, %v3479_v35 }
 0x705   :  { %3480 = vrcp.f32 %v1008_v36 }
 0x706   :  { %3482 = vpow2.f32 %v2756_v47 }
 0x70f   :  { %v3481_v40 = vpop.eup %3480 }
 0x710   :  { %v1015_v45 = vmul.f32 %v3481_v40, %v1013_v37  ;;  %v3483_v48 = vpop.eup %3482  ;;  %v1022_v2 = vsub.f32 1.0, %v3481_v40  ;;  %v1028_v4 = vmul.f32 0.0, %v3481_v40 }
 0x711   :  { %v1107_v49 = vadd.f32 1.0, %v3483_v48 }
 0x712   :  { %1017 = vrot.lane.b32.xlu1 %v1015_v45, %s3914_s7 }
 0x713   :  { %3484 = vrcp.f32 %v1107_v49 }
 0x71d   :  { %v3485_v50 = vpop.eup %3484 }
 0x71e   :  { %v1121_v11 = vsub.f32 1.0, %v3485_v50  ;;  %v1127_v13 = vmul.f32 %v3485_v50, %v4447_v17 }
 0x76e   :  { %v1112_v51 = vpop.permute.xlu1 %1111 }
 0x76f   :  { %v1114_v54 = vmul.f32 %v3485_v50, %v1112_v51 }
 0x771   :  { %1116 = vrot.lane.b32.xlu1 %v1114_v54, %s3914_s7  ;;  %v1410_v54 = vsel %vm1312_vm7, 1, %v3915_v53 }
 0x775   :  { %1131 = vperm.xlu1 %3467, %v1129_v55  }
 0x784   :  { %v1018_v56 = vpop.permute.xlu1 %1017 }
 0x785   :  { %v1020_v57 = vadd.f32 %v1018_v56, %v925_v28 }
 0x787   :  { %3486 = vtanh.f32 %v1020_v57 }
 0x791   :  { %v3487_v58 = vpop.eup %3486 }
 0x792   :  { %1024 = vrot.lane.b32.xlu1 %v3487_v58, %s3916_s13 }
 0x7e3   :  { %v1117_v59 = vpop.permute.xlu1 %1116 }
 0x7e4   :  { %v1119_v60 = vadd.f32 %v1117_v59, %v4398_v41 }
 0x7e6   :  { %3488 = vtanh.f32 %v1119_v60 }
 0x7f0   :  { %v3489_v61 = vpop.eup %3488 }
 0x7f1   :  { %1123 = vrot.lane.b32.xlu1 %v3489_v61, %s3916_s13 }
 0x7f4   :  { %v4482_v62 = vpop.permute.xlu1 %1131 }
 0x7f5   :  { %vm1133_vm6 = vcmp.eq.s32.totalorder %v4482_v62, 1 }
 0x804   :  { %v1025_v3 = vpop.permute.xlu1 %1024 }
 0x805   :  { %v1027_v6 = vmul.f32 %v1025_v3, %v1022_v2 }
 0x807   :  { %v1029_v7 = vadd.f32 %v1028_v4, %v1027_v6 }
 0x809   :  { %v4486_v10 = vsel %vm845_vm4, %v1029_v7, 0.0 }
 0x80a   :  { %1211 = vrot.lane.b32.xlu1 %v4486_v10, %s3916_s13 }
 0x863   :  { %v1124_v41 = vpop.permute.xlu1 %1123 }
 0x864   :  { %v1126_v14 = vmul.f32 %v1124_v41, %v1121_v11 }
 0x866   :  { %v1128_v15 = vadd.f32 %v1127_v13, %v1126_v14 }
 0x868   :  { %v4495_v16 = vsel %vm1133_vm6, %v1128_v15, %v4447_v17 }
 0x869   :  { %1136 = vrot.lane.b32.xlu1 %v4495_v16, %s3916_s13 }
 0x87c   :  { %v1212_v12 = vpop.permute.xlu1 %1211 }
 0x87d   :  { %3099 = vmatmul.mubr.msk.f32.vlgmr.msra.gmra.mrb[12].mxu0 %vm4801_vm2, %v1212_v12 }
 0x87e   :  { %3360 = vmatpush3.bf16.msra.mxu0 %v4420_v5  ;;  %3120 = vmatprep.mubr.msk.f32.mxu0 %vm4800_vm0, %v3913_v1 }
 0x87f   :  { %3361 = vmatprep.subr.bf16.mxu0 %v3911_v0 }
 0x882   :  { %3363 = vmatpush3.bf16.msra.mxu0 %v4427_v9 }
 0x883   :  { %3370 = vmatprep.subr.bf16.mxu0 %v3911_v0 }
 0x8db   :  { %v1137_v19 = vpop.permute.xlu1 %1136 }
 0x8dc   :  { %3088 = vmatmul.mubr.msk.f32.vlgmr.msra.gmra.mrb[8].mxu1 %vm4801_vm2, %v1137_v19 }
 0x8dd   :  { %3354 = vmatpush3.bf16.msra.mxu1 %v4378_v21  ;;  %3109 = vmatprep.mubr.msk.f32.mxu1 %vm4800_vm0, %v3913_v1 }
 0x8de   :  { %3355 = vmatprep.subr.bf16.mxu1 %v3911_v0 }
 0x8e1   :  { %3357 = vmatpush3.bf16.msra.mxu1 %v4382_v25 }
 0x8e2   :  { %3364 = vmatprep.subr.bf16.mxu1 %v3911_v0 }
 0x8e4   :  { %3110 = vmatmul.mubr.msk.f32.vlgmr.msra.gmra.mrb[10].mxu1 %vm4801_vm2, %v1137_v19 }
 0x8e5   :  { %3366 = vmatpush3.bf16.msra.mxu1 %v4418_v63  ;;  %3131 = vmatprep.mubr.msk.f32.mxu1 %vm4800_vm0, %v3913_v1 }
 0x8e6   :  { %3367 = vmatprep.subr.bf16.mxu1 %v3911_v0 }
 0x8e9   :  { %3369 = vmatpush3.bf16.msra.mxu1 %v4423_v8 }
 0x8ea   :  { %3376 = vmatprep.subr.bf16.mxu1 %v3911_v0 }
 0x950   :  { %v1281_v17 = vpop.f32.mrb[12].mxu0 }
 0x951   :  { %v1282_v20 = vadd.f32 %v4451_v18, %v1281_v17  ;;  %v3100_v22 = vpop.f32.mrb[13].mxu0 }
 0x953   :  { %1293 = vrot.lane.b32.xlu0 %v1282_v20, %s3914_s7 }
 0x9af   :  { %v1206_v23 = vpop.f32.mrb[8].mxu1 }
 0x9b0   :  { %v1207_v27 = vadd.f32 %v4469_v24, %v1206_v23  ;;  %v3089_v28 = vpop.f32.mrb[9].mxu1 }
 0x9b2   :  { %v1285_v29 = vadd.f32 %v1282_v20, %v1207_v27 }
 0x9b4   :  { %v2759_v30 = vmul.f32 -1.442695, %v1285_v29 }
 0x9b6   :  { %3490 = vpow2.f32 %v2759_v30 }
 0x9b7   :  { %v1380_v31 = vpop.f32.mrb[10].mxu1 }
 0x9b8   :  { %v1381_v32 = vadd.f32 %v4404_v44, %v1380_v31  ;;  %v3111_v33 = vpop.f32.mrb[11].mxu1 }
 0x9ba   :  { %1392 = vrot.lane.b32.xlu1 %v1381_v32, %s3914_s7  ;;  %v1384_v45 = vadd.f32 %v1381_v32, %v4400_v42 }
 0x9bc   :  { %v2761_v46 = vmul.f32 -1.442695, %v1384_v45 }
 0x9c0   :  { %v3491_v34 = vpop.eup %3490 }
 0x9c1   :  { %v1289_v35 = vadd.f32 1.0, %v3491_v34 }
 0x9c3   :  { %3492 = vrcp.f32 %v1289_v35 }
 0x9c4   :  { %3494 = vpow2.f32 %v2761_v46 }
 0x9c5   :  { %v1294_v37 = vpop.permute.xlu0 %1293 }
 0x9cd   :  { %v3493_v36 = vpop.eup %3492 }
 0x9ce   :  { %v1296_v40 = vmul.f32 %v3493_v36, %v1294_v37  ;;  %v3495_v47 = vpop.eup %3494  ;;  %v1303_v61 = vsub.f32 1.0, %v3493_v36  ;;  %v1309_v3 = vmul.f32 %v3493_v36, %v4486_v10 }
 0x9cf   :  { %v1388_v48 = vadd.f32 1.0, %v3495_v47 }
 0x9d0   :  { %1298 = vrot.lane.b32.xlu0 %v1296_v40, %s3914_s7 }
 0x9d1   :  { %3496 = vrcp.f32 %v1388_v48 }
 0x9db   :  { %v3497_v49 = vpop.eup %3496 }
 0x9dc   :  { %v1402_v11 = vsub.f32 1.0, %v3497_v49  ;;  %v1408_v13 = vmul.f32 %v3497_v49, %v4495_v16 }
 0xa2c   :  { %v1393_v50 = vpop.permute.xlu1 %1392 }
 0xa2d   :  { %v1395_v51 = vmul.f32 %v3497_v49, %v1393_v50  ;;  %v1691_v50 = vsel %vm1593_vm9, 1, %v3915_v53 }
 0xa2f   :  { %1397 = vrot.lane.b32.xlu1 %v1395_v51, %s3914_s7 }
 0xa33   :  { %1412 = vperm.xlu1 %3467, %v1410_v54  }
 0xa42   :  { %v1299_v55 = vpop.permute.xlu0 %1298 }
 0xa43   :  { %v1301_v56 = vadd.f32 %v1299_v55, %v1207_v27 }
 0xa45   :  { %3498 = vtanh.f32 %v1301_v56 }
 0xa4f   :  { %v3499_v57 = vpop.eup %3498 }
 0xa50   :  { %1305 = vrot.lane.b32.xlu0 %v3499_v57, %s3916_s13 }
 0xaa1   :  { %v1398_v58 = vpop.permute.xlu1 %1397 }
 0xaa2   :  { %v1400_v59 = vadd.f32 %v1398_v58, %v4400_v42 }
 0xaa4   :  { %3500 = vtanh.f32 %v1400_v59 }
 0xaae   :  { %v3501_v60 = vpop.eup %3500 }
 0xaaf   :  { %1404 = vrot.lane.b32.xlu0 %v3501_v60, %s3916_s13 }
 0xab2   :  { %v4541_v41 = vpop.permute.xlu1 %1412 }
 0xab3   :  { %vm1414_vm8 = vcmp.eq.s32.totalorder %v4541_v41, 1 }
 0xac2   :  { %v1306_v2 = vpop.permute.xlu0 %1305 }
 0xac3   :  { %v1308_v4 = vmul.f32 %v1306_v2, %v1303_v61 }
 0xac5   :  { %v1310_v6 = vadd.f32 %v1309_v3, %v1308_v4 }
 0xac7   :  { %v4537_v7 = vsel %vm1133_vm6, %v1310_v6, %v4486_v10 }
 0xac8   :  { %1492 = vrot.lane.b32.xlu1 %v4537_v7, %s3916_s13 }
 0xb21   :  { %v1405_v42 = vpop.permute.xlu0 %1404 }
 0xb22   :  { %v1407_v14 = vmul.f32 %v1405_v42, %v1402_v11 }
 0xb24   :  { %v1409_v15 = vadd.f32 %v1408_v13, %v1407_v14 }
 0xb26   :  { %v4548_v12 = vsel %vm1414_vm8, %v1409_v15, %v4495_v16 }
 0xb27   :  { %1417 = vrot.lane.b32.xlu0 %v4548_v12, %s3916_s13 }
 0xb3a   :  { %v1493_v62 = vpop.permute.xlu1 %1492 }
 0xb3b   :  { %3132 = vmatmul.mubr.msk.f32.vlgmr.msra.gmra.mrb[12].mxu1 %vm4801_vm2, %v1493_v62 }
 0xb3c   :  { %3378 = vmatpush3.bf16.msra.mxu1 %v4420_v5  ;;  %3153 = vmatprep.mubr.msk.f32.mxu1 %vm4800_vm0, %v3913_v1 }
 0xb3d   :  { %3379 = vmatprep.subr.bf16.mxu1 %v3911_v0 }
 0xb40   :  { %3381 = vmatpush3.bf16.msra.mxu1 %v4427_v9 }
 0xb41   :  { %3388 = vmatprep.subr.bf16.mxu1 %v3911_v0 }
 0xb99   :  { %v1418_v10 = vpop.permute.xlu0 %1417 }
 0xb9a   :  { %3121 = vmatmul.mubr.msk.f32.vlgmr.msra.gmra.mrb[14].mxu0 %vm4801_vm2, %v1418_v10 }
 0xb9b   :  { %3372 = vmatpush3.bf16.msra.mxu0 %v4378_v21  ;;  %3142 = vmatprep.mubr.msk.f32.mxu0 %vm4800_vm0, %v3913_v1 }
 0xb9c   :  { %3373 = vmatprep.subr.bf16.mxu0 %v3911_v0 }
 0xb9f   :  { %3375 = vmatpush3.bf16.msra.mxu0 %v4382_v25 }
 0xba0   :  { %3382 = vmatprep.subr.bf16.mxu0 %v3911_v0 }
 0xba2   :  { %3143 = vmatmul.mubr.msk.f32.vlgmr.msra.gmra.mrb[16].mxu0 %vm4801_vm2, %v1418_v10 }
 0xba3   :  { %3384 = vmatpush3.bf16.msra.mxu0 %v4418_v63  ;;  %3164 = vmatprep.mubr.msk.f32.mxu0 %vm4800_vm0, %v3913_v1 }
 0xba4   :  { %3385 = vmatprep.subr.bf16.mxu0 %v3911_v0 }
 0xba7   :  { %3387 = vmatpush3.bf16.msra.mxu0 %v4423_v8 }
 0xba8   :  { %3394 = vmatprep.subr.bf16.mxu0 %v3911_v0 }
 0xc0e   :  { %v1562_v16 = vpop.f32.mrb[12].mxu1 }
 0xc0f   :  { %v1563_v19 = vadd.f32 %v4451_v18, %v1562_v16  ;;  %v3133_v17 = vpop.f32.mrb[13].mxu1 }
 0xc11   :  { %1574 = vrot.lane.b32.xlu1 %v1563_v19, %s3914_s7 }
 0xc6d   :  { %v1487_v20 = vpop.f32.mrb[14].mxu0 }
 0xc6e   :  { %v1488_v22 = vadd.f32 %v4469_v24, %v1487_v20  ;;  %v3122_v23 = vpop.f32.mrb[15].mxu0 }
 0xc70   :  { %v1566_v27 = vadd.f32 %v1563_v19, %v1488_v22 }
 0xc72   :  { %v2764_v28 = vmul.f32 -1.442695, %v1566_v27 }
 0xc74   :  { %3502 = vpow2.f32 %v2764_v28 }
 0xc75   :  { %v1661_v29 = vpop.f32.mrb[16].mxu0 }
 0xc76   :  { %v1662_v30 = vadd.f32 %v4404_v44, %v1661_v29  ;;  %v3144_v31 = vpop.f32.mrb[17].mxu0 }
 0xc78   :  { %1673 = vrot.lane.b32.xlu0 %v1662_v30, %s3914_s7  ;;  %v1665_v37 = vadd.f32 %v1662_v30, %v4402_v43 }
 0xc7a   :  { %v2766_v40 = vmul.f32 -1.442695, %v1665_v37 }
 0xc7e   :  { %v3503_v32 = vpop.eup %3502 }
 0xc7f   :  { %v1570_v33 = vadd.f32 1.0, %v3503_v32 }
 0xc81   :  { %3504 = vrcp.f32 %v1570_v33 }
 0xc82   :  { %3506 = vpow2.f32 %v2766_v40 }
 0xc83   :  { %v1575_v35 = vpop.permute.xlu1 %1574 }
 0xc8b   :  { %v3505_v34 = vpop.eup %3504 }
 0xc8c   :  { %v1577_v36 = vmul.f32 %v3505_v34, %v1575_v35  ;;  %v3507_v45 = vpop.eup %3506  ;;  %v1584_v59 = vsub.f32 1.0, %v3505_v34  ;;  %v1590_v61 = vmul.f32 %v3505_v34, %v4537_v7 }
 0xc8d   :  { %v1669_v46 = vadd.f32 1.0, %v3507_v45 }
 0xc8e   :  { %1579 = vrot.lane.b32.xlu1 %v1577_v36, %s3914_s7 }
 0xc8f   :  { %3508 = vrcp.f32 %v1669_v46 }
 0xc99   :  { %v3509_v47 = vpop.eup %3508 }
 0xc9a   :  { %v1683_v6 = vsub.f32 1.0, %v3509_v47  ;;  %v1689_v42 = vmul.f32 %v3509_v47, %v4548_v12 }
 0xcea   :  { %v1674_v48 = vpop.permute.xlu0 %1673 }
 0xceb   :  { %v1676_v49 = vmul.f32 %v3509_v47, %v1674_v48  ;;  %v1972_v47 = vsel %vm1874_vm11, 1, %v3915_v53 }
 0xced   :  { %1678 = vrot.lane.b32.xlu0 %v1676_v49, %s3914_s7 }
 0xcf1   :  { %1693 = vperm.xlu0 %3466, %v1691_v50  }
 0xd00   :  { %v1580_v51 = vpop.permute.xlu1 %1579 }
 0xd01   :  { %v1582_v54 = vadd.f32 %v1580_v51, %v1488_v22 }
 0xd03   :  { %3510 = vtanh.f32 %v1582_v54 }
 0xd0d   :  { %v3511_v55 = vpop.eup %3510 }
 0xd0e   :  { %1586 = vrot.lane.b32.xlu1 %v3511_v55, %s3916_s13 }
 0xd5f   :  { %v1679_v56 = vpop.permute.xlu0 %1678 }
 0xd60   :  { %v1681_v57 = vadd.f32 %v1679_v56, %v4402_v43 }
 0xd62   :  { %3512 = vtanh.f32 %v1681_v57 }
 0xd6c   :  { %v3513_v58 = vpop.eup %3512 }
 0xd6d   :  { %1685 = vrot.lane.b32.xlu1 %v3513_v58, %s3916_s13 }
 0xd70   :  { %v4594_v11 = vpop.permute.xlu0 %1693 }
 0xd71   :  { %vm1695_vm10 = vcmp.eq.s32.totalorder %v4594_v11, 1 }
 0xd80   :  { %v1587_v60 = vpop.permute.xlu1 %1586 }
 0xd81   :  { %v1589_v2 = vmul.f32 %v1587_v60, %v1584_v59 }
 0xd83   :  { %v1591_v3 = vadd.f32 %v1590_v61, %v1589_v2 }
 0xd85   :  { %v4590_v4 = vsel %vm1414_vm8, %v1591_v3, %v4537_v7 }
 0xd86   :  { %1773 = vrot.lane.b32.xlu0 %v4590_v4, %s3916_s13 }
 0xddf   :  { %v1686_v43 = vpop.permute.xlu1 %1685 }
 0xde0   :  { %v1688_v13 = vmul.f32 %v1686_v43, %v1683_v6 }
 0xde2   :  { %v1690_v14 = vadd.f32 %v1689_v42, %v1688_v13 }
 0xde4   :  { %v4601_v15 = vsel %vm1695_vm10, %v1690_v14, %v4548_v12 }
 0xde5   :  { %1698 = vrot.lane.b32.xlu1 %v4601_v15, %s3916_s13 }
 0xdf8   :  { %v1774_v7 = vpop.permute.xlu0 %1773 }
 0xdf9   :  { %3165 = vmatmul.mubr.msk.f32.vlgmr.msra.gmra.mrb[18].mxu0 %vm4801_vm2, %v1774_v7 }
 0xdfa   :  { %3396 = vmatpush3.bf16.msra.mxu0 %v4420_v5  ;;  %3186 = vmatprep.mubr.msk.f32.mxu0 %vm4800_vm0, %v3913_v1 }
 0xdfb   :  { %3397 = vmatprep.subr.bf16.mxu0 %v3911_v0 }
 0xdfe   :  { %3399 = vmatpush3.bf16.msra.mxu0 %v4427_v9 }
 0xdff   :  { %3406 = vmatprep.subr.bf16.mxu0 %v3911_v0 }
 0xe57   :  { %v1699_v41 = vpop.permute.xlu1 %1698 }
 0xe58   :  { %3154 = vmatmul.mubr.msk.f32.vlgmr.msra.gmra.mrb[14].mxu1 %vm4801_vm2, %v1699_v41 }
 0xe59   :  { %3390 = vmatpush3.bf16.msra.mxu1 %v4378_v21  ;;  %3175 = vmatprep.mubr.msk.f32.mxu1 %vm4800_vm0, %v3913_v1 }
 0xe5a   :  { %3391 = vmatprep.subr.bf16.mxu1 %v3911_v0 }
 0xe5d   :  { %3393 = vmatpush3.bf16.msra.mxu1 %v4382_v25 }
 0xe5e   :  { %3400 = vmatprep.subr.bf16.mxu1 %v3911_v0 }
 0xe60   :  { %3176 = vmatmul.mubr.msk.f32.vlgmr.msra.gmra.mrb[16].mxu1 %vm4801_vm2, %v1699_v41 }
 0xe61   :  { %3402 = vmatpush3.bf16.msra.mxu1 %v4418_v63  ;;  %3197 = vmatprep.mubr.msk.f32.mxu1 %vm4800_vm0, %v3913_v1 }
 0xe62   :  { %3403 = vmatprep.subr.bf16.mxu1 %v3911_v0 }
 0xe65   :  { %3405 = vmatpush3.bf16.msra.mxu1 %v4423_v8 }
 0xe66   :  { %3412 = vmatprep.subr.bf16.mxu1 %v3911_v0 }
 0xecc   :  { %v1843_v12 = vpop.f32.mrb[18].mxu0 }
 0xecd   :  { %v1844_v62 = vadd.f32 %v4451_v18, %v1843_v12  ;;  %v3166_v10 = vpop.f32.mrb[19].mxu0 }
 0xecf   :  { %1855 = vrot.lane.b32.xlu0 %v1844_v62, %s3914_s7 }
 0xf2b   :  { %v1768_v16 = vpop.f32.mrb[14].mxu1 }
 0xf2c   :  { %v1769_v19 = vadd.f32 %v4469_v24, %v1768_v16  ;;  %v3155_v17 = vpop.f32.mrb[15].mxu1 }
 0xf2e   :  { %v1847_v20 = vadd.f32 %v1844_v62, %v1769_v19 }
 0xf30   :  { %v2769_v22 = vmul.f32 -1.442695, %v1847_v20 }
 0xf32   :  { %3514 = vpow2.f32 %v2769_v22 }
 0xf33   :  { %v1942_v23 = vpop.f32.mrb[16].mxu1 }
 0xf34   :  { %v1943_v27 = vadd.f32 %v4404_v44, %v1942_v23  ;;  %v3177_v28 = vpop.f32.mrb[17].mxu1 }
 0xf36   :  { %1954 = vrot.lane.b32.xlu1 %v1943_v27, %s3914_s7  ;;  %v1946_v34 = vadd.f32 %v1943_v27, %v4396_v39 }
 0xf38   :  { %v2771_v35 = vmul.f32 -1.442695, %v1946_v34 }
 0xf3c   :  { %v3515_v29 = vpop.eup %3514 }
 0xf3d   :  { %v1851_v30 = vadd.f32 1.0, %v3515_v29 }
 0xf3f   :  { %3516 = vrcp.f32 %v1851_v30  ;;  %v2253_v30 = vsel %vm2155_vm13, 1, %v3915_v53 }
 0xf40   :  { %3518 = vpow2.f32 %v2771_v35 }
 0xf41   :  { %v1856_v32 = vpop.permute.xlu0 %1855 }
 0xf49   :  { %v3517_v31 = vpop.eup %3516 }
 0xf4a   :  { %v1858_v33 = vmul.f32 %v3517_v31, %v1856_v32  ;;  %v3519_v36 = vpop.eup %3518  ;;  %v1865_v56 = vsub.f32 1.0, %v3517_v31  ;;  %v1871_v58 = vmul.f32 %v3517_v31, %v4590_v4 }
 0xf4b   :  { %v1950_v37 = vadd.f32 1.0, %v3519_v36 }
 0xf4c   :  { %1860 = vrot.lane.b32.xlu0 %v1858_v33, %s3914_s7 }
 0xf4d   :  { %3520 = vrcp.f32 %v1950_v37 }
 0xf57   :  { %v3521_v40 = vpop.eup %3520 }
 0xf58   :  { %v1964_v2 = vsub.f32 1.0, %v3521_v40  ;;  %v1970_v6 = vmul.f32 %v3521_v40, %v4601_v15 }
 0xfa8   :  { %v1955_v45 = vpop.permute.xlu1 %1954 }
 0xfa9   :  { %v1957_v46 = vmul.f32 %v3521_v40, %v1955_v45 }
 0xfab   :  { %1959 = vrot.lane.b32.xlu1 %v1957_v46, %s3914_s7 }
 0xfaf   :  { %1974 = vperm.xlu1 %3467, %v1972_v47  }
 0xfbe   :  { %v1861_v48 = vpop.permute.xlu0 %1860 }
 0xfbf   :  { %v1863_v49 = vadd.f32 %v1861_v48, %v1769_v19 }
 0xfc1   :  { %3522 = vtanh.f32 %v1863_v49 }
 0xfcb   :  { %v3523_v50 = vpop.eup %3522 }
 0xfcc   :  { %1867 = vrot.lane.b32.xlu0 %v3523_v50, %s3916_s13 }
0x101d   :  { %v1960_v51 = vpop.permute.xlu1 %1959 }
0x101e   :  { %v1962_v54 = vadd.f32 %v1960_v51, %v4396_v39 }
0x1020   :  { %3524 = vtanh.f32 %v1962_v54 }
0x102a   :  { %v3525_v55 = vpop.eup %3524 }
0x102b   :  { %1966 = vrot.lane.b32.xlu0 %v3525_v55, %s3916_s13 }
0x102e   :  { %v4647_v3 = vpop.permute.xlu1 %1974 }
0x102f   :  { %vm1976_vm12 = vcmp.eq.s32.totalorder %v4647_v3, 1 }
0x103e   :  { %v1868_v57 = vpop.permute.xlu0 %1867 }
0x103f   :  { %v1870_v59 = vmul.f32 %v1868_v57, %v1865_v56  ;;  %v2737_v56 = vld [vmem:[#allocation7] ss:$0 sm:$0xff] }
0x1040   :  { %v474_v57 = vadd.f32 %v2737_v56, %v4392_v26 }
0x1041   :  { %v1872_v60 = vadd.f32 %v1871_v58, %v1870_v59 }
0x1042   :  { %v479_v58 = vsel %vm4801_vm2, %v474_v57, 0.0 }
0x1043   :  { %v4643_v61 = vsel %vm1695_vm10, %v1872_v60, %v4590_v4 }
0x1044   :  { %2054 = vrot.lane.b32.xlu1 %v4643_v61, %s3916_s13 }
0x109d   :  { %v1967_v39 = vpop.permute.xlu0 %1966 }
0x109e   :  { %v1969_v43 = vmul.f32 %v1967_v39, %v1964_v2 }
0x10a0   :  { %v1971_v42 = vadd.f32 %v1970_v6, %v1969_v43 }
0x10a2   :  { %v4654_v13 = vsel %vm1976_vm12, %v1971_v42, %v4601_v15 }
0x10a3   :  { %1979 = vrot.lane.b32.xlu0 %v4654_v13, %s3916_s13 }
0x10b6   :  { %v2055_v4 = vpop.permute.xlu1 %2054 }
0x10b7   :  { %3198 = vmatmul.mubr.msk.f32.vlgmr.msra.gmra.mrb[18].mxu1 %vm4801_vm2, %v2055_v4 }
0x10b8   :  { %3414 = vmatpush3.bf16.msra.mxu1 %v4420_v5  ;;  %3219 = vmatprep.mubr.msk.f32.mxu1 %vm4800_vm0, %v3913_v1 }
0x10b9   :  { %3415 = vmatprep.subr.bf16.mxu1 %v3911_v0 }
0x10bc   :  { %3417 = vmatpush3.bf16.msra.mxu1 %v4427_v9 }
0x10bd   :  { %3424 = vmatprep.subr.bf16.mxu1 %v3911_v0 }
0x1115   :  { %v1980_v11 = vpop.permute.xlu0 %1979 }
0x1116   :  { %3187 = vmatmul.mubr.msk.f32.vlgmr.msra.gmra.mrb[20].mxu0 %vm4801_vm2, %v1980_v11 }
0x1117   :  { %3408 = vmatpush3.bf16.msra.mxu0 %v4378_v21  ;;  %3208 = vmatprep.mubr.msk.f32.mxu0 %vm4800_vm0, %v3913_v1 }
0x1118   :  { %3409 = vmatprep.subr.bf16.mxu0 %v3911_v0 }
0x111b   :  { %3411 = vmatpush3.bf16.msra.mxu0 %v4382_v25 }
0x111c   :  { %3418 = vmatprep.subr.bf16.mxu0 %v3911_v0 }
0x111e   :  { %3209 = vmatmul.mubr.msk.f32.vlgmr.msra.gmra.mrb[22].mxu0 %vm4801_vm2, %v1980_v11 }
0x111f   :  { %3420 = vmatpush3.bf16.msra.mxu0 %v4418_v63  ;;  %3230 = vmatprep.mubr.msk.f32.mxu0 %vm4800_vm0, %v3913_v1 }
0x1120   :  { %3421 = vmatprep.subr.bf16.mxu0 %v3911_v0 }
0x1123   :  { %3423 = vmatpush3.bf16.msra.mxu0 %v4423_v8 }
0x1124   :  { %3430 = vmatprep.subr.bf16.mxu0 %v3911_v0 }
0x118a   :  { %v2124_v21 = vpop.f32.mrb[18].mxu1 }
0x118b   :  { %v2125_v5 = vadd.f32 %v4451_v18, %v2124_v21  ;;  %v3199_v9 = vpop.f32.mrb[19].mxu1 }
0x118d   :  { %2136 = vrot.lane.b32.xlu1 %v2125_v5, %s3914_s7 }
0x11e9   :  { %v2049_v25 = vpop.f32.mrb[20].mxu0 }
0x11ea   :  { %v2050_v14 = vadd.f32 %v4469_v24, %v2049_v25  ;;  %v3188_v15 = vpop.f32.mrb[21].mxu0 }
0x11ec   :  { %v2128_v63 = vadd.f32 %v2125_v5, %v2050_v14 }
0x11ee   :  { %v2774_v7 = vmul.f32 -1.442695, %v2128_v63 }
0x11f0   :  { %3526 = vpow2.f32 %v2774_v7  ;;  %v2436_v7 = vlaneseq }
0x11f1   :  { %v2223_v41 = vpop.f32.mrb[22].mxu0 }
0x11f2   :  { %v2224_v12 = vadd.f32 %v4404_v44, %v2223_v41  ;;  %v3210_v62 = vpop.f32.mrb[23].mxu0  ;;  %v2437_v41 = vshrl.u32 %v2436_v7, 7 }
0x11f4   :  { %2235 = vrot.lane.b32.xlu0 %v2224_v12, %s3914_s7  ;;  %v2227_v20 = vadd.f32 %v2224_v12, %v4394_v38  ;;  %v2442_v12 = vand.u32 127, %v2436_v7  ;;  %v2438_v62 = vadd.s32 8, %v2437_v41 }
0x11f6   :  { %v2776_v22 = vmul.f32 -1.442695, %v2227_v20  ;;  %vm2443_vm13 = vcmp.eq.s32.totalorder %v2442_v12, %v2437_v41 }
0x11fa   :  { %v3527_v8 = vpop.eup %3526 }
0x11fb   :  { %v2132_v10 = vadd.f32 1.0, %v3527_v8  ;;  %v2467_v8 = vadd.s32 32, %v2437_v41 }
0x11fd   :  { %3528 = vrcp.f32 %v2132_v10  ;;  %v2439_v10 = vadd.s32 16, %v2437_v41  ;;  %vm2471_vm15 = vcmp.eq.s32.totalorder %v2442_v12, %v2467_v8 }
0x11fe   :  { %3530 = vpow2.f32 %v2776_v22  ;;  %v3917_v22 = vmov 1.0|1.0  }
0x11ff   :  { %v2137_v19 = vpop.permute.xlu1 %2136 }
0x1207   :  { %v3529_v16 = vpop.eup %3528 }
0x1208   :  { %v2139_v17 = vmul.f32 %v3529_v16, %v2137_v19  ;;  %v3531_v23 = vpop.eup %3530  ;;  %v2146_v37 = vsub.f32 1.0, %v3529_v16  ;;  %v2152_v40 = vmul.f32 %v3529_v16, %v4643_v61  ;;  %v2440_v16 = vadd.s32 24, %v2437_v41 }
0x1209   :  { %v2231_v27 = vadd.f32 1.0, %v3531_v23  ;;  %v2468_v19 = vadd.s32 32, %v2438_v62  ;;  %v2631_v23 = vadd.s32 64, %v2437_v41 }
0x120a   :  { %2141 = vrot.lane.b32.xlu1 %v2139_v17, %s3914_s7  ;;  %v2469_v17 = vadd.s32 32, %v2439_v10  ;;  %v2470_v20 = vadd.s32 32, %v2440_v16 }
0x120b   :  { %3532 = vrcp.f32 %v2231_v27  ;;  %vm2472_vm1 = vcmp.eq.s32.totalorder %v2442_v12, %v2468_v19  ;;  %v2632_v27 = vadd.s32 64, %v2438_v62  ;;  %vm2635_vm7 = vcmp.eq.s32.totalorder %v2442_v12, %v2631_v23 }
0x120c   :  { %vm2473_vm3 = vcmp.eq.s32.totalorder %v2442_v12, %v2469_v17  ;;  %vm2474_vm4 = vcmp.eq.s32.totalorder %v2442_v12, %v2470_v20  ;;  %vm3425_vm5 = vmpackc.low %vm2472_vm1, %vm2471_vm15  ;;  %vm2444_vm15 = vcmp.eq.s32.totalorder %v2442_v12, %v2438_v62 }
0x120d   :  { %vm3428_vm6 = vmpackc.low %vm2474_vm4, %vm2473_vm3  ;;  %vm2636_vm8 = vcmp.eq.s32.totalorder %v2442_v12, %v2632_v27 }
0x120e   :  { %vm4736_vm9 = vmpackc.low %vm2636_vm8, %vm2635_vm7  ;;  %vm2446_vm8 = vcmp.eq.s32.totalorder %v2442_v12, %v2440_v16 }
0x1215   :  { %v3533_v28 = vpop.eup %3532 }
0x1216   :  { %v2245_v47 = vsub.f32 1.0, %v3533_v28  ;;  %v2251_v49 = vmul.f32 %v3533_v28, %v4654_v13 }
0x1266   :  { %v2236_v44 = vpop.permute.xlu0 %2235 }
0x1267   :  { %v2238_v29 = vmul.f32 %v3533_v28, %v2236_v44  ;;  %v2633_v44 = vadd.s32 64, %v2439_v10 }
0x1269   :  { %2240 = vrot.lane.b32.xlu0 %v2238_v29, %s3914_s7  ;;  %v2634_v29 = vadd.s32 64, %v2440_v16  ;;  %vm2637_vm10 = vcmp.eq.s32.totalorder %v2442_v12, %v2633_v44 }
0x126b   :  { %vm2638_vm11 = vcmp.eq.s32.totalorder %v2442_v12, %v2634_v29 }
0x126d   :  { %2255 = vperm.xlu0 %3466, %v2253_v30  }
0x127c   :  { %v2142_v31 = vpop.permute.xlu1 %2141 }
0x127d   :  { %v2144_v32 = vadd.f32 %v2142_v31, %v2050_v14  ;;  %v2447_v31 = vadd.s32 96, %v2437_v41 }
0x127f   :  { %3534 = vtanh.f32 %v2144_v32  ;;  %v2448_v32 = vadd.s32 96, %v2438_v62  ;;  %vm2451_vm1 = vcmp.eq.s32.totalorder %v2442_v12, %v2447_v31 }
0x1280   :  { %vm2455_vm4 = vmor %vm2443_vm13, %vm2451_vm1 }
0x1281   :  { %vm2452_vm3 = vcmp.eq.s32.totalorder %v2442_v12, %v2448_v32 }
0x1282   :  { %vm2456_vm7 = vmor %vm2444_vm15, %vm2452_vm3 }
0x1289   :  { %v3535_v33 = vpop.eup %3534 }
0x128a   :  { %2148 = vrot.lane.b32.xlu1 %v3535_v33, %s3916_s13  ;;  %v2449_v33 = vadd.s32 96, %v2439_v10 }
0x12db   :  { %v2241_v34 = vpop.permute.xlu0 %2240 }
0x12dc   :  { %v2243_v35 = vadd.f32 %v2241_v34, %v4394_v38  ;;  %v2450_v34 = vadd.s32 96, %v2440_v16 }
0x12de   :  { %3536 = vtanh.f32 %v2243_v35 }
0x12e8   :  { %v3537_v36 = vpop.eup %3536 }
0x12e9   :  { %2247 = vrot.lane.b32.xlu1 %v3537_v36, %s3916_s13 }
0x12ec   :  { %v4700_v48 = vpop.permute.xlu0 %2255 }
0x12ed   :  { %vm4802_vm14 = vcmp.eq.s32.totalorder %v4700_v48, 1  ;;  %vm4820_vm13 = vcmp.eq.s32.totalorder %v4700_v48, 1 }
0x12fc   :  { %v2149_v52 = vpop.permute.xlu1 %2148 }
0x12fd   :  { %v2151_v45 = vmul.f32 %v2149_v52, %v2146_v37 }
0x12ff   :  { %v2153_v53 = vadd.f32 %v2152_v40, %v2151_v45 }
0x1301   :  { %v4696_v46 = vsel %vm1976_vm12, %v2153_v53, %v4643_v61  ;;  %vm4740_vm12 = vmpackc.low %vm2638_vm11, %vm2637_vm10 }
0x1302   :  { %2335 = vrot.lane.b32.xlu0 %v4696_v46, %s3916_s13 }
0x135b   :  { %v2248_v38 = vpop.permute.xlu1 %2247 }
0x135c   :  { %v2250_v50 = vmul.f32 %v2248_v38, %v2245_v47 }
0x135e   :  { %v2252_v51 = vadd.f32 %v2251_v49, %v2250_v50  ;;  %v2739_v50 = vld [vmem:[#allocation10] ss:$0 sm:$0xff] }
0x1360   :  { %v2258_v54 = vsel %vm4802_vm14, %v2252_v51, %v4654_v13 }
0x1361   :  { %2260 = vrot.lane.b32.xlu1 %v2258_v54, %s3916_s13  ;;  %v2740_v54 = vld [vmem:[#allocation9] ss:$0 sm:$0xff] }
0x1374   :  { %v2336_v55 = vpop.permute.xlu0 %2335 }
0x1375   :  { %3231 = vmatmul.mubr.msk.f32.vlgmr.msra.gmra.mrb[24].mxu0 %vm4801_vm2, %v2336_v55 }
0x1376   :  { %3252 = vmatprep.mubr.msk.f32.mxu0 %vm4800_vm0, %v3913_v1 }
0x1385   :  { %480 = vadd.xlane.f32.xlu1 %v479_v58 }
0x13d3   :  { %v4713_v59 = vpop.permute.xlu1 %2260 }
0x13d4   :  { %3220 = vmatmul.mubr.msk.f32.vlgmr.msra.gmra.mrb[20].mxu1 %vm4801_vm2, %v4713_v59 }
0x13d5   :  { %3241 = vmatprep.mubr.msk.f32.mxu1 %vm4800_vm0, %v3913_v1  ;;  %3426 = vmatpush3.bf16.msk.msra.mxu1 %vm3425_vm5, %v3917_v22  ;;  %vm2445_vm5 = vcmp.eq.s32.totalorder %v2442_v12, %v2439_v10  ;;  %vm2454_vm0 = vcmp.eq.s32.totalorder %v2442_v12, %v2450_v34 }
0x13d6   :  { %3427 = vmatprep.subr.bf16.mxu1 %v3911_v0  ;;  %vm2458_vm11 = vmor %vm2446_vm8, %vm2454_vm0  ;;  %vm4821_vm0 = vcmask 261120  }
0x13d7   :  { %vm4824_vm15 = vmmov %vm4821_vm0 }
0x13d9   :  { %3429 = vmatpush3.bf16.msk.msra.mxu1 %vm3428_vm6, %v3917_v22  ;;  %vm2453_vm6 = vcmp.eq.s32.totalorder %v2442_v12, %v2449_v33 }
0x13da   :  { %3436 = vmatprep.subr.bf16.mxu1 %v3911_v0  ;;  %vm2457_vm10 = vmor %vm2445_vm5, %vm2453_vm6 }
0x13db   :  { %vm3434_vm14 = vmpackc.low %vm2458_vm11, %vm2457_vm10 }
0x1448   :  { %v2405_v60 = vpop.f32.mrb[24].mxu0 }
0x1449   :  { %v2406_v61 = vadd.f32 %v4451_v18, %v2405_v60  ;;  %v3232_v2 = vpop.f32.mrb[25].mxu0 }
0x144b   :  { %2417 = vrot.lane.b32.xlu0 %v2406_v61, %s3914_s7 }
0x14a7   :  { %v2330_v39 = vpop.f32.mrb[20].mxu1 }
0x14a8   :  { %v2331_v26 = vadd.f32 %v4469_v24, %v2330_v39  ;;  %v3221_v3 = vpop.f32.mrb[21].mxu1  ;;  %v481_v24 = vpop.xlane.xlu1 %480 }
0x14a9   :  { %v482_v25 = vmul.f32 0.03125, %v481_v24 }
0x14aa   :  { %v2409_v6 = vadd.f32 %v2406_v61, %v2331_v26 }
0x14ab   :  { %v4727_v14 = vsub.f32 %v474_v57, %v482_v25 }
0x14ac   :  { %v2779_v43 = vmul.f32 -1.442695, %v2409_v6 }
0x14ad   :  { %v484_v15 = vmul.f32 %v4727_v14, %v4727_v14 }
0x14ae   :  { %3538 = vpow2.f32 %v2779_v43 }
0x14af   :  { %v485_v63 = vsel %vm4801_vm2, %v484_v15, 0.0  ;;  %vm3431_vm2 = vmpackc.low %vm2456_vm7, %vm2455_vm4 }
0x14b0   :  { %3432 = vmatpush3.bf16.msk.msra.mxu0 %vm3431_vm2, %v3917_v22  ;;  %vm4822_vm2 = vmmov 0  }
0x14b1   :  { %3433 = vmatprep.subr.bf16.mxu0 %v3911_v0 }
0x14b4   :  { %3435 = vmatpush3.bf16.msk.msra.mxu0 %vm3434_vm14, %v3917_v22  ;;  %vm4823_vm14 = vmmov %vm4821_vm0 }
0x14b8   :  { %v3539_v42 = vpop.eup %3538 }
0x14b9   :  { %v2413_v13 = vadd.f32 1.0, %v3539_v42 }
0x14bb   :  { %3540 = vrcp.f32 %v2413_v13 }
0x14bd   :  { %v2418_v11 = vpop.permute.xlu0 %2417 }
0x14c5   :  { %v4722_v4 = vpop.eup %3540 }
0x14c6   :  { %v2420_v21 = vmul.f32 %v4722_v4, %v2418_v11  ;;  %v2427_v35 = vsub.f32 1.0, %v4722_v4  ;;  %v2433_v37 = vmul.f32 %v4722_v4, %v4696_v46 }
0x14c8   :  { %2422 = vrot.lane.b32.xlu0 %v2420_v21, %s3914_s7 }
0x153a   :  { %v2423_v18 = vpop.permute.xlu0 %2422 }
0x153b   :  { %v2425_v5 = vadd.f32 %v2423_v18, %v2331_v26 }
0x153d   :  { %3542 = vtanh.f32 %v2425_v5 }
0x1547   :  { %v3543_v9 = vpop.eup %3542 }
0x1548   :  { %2429 = vrot.lane.b32.xlu0 %v3543_v9, %s3916_s13 }
0x1567   :  { %486 = vadd.xlane.f32.xlu0 %v485_v63 }
0x15ba   :  { %v2430_v36 = vpop.permute.xlu0 %2429 }
0x15bb   :  { %v2432_v52 = vmul.f32 %v2430_v36, %v2427_v35 }
0x15bd   :  { %v2434_v40 = vadd.f32 %v2433_v37, %v2432_v52 }
0x15bf   :  { %v2435_v45 = vsel %vm4820_vm13, %v2434_v40, %v4696_v46 }
0x15c0   :  { %2557 = vrot.lane.b32.xlu1 %v2435_v45, %s3916_s13 }
0x15f4   :  { %v487_v53 = vpop.xlane.xlu0 %486 }
0x15f5   :  { %v488_v47 = vmul.f32 0.03125, %v487_v53 }
0x15f7   :  { %v489_v38 = vadd.f32 1e-05, %v488_v47 }
0x15f9   :  { %3544 = vrsqrt.f32 %v489_v38 }
0x1603   :  { %v3545_v49 = vpop.eup %3544 }
0x1604   :  { %v491_v51 = vmul.f32 %v3545_v49, %v4727_v14 }
0x1606   :  { %v498_v55 = vmul.f32 %v2739_v50, %v491_v51 }
0x1608   :  { %v505_v56 = vadd.f32 %v2740_v54, %v498_v55 }
0x160a   :  { %v507_v57 = vmul.f32 0.70710677, %v505_v56  ;;  %v506_v60 = vmul.f32 0.5, %v505_v56 }
0x160c   :  { %3546 = verf.f32 %v507_v57 }
0x1616   :  { %v3547_v58 = vpop.eup %3546 }
0x1617   :  { %v509_v61 = vadd.f32 1.0, %v3547_v58 }
0x1619   :  { %v510_v48 = vmul.f32 %v509_v61, %v506_v60 }
0x161b   :  { %3242 = vmatmul.mubr.msk.f32.vlgmr.msra.gmra.mrb[22].mxu1 %vm4821_vm0, %v510_v48 }
0x161c   :  { %3438 = vmatpush3.bf16.msk.msra.mxu1 %vm4736_vm9, %v3917_v22  ;;  %3263 = vmatprep.mubr.msk.f32.mxu1 %vm4822_vm2, %v3913_v1 }
0x161d   :  { %3439 = vmatprep.subr.bf16.mxu1 %v3911_v0  ;;  %v2718_v0 = vld [vmem:[%s4825_s24] sm:$0xff] }
0x1620   :  { %3441 = vmatpush3.bf16.msk.msra.mxu1 %vm4740_vm12, %v3917_v22 }
0x1623   :  { %3264 = vmatmul.mubr.msk.f32.vlgmr.msra.gmra.mrb[24].mxu1 %vm4823_vm14, %v4713_v59 }
0x1632   :  { %v2558_v46 = vpop.permute.xlu1 %2557 }
0x1633   :  { %3253 = vmatmul.mubr.msk.f32.vlgmr.msra.gmra.mrb[26].mxu0 %vm4824_vm15, %v2558_v46 }
0x16ee   :  { %v2552_v2 = vpop.f32.mrb[22].mxu1 }
0x16ef   :  { %v3243_v39 = vpop.f32.mrb[23].mxu1 }
0x16f6   :  { %v2713_v26 = vpop.f32.mrb[24].mxu1 }
0x16f7   :  { %v3265_v3 = vpop.f32.mrb[25].mxu1 }
0x1706   :  { %v2627_v6 = vpop.f32.mrb[26].mxu0 }
0x1707   :  { %v2628_v43 = vadd.f32 %v2627_v6, %v2552_v2  ;;  %v3254_v42 = vpop.f32.mrb[27].mxu0 }
0x1709   :  { %v2717_v1 = vadd.f32 %v2713_v26, %v2628_v43 }
0x170b   :  { %v2719_v13 = vadd.f32 %v2718_v0, %v2717_v1 }
0x170d   :  { %2720 = vst [vmem:[%s4796_s22] sm:$0xff] %v2719_v13 }
0x170e   :  { %2725 = vsyncpa [#allocation3], 1 }
0x170f   :  { %2726 = vsyncpa [#allocation5], 1 }
0x1710   :  { %2727 = vsyncpa [#allocation8], 1 }
0x1711   :  { %2728 = vsyncpa [#allocation11], 1 }
0x1712   :  { %2729 = vsyncpa [#allocation14], 1 }
0x1713   :  { %2730 = vsyncpa [#allocation17], 1 }
0x1714   :  { %2731 = vsyncpa [#allocation20], 1 }
0x1715   :  { %2732 = vsyncpa [#allocation23], 1 }

// kernel: remnet_forward.3
= control target key start
LH: loop header
LB: loop body
LE: loop exit
PB: predicated region body
PF: predicated region fallthrough
CT: control target
= control target key end

     0   :  { %s5996_s6 = smov 1   ;;  %s5997_s10 = smov 2   ;;  %s7506_s0 = inlined_call_operand.smem [shape: u32[38], index: -1, kind: input, shape index: {}] }
   0x1   :  { %s6059_s5 = sld [smem:[%s7506_s0]]   ;;  %s5998_s14 = smov 3  }
   0x2   :  { %s6064_s9 = sld [smem:[%s7506_s0 + %s5996_s6]]   ;;  %s5999_s18 = smov 4  }
   0x3   :  { %s6069_s13 = sld [smem:[%s7506_s0 + %s5997_s10]]   ;;  %s6000_s22 = smov 5  }
   0x4   :  { %s6074_s17 = sld [smem:[%s7506_s0 + %s5998_s14]]   ;;  %s6001_s26 = smov 6  }
   0x5   :  { %s6079_s21 = sld [smem:[%s7506_s0 + %s5999_s18]]   ;;  %s6002_s30 = smov 7  }
   0x6   :  { %s6084_s25 = sld [smem:[%s7506_s0 + %s6000_s22]]   ;;  %s6003_s4 = smov 8  }
   0x7   :  { %7534 = sst [smem:[#allocation25_spill]] %s6059_s5  ;;  %s6004_s10 = smov 9  }
   0x8   :  { %7535 = sst [smem:[#allocation26_spill]] %s6064_s9  ;;  %s6005_s15 = smov 10  }
   0x9   :  { %7536 = sst [smem:[#allocation27_spill]] %s6069_s13  ;;  %s6006_s20 = smov 11  }
   0xa   :  { %7537 = sst [smem:[#allocation28_spill]] %s6074_s17  ;;  %s6008_s1 = smov 13  }
   0xb   :  { %7538 = sst [smem:[#allocation29_spill]] %s6079_s21  ;;  %s6009_s7 = smov 14  }
   0xc   :  { %7539 = sst [smem:[#allocation30_spill]] %s6084_s25  ;;  %s6011_s22 = smov 16  }
   0xd   :  { %s6089_s29 = sld [smem:[%s7506_s0 + %s6001_s26]]   ;;  %s6007_s26 = smov 12  }
   0xe   :  { %s6094_s3 = sld [smem:[%s7506_s0 + %s6002_s30]]   ;;  %s6012_s28 = smov 17  }
   0xf   :  { %s6099_s8 = sld [smem:[%s7506_s0 + %s6003_s4]]  }
  0x10   :  { %s6104_s14 = sld [smem:[%s7506_s0 + %s6004_s10]]  }
  0x11   :  { %s6109_s19 = sld [smem:[%s7506_s0 + %s6005_s15]]   ;;  %s6010_s15 = smov 15  }
  0x12   :  { %s6114_s24 = sld [smem:[%s7506_s0 + %s6006_s20]]  }
  0x13   :  { %s6119_s30 = sld [smem:[%s7506_s0 + %s6007_s26]]  }
  0x14   :  { %7540 = sst [smem:[#allocation31_spill]] %s6094_s3 }
  0x15   :  { %s6124_s6 = sld [smem:[%s7506_s0 + %s6008_s1]]  }
  0x16   :  { %7541 = sst [smem:[#allocation32_spill]] %s6104_s14 }
  0x17   :  { %7542 = sst [smem:[#allocation33_spill]] %s6109_s19 }
  0x18   :  { %7543 = sst [smem:[#allocation34_spill]] %s6114_s24 }
  0x19   :  { %7544 = sst [smem:[#allocation35_spill]] %s6119_s30 }
  0x1a   :  { %s6129_s12 = sld [smem:[%s7506_s0 + %s6009_s7]]   ;;  %s6013_s7 = smov 18  }
  0x1b   :  { %7545 = sst [smem:[#allocation36_spill]] %s6124_s6 }
  0x1c   :  { %s6134_s20 = sld [smem:[%s7506_s0 + %s6010_s15]]   ;;  %s6014_s15 = smov 19  }
  0x1d   :  { %s6139_s27 = sld [smem:[%s7506_s0 + %s6011_s22]]   ;;  %s6015_s22 = smov 20  }
  0x1e   :  { %s6144_s4 = sld [smem:[%s7506_s0 + %s6012_s28]]   ;;  %s6016_s28 = smov 21  }
  0x1f   :  { %s6149_s17 = sld [smem:[%s7506_s0 + %s6013_s7]]   ;;  %s6017_s7 = smov 22  }
  0x20   :  { %7546 = sst [smem:[#allocation37_spill]] %s6129_s12 }
  0x21   :  { %s6154_s13 = sld [smem:[%s7506_s0 + %s6014_s15]]   ;;  %s6018_s15 = smov 23  }
  0x22   :  { %7547 = sst [smem:[#allocation38_spill]] %s6134_s20 }
  0x23   :  { %7548 = sst [smem:[#allocation39_spill]] %s6139_s27 }
  0x24   :  { %s6159_s21 = sld [smem:[%s7506_s0 + %s6015_s22]]   ;;  %s6019_s22 = smov 24  }
  0x25   :  { %7549 = sst [smem:[#allocation40_spill]] %s6149_s17 }
  0x26   :  { %s6164_s25 = sld [smem:[%s7506_s0 + %s6016_s28]]   ;;  %s6020_s28 = smov 25  }
  0x27   :  { %7550 = sst [smem:[#allocation41_spill]] %s6154_s13 }
  0x28   :  { %s6169_s9 = sld [smem:[%s7506_s0 + %s6017_s7]]   ;;  %s6021_s7 = smov 26  }
  0x29   :  { %s6174_s13 = sld [smem:[%s7506_s0 + %s6018_s15]]   ;;  %s6022_s15 = smov 27  }
  0x2a   :  { %7551 = sst [smem:[#allocation42_spill]] %s6159_s21 }
  0x2b   :  { %s6179_s21 = sld [smem:[%s7506_s0 + %s6019_s22]]   ;;  %s6023_s22 = smov 28  }
  0x2c   :  { %7552 = sst [smem:[#allocation43_spill]] %s6164_s25 }
  0x2d   :  { %s6184_s25 = sld [smem:[%s7506_s0 + %s6020_s28]]   ;;  %s6024_s28 = smov 29  }
  0x2e   :  { %7553 = sst [smem:[#allocation44_spill]] %s6169_s9 }
  0x2f   :  { %7554 = sst [smem:[#allocation45_spill]] %s6174_s13 }
  0x30   :  { %s6189_s9 = sld [smem:[%s7506_s0 + %s6021_s7]]   ;;  %s6025_s7 = smov 30  }
  0x31   :  { %7555 = sst [smem:[#allocation46_spill]] %s6179_s21 }
  0x32   :  { %s6194_s13 = sld [smem:[%s7506_s0 + %s6022_s15]]   ;;  %s6026_s15 = smov 31  }
  0x33   :  { %7556 = sst [smem:[#allocation47_spill]] %s6184_s25 }
  0x34   :  { %s6199_s21 = sld [smem:[%s7506_s0 + %s6023_s22]]   ;;  %s6027_s22 = smov 32  }
  0x35   :  { %s6204_s25 = sld [smem:[%s7506_s0 + %s6024_s28]]   ;;  %s6028_s28 = smov 33  }
  0x36   :  { %7557 = sst [smem:[#allocation48_spill]] %s6189_s9 }
  0x37   :  { %s6209_s30 = sld [smem:[%s7506_s0 + %s6025_s7]]   ;;  %s6029_s7 = smov 34  }
  0x38   :  { %s6214_s20 = sld [smem:[%s7506_s0 + %s6026_s15]]   ;;  %s6030_s15 = smov 35  }
  0x39   :  { %s6219_s19 = sld [smem:[%s7506_s0 + %s6027_s22]]   ;;  %s6031_s22 = smov 36  }
  0x3a   :  { %7558 = sst [smem:[#allocation49_spill]] %s6199_s21 }
  0x3b   :  { %7559 = sst [smem:[#allocation50_spill]] %s6204_s25 }
  0x3c   :  { %s6224_s25 = sld [smem:[%s7506_s0 + %s6028_s28]]   ;;  %s6032_s28 = smov 37  }
  0x3d   :  { %7560 = sst [smem:[#allocation51_spill]] %s6209_s30 }
  0x3e   :  { %7561 = sst [smem:[#allocation52_spill]] %s6214_s20 }
  0x3f   :  { %7562 = sst [smem:[#allocation53_spill]] %s6219_s19 }
  0x40   :  { %s6229_s30 = sld [smem:[%s7506_s0 + %s6029_s7]]  }
  0x41   :  { %s6234_s20 = sld [smem:[%s7506_s0 + %s6030_s15]]  }
  0x42   :  { %7563 = sst [smem:[#allocation54_spill]] %s6224_s25 }
  0x43   :  { %s6239_s19 = sld [smem:[%s7506_s0 + %s6031_s22]]  }
  0x44   :  { %s6244_s25 = sld [smem:[%s7506_s0 + %s6032_s28]]  }
  0x4a   :  { %7564 = sst [smem:[#allocation55_spill]] %s6244_s25 }
  0x4b   :  { %80 = vsyncpa [#allocation3], 0 }
  0x4c   :  { %82 = vsyncpa [#allocation3 + $0x1], 0 }
  0x4d   :  { %83 = vsyncpa [#allocation5], 0 }
  0x4e   :  { %85 = vsyncpa [#allocation5 + $0x1], 0 }
  0x4f   :  { %86 = vsyncpa [#allocation8], 0 }
  0x50   :  { %88 = vsyncpa [#allocation8 + $0x1], 0 }
  0x51   :  { %89 = vsyncpa [#allocation11], 0 }
  0x52   :  { %91 = vsyncpa [#allocation11 + $0x1], 0 }
  0x53   :  { %92 = vsyncpa [#allocation14], 0 }
  0x54   :  { %94 = vsyncpa [#allocation14 + $0x1], 0 }
  0x55   :  { %95 = vsyncpa [#allocation17], 0 }
  0x56   :  { %97 = vsyncpa [#allocation17 + $0x1], 0  ;;  %s6246_s7 = smov 0   ;;  %s6248_s10 = smov 0  }
  0x57   :  { %s6250_s11 = smov 0   ;;  %s6252_s0 = smov 0  }
  0x58 LB: > { %s7565_s21 = sld [smem:[#allocation49_spill]]  ;;  %s7566_s17 = sld [smem:[#allocation40_spill]]  ;;  %s5994_s0 = sphi %s6252_s0, %s7625_s0   ;;  %s5990_s11 = sphi %s6250_s11, %s7627_s11   ;;  %s5986_s10 = sphi %s6248_s10, %s7629_s10   ;;  %s5982_s7 = sphi %s6246_s7, %s7628_s7  }
  0x59   : > { %s7567_s27 = sld [smem:[#allocation39_spill]]  ;;  %7569 = sst [smem:[#allocation56_spill]] %s5990_s11 }
  0x5a   : > { %s7568_s3 = sld [smem:[#allocation31_spill]]  ;;  %s6265_s15 = sadd.s32 4294967295, %s5994_s0  }
  0x5b   : > { %7570 = sst [smem:[#allocation57_spill]] %s6265_s15  ;;  %s6268_s16 = sadd.s32 1, %s5994_s0  }
  0x5c   : > { %7571 = sst [smem:[#allocation58_spill]] %s6268_s16  ;;  %s258_s18 = ssub.s32 %s5994_s0, %s6268_s16 }
  0x5d   : > { %s261_s22 = sadd.s32 1, %s5990_s11  ;;  %p259_p0 = scmp.eq.s32.totalorder %s258_s18, 0 }
  0x5e   : > { %p268_p1 = scmp.ne.s32.totalorder %s5990_s11, %s5986_s10  ;;  %p269_p2 = scmp.eq.s32.totalorder %s5994_s0, 0 }
  0x5f   : > { %p274_p3 = scmp.ne.s32.totalorder %s5986_s10, %s5982_s7  ;;  %p275_p5 = scmp.eq.s32.totalorder %s6265_s15, 0 }
  0x60   : > { %s6278_s23 = scalar_select %p259_p0, %s5990_s11, %s261_s22  }
  0x61   : > { %p270_p4 = por %p269_p2, %p268_p1  ;;  %p5498_p6 = scmp.lt.s32.totalorder %s5994_s0, 2 }
  0x62   : > { %7572 = sst [smem:[#allocation59_spill]] %s6278_s23  ;;  %p6282_p7 = por %p275_p5, %p274_p3 }
  0x63   : > { %s6287_s28 = sand.u32 1, %s5990_s11   ;;  %p6289_p8 = pnand %p5498_p6, %p270_p4 }
  0x64   : > { %s7573_s26 = scalar_select %p6282_p7, 1, 0 }
  0x65   : > { %s6294_s2 = sand.u32 1, %s5994_s0   ;;  %s7512_s7 = sshll.u32 %s6287_s28, 7 }
  0x66   : > { %7574 = sst [smem:[#allocation60_spill]] %s7573_s26  ;;  %s7510_s18 = sshll.u32 %s5994_s0, 11 }
  0x67   : > { %s6301_s22 = scalar_lea.hbm %s7568_s3, %s7510_s18  ;;  %s1162_s23 = scalar_lea.vmem [#allocation4], %s7512_s7 }
  0x68   : > { %s1169_s11 = sshll.u32 %s1162_s23, 4  ;;  %s5610_s25 = scalar_lea.hbm %s6301_s22, 2048  ;;  %s6306_s11 = int_to_ptr.vmem [resolvable:$true] %s1169_s11 }
  0x69   : > { %p5611_p11 = scmp.ne.s32.totalorder %s6301_s22, %s5610_s25  ;;  %p6314_p12 = pneg %p6289_p8 }
  0x6a   : > { %s5615_s18 = scalar_lea.hbm %s7568_s3, 4096  ;;  %p5616_p1 = scmp.lt.u32.totalorder %s6301_s22, %s7568_s3 }
  0x6b   : > { %p5613_p13 = pnand %p6314_p12, %p5611_p11  ;;  %p5617_p2 = scmp.lt.u32.totalorder %s5615_s18, %s5610_s25 }
  0x6c   : > { %p5619_p4 = scmp.lt.u32.totalorder %s5610_s25, %s6301_s22 }
  0x6d   : > { %p5614_p0 = pneg %p5613_p13  ;;  %p5618_p3 = por %p5617_p2, %p5616_p1 }
  0x6f   : > { %p5620_p5 = por %p5619_p4, %p5618_p3 }
  0x71   : > { %p5621_p6 = pnand %p5620_p5, %p5614_p0 }
  0x73   : > { %5624 = shalt.err (!%p5621_p6)
}
  0x74   : > { %s5625_s23 = scalar_lea.vmem %s6306_s11, 2048  ;;  %s6033_s7 = smov [#allocation4]  }
  0x75   : > { %p5626_p9 = scmp.ne.s32.totalorder %s6306_s11, %s5625_s23  ;;  %s5630_s16 = sshll.u32 %s6033_s7, 4  ;;  %s5631_s16 = int_to_ptr.vmem [resolvable:$false] %s5630_s16 }
  0x76   : > { %s5632_s9 = scalar_lea.vmem %s5631_s16, 4096  ;;  %p5633_p11 = scmp.lt.s32.totalorder %s6306_s11, %s5631_s16 }
  0x77   : > { %p5628_p10 = pnand %p5626_p9, %p6314_p12  ;;  %p5634_p13 = scmp.lt.s32.totalorder %s5632_s9, %s5625_s23 }
  0x79   : > { %p5629_p7 = pneg %p5628_p10  ;;  %p5635_p1 = por %p5634_p13, %p5633_p11 }
  0x7b   : > { %p5636_p2 = pnand %p5635_p1, %p5629_p7 }
  0x7d   : > { %5639 = shalt.err (!%p5636_p2)
}
  0x7e   : > { %s7514_s25 = smov 128   ;;  %s7516_s9 = smov 8  }
  0x7f   : > { %s7577_s16 = scalar_lea.sflag [#allocation5], %s6294_s2  ;;  %p7578_p7 = scmp.lt.s32.totalorder %s5994_s0, 3 }
  0x80   : > { %5470 = dma.hbm_to_vmem [thread:$0]  (!%p6289_p8), %s6301_s22, 2048, %s6306_s11, %s7577_s16, %s7514_s25, %s7514_s25, %s7516_s9  }
  0x81   : > { %p7579_p9 = scmp.ge.s32.totalorder %s5994_s0, 1  ;;  %s7518_s18 = sshll.u32 %s6287_s28, 9 }
  0x82   : > { %s4573_s23 = sshll.u32 %s5994_s0, 13  ;;  %s1253_s24 = scalar_lea.vmem [#allocation7], %s7518_s18 }
  0x83   : > { %p6342_p10 = pnand %p7579_p9, %p7578_p7  ;;  %s6351_s3 = scalar_lea.hbm %s7567_s27, %s4573_s23 }
  0x84   : > { %s1260_s12 = sshll.u32 %s1253_s24, 4  ;;  %s7521_s11 = scalar_lea.sflag [#allocation8], %s6294_s2  ;;  %s6355_s12 = int_to_ptr.vmem [resolvable:$true] %s1260_s12 }
  0x85   : > { %s7580_s7 = scalar_select %p6342_p10, 1, 0 }
  0x86   : > { %s5640_s22 = scalar_lea.hbm %s6351_s3, 8192  ;;  %s5645_s16 = scalar_lea.hbm %s7567_s27, 16384 }
  0x87   : > { %p5641_p0 = scmp.ne.s32.totalorder %s6351_s3, %s5640_s22  ;;  %p5646_p5 = scmp.lt.u32.totalorder %s6351_s3, %s7567_s27 }
  0x88   : > { %p5647_p6 = scmp.lt.u32.totalorder %s5645_s16, %s5640_s22  ;;  %p5649_p13 = scmp.lt.u32.totalorder %s5640_s22, %s6351_s3 }
  0x89   : > { %p5643_p3 = pnand %p5641_p0, %p6314_p12 }
  0x8a   : > { %p5648_p11 = por %p5647_p6, %p5646_p5 }
  0x8b   : > { %p5644_p4 = pneg %p5643_p3 }
  0x8c   : > { %p5650_p1 = por %p5649_p13, %p5648_p11 }
  0x8e   : > { %p5651_p2 = pnand %p5650_p1, %p5644_p4 }
  0x90   : > { %5654 = shalt.err (!%p5651_p2)
}
  0x91   : > { %s5655_s24 = scalar_lea.vmem %s6355_s12, 8192  ;;  %s6036_s25 = smov [#allocation7]  }
  0x92   : > { %p5656_p7 = scmp.ne.s32.totalorder %s6355_s12, %s5655_s24  ;;  %s5660_s9 = sshll.u32 %s6036_s25, 4  ;;  %s5661_s9 = int_to_ptr.vmem [resolvable:$false] %s5660_s9 }
  0x93   : > { %s5662_s18 = scalar_lea.vmem %s5661_s9, 16384  ;;  %p5663_p0 = scmp.lt.s32.totalorder %s6355_s12, %s5661_s9 }
  0x94   : > { %p5658_p9 = pnand %p5656_p7, %p6314_p12  ;;  %p5664_p3 = scmp.lt.s32.totalorder %s5662_s18, %s5655_s24 }
  0x96   : > { %p5659_p10 = pneg %p5658_p9  ;;  %p5665_p5 = por %p5664_p3, %p5663_p0 }
  0x98   : > { %p5666_p6 = pnand %p5665_p5, %p5659_p10 }
  0x9a   : > { %5669 = shalt.err (!%p5666_p6)
}
  0x9b   : > { %s7522_s22 = smov 256   ;;  %s7531_s25 = smov 16  }
  0x9c   : > { %5476 = dma.hbm_to_vmem [thread:$0]  (!%p6289_p8), %s6351_s3, 8192, %s6355_s12, %s7521_s11, %s7522_s22, %s7522_s22, %s7531_s25  }
  0x9d   : > { %s6383_s9 = scalar_lea.hbm %s6144_s4, %s4573_s23  ;;  %s7581_s18 = sshll.u32 %s6287_s28, 9 }
  0x9e   : > { %s1274_s16 = scalar_lea.vmem [#allocation9], %s7581_s18  ;;  %s6388_s27 = sshll.u32 %s6287_s28, 8 }
  0x9f   : > { %s1281_s24 = sshll.u32 %s1274_s16, 4  ;;  %s6393_s14 = sshll.u32 %s5994_s0, 12  ;;  %s6390_s24 = int_to_ptr.vmem [resolvable:$true] %s1281_s24 }
  0xa0   : > { %s6397_s5 = scalar_lea.hbm %s7566_s17, %s6393_s14  ;;  %s1295_s3 = scalar_lea.vmem [#allocation10], %s6388_s27 }
  0xa1   : > { %s1302_s12 = sshll.u32 %s1295_s3, 4  ;;  %s5670_s18 = scalar_lea.hbm %s6397_s5, 4096  ;;  %s6400_s12 = int_to_ptr.vmem [resolvable:$true] %s1302_s12 }
  0xa2   : > { %p5671_p10 = scmp.ne.s32.totalorder %s6397_s5, %s5670_s18  ;;  %s5675_s16 = scalar_lea.hbm %s7566_s17, 8192 }
  0xa3   : > { %p5676_p13 = scmp.lt.u32.totalorder %s6397_s5, %s7566_s17  ;;  %p5677_p1 = scmp.lt.u32.totalorder %s5675_s16, %s5670_s18 }
  0xa4   : > { %p5673_p4 = pnand %p5671_p10, %p6314_p12  ;;  %p5679_p7 = scmp.lt.u32.totalorder %s5670_s18, %s6397_s5 }
  0xa5   : > { %p5678_p2 = por %p5677_p1, %p5676_p13 }
  0xa6   : > { %p5674_p11 = pneg %p5673_p4 }
  0xa7   : > { %p5680_p9 = por %p5679_p7, %p5678_p2 }
  0xa9   : > { %p5681_p0 = pnand %p5680_p9, %p5674_p11 }
  0xab   : > { %5684 = shalt.err (!%p5681_p0)
}
  0xac   : > { %s5685_s3 = scalar_lea.vmem %s6400_s12, 4096  ;;  %s6039_s11 = smov [#allocation10]  }
  0xad   : > { %p5686_p3 = scmp.ne.s32.totalorder %s6400_s12, %s5685_s3  ;;  %s5690_s23 = sshll.u32 %s6039_s11, 4  ;;  %s5691_s23 = int_to_ptr.vmem [resolvable:$false] %s5690_s23 }
  0xae   : > { %s5692_s22 = scalar_lea.vmem %s5691_s23, 8192  ;;  %p5693_p10 = scmp.lt.s32.totalorder %s6400_s12, %s5691_s23 }
  0xaf   : > { %p5688_p5 = pnand %p5686_p3, %p6314_p12  ;;  %p5694_p4 = scmp.lt.s32.totalorder %s5692_s22, %s5685_s3 }
  0xb1   : > { %p5689_p6 = pneg %p5688_p5  ;;  %p5695_p13 = por %p5694_p4, %p5693_p10 }
  0xb3   : > { %p5696_p1 = pnand %p5695_p13, %p5689_p6 }
  0xb5   : > { %5699 = shalt.err (!%p5696_p1)
}
  0xb6   : > { %s7582_s18 = smov 256   ;;  %s7583_s16 = scalar_lea.sflag [#allocation11], %s6294_s2 }
  0xb7   : > { %5482 = dma.hbm_to_vmem [thread:$0]  (!%p6289_p8), %s6397_s5, 4096, %s6400_s12, %s7583_s16, %s7582_s18, %s7582_s18, %s7531_s25  }
  0xb8   : > { %s6427_s11 = scalar_lea.hbm %s7565_s21, %s6393_s14  ;;  %s1394_s22 = scalar_lea.vmem [#allocation13], %s6388_s27 }
  0xb9   : > { %s1401_s23 = sshll.u32 %s1394_s22, 4  ;;  %s7530_s3 = scalar_lea.sflag [#allocation14], %s6294_s2  ;;  %s6430_s23 = int_to_ptr.vmem [resolvable:$true] %s1401_s23 }
  0xba   : > { %s5700_s17 = scalar_lea.hbm %s6427_s11, 4096  ;;  %s5705_s15 = scalar_lea.hbm %s7565_s21, 8192 }
  0xbb   : > { %p5701_p11 = scmp.ne.s32.totalorder %s6427_s11, %s5700_s17  ;;  %p5706_p9 = scmp.lt.u32.totalorder %s6427_s11, %s7565_s21 }
  0xbc   : > { %p5707_p0 = scmp.lt.u32.totalorder %s5705_s15, %s5700_s17  ;;  %p5709_p5 = scmp.lt.u32.totalorder %s5700_s17, %s6427_s11 }
  0xbd   : > { %p5703_p2 = pnand %p5701_p11, %p6314_p12 }
  0xbe   : > { %p5708_p3 = por %p5707_p0, %p5706_p9 }
  0xbf   : > { %p5704_p7 = pneg %p5703_p2 }
  0xc0   : > { %p5710_p6 = por %p5709_p5, %p5708_p3 }
  0xc2   : > { %p5711_p10 = pnand %p5710_p6, %p5704_p7 }
  0xc4   : > { %5714 = shalt.err (!%p5711_p10)
}
  0xc5   : > { %s5715_s5 = scalar_lea.vmem %s6430_s23, 4096  ;;  %s6040_s12 = smov [#allocation13]  }
  0xc6   : > { %p5716_p4 = scmp.ne.s32.totalorder %s6430_s23, %s5715_s5  ;;  %s5720_s16 = sshll.u32 %s6040_s12, 4  ;;  %s5721_s16 = int_to_ptr.vmem [resolvable:$false] %s5720_s16 }
  0xc7   : > { %s5722_s22 = scalar_lea.vmem %s5721_s16, 8192  ;;  %p5723_p11 = scmp.lt.s32.totalorder %s6430_s23, %s5721_s16 }
  0xc8   : > { %p5718_p13 = pnand %p5716_p4, %p6314_p12  ;;  %p5724_p2 = scmp.lt.s32.totalorder %s5722_s22, %s5715_s5 }
  0xca   : > { %p5719_p1 = pneg %p5718_p13  ;;  %p5725_p9 = por %p5724_p2, %p5723_p11 }
  0xcc   : > { %p5726_p0 = pnand %p5725_p9, %p5719_p1 }
  0xce   : > { %5729 = shalt.err (!%p5726_p0)
}
  0xcf   : > { %5488 = dma.hbm_to_vmem [thread:$0]  (!%p6289_p8), %s6427_s11, 4096, %s6430_s23, %s7530_s3, %s7582_s18, %s7582_s18, %s7531_s25  }
  0xd0   : > { %s7584_s17 = sshll.u32 %s5994_s0, 11  ;;  %s7585_s5 = sshll.u32 %s6287_s28, 7 }
  0xd1   : > { %s6458_s15 = scalar_lea.hbm %s6234_s20, %s7584_s17  ;;  %s1466_s12 = scalar_lea.vmem [#allocation16], %s7585_s5 }
  0xd2   : > { %s1473_s16 = sshll.u32 %s1466_s12, 4  ;;  %s7533_s22 = scalar_lea.sflag [#allocation17], %s6294_s2  ;;  %s6462_s16 = int_to_ptr.vmem [resolvable:$true] %s1473_s16 }
  0xd3   : > { %s5730_s21 = scalar_lea.hbm %s6458_s15, 2048  ;;  %s5735_s26 = scalar_lea.hbm %s6234_s20, 4096 }
  0xd4   : > { %p5731_p7 = scmp.ne.s32.totalorder %s6458_s15, %s5730_s21  ;;  %p5736_p6 = scmp.lt.u32.totalorder %s6458_s15, %s6234_s20 }
  0xd5   : > { %p5737_p10 = scmp.lt.u32.totalorder %s5735_s26, %s5730_s21  ;;  %p5739_p13 = scmp.lt.u32.totalorder %s5730_s21, %s6458_s15 }
  0xd6   : > { %p5733_p3 = pnand %p5731_p7, %p6314_p12 }
  0xd7   : > { %p5738_p4 = por %p5737_p10, %p5736_p6 }
  0xd8   : > { %p5734_p5 = pneg %p5733_p3 }
  0xd9   : > { %p5740_p1 = por %p5739_p13, %p5738_p4 }
  0xdb   : > { %p5741_p11 = pnand %p5740_p1, %p5734_p5 }
  0xdd   : > { %5744 = shalt.err (!%p5741_p11)
}
  0xde   : > { %s5745_s11 = scalar_lea.vmem %s6462_s16, 2048  ;;  %s6041_s23 = smov [#allocation16]  }
  0xdf   : > { %p5746_p2 = scmp.ne.s32.totalorder %s6462_s16, %s5745_s11  ;;  %s5750_s17 = sshll.u32 %s6041_s23, 4  ;;  %s5751_s17 = int_to_ptr.vmem [resolvable:$false] %s5750_s17 }
  0xe0   : > { %s5752_s5 = scalar_lea.vmem %s5751_s17, 4096  ;;  %p5753_p7 = scmp.lt.s32.totalorder %s6462_s16, %s5751_s17 }
  0xe1   : > { %p5748_p9 = pnand %p5746_p2, %p6314_p12  ;;  %p5754_p3 = scmp.lt.s32.totalorder %s5752_s5, %s5745_s11 }
  0xe3   : > { %p5749_p0 = pneg %p5748_p9  ;;  %p5755_p6 = por %p5754_p3, %p5753_p7 }
  0xe5   : > { %p5756_p10 = pnand %p5755_p6, %p5749_p0 }
  0xe7   : > { %5759 = shalt.err (!%p5756_p10)
}
  0xe8   : > { %s7586_s21 = smov 8   ;;  %s7587_s26 = smov 128  }
  0xe9   : > { %5494 = dma.hbm_to_vmem [thread:$0]  (!%p6289_p8), %s6458_s15, 2048, %s6462_s16, %s7533_s22, %s7587_s26, %s7587_s26, %s7586_s21  }
  0xea   : > { %s6489_s12 = scalar_lea.hbm %s6089_s29, %s6393_s14  ;;  %s1141_s11 = scalar_lea.vmem [#allocation2], %s6388_s27 }
  0xeb   : > { %s1148_s23 = sshll.u32 %s1141_s11, 4  ;;  %s6496_s17 = scalar_lea.hbm %s6099_s8, %s6393_s14  ;;  %s6492_s23 = int_to_ptr.vmem [resolvable:$true] %s1148_s23 }
  0xec   : > { %s1138_s5 = scalar_lea.sflag [#allocation3], %s6287_s28  ;;  %s5760_s3 = scalar_lea.hbm %s6489_s12, 4096 }
  0xed   : > { %p5761_p5 = scmp.ne.s32.totalorder %s6489_s12, %s5760_s3  ;;  %s5765_s25 = scalar_lea.hbm %s6089_s29, 8192 }
  0xee   : > { %p5766_p1 = scmp.lt.u32.totalorder %s6489_s12, %s6089_s29  ;;  %p5767_p11 = scmp.lt.u32.totalorder %s5765_s25, %s5760_s3 }
  0xef   : > { %p5763_p4 = pnand %p5761_p5, %p6314_p12  ;;  %p5769_p9 = scmp.lt.u32.totalorder %s5760_s3, %s6489_s12 }
  0xf0   : > { %p5768_p2 = por %p5767_p11, %p5766_p1 }
  0xf1   : > { %p5764_p13 = pneg %p5763_p4 }
  0xf2   : > { %p5770_p0 = por %p5769_p9, %p5768_p2 }
  0xf4   : > { %p5771_p7 = pnand %p5770_p0, %p5764_p13 }
  0xf6   : > { %5774 = shalt.err (!%p5771_p7)
}
  0xf7   : > { %s5775_s15 = scalar_lea.vmem %s6492_s23, 4096  ;;  %s6042_s16 = smov [#allocation2]  }
  0xf8   : > { %p5776_p3 = scmp.ne.s32.totalorder %s6492_s23, %s5775_s15  ;;  %s5780_s11 = sshll.u32 %s6042_s16, 4  ;;  %s5781_s11 = int_to_ptr.vmem [resolvable:$false] %s5780_s11 }
  0xf9   : > { %s5782_s22 = scalar_lea.vmem %s5781_s11, 8192  ;;  %p5783_p5 = scmp.lt.s32.totalorder %s6492_s23, %s5781_s11 }
  0xfa   : > { %p5778_p6 = pnand %p5776_p3, %p6314_p12  ;;  %p5784_p4 = scmp.lt.s32.totalorder %s5782_s22, %s5775_s15 }
  0xfc   : > { %p5779_p10 = pneg %p5778_p6  ;;  %p5785_p1 = por %p5784_p4, %p5783_p5 }
  0xfe   : > { %p5786_p11 = pnand %p5785_p1, %p5779_p10 }
 0x100   : > { %5789 = shalt.err (!%p5786_p11)
}
 0x101   : > { %5467 = dma.hbm_to_vmem [thread:$0]  (!%p6289_p8), %s6489_s12, 4096, %s6492_s23, %s1138_s5, %s7587_s26, %s7587_s26, %s7586_s21  }
 0x102   : > { %s1183_s25 = scalar_lea.vmem [#allocation6], %s6388_s27  ;;  %s5437_s22 = smul.u32 768, %s6287_s28 }
 0x103   : > { %s1190_s3 = sshll.u32 %s1183_s25, 4  ;;  %s5438_s15 = smul.u32 12288, %s5994_s0  ;;  %s6523_s3 = int_to_ptr.vmem [resolvable:$true] %s1190_s3 }
 0x104   : > { %s5790_s16 = scalar_lea.hbm %s6496_s17, 4096  ;;  %s5795_s11 = scalar_lea.hbm %s6099_s8, 8192 }
 0x105   : > { %p5791_p13 = scmp.ne.s32.totalorder %s6496_s17, %s5790_s16  ;;  %p5796_p0 = scmp.lt.u32.totalorder %s6496_s17, %s6099_s8 }
 0x106   : > { %p5797_p7 = scmp.lt.u32.totalorder %s5795_s11, %s5790_s16  ;;  %p5799_p6 = scmp.lt.u32.totalorder %s5790_s16, %s6496_s17 }
 0x107   : > { %p5793_p2 = pnand %p5791_p13, %p6314_p12 }
 0x108   : > { %p5798_p3 = por %p5797_p7, %p5796_p0 }
 0x109   : > { %p5794_p9 = pneg %p5793_p2 }
 0x10a   : > { %p5800_p10 = por %p5799_p6, %p5798_p3 }
 0x10c   : > { %p5801_p5 = pnand %p5800_p10, %p5794_p9 }
 0x10e   : > { %5804 = shalt.err (!%p5801_p5)
}
 0x10f   : > { %s5805_s12 = scalar_lea.vmem %s6523_s3, 4096  ;;  %s6043_s23 = smov [#allocation6]  }
 0x110   : > { %p5806_p4 = scmp.ne.s32.totalorder %s6523_s3, %s5805_s12  ;;  %s5810_s5 = sshll.u32 %s6043_s23, 4  ;;  %s5811_s5 = int_to_ptr.vmem [resolvable:$false] %s5810_s5 }
 0x111   : > { %s5812_s25 = scalar_lea.vmem %s5811_s5, 8192  ;;  %p5813_p13 = scmp.lt.s32.totalorder %s6523_s3, %s5811_s5 }
 0x112   : > { %p5808_p1 = pnand %p5806_p4, %p6314_p12  ;;  %p5814_p2 = scmp.lt.s32.totalorder %s5812_s25, %s5805_s12 }
 0x114   : > { %p5809_p11 = pneg %p5808_p1  ;;  %p5815_p0 = por %p5814_p2, %p5813_p13 }
 0x116   : > { %p5816_p7 = pnand %p5815_p0, %p5809_p11 }
 0x118   : > { %5819 = shalt.err (!%p5816_p7)
}
 0x119   : > { %s7588_s16 = scalar_lea.sflag [#allocation5], %s6294_s2  ;;  %s5820_s11 = scalar_lea.hbm %s6383_s9, 8192 }
 0x11a   : > { %5473 = dma.hbm_to_vmem [thread:$0]  (!%p6289_p8), %s6496_s17, 4096, %s6523_s3, %s7588_s16, %s7587_s26, %s7587_s26, %s7586_s21  }
 0x11b   : > { %p5821_p9 = scmp.ne.s32.totalorder %s6383_s9, %s5820_s11  ;;  %s5825_s12 = scalar_lea.hbm %s6144_s4, 16384 }
 0x11c   : > { %p5826_p10 = scmp.lt.u32.totalorder %s6383_s9, %s6144_s4  ;;  %p5827_p5 = scmp.lt.u32.totalorder %s5825_s12, %s5820_s11 }
 0x11d   : > { %p5823_p3 = pnand %p5821_p9, %p6314_p12  ;;  %p5829_p1 = scmp.lt.u32.totalorder %s5820_s11, %s6383_s9 }
 0x11e   : > { %p5828_p4 = por %p5827_p5, %p5826_p10 }
 0x11f   : > { %p5824_p6 = pneg %p5823_p3 }
 0x120   : > { %p5830_p11 = por %p5829_p1, %p5828_p4 }
 0x122   : > { %p5831_p13 = pnand %p5830_p11, %p5824_p6 }
 0x124   : > { %5834 = shalt.err (!%p5831_p13)
}
 0x125   : > { %s5835_s23 = scalar_lea.vmem %s6390_s24, 8192  ;;  %s6044_s17 = smov [#allocation9]  }
 0x126   : > { %p5836_p2 = scmp.ne.s32.totalorder %s6390_s24, %s5835_s23  ;;  %s5840_s3 = sshll.u32 %s6044_s17, 4  ;;  %s5841_s3 = int_to_ptr.vmem [resolvable:$false] %s5840_s3 }
 0x127   : > { %s5842_s5 = scalar_lea.vmem %s5841_s3, 16384  ;;  %p5843_p9 = scmp.lt.s32.totalorder %s6390_s24, %s5841_s3 }
 0x128   : > { %p5838_p0 = pnand %p5836_p2, %p6314_p12  ;;  %p5844_p3 = scmp.lt.s32.totalorder %s5842_s5, %s5835_s23 }
 0x12a   : > { %p5839_p7 = pneg %p5838_p0  ;;  %p5845_p10 = por %p5844_p3, %p5843_p9 }
 0x12c   : > { %p5846_p5 = pnand %p5845_p10, %p5839_p7 }
 0x12e   : > { %5849 = shalt.err (!%p5846_p5)
}
 0x12f   : > { %s7589_s25 = smov 16   ;;  %s7590_s16 = scalar_lea.sflag [#allocation8], %s6294_s2 }
 0x130   : > { %5479 = dma.hbm_to_vmem [thread:$0]  (!%p6289_p8), %s6383_s9, 8192, %s6390_s24, %s7590_s16, %s7582_s18, %s7582_s18, %s7589_s25  }
 0x131   : > { %s6573_s11 = scalar_lea.hbm %s6194_s13, %s5438_s15  ;;  %s1373_s12 = scalar_lea.vmem [#allocation12], %s5437_s22 }
 0x132   : > { %s1380_s23 = sshll.u32 %s1373_s12, 4  ;;  %s6581_s17 = scalar_lea.hbm %s6229_s30, %s6393_s14  ;;  %s6577_s23 = int_to_ptr.vmem [resolvable:$true] %s1380_s23 }
 0x133   : > { %s5850_s3 = scalar_lea.hbm %s6573_s11, 12288  ;;  %s5855_s9 = scalar_lea.hbm %s6194_s13, 24576 }
 0x134   : > { %p5851_p6 = scmp.ne.s32.totalorder %s6573_s11, %s5850_s3  ;;  %p5856_p11 = scmp.lt.u32.totalorder %s6573_s11, %s6194_s13 }
 0x135   : > { %p5857_p13 = scmp.lt.u32.totalorder %s5855_s9, %s5850_s3  ;;  %p5859_p0 = scmp.lt.u32.totalorder %s5850_s3, %s6573_s11 }
 0x136   : > { %p5853_p4 = pnand %p5851_p6, %p6314_p12 }
 0x137   : > { %p5858_p2 = por %p5857_p13, %p5856_p11 }
 0x138   : > { %p5854_p1 = pneg %p5853_p4 }
 0x139   : > { %p5860_p7 = por %p5859_p0, %p5858_p2 }
 0x13b   : > { %p5861_p9 = pnand %p5860_p7, %p5854_p1 }
 0x13d   : > { %5864 = shalt.err (!%p5861_p9)
}
 0x13e   : > { %s5865_s0 = scalar_lea.vmem %s6577_s23, 12288  ;;  %s6045_s28 = smov [#allocation12]  }
 0x13f   : > { %p5866_p3 = scmp.ne.s32.totalorder %s6577_s23, %s5865_s0  ;;  %s5870_s24 = sshll.u32 %s6045_s28, 4  ;;  %s5871_s24 = int_to_ptr.vmem [resolvable:$false] %s5870_s24 }
 0x140   : > { %s5872_s22 = scalar_lea.vmem %s5871_s24, 24576  ;;  %p5873_p6 = scmp.lt.s32.totalorder %s6577_s23, %s5871_s24 }
 0x141   : > { %p5868_p10 = pnand %p5866_p3, %p6314_p12  ;;  %p5874_p4 = scmp.lt.s32.totalorder %s5872_s22, %s5865_s0 }
 0x143   : > { %p5869_p5 = pneg %p5868_p10  ;;  %p5875_p11 = por %p5874_p4, %p5873_p6 }
 0x145   : > { %p5876_p13 = pnand %p5875_p11, %p5869_p5 }
 0x147   : > { %5879 = shalt.err (!%p5876_p13)
}
 0x148   : > { %s7591_s15 = scalar_lea.sflag [#allocation11], %s6294_s2  ;;  %s1445_s5 = scalar_lea.vmem [#allocation15], %s6388_s27 }
 0x149   : > { %5485 = dma.hbm_to_vmem [thread:$0]  (!%p6289_p8), %s6573_s11, 12288, %s6577_s23, %s7591_s15, %s7582_s18, %s7582_s18, %s7589_s25  }
 0x14a   : > { %s1452_s16 = sshll.u32 %s1445_s5, 4  ;;  %s6610_s12 = scalar_lea.hbm %s6239_s19, %s6393_s14  ;;  %s6606_s16 = int_to_ptr.vmem [resolvable:$true] %s1452_s16 }
 0x14b   : > { %s5880_s3 = scalar_lea.hbm %s6581_s17, 4096  ;;  %s5885_s9 = scalar_lea.hbm %s6229_s30, 8192 }
 0x14c   : > { %p5881_p1 = scmp.ne.s32.totalorder %s6581_s17, %s5880_s3  ;;  %p5886_p7 = scmp.lt.u32.totalorder %s6581_s17, %s6229_s30 }
 0x14d   : > { %p5887_p9 = scmp.lt.u32.totalorder %s5885_s9, %s5880_s3  ;;  %p5889_p10 = scmp.lt.u32.totalorder %s5880_s3, %s6581_s17 }
 0x14e   : > { %p5883_p2 = pnand %p5881_p1, %p6314_p12 }
 0x14f   : > { %p5888_p3 = por %p5887_p9, %p5886_p7 }
 0x150   : > { %p5884_p0 = pneg %p5883_p2 }
 0x151   : > { %p5890_p5 = por %p5889_p10, %p5888_p3 }
 0x153   : > { %p5891_p6 = pnand %p5890_p5, %p5884_p0 }
 0x155   : > { %5894 = shalt.err (!%p5891_p6)
}
 0x156   : > { %s5895_s18 = scalar_lea.vmem %s6606_s16, 4096  ;;  %s6046_s14 = smov [#allocation15]  }
 0x157   : > { %p5896_p4 = scmp.ne.s32.totalorder %s6606_s16, %s5895_s18  ;;  %s5900_s25 = sshll.u32 %s6046_s14, 4  ;;  %s5901_s25 = int_to_ptr.vmem [resolvable:$false] %s5900_s25 }
 0x158   : > { %s5902_s11 = scalar_lea.vmem %s5901_s25, 8192  ;;  %p5903_p1 = scmp.lt.s32.totalorder %s6606_s16, %s5901_s25 }
 0x159   : > { %p5898_p11 = pnand %p5896_p4, %p6314_p12  ;;  %p5904_p2 = scmp.lt.s32.totalorder %s5902_s11, %s5895_s18 }
 0x15b   : > { %p5899_p13 = pneg %p5898_p11  ;;  %p5905_p7 = por %p5904_p2, %p5903_p1 }
 0x15d   : > { %p5906_p9 = pnand %p5905_p7, %p5899_p13 }
 0x15f   : > { %5909 = shalt.err (!%p5906_p9)
}
 0x160   : > { %s7592_s23 = scalar_lea.sflag [#allocation14], %s6294_s2  ;;  %s1487_s0 = scalar_lea.vmem [#allocation18], %s6388_s27 }
 0x161   : > { %5491 = dma.hbm_to_vmem [thread:$0]  (!%p6289_p8), %s6581_s17, 4096, %s6606_s16, %s7592_s23, %s7587_s26, %s7587_s26, %s7586_s21  }
 0x162   : > { %s1494_s28 = sshll.u32 %s1487_s0, 4  ;;  %s5910_s24 = scalar_lea.hbm %s6610_s12, 4096  ;;  %s6635_s28 = int_to_ptr.vmem [resolvable:$true] %s1494_s28 }
 0x163   : > { %p5911_p0 = scmp.ne.s32.totalorder %s6610_s12, %s5910_s24  ;;  %s5915_s22 = scalar_lea.hbm %s6239_s19, 8192 }
 0x164   : > { %p5916_p5 = scmp.lt.u32.totalorder %s6610_s12, %s6239_s19  ;;  %p5917_p6 = scmp.lt.u32.totalorder %s5915_s22, %s5910_s24 }
 0x165   : > { %p5913_p3 = pnand %p5911_p0, %p6314_p12  ;;  %p5919_p11 = scmp.lt.u32.totalorder %s5910_s24, %s6610_s12 }
 0x166   : > { %p5918_p4 = por %p5917_p6, %p5916_p5 }
 0x167   : > { %p5914_p10 = pneg %p5913_p3 }
 0x168   : > { %p5920_p13 = por %p5919_p11, %p5918_p4 }
 0x16a   : > { %p5921_p1 = pnand %p5920_p13, %p5914_p10 }
 0x16c   : > { %5924 = shalt.err (!%p5921_p1)
}
 0x16d   : > { %s5925_s27 = scalar_lea.vmem %s6635_s28, 4096  ;;  %s6047_s17 = smov [#allocation18]  }
 0x16e   : > { %p5926_p2 = scmp.ne.s32.totalorder %s6635_s28, %s5925_s27  ;;  %s5930_s15 = sshll.u32 %s6047_s17, 4  ;;  %s5931_s15 = int_to_ptr.vmem [resolvable:$false] %s5930_s15 }
 0x16f   : > { %s5932_s5 = scalar_lea.vmem %s5931_s15, 8192  ;;  %p5933_p0 = scmp.lt.s32.totalorder %s6635_s28, %s5931_s15 }
 0x170   : > { %p5928_p7 = pnand %p5926_p2, %p6314_p12  ;;  %p5934_p3 = scmp.lt.s32.totalorder %s5932_s5, %s5925_s27 }
 0x172   : > { %p5929_p9 = pneg %p5928_p7  ;;  %p5935_p5 = por %p5934_p3, %p5933_p0 }
 0x174   : > { %p5936_p6 = pnand %p5935_p5, %p5929_p9 }
 0x176   : > { %5939 = shalt.err (!%p5936_p6)
}
 0x177   : > { %s7593_s16 = scalar_lea.sflag [#allocation17], %s6294_s2  ;;  %p7594_p12 = scmp.ne.s32.totalorder %s7580_s7, 0 }
 0x178   : > { %5497 = dma.hbm_to_vmem [thread:$0]  (!%p6289_p8), %s6610_s12, 4096, %s6635_s28, %s7593_s16, %s7587_s26, %s7587_s26, %s7586_s21  }
 0x179   : > { %1506 = sbr.rel (%p7594_p12) target bundleno = 3253 (0xcb5), region = 168  ;;  %s7595_s6 = sld [smem:[#allocation60_spill]] (!%p7594_p12) }
 0x17a   : > { %s6662_s3 = sand.u32 (!%p7594_p12), 1, %s5986_s10  }
 0x17b   : > { %s6665_s9 = sshll.u32 (!%p7594_p12), %s6662_s3, 8  ;;  %s1509_s1 = scalar_lea.sflag (!%p7594_p12), [#allocation3], %s6662_s3 }
 0x17c   : > { %s6669_s18 = scalar_lea.vmem (!%p7594_p12), [#allocation2], %s6665_s9 }
 0x17f   : > { %p7596_p10 = scmp.ne.s32.totalorder (!%p7594_p12), %s7595_s6, 0 }
 0x181   : > { %5957 = dma.done.wait (%p7596_p10), %s1509_s1, 4096  }
 0x182   : > { %5959 = vsyncadd (%p7596_p10), %s1509_s1, 4294963200  ;;  %s7597_s2 = sld [smem:[#allocation57_spill]]  ;;  %s4536_s21 = sshll.u32 %s6662_s3, 7 }
 0x183   : > { %s6677_s12 = scalar_lea.vmem [#allocation4], %s4536_s21 }
 0x188   : > { %s1517_s7 = sand.u32 1, %s7597_s2  }
 0x189   : > { %s1518_s26 = scalar_lea.sflag [#allocation5], %s1517_s7 }
 0x18a   : > { %5961 = dma.done.wait (%p7596_p10), %s1518_s26, 6144  }
 0x18b   : > { %5963 = vsyncadd (%p7596_p10), %s1518_s26, 4294961152  ;;  %s4538_s14 = sshll.u32 %s6662_s3, 9  ;;  %s6685_s25 = scalar_lea.vmem [#allocation6], %s6665_s9 }
 0x18c   : > { %s1536_s11 = scalar_lea.sflag [#allocation8], %s1517_s7  ;;  %s6687_s23 = scalar_lea.vmem [#allocation7], %s4538_s14 }
 0x18d   : > { %5965 = dma.done.wait (%p7596_p10), %s1536_s11, 16384  }
 0x18e   : > { %5967 = vsyncadd (%p7596_p10), %s1536_s11, 4294950912  ;;  %s6693_s0 = scalar_lea.vmem [#allocation9], %s4538_s14  ;;  %s1554_s28 = scalar_lea.sflag [#allocation11], %s1517_s7 }
 0x18f   : > { %s6696_s24 = scalar_lea.vmem [#allocation10], %s6665_s9 }
 0x190   : > { %5969 = dma.done.wait (%p7596_p10), %s1554_s28, 16384  }
 0x191   : > { %5971 = vsyncadd (%p7596_p10), %s1554_s28, 4294950912  ;;  %s5439_s22 = smul.u32 768, %s6662_s3  ;;  %s1572_s17 = scalar_lea.sflag [#allocation14], %s1517_s7 }
 0x192   : > { %s6706_s15 = scalar_lea.vmem [#allocation13], %s6665_s9 }
 0x193   : > { %s6703_s27 = scalar_lea.vmem [#allocation12], %s5439_s22 }
 0x194   : > { %5973 = dma.done.wait (%p7596_p10), %s1572_s17, 8192  }
 0x195   : > { %5975 = vsyncadd (%p7596_p10), %s1572_s17, 4294959104  ;;  %s6713_s5 = scalar_lea.vmem [#allocation15], %s6665_s9  ;;  %s1590_s16 = scalar_lea.sflag [#allocation17], %s1517_s7 }
 0x196   : > { %s6715_s1 = scalar_lea.vmem [#allocation16], %s4536_s21 }
 0x197   : > { %5977 = dma.done.wait (%p7596_p10), %s1590_s16, 6144  }
 0x198   : > { %5979 = vsyncadd (%p7596_p10), %s1590_s16, 4294961152  ;;  %v6048_v0 = vmov 0.0   ;;  %v1930_v1 = vld [vmem:[%s6687_s23 + $0x8] sm:$0xff]  ;;  %v1932_v2 = vld [vmem:[%s6687_s23 + $0x18] sm:$0xff]  ;;  %s7598_s6 = sld [smem:[#allocation25_spill]]  ;;  %s7599_s3 = sld [smem:[#allocation32_spill]] }
 0x199   : > { %2069 = vmatprep.mubr.f32.mxu0 %v6048_v0  ;;  %v1929_v3 = vld [vmem:[%s6687_s23] sm:$0xff]  ;;  %v4859_v4 = vpack.c.bf16 %v1932_v2, %v1930_v1  ;;  %v1931_v5 = vld [vmem:[%s6687_s23 + $0x10] sm:$0xff]  ;;  %v1934_v6 = vld [vmem:[%s6687_s23 + $0x28] sm:$0xff]  ;;  %p1833_p8 = scmp.lt.s32.totalorder %s7597_s2, 1  ;;  %s7600_s26 = sld [smem:[#allocation37_spill]]  ;;  %vm6050_vm0 = vmmov 0  }
 0x19a   : > { %v1936_v7 = vld [vmem:[%s6687_s23 + $0x38] sm:$0xff]  ;;  %v4861_v8 = vpack.c.bf16 %v1931_v5, %v1929_v3  ;;  %v1933_v10 = vld [vmem:[%s6687_s23 + $0x20] sm:$0xff]  ;;  %v1935_v11 = vld [vmem:[%s6687_s23 + $0x30] sm:$0xff]  ;;  %s7601_s14 = sld [smem:[#allocation34_spill]]  ;;  %s7603_s22 = sld [smem:[#allocation36_spill]] }
 0x19b   : > { %v4863_v9 = vpack.c.bf16 %v1936_v7, %v1934_v6  ;;  %v1938_v12 = vld [vmem:[%s6687_s23 + $0x48] sm:$0xff]  ;;  %4860 = vmatprep.subr.bf16.mxu0 %v4859_v4  ;;  %v1940_v13 = vld [vmem:[%s6687_s23 + $0x58] sm:$0xff]  ;;  %v4865_v14 = vpack.c.bf16 %v1935_v11, %v1933_v10  ;;  %v1937_v16 = vld [vmem:[%s6687_s23 + $0x40] sm:$0xff]  ;;  %s7631_s2 = smov (!%p1833_p8, %s7597_s2), 1  ;;  %s7604_s17 = sld [smem:[#allocation33_spill]] }
 0x19c   : > { %4862 = vmatpush1.bf16.msra.mxu0 %v4861_v8  ;;  %v4867_v15 = vpack.c.bf16 %v1940_v13, %v1938_v12  ;;  %v1939_v17 = vld [vmem:[%s6687_s23 + $0x50] sm:$0xff]  ;;  %v1942_v18 = vld [vmem:[%s6687_s23 + $0x68] sm:$0xff]  ;;  %v1944_v19 = vld [vmem:[%s6687_s23 + $0x78] sm:$0xff]  ;;  %s6814_s7 = sshll.u32 %s7631_s2, 1  ;;  %s5441_s28 = smul.u32 768, %s7631_s2 }
 0x19d   : > { %4864 = vmatprep.subr.bf16.mxu0 %v4863_v9  ;;  %v4869_v20 = vpack.c.bf16 %v1939_v17, %v1937_v16  ;;  %v4871_v21 = vpack.c.bf16 %v1944_v19, %v1942_v18  ;;  %v1941_v22 = vld [vmem:[%s6687_s23 + $0x60] sm:$0xff]  ;;  %v1943_v23 = vld [vmem:[%s6687_s23 + $0x70] sm:$0xff]  ;;  %v1946_v24 = vld [vmem:[%s6687_s23 + $0x88] sm:$0xff] }
 0x19e   : > { %v1948_v25 = vld [vmem:[%s6687_s23 + $0x98] sm:$0xff]  ;;  %v4873_v26 = vpack.c.bf16 %v1943_v23, %v1941_v22  ;;  %v1945_v28 = vld [vmem:[%s6687_s23 + $0x80] sm:$0xff]  ;;  %v1947_v29 = vld [vmem:[%s6687_s23 + $0x90] sm:$0xff]  ;;  %s1851_s21 = scalar_lea.vmem %s7599_s3, %s6814_s7 }
 0x19f   : > { %v4875_v27 = vpack.c.bf16 %v1948_v25, %v1946_v24  ;;  %v1950_v30 = vld [vmem:[%s6687_s23 + $0xa8] sm:$0xff]  ;;  %v1952_v31 = vld [vmem:[%s6687_s23 + $0xb8] sm:$0xff]  ;;  %v4877_v32 = vpack.c.bf16 %v1947_v29, %v1945_v28  ;;  %v1949_v34 = vld [vmem:[%s6687_s23 + $0xa0] sm:$0xff]  ;;  %s1871_s11 = scalar_lea.vmem %s7600_s26, %s6814_s7  ;;  %s7606_s26 = sld [smem:[#allocation35_spill]] }
 0x1a0   : > { %4866 = vmatpush1.bf16.msra.mxu0 %v4865_v14  ;;  %v4879_v33 = vpack.c.bf16 %v1952_v31, %v1950_v30  ;;  %v1951_v35 = vld [vmem:[%s6687_s23 + $0xb0] sm:$0xff]  ;;  %v1954_v36 = vld [vmem:[%s6687_s23 + $0xc8] sm:$0xff]  ;;  %v1956_v37 = vld [vmem:[%s6687_s23 + $0xd8] sm:$0xff]  ;;  %s1867_s16 = scalar_lea.vmem %s7603_s22, %s6814_s7  ;;  %s7609_s22 = sld [smem:[#allocation43_spill]] }
 0x1a1   : > { %4868 = vmatprep.subr.bf16.mxu0 %v4867_v15  ;;  %v4881_v38 = vpack.c.bf16 %v1951_v35, %v1949_v34  ;;  %v4883_v39 = vpack.c.bf16 %v1956_v37, %v1954_v36  ;;  %v1953_v40 = vld [vmem:[%s6687_s23 + $0xc0] sm:$0xff]  ;;  %v1955_v41 = vld [vmem:[%s6687_s23 + $0xd0] sm:$0xff]  ;;  %v1958_v42 = vld [vmem:[%s6687_s23 + $0xe8] sm:$0xff]  ;;  %s1855_s3 = scalar_lea.vmem %s7604_s17, %s6814_s7 }
 0x1a2   : > { %v1960_v43 = vld [vmem:[%s6687_s23 + $0xf8] sm:$0xff]  ;;  %v4885_v44 = vpack.c.bf16 %v1955_v41, %v1953_v40  ;;  %v1957_v46 = vld [vmem:[%s6687_s23 + $0xe0] sm:$0xff]  ;;  %v1959_v47 = vld [vmem:[%s6687_s23 + $0xf0] sm:$0xff] }
 0x1a3   : > { %v4887_v45 = vpack.c.bf16 %v1960_v43, %v1958_v42  ;;  %v1962_v48 = vld [vmem:[%s6687_s23 + $0x108] sm:$0xff]  ;;  %v1964_v49 = vld [vmem:[%s6687_s23 + $0x118] sm:$0xff]  ;;  %v4889_v50 = vpack.c.bf16 %v1959_v47, %v1957_v46  ;;  %v1961_v52 = vld [vmem:[%s6687_s23 + $0x100] sm:$0xff] }
 0x1a4   : > { %4870 = vmatpush1.bf16.msra.mxu0 %v4869_v20  ;;  %v4891_v51 = vpack.c.bf16 %v1964_v49, %v1962_v48  ;;  %v1963_v53 = vld [vmem:[%s6687_s23 + $0x110] sm:$0xff]  ;;  %v1966_v54 = vld [vmem:[%s6687_s23 + $0x128] sm:$0xff]  ;;  %v1968_v55 = vld [vmem:[%s6687_s23 + $0x138] sm:$0xff] }
 0x1a5   : > { %4872 = vmatprep.subr.bf16.mxu0 %v4871_v21  ;;  %v4893_v56 = vpack.c.bf16 %v1963_v53, %v1961_v52  ;;  %v4895_v57 = vpack.c.bf16 %v1968_v55, %v1966_v54  ;;  %v1965_v58 = vld [vmem:[%s6687_s23 + $0x120] sm:$0xff]  ;;  %v1967_v59 = vld [vmem:[%s6687_s23 + $0x130] sm:$0xff]  ;;  %v1970_v60 = vld [vmem:[%s6687_s23 + $0x148] sm:$0xff] }
 0x1a6   : > { %v1972_v61 = vld [vmem:[%s6687_s23 + $0x158] sm:$0xff]  ;;  %v4897_v62 = vpack.c.bf16 %v1967_v59, %v1965_v58  ;;  %v1969_v1 = vld [vmem:[%s6687_s23 + $0x140] sm:$0xff]  ;;  %v1971_v2 = vld [vmem:[%s6687_s23 + $0x150] sm:$0xff] }
 0x1a7   : > { %v4899_v63 = vpack.c.bf16 %v1972_v61, %v1970_v60  ;;  %v1974_v3 = vld [vmem:[%s6687_s23 + $0x168] sm:$0xff]  ;;  %v1976_v4 = vld [vmem:[%s6687_s23 + $0x178] sm:$0xff]  ;;  %v4901_v5 = vpack.c.bf16 %v1971_v2, %v1969_v1  ;;  %v1973_v7 = vld [vmem:[%s6687_s23 + $0x160] sm:$0xff] }
 0x1a8   : > { %4874 = vmatpush1.bf16.msra.mxu0 %v4873_v26  ;;  %v4903_v6 = vpack.c.bf16 %v1976_v4, %v1974_v3  ;;  %v1975_v8 = vld [vmem:[%s6687_s23 + $0x170] sm:$0xff]  ;;  %v1978_v9 = vld [vmem:[%s6687_s23 + $0x188] sm:$0xff]  ;;  %v1980_v10 = vld [vmem:[%s6687_s23 + $0x198] sm:$0xff] }
 0x1a9   : > { %4876 = vmatprep.subr.bf16.mxu0 %v4875_v27  ;;  %v4905_v11 = vpack.c.bf16 %v1975_v8, %v1973_v7  ;;  %v4907_v12 = vpack.c.bf16 %v1980_v10, %v1978_v9  ;;  %v1977_v13 = vld [vmem:[%s6687_s23 + $0x180] sm:$0xff]  ;;  %v1979_v14 = vld [vmem:[%s6687_s23 + $0x190] sm:$0xff]  ;;  %v1982_v15 = vld [vmem:[%s6687_s23 + $0x1a8] sm:$0xff] }
 0x1aa   : > { %v1984_v16 = vld [vmem:[%s6687_s23 + $0x1b8] sm:$0xff]  ;;  %v4909_v17 = vpack.c.bf16 %v1979_v14, %v1977_v13  ;;  %v1981_v19 = vld [vmem:[%s6687_s23 + $0x1a0] sm:$0xff]  ;;  %v1983_v20 = vld [vmem:[%s6687_s23 + $0x1b0] sm:$0xff] }
 0x1ab   : > { %v4911_v18 = vpack.c.bf16 %v1984_v16, %v1982_v15  ;;  %v1986_v21 = vld [vmem:[%s6687_s23 + $0x1c8] sm:$0xff]  ;;  %v1988_v22 = vld [vmem:[%s6687_s23 + $0x1d8] sm:$0xff]  ;;  %v4913_v23 = vpack.c.bf16 %v1983_v20, %v1981_v19  ;;  %v1985_v25 = vld [vmem:[%s6687_s23 + $0x1c0] sm:$0xff] }
 0x1ac   : > { %4878 = vmatpush1.bf16.msra.mxu0 %v4877_v32  ;;  %v4915_v24 = vpack.c.bf16 %v1988_v22, %v1986_v21  ;;  %v1987_v26 = vld [vmem:[%s6687_s23 + $0x1d0] sm:$0xff]  ;;  %v1990_v27 = vld [vmem:[%s6687_s23 + $0x1e8] sm:$0xff]  ;;  %v1992_v28 = vld [vmem:[%s6687_s23 + $0x1f8] sm:$0xff] }
 0x1ad   : > { %4880 = vmatprep.subr.bf16.mxu0 %v4879_v33  ;;  %v4917_v29 = vpack.c.bf16 %v1987_v26, %v1985_v25  ;;  %v4919_v30 = vpack.c.bf16 %v1992_v28, %v1990_v27  ;;  %v1989_v31 = vld [vmem:[%s6687_s23 + $0x1e0] sm:$0xff]  ;;  %v1991_v32 = vld [vmem:[%s6687_s23 + $0x1f0] sm:$0xff]  ;;  %v2134_v35 = vld [vmem:[%s6693_s0 + $0x8] sm:$0xff]  ;;  %s1859_s23 = scalar_lea.vmem %s7601_s14, %s6814_s7 }
 0x1ae   : > { %v4921_v33 = vpack.c.bf16 %v1991_v32, %v1989_v31  ;;  %v6787_v34 = vld [vmem:[%s7598_s6] sm:$0xff]  ;;  %v2136_v36 = vld [vmem:[%s6693_s0 + $0x18] sm:$0xff]  ;;  %v2138_v40 = vld [vmem:[%s6693_s0 + $0x28] sm:$0xff] }
 0x1af   : > { %v2133_v37 = vld [vmem:[%s6693_s0] sm:$0xff]  ;;  %v2140_v41 = vld [vmem:[%s6693_s0 + $0x38] sm:$0xff]  ;;  %v2142_v46 = vld [vmem:[%s6693_s0 + $0x48] sm:$0xff] }
 0x1b0   : > { %4882 = vmatpush1.bf16.msra.mxu0 %v4881_v38  ;;  %v4923_v38 = vpack.c.bf16 %v2136_v36, %v2134_v35  ;;  %v4927_v43 = vpack.c.bf16 %v2140_v41, %v2138_v40  ;;  %v2144_v47 = vld [vmem:[%s6693_s0 + $0x58] sm:$0xff]  ;;  %v2146_v52 = vld [vmem:[%s6693_s0 + $0x68] sm:$0xff]  ;;  %v1993_v2 = vld [vmem:[%s1851_s21] sm:$0x3]  ;;  %s7605_s21 = sld [smem:[#allocation38_spill]] }
 0x1b1   : > { %4884 = vmatprep.subr.bf16.mxu0 %v4883_v39  ;;  %v2135_v39 = vld [vmem:[%s6693_s0 + $0x10] sm:$0xff]  ;;  %v4931_v49 = vpack.c.bf16 %v2144_v47, %v2142_v46  ;;  %v2148_v53 = vld [vmem:[%s6693_s0 + $0x78] sm:$0xff]  ;;  %v2150_v58 = vld [vmem:[%s6693_s0 + $0x88] sm:$0xff] }
 0x1b2   : > { %v4925_v42 = vpack.c.bf16 %v2135_v39, %v2133_v37  ;;  %4924 = vmatprep.subr.bf16.mxu1 %v4923_v38  ;;  %v4935_v55 = vpack.c.bf16 %v2148_v53, %v2146_v52  ;;  %v2152_v59 = vld [vmem:[%s6693_s0 + $0x98] sm:$0xff]  ;;  %v2149_v14 = vld [vmem:[%s6693_s0 + $0x80] sm:$0xff]  ;;  %v2151_v15 = vld [vmem:[%s6693_s0 + $0x90] sm:$0xff] }
 0x1b3   : > { %v4939_v61 = vpack.c.bf16 %v2152_v59, %v2150_v58  ;;  %v4941_v16 = vpack.c.bf16 %v2151_v15, %v2149_v14  ;;  %v2153_v20 = vld [vmem:[%s6693_s0 + $0xa0] sm:$0xff]  ;;  %v2155_v21 = vld [vmem:[%s6693_s0 + $0xb0] sm:$0xff]  ;;  %v2166_v36 = vld [vmem:[%s6693_s0 + $0x108] sm:$0xff] }
 0x1b4   : > { %4886 = vmatpush1.bf16.msra.mxu0 %v4885_v44  ;;  %v2137_v44 = vld [vmem:[%s6693_s0 + $0x20] sm:$0xff]  ;;  %4926 = vmatpush1.bf16.msra.mxu1 %v4925_v42  ;;  %v4945_v22 = vpack.c.bf16 %v2155_v21, %v2153_v20  ;;  %v2159_v27 = vld [vmem:[%s6693_s0 + $0xd0] sm:$0xff]  ;;  %v2168_v37 = vld [vmem:[%s6693_s0 + $0x118] sm:$0xff] }
 0x1b5   : > { %4888 = vmatprep.subr.bf16.mxu0 %v4887_v45  ;;  %v2139_v45 = vld [vmem:[%s6693_s0 + $0x30] sm:$0xff]  ;;  %4928 = vmatprep.subr.bf16.mxu1 %v4927_v43  ;;  %v2157_v26 = vld [vmem:[%s6693_s0 + $0xc0] sm:$0xff]  ;;  %v2281_v38 = vld [vmem:[%s6696_s24 + $0x8] sm:$0xff]  ;;  %v4955_v39 = vpack.c.bf16 %v2168_v37, %v2166_v36 }
 0x1b6   : > { %v4929_v48 = vpack.c.bf16 %v2139_v45, %v2137_v44  ;;  %v4949_v28 = vpack.c.bf16 %v2159_v27, %v2157_v26  ;;  %v2161_v32 = vld [vmem:[%s6693_s0 + $0xe0] sm:$0xff]  ;;  %v2283_v40 = vld [vmem:[%s6696_s24 + $0x18] sm:$0xff]  ;;  %v2167_v42 = vld [vmem:[%s6693_s0 + $0x110] sm:$0xff]  ;;  %s1875_s14 = scalar_lea.vmem %s7605_s21, %s6814_s7 }
 0x1b7   : > { %v2165_v41 = vld [vmem:[%s6693_s0 + $0x100] sm:$0xff]  ;;  %v4987_v43 = vpack.c.bf16 %v2283_v40, %v2281_v38  ;;  %v2282_v46 = vld [vmem:[%s6696_s24 + $0x10] sm:$0xff]  ;;  %v2170_v47 = vld [vmem:[%s6693_s0 + $0x128] sm:$0xff] }
 0x1b8   : > { %4890 = vmatpush1.bf16.msra.mxu0 %v4889_v50  ;;  %v2141_v50 = vld [vmem:[%s6693_s0 + $0x40] sm:$0xff]  ;;  %4930 = vmatpush1.bf16.msra.mxu1 %v4929_v48  ;;  %v4957_v44 = vpack.c.bf16 %v2167_v42, %v2165_v41  ;;  %v2286_v58 = vld [vmem:[%s6696_s24 + $0x30] sm:$0xff]  ;;  %v2174_v59 = vld [vmem:[%s6693_s0 + $0x148] sm:$0xff] }
 0x1b9   : > { %4892 = vmatprep.subr.bf16.mxu0 %v4891_v51  ;;  %v2143_v51 = vld [vmem:[%s6693_s0 + $0x50] sm:$0xff]  ;;  %4932 = vmatprep.subr.bf16.mxu1 %v4931_v49  ;;  %v2280_v45 = vld [vmem:[%s6696_s24] sm:$0xff]  ;;  %v2172_v49 = vld [vmem:[%s6693_s0 + $0x138] sm:$0xff] }
 0x1ba   : > { %v4933_v54 = vpack.c.bf16 %v2143_v51, %v2141_v50  ;;  %v4989_v48 = vpack.c.bf16 %v2282_v46, %v2280_v45  ;;  %v2285_v50 = vld [vmem:[%s6696_s24 + $0x28] sm:$0xff]  ;;  %v2287_v51 = vld [vmem:[%s6696_s24 + $0x38] sm:$0xff]  ;;  %v4959_v52 = vpack.c.bf16 %v2172_v49, %v2170_v47  ;;  %v2179_v20 = vld [vmem:[%s6693_s0 + $0x170] sm:$0xff] }
 0x1bb   : > { %v4991_v53 = vpack.c.bf16 %v2287_v51, %v2285_v50  ;;  %v2180_v14 = vld [vmem:[%s6693_s0 + $0x178] sm:$0xff]  ;;  %v2293_v15 = vld [vmem:[%s6696_s24 + $0x68] sm:$0xff]  ;;  %v2298_v36 = vld [vmem:[%s6696_s24 + $0x90] sm:$0xff] }
 0x1bc   : > { %4894 = vmatpush1.bf16.msra.mxu0 %v4893_v56  ;;  %v2145_v56 = vld [vmem:[%s6693_s0 + $0x60] sm:$0xff]  ;;  %4934 = vmatpush1.bf16.msra.mxu1 %v4933_v54  ;;  %v2297_v26 = vld [vmem:[%s6696_s24 + $0x88] sm:$0xff]  ;;  %v2299_v27 = vld [vmem:[%s6696_s24 + $0x98] sm:$0xff] }
 0x1bd   : > { %4896 = vmatprep.subr.bf16.mxu0 %v4895_v57  ;;  %v2147_v57 = vld [vmem:[%s6693_s0 + $0x70] sm:$0xff]  ;;  %4936 = vmatprep.subr.bf16.mxu1 %v4935_v55  ;;  %v2169_v54 = vld [vmem:[%s6693_s0 + $0x120] sm:$0xff]  ;;  %v2186_v37 = vld [vmem:[%s6693_s0 + $0x1a8] sm:$0xff] }
 0x1be   : > { %v4937_v60 = vpack.c.bf16 %v2147_v57, %v2145_v56  ;;  %v2171_v55 = vld [vmem:[%s6693_s0 + $0x130] sm:$0xff]  ;;  %v2284_v56 = vld [vmem:[%s6696_s24 + $0x20] sm:$0xff]  ;;  %v2188_v38 = vld [vmem:[%s6693_s0 + $0x1b8] sm:$0xff] }
 0x1bf   : > { %v4961_v57 = vpack.c.bf16 %v2171_v55, %v2169_v54  ;;  %v2303_v40 = vld [vmem:[%s6696_s24 + $0xb8] sm:$0xff]  ;;  %v2187_v45 = vld [vmem:[%s6693_s0 + $0x1b0] sm:$0xff]  ;;  %v2300_v46 = vld [vmem:[%s6696_s24 + $0xa0] sm:$0xff] }
 0x1c0   : > { %4898 = vmatpush1.bf16.msra.mxu0 %v4897_v62  ;;  %4938 = vmatpush1.bf16.msra.mxu1 %v4937_v60  ;;  %v1995_v62 = vlaneseq  ;;  %v2176_v60 = vld [vmem:[%s6693_s0 + $0x158] sm:$0xff]  ;;  %v2190_v49 = vld [vmem:[%s6693_s0 + $0x1c8] sm:$0xff] }
 0x1c1   : > { %4900 = vmatprep.subr.bf16.mxu0 %v4899_v63  ;;  %4940 = vmatprep.subr.bf16.mxu1 %v4939_v61  ;;  %v4993_v61 = vpack.c.bf16 %v2286_v58, %v2284_v56  ;;  %v2192_v50 = vld [vmem:[%s6693_s0 + $0x1d8] sm:$0xff]  ;;  %v2305_v51 = vld [vmem:[%s6696_s24 + $0xc8] sm:$0xff]  ;;  %v2189_v56 = vld [vmem:[%s6693_s0 + $0x1c0] sm:$0xff] }
 0x1c2   : > { %v6816_v63 = vshrl.u32 %v1995_v62, 7  ;;  %v4963_v62 = vpack.c.bf16 %v2176_v60, %v2174_v59  ;;  %v4979_v55 = vpack.c.bf16 %v2192_v50, %v2190_v49  ;;  %v2304_v58 = vld [vmem:[%s6696_s24 + $0xc0] sm:$0xff]  ;;  %v2306_v60 = vld [vmem:[%s6696_s24 + $0xd0] sm:$0xff] }
 0x1c4   : > { %4902 = vmatpush1.bf16.msra.mxu0 %v4901_v5  ;;  %v6821_v1 = vsub.s32 0, %v6816_v63  ;;  %v6824_v3 = vsub.s32 1, %v6816_v63  ;;  %4942 = vmatpush1.bf16.msra.mxu1 %v4941_v16 }
 0x1c5   : > { %4904 = vmatprep.subr.bf16.mxu0 %v4903_v6 }
 0x1c6   : > { %v1998_v4 = vrot.slane %v1993_v2, %v6821_v1  ;;  %v2002_v5 = vrot.slane %v1993_v2, %v6824_v3  ;;  %v2289_v2 = vld [vmem:[%s6696_s24 + $0x48] sm:$0xff] }
 0x1c8   : > { %4906 = vmatpush1.bf16.msra.mxu0 %v4905_v11 }
 0x1c9   : > { %4908 = vmatprep.subr.bf16.mxu0 %v4907_v12 }
 0x1cc   : > { %4910 = vmatpush1.bf16.msra.mxu0 %v4909_v17  ;;  %v2154_v17 = vld [vmem:[%s6693_s0 + $0xa8] sm:$0xff] }
 0x1cd   : > { %4912 = vmatprep.subr.bf16.mxu0 %v4911_v18  ;;  %v2156_v18 = vld [vmem:[%s6693_s0 + $0xb8] sm:$0xff] }
 0x1ce   : > { %v4943_v19 = vpack.c.bf16 %v2156_v18, %v2154_v17  ;;  %v2295_v18 = vld [vmem:[%s6696_s24 + $0x78] sm:$0xff] }
 0x1cf   : > { %v4999_v21 = vpack.c.bf16 %v2295_v18, %v2293_v15 }
 0x1d0   : > { %4914 = vmatpush1.bf16.msra.mxu0 %v4913_v23  ;;  %4944 = vmatprep.subr.bf16.mxu1 %v4943_v19  ;;  %v2158_v23 = vld [vmem:[%s6693_s0 + $0xc8] sm:$0xff]  ;;  %v2177_v19 = vld [vmem:[%s6693_s0 + $0x160] sm:$0xff] }
 0x1d1   : > { %4916 = vmatprep.subr.bf16.mxu0 %v4915_v24  ;;  %4946 = vmatpush1.bf16.msra.mxu1 %v4945_v22  ;;  %v2160_v24 = vld [vmem:[%s6693_s0 + $0xd8] sm:$0xff]  ;;  %v2292_v22 = vld [vmem:[%s6696_s24 + $0x60] sm:$0xff] }
 0x1d2   : > { %v4947_v25 = vpack.c.bf16 %v2160_v24, %v2158_v23  ;;  %v2294_v23 = vld [vmem:[%s6696_s24 + $0x70] sm:$0xff]  ;;  %v2182_v24 = vld [vmem:[%s6693_s0 + $0x188] sm:$0xff] }
 0x1d4   : > { %4918 = vmatpush1.bf16.msra.mxu0 %v4917_v29  ;;  %4948 = vmatprep.subr.bf16.mxu1 %v4947_v25  ;;  %v2162_v29 = vld [vmem:[%s6693_s0 + $0xe8] sm:$0xff]  ;;  %v2184_v25 = vld [vmem:[%s6693_s0 + $0x198] sm:$0xff] }
 0x1d5   : > { %4920 = vmatprep.subr.bf16.mxu0 %v4919_v30  ;;  %4950 = vmatpush1.bf16.msra.mxu1 %v4949_v28  ;;  %v2164_v30 = vld [vmem:[%s6693_s0 + $0xf8] sm:$0xff]  ;;  %v4969_v28 = vpack.c.bf16 %v2179_v20, %v2177_v19 }
 0x1d6   : > { %v4951_v31 = vpack.c.bf16 %v2164_v30, %v2162_v29  ;;  %v5001_v29 = vpack.c.bf16 %v2294_v23, %v2292_v22  ;;  %v4971_v30 = vpack.c.bf16 %v2184_v25, %v2182_v24  ;;  %v2076_v25 = vld [vmem:[%s1871_s11] sm:$0x3]  ;;  %s1863_s11 = scalar_lea.vmem %s7606_s26, %s6814_s7 }
 0x1d8   : > { %4922 = vmatpush1.bf16.msra.mxu0 %v4921_v33  ;;  %v2163_v33 = vld [vmem:[%s6693_s0 + $0xf0] sm:$0xff]  ;;  %4952 = vmatprep.subr.bf16.mxu1 %v4951_v31  ;;  %v2181_v31 = vld [vmem:[%s6693_s0 + $0x180] sm:$0xff] }
 0x1d9   : > { %v4953_v35 = vpack.c.bf16 %v2163_v33, %v2161_v32  ;;  %4988 = vmatprep.subr.bf16.mxu0 %v4987_v43  ;;  %v2183_v32 = vld [vmem:[%s6693_s0 + $0x190] sm:$0xff]  ;;  %v2296_v33 = vld [vmem:[%s6696_s24 + $0x80] sm:$0xff]  ;;  %v4975_v43 = vpack.c.bf16 %v2188_v38, %v2186_v37 }
 0x1da   : > { %v4973_v41 = vpack.c.bf16 %v2183_v32, %v2181_v31  ;;  %v5005_v42 = vpack.c.bf16 %v2298_v36, %v2296_v33 }
 0x1db   : > { %2070 = vmatmul.mubr.f32.vlgmr.msra.gmra.mrb[0].mxu0 %v6787_v34  ;;  %4954 = vmatpush1.bf16.msra.mxu1 %v4953_v35  ;;  %v5003_v35 = vpack.c.bf16 %v2299_v27, %v2297_v26  ;;  %v2077_v26 = vld [vmem:[%s1859_s23] sm:$0x3]  ;;  %s7607_s23 = sld [smem:[#allocation41_spill]] }
 0x1dc   : > { %2388 = vmatprep.mubr.f32.mxu0 %v6048_v0  ;;  %4956 = vmatprep.subr.bf16.mxu1 %v4955_v39  ;;  %v2301_v39 = vld [vmem:[%s6696_s24 + $0xa8] sm:$0xff]  ;;  %v2114_v33 = vrot.slane %v2077_v26, %v6821_v1 }
 0x1dd   : > { %4990 = vmatpush1.bf16.msra.mxu0 %v4989_v48  ;;  %v5007_v47 = vpack.c.bf16 %v2303_v40, %v2301_v39  ;;  %v2302_v48 = vld [vmem:[%s6696_s24 + $0xb0] sm:$0xff] }
 0x1de   : > { %4992 = vmatprep.subr.bf16.mxu0 %v4991_v53  ;;  %v5009_v54 = vpack.c.bf16 %v2302_v48, %v2300_v46 }
 0x1df   : > { %4958 = vmatpush1.bf16.msra.mxu1 %v4957_v44  ;;  %v2185_v44 = vld [vmem:[%s6693_s0 + $0x1a0] sm:$0xff] }
 0x1e0   : > { %4960 = vmatprep.subr.bf16.mxu1 %v4959_v52  ;;  %v2307_v52 = vld [vmem:[%s6696_s24 + $0xd8] sm:$0xff]  ;;  %v4977_v53 = vpack.c.bf16 %v2187_v45, %v2185_v44 }
 0x1e1   : > { %4994 = vmatpush1.bf16.msra.mxu0 %v4993_v61  ;;  %v5011_v59 = vpack.c.bf16 %v2307_v52, %v2305_v51  ;;  %v2194_v61 = vld [vmem:[%s6693_s0 + $0x1e8] sm:$0xff] }
 0x1e3   : > { %4962 = vmatpush1.bf16.msra.mxu1 %v4961_v57  ;;  %v2191_v57 = vld [vmem:[%s6693_s0 + $0x1d0] sm:$0xff] }
 0x1e4   : > { %4964 = vmatprep.subr.bf16.mxu1 %v4963_v62  ;;  %v2196_v62 = vld [vmem:[%s6693_s0 + $0x1f8] sm:$0xff] }
 0x2ae   : > { %v2071_v6 = vpop.f32.mrb[0].mxu0 }
 0x2af   : > { %v6828_v7 = vadd.f32 %v2071_v6, %v1998_v4  ;;  %v2073_v8 = vpop.f32.mrb[1].mxu0  ;;  %v2291_v4 = vld [vmem:[%s6696_s24 + $0x58] sm:$0xff] }
 0x2b0   : > { %v6830_v9 = vadd.f32 %v2073_v8, %v2002_v5  ;;  %v2173_v5 = vld [vmem:[%s6693_s0 + $0x140] sm:$0xff]  ;;  %v4995_v6 = vpack.c.bf16 %v2291_v4, %v2289_v2  ;;  %v2175_v8 = vld [vmem:[%s6693_s0 + $0x150] sm:$0xff]  ;;  %v2309_v2 = vld [vmem:[%s6696_s24 + $0xe8] sm:$0xff] }
 0x2b1   : > { %v2082_v11 = vmul.f32 %v6828_v7, %v6828_v7  ;;  %v2311_v4 = vld [vmem:[%s6696_s24 + $0xf8] sm:$0xff] }
 0x2b2   : > { %v2078_v10 = vadd.f32 %v6830_v9, %v6828_v7  ;;  %v2083_v12 = vmul.f32 %v6830_v9, %v6830_v9  ;;  %4996 = vmatprep.subr.bf16.mxu0 %v4995_v6  ;;  %v5013_v6 = vpack.c.bf16 %v2306_v60, %v2304_v58 }
 0x2b4   : > { %2079 = vadd.xlane.f32.xlu0 %v2078_v10  ;;  %v2084_v13 = vadd.f32 %v2083_v12, %v2082_v11  ;;  %v2288_v10 = vld [vmem:[%s6696_s24 + $0x40] sm:$0xff]  ;;  %v2290_v11 = vld [vmem:[%s6696_s24 + $0x50] sm:$0xff]  ;;  %v4965_v12 = vpack.c.bf16 %v2175_v8, %v2173_v5  ;;  %v4981_v5 = vpack.c.bf16 %v2191_v57, %v2189_v56  ;;  %v4983_v8 = vpack.c.bf16 %v2196_v62, %v2194_v61 }
 0x2b5   : > { %v4997_v16 = vpack.c.bf16 %v2290_v11, %v2288_v10  ;;  %v2193_v10 = vld [vmem:[%s6693_s0 + $0x1e0] sm:$0xff]  ;;  %v2195_v11 = vld [vmem:[%s6693_s0 + $0x1f0] sm:$0xff] }
 0x2b6   : > { %4966 = vmatpush1.bf16.msra.mxu1 %v4965_v12  ;;  %v5015_v12 = vpack.c.bf16 %v2311_v4, %v2309_v2  ;;  %v4985_v15 = vpack.c.bf16 %v2195_v11, %v2193_v10 }
 0x2b7   : > { %4998 = vmatpush1.bf16.msra.mxu0 %v4997_v16 }
 0x2b8   : > { %2085 = vadd.xlane.f32.xlu0 %v2084_v13  ;;  %v2178_v13 = vld [vmem:[%s6693_s0 + $0x168] sm:$0xff]  ;;  %5000 = vmatprep.subr.bf16.mxu0 %v4999_v21  ;;  %s7602_s0 = sld [smem:[#allocation48_spill]] }
 0x2b9   : > { %v4967_v17 = vpack.c.bf16 %v2180_v14, %v2178_v13  ;;  %v2308_v13 = vld [vmem:[%s6696_s24 + $0xe0] sm:$0xff]  ;;  %v2310_v14 = vld [vmem:[%s6696_s24 + $0xf0] sm:$0xff] }
 0x2ba   : > { %v5017_v16 = vpack.c.bf16 %v2310_v14, %v2308_v13 }
 0x2bb   : > { %4968 = vmatprep.subr.bf16.mxu1 %v4967_v17  ;;  %5002 = vmatpush1.bf16.msra.mxu0 %v5001_v29  ;;  %v2101_v29 = vrot.slane %v2076_v25, %v6821_v1 }
 0x2bc   : > { %4970 = vmatpush1.bf16.msra.mxu1 %v4969_v28  ;;  %5004 = vmatprep.subr.bf16.mxu0 %v5003_v35  ;;  %v2118_v35 = vrot.slane %v2077_v26, %v6824_v3 }
 0x2bd   : > { %4972 = vmatprep.subr.bf16.mxu1 %v4971_v30  ;;  %v2105_v30 = vrot.slane %v2076_v25, %v6824_v3 }
 0x2be   : > { %s6929_s24 = scalar_lea.vmem %s7602_s0, %s5441_s28  ;;  %s7085_s0 = smul.u32 3, %s7631_s2 }
 0x2bf   : > { %5006 = vmatpush1.bf16.msra.mxu0 %v5005_v42  ;;  %v2457_v51 = vld [vmem:[%s6929_s24 + $0x8] sm:$0xff]  ;;  %v2460_v52 = vld [vmem:[%s6929_s24 + $0x20] sm:$0xff]  ;;  %v2463_v56 = vld [vmem:[%s6929_s24 + $0x38] sm:$0xff] }
 0x2c0   : > { %4974 = vmatpush1.bf16.msra.mxu1 %v4973_v41  ;;  %5008 = vmatprep.subr.bf16.mxu0 %v5007_v47  ;;  %v2466_v57 = vld [vmem:[%s6929_s24 + $0x50] sm:$0xff]  ;;  %v2465_v61 = vld [vmem:[%s6929_s24 + $0x48] sm:$0xff]  ;;  %v2472_v2 = vld [vmem:[%s6929_s24 + $0x80] sm:$0xff]  ;;  %s1879_s28 = scalar_lea.vmem %s7607_s23, %s7085_s0  ;;  %s7371_s23 = scalar_lea.vmem [#allocation18], %s6665_s9 }
 0x2c1   : > { %4976 = vmatprep.subr.bf16.mxu1 %v4975_v43  ;;  %v2462_v60 = vld [vmem:[%s6929_s24 + $0x30] sm:$0xff]  ;;  %v2469_v62 = vld [vmem:[%s6929_s24 + $0x68] sm:$0xff]  ;;  %v2475_v10 = vld [vmem:[%s6929_s24 + $0x98] sm:$0xff] }
 0x2c2   : > { %v5025_v4 = vpack.c.bf16 %v2465_v61, %v2462_v60  ;;  %v2478_v11 = vld [vmem:[%s6929_s24 + $0xb0] sm:$0xff] }
 0x2c3   : > { %5010 = vmatpush1.bf16.msra.mxu0 %v5009_v54  ;;  %v5019_v54 = vpack.c.bf16 %v2460_v52, %v2457_v51  ;;  %v5031_v13 = vpack.c.bf16 %v2478_v11, %v2475_v10  ;;  %v2474_v14 = vld [vmem:[%s6929_s24 + $0x90] sm:$0xff]  ;;  %v2499_v52 = vld [vmem:[%s6929_s24 + $0x158] sm:$0xff]  ;;  %v2461_v10 = vld [vmem:[%s6929_s24 + $0x28] sm:$0xff] }
 0x2c4   : > { %4978 = vmatpush1.bf16.msra.mxu1 %v4977_v53  ;;  %5012 = vmatprep.subr.bf16.mxu0 %v5011_v59  ;;  %v2456_v53 = vld [vmem:[%s6929_s24] sm:$0xff]  ;;  %v5023_v59 = vpack.c.bf16 %v2466_v57, %v2463_v56  ;;  %v2501_v56 = vld [vmem:[%s6929_s24 + $0x168] sm:$0xff]  ;;  %v2506_v60 = vld [vmem:[%s6929_s24 + $0x190] sm:$0xff] }
 0x2c5   : > { %4980 = vmatprep.subr.bf16.mxu1 %v4979_v55  ;;  %v2459_v55 = vld [vmem:[%s6929_s24 + $0x18] sm:$0xff] }
 0x2c6   : > { %v5021_v58 = vpack.c.bf16 %v2459_v55, %v2456_v53  ;;  %v2502_v53 = vld [vmem:[%s6929_s24 + $0x170] sm:$0xff] }
 0x2c7   : > { %5014 = vmatpush1.bf16.msra.mxu0 %v5013_v6  ;;  %v2468_v6 = vld [vmem:[%s6929_s24 + $0x60] sm:$0xff]  ;;  %v2498_v55 = vld [vmem:[%s6929_s24 + $0x150] sm:$0xff] }
 0x2c8   : > { %4982 = vmatpush1.bf16.msra.mxu1 %v4981_v5  ;;  %5016 = vmatprep.subr.bf16.mxu0 %v5015_v12  ;;  %v5027_v5 = vpack.c.bf16 %v2472_v2, %v2469_v62  ;;  %v5049_v57 = vpack.c.bf16 %v2501_v56, %v2498_v55  ;;  %v2509_v62 = vld [vmem:[%s6929_s24 + $0x1a8] sm:$0xff]  ;;  %v2504_v2 = vld [vmem:[%s6929_s24 + $0x180] sm:$0xff]  ;;  %v2531_v55 = vld [vmem:[%s6929_s24 + $0x258] sm:$0xff] }
 0x2c9   : > { %4984 = vmatprep.subr.bf16.mxu1 %v4983_v8  ;;  %v2471_v8 = vld [vmem:[%s6929_s24 + $0x78] sm:$0xff]  ;;  %v2482_v56 = vld [vmem:[%s6929_s24 + $0xd0] sm:$0xff] }
 0x2ca   : > { %v5029_v12 = vpack.c.bf16 %v2471_v8, %v2468_v6  ;;  %v2458_v8 = vld [vmem:[%s6929_s24 + $0x10] sm:$0xff] }
 0x2cb   : > { %5018 = vmatpush1.bf16.msra.mxu0 %v5017_v16  ;;  %v2481_v16 = vld [vmem:[%s6929_s24 + $0xc8] sm:$0xff]  ;;  %v5085_v11 = vpack.c.bf16 %v2461_v10, %v2458_v8  ;;  %v2488_v10 = vld [vmem:[%s6929_s24 + $0x100] sm:$0xff] }
 0x2cc   : > { %4986 = vmatpush1.bf16.msra.mxu1 %v4985_v15  ;;  %v2477_v15 = vld [vmem:[%s6929_s24 + $0xa8] sm:$0xff] }
 0x2cd   : > { %5020 = vmatprep.subr.bf16.mxu1 %v5019_v54  ;;  %v5047_v54 = vpack.c.bf16 %v2502_v53, %v2499_v52  ;;  %v2533_v52 = vld [vmem:[%s6929_s24 + $0x268] sm:$0xff]  ;;  %v2528_v53 = vld [vmem:[%s6929_s24 + $0x240] sm:$0xff] }
 0x2ce   : > { %2389 = vmatmul.mubr.f32.vlgmr.msra.gmra.mrb[2].mxu0 %v6787_v34 }
 0x341   : > { %v2080_v17 = vpop.xlane.xlu0 %2079 }
 0x342   : > { %v2081_v18 = vmul.f32 0.00390625, %v2080_v17  ;;  %v2484_v17 = vld [vmem:[%s6929_s24 + $0xe0] sm:$0xff] }
 0x344   : > { %v2088_v20 = vmul.f32 %v2081_v18, %v2081_v18  ;;  %v2091_v27 = vsub.f32 %v6828_v7, %v2081_v18  ;;  %v2092_v28 = vsub.f32 %v6830_v9, %v2081_v18  ;;  %v5033_v18 = vpack.c.bf16 %v2477_v15, %v2474_v14  ;;  %v2512_v14 = vld [vmem:[%s6929_s24 + $0x1c0] sm:$0xff] }
 0x345   : > { %v2086_v19 = vpop.xlane.xlu0 %2085 }
 0x346   : > { %v2087_v21 = vmul.f32 0.00390625, %v2086_v19  ;;  %v5035_v19 = vpack.c.bf16 %v2484_v17, %v2481_v16  ;;  %v2515_v16 = vld [vmem:[%s6929_s24 + $0x1d8] sm:$0xff]  ;;  %v2510_v17 = vld [vmem:[%s6929_s24 + $0x1b0] sm:$0xff] }
 0x348   : > { %v2089_v22 = vsub.f32 %v2087_v21, %v2088_v20  ;;  %v2312_v20 = vld [vmem:[%s1867_s16] sm:$0x3]  ;;  %s1887_s16 = scalar_lea.vmem %s7609_s22, %s7085_s0  ;;  %s7618_s22 = sld [smem:[#allocation30_spill]] }
 0x349   : > { %v2197_v21 = vld [vmem:[%s1855_s3] sm:$0x3]  ;;  %s7611_s3 = sld [smem:[#allocation45_spill]] }
 0x34a   : > { %v2090_v23 = vmax.f32 %v2089_v22, 0.0  ;;  %v2321_v22 = vrot.slane %v2312_v20, %v6824_v3  ;;  %v2206_v25 = vrot.slane %v2197_v21, %v6824_v3 }
 0x34c   : > { %v2093_v24 = vadd.f32 1e-05, %v2090_v23  ;;  %v2202_v23 = vrot.slane %v2197_v21, %v6821_v1  ;;  %v2464_v21 = vld [vmem:[%s6929_s24 + $0x40] sm:$0xff] }
 0x34e   : > { %5575 = vrsqrt.f32 %v2093_v24  ;;  %v2317_v24 = vrot.slane %v2312_v20, %v6821_v1 }
 0x34f   : > { %s1895_s26 = scalar_lea.vmem %s7611_s3, %s6814_s7  ;;  %s7621_s3 = sld [smem:[#allocation52_spill]] }
 0x358   : > { %v5576_v31 = vpop.eup %5575 }
 0x359   : > { %v2096_v32 = vmul.f32 %v5576_v31, %v2092_v28  ;;  %v2095_v36 = vmul.f32 %v5576_v31, %v2091_v27 }
 0x35b   : > { %v2109_v37 = vmul.f32 %v2105_v30, %v2096_v32  ;;  %v2108_v38 = vmul.f32 %v2101_v29, %v2095_v36 }
 0x35d   : > { %v2122_v39 = vadd.f32 %v2118_v35, %v2109_v37  ;;  %v2121_v40 = vadd.f32 %v2114_v33, %v2108_v38 }
 0x35f   : > { %v2126_v41 = vmul.f32 0.70710677, %v2122_v39  ;;  %v2125_v7 = vmul.f32 0.70710677, %v2121_v40  ;;  %v2124_v43 = vmul.f32 0.5, %v2122_v39  ;;  %v2123_v45 = vmul.f32 0.5, %v2121_v40 }
 0x360   : > { %v2483_v40 = vld [vmem:[%s6929_s24 + $0xd8] sm:$0xff] }
 0x361   : > { %5577 = verf.f32 %v2126_v41 }
 0x362   : > { %5579 = verf.f32 %v2125_v7  ;;  %v2487_v7 = vld [vmem:[%s6929_s24 + $0xf8] sm:$0xff] }
 0x36b   : > { %v5578_v9 = vpop.eup %5577 }
 0x36c   : > { %v5580_v42 = vpop.eup %5579  ;;  %v2130_v44 = vadd.f32 1.0, %v5578_v9  ;;  %v2490_v9 = vld [vmem:[%s6929_s24 + $0x110] sm:$0xff] }
 0x36d   : > { %v2129_v46 = vadd.f32 1.0, %v5580_v42  ;;  %v5039_v42 = vpack.c.bf16 %v2490_v9, %v2487_v7 }
 0x36e   : > { %v2132_v47 = vmul.f32 %v2130_v44, %v2124_v43  ;;  %v2486_v43 = vld [vmem:[%s6929_s24 + $0xf0] sm:$0xff]  ;;  %v2489_v44 = vld [vmem:[%s6929_s24 + $0x108] sm:$0xff] }
 0x36f   : > { %v2131_v48 = vmul.f32 %v2129_v46, %v2123_v45  ;;  %v5041_v45 = vpack.c.bf16 %v2489_v44, %v2486_v43  ;;  %v2493_v46 = vld [vmem:[%s6929_s24 + $0x128] sm:$0xff]  ;;  %v2476_v44 = vld [vmem:[%s6929_s24 + $0xa0] sm:$0xff] }
 0x370   : > { %2273 = vmatprep.mubr.f32.mxu1 %v2132_v47  ;;  %v2496_v47 = vld [vmem:[%s6929_s24 + $0x140] sm:$0xff]  ;;  %v2525_v43 = vld [vmem:[%s6929_s24 + $0x228] sm:$0xff] }
 0x371   : > { %2274 = vmatmul.mubr.f32.vlgmr.msra.gmra.mrb[0].mxu1 %v2131_v48  ;;  %v5043_v48 = vpack.c.bf16 %v2496_v47, %v2493_v46  ;;  %v2479_v46 = vld [vmem:[%s6929_s24 + $0xb8] sm:$0xff]  ;;  %v2529_v47 = vld [vmem:[%s6929_s24 + $0x248] sm:$0xff] }
 0x372   : > { %5022 = vmatpush1.bf16.msra.mxu1 %v5021_v58  ;;  %v2505_v58 = vld [vmem:[%s6929_s24 + $0x188] sm:$0xff] }
 0x373   : > { %5024 = vmatprep.subr.bf16.mxu1 %v5023_v59  ;;  %v2508_v59 = vld [vmem:[%s6929_s24 + $0x1a0] sm:$0xff] }
 0x374   : > { %v5051_v61 = vpack.c.bf16 %v2508_v59, %v2505_v58  ;;  %v5069_v58 = vpack.c.bf16 %v2531_v55, %v2528_v53  ;;  %v2535_v59 = vld [vmem:[%s6929_s24 + $0x278] sm:$0xff] }
 0x376   : > { %5026 = vmatpush1.bf16.msra.mxu1 %v5025_v4  ;;  %v2507_v4 = vld [vmem:[%s6929_s24 + $0x198] sm:$0xff] }
 0x377   : > { %5028 = vmatprep.subr.bf16.mxu1 %v5027_v5  ;;  %v5083_v5 = vpack.c.bf16 %v2509_v62, %v2506_v60  ;;  %v5053_v6 = vpack.c.bf16 %v2507_v4, %v2504_v2  ;;  %v2538_v60 = vld [vmem:[%s6929_s24 + $0x290] sm:$0xff]  ;;  %v2539_v4 = vld [vmem:[%s6929_s24 + $0x298] sm:$0xff] }
 0x378   : > { %v5071_v2 = vpack.c.bf16 %v2538_v60, %v2535_v59 }
 0x379   : > { %5084 = vmatprep.subr.bf16.mxu0 %v5083_v5  ;;  %v2534_v5 = vld [vmem:[%s6929_s24 + $0x270] sm:$0xff] }
 0x37a   : > { %5030 = vmatpush1.bf16.msra.mxu1 %v5029_v12  ;;  %v2511_v12 = vld [vmem:[%s6929_s24 + $0x1b8] sm:$0xff]  ;;  %5086 = vmatpush3.bf16.msra.mxu0 %v5085_v11 }
 0x37b   : > { %5032 = vmatprep.subr.bf16.mxu1 %v5031_v13  ;;  %v2514_v13 = vld [vmem:[%s6929_s24 + $0x1d0] sm:$0xff]  ;;  %v2491_v11 = vld [vmem:[%s6929_s24 + $0x118] sm:$0xff] }
 0x37c   : > { %v5055_v15 = vpack.c.bf16 %v2514_v13, %v2511_v12  ;;  %v2541_v12 = vld [vmem:[%s6929_s24 + $0x2a8] sm:$0xff]  ;;  %v2544_v13 = vld [vmem:[%s6929_s24 + $0x2c0] sm:$0xff] }
 0x37e   : > { %5034 = vmatpush1.bf16.msra.mxu1 %v5033_v18  ;;  %v2513_v18 = vld [vmem:[%s6929_s24 + $0x1c8] sm:$0xff] }
 0x37f   : > { %5036 = vmatprep.subr.bf16.mxu1 %v5035_v19  ;;  %v5087_v19 = vpack.c.bf16 %v2515_v16, %v2512_v14  ;;  %v5057_v20 = vpack.c.bf16 %v2513_v18, %v2510_v17  ;;  %v2542_v14 = vld [vmem:[%s6929_s24 + $0x2b0] sm:$0xff]  ;;  %v5105_v17 = vpack.c.bf16 %v2491_v11, %v2488_v10  ;;  %v5075_v18 = vpack.c.bf16 %v2544_v13, %v2541_v12  ;;  %v2790_v11 = vld [vmem:[%s6703_s27 + $0x8] sm:$0xff]  ;;  %v2792_v12 = vld [vmem:[%s6703_s27 + $0x18] sm:$0xff] }
 0x380   : > { %v2789_v13 = vld [vmem:[%s6703_s27] sm:$0xff] }
 0x381   : > { %5088 = vmatprep.subr.bf16.mxu0 %v5087_v19  ;;  %v2540_v19 = vld [vmem:[%s6929_s24 + $0x2a0] sm:$0xff] }
 0x3a1   : > { %v2390_v49 = vpop.f32.mrb[2].mxu0 }
 0x3a2   : > { %v2392_v50 = vpop.f32.mrb[3].mxu0  ;;  %v2391_v29 = vadd.f32 %v2390_v49, %v2317_v24  ;;  %v2492_v49 = vld [vmem:[%s6929_s24 + $0x120] sm:$0xff]  ;;  %v2517_v24 = vld [vmem:[%s6929_s24 + $0x1e8] sm:$0xff] }
 0x3a3   : > { %v2393_v27 = vadd.f32 %v2392_v50, %v2321_v22  ;;  %v2495_v50 = vld [vmem:[%s6929_s24 + $0x138] sm:$0xff] }
 0x3a4   : > { %v5045_v51 = vpack.c.bf16 %v2495_v50, %v2492_v49  ;;  %v2467_v22 = vld [vmem:[%s6929_s24 + $0x58] sm:$0xff]  ;;  %v5097_v49 = vpack.c.bf16 %v2479_v46, %v2476_v44  ;;  %v2399_v46 = vld [vmem:[%s1875_s14] sm:$0x3]  ;;  %s7613_s14 = sld [smem:[#allocation44_spill]] }
 0x444   : > { %v2275_v26 = vpop.f32.mrb[0].mxu1 }
 0x445   : > { %v2276_v28 = vadd.f32 %v2275_v26, %v2202_v23  ;;  %v2277_v30 = vpop.f32.mrb[1].mxu1  ;;  %v5089_v23 = vpack.c.bf16 %v2467_v22, %v2464_v21  ;;  %v2518_v26 = vld [vmem:[%s6929_s24 + $0x1f0] sm:$0xff] }
 0x446   : > { %v2278_v31 = vadd.f32 %v2277_v30, %v2206_v25  ;;  %v2520_v25 = vld [vmem:[%s6929_s24 + $0x200] sm:$0xff]  ;;  %v2519_v30 = vld [vmem:[%s6929_s24 + $0x1f8] sm:$0xff]  ;;  %v2494_v21 = vld [vmem:[%s6929_s24 + $0x130] sm:$0xff] }
 0x447   : > { %v2395_v32 = vadd.f32 %v2276_v28, %v6787_v34  ;;  %v2480_v34 = vld [vmem:[%s6929_s24 + $0xc0] sm:$0xff]  ;;  %5090 = vmatpush3.bf16.msra.mxu0 %v5089_v23  ;;  %v2521_v28 = vld [vmem:[%s6929_s24 + $0x208] sm:$0xff] }
 0x448   : > { %v6958_v33 = vadd.f32 %v2393_v27, %v2278_v31  ;;  %v5037_v41 = vpack.c.bf16 %v2483_v40, %v2480_v34  ;;  %v5059_v27 = vpack.c.bf16 %v2520_v25, %v2517_v24  ;;  %v5091_v31 = vpack.c.bf16 %v2521_v28, %v2518_v26  ;;  %v2526_v34 = vld [vmem:[%s6929_s24 + $0x230] sm:$0xff]  ;;  %v2524_v40 = vld [vmem:[%s6929_s24 + $0x220] sm:$0xff]  ;;  %v2497_v23 = vld [vmem:[%s6929_s24 + $0x148] sm:$0xff] }
 0x449   : > { %v6960_v35 = vadd.f32 %v2395_v32, %v2391_v29  ;;  %v2516_v29 = vld [vmem:[%s6929_s24 + $0x1e0] sm:$0xff]  ;;  %v2547_v24 = vld [vmem:[%s6929_s24 + $0x2d8] sm:$0xff]  ;;  %v2550_v25 = vld [vmem:[%s6929_s24 + $0x2f0] sm:$0xff] }
 0x44a   : > { %v2406_v38 = vmul.f32 %v6958_v33, %v6958_v33  ;;  %5038 = vmatpush1.bf16.msra.mxu1 %v5037_v41  ;;  %v5061_v32 = vpack.c.bf16 %v2519_v30, %v2516_v29  ;;  %v2527_v41 = vld [vmem:[%s6929_s24 + $0x238] sm:$0xff]  ;;  %5092 = vmatprep.subr.bf16.mxu0 %v5091_v31  ;;  %v2548_v26 = vld [vmem:[%s6929_s24 + $0x2e0] sm:$0xff]  ;;  %v5109_v29 = vpack.c.bf16 %v2497_v23, %v2494_v21  ;;  %v2546_v31 = vld [vmem:[%s6929_s24 + $0x2d0] sm:$0xff] }
 0x44b   : > { %v2401_v36 = vadd.f32 %v6958_v33, %v6960_v35  ;;  %v2405_v37 = vmul.f32 %v6960_v35, %v6960_v35  ;;  %5040 = vmatprep.subr.bf16.mxu1 %v5039_v42  ;;  %v5095_v9 = vpack.c.bf16 %v2527_v41, %v2524_v40  ;;  %v2522_v42 = vld [vmem:[%s6929_s24 + $0x210] sm:$0xff]  ;;  %v5079_v30 = vpack.c.bf16 %v2550_v25, %v2547_v24  ;;  %v2800_v23 = vld [vmem:[%s6703_s27 + $0x58] sm:$0xff] }
 0x44c   : > { %v2795_v21 = vld [vmem:[%s6703_s27 + $0x30] sm:$0xff] }
 0x44d   : > { %2402 = vadd.xlane.f32.xlu1 %v2401_v36  ;;  %v2407_v39 = vadd.f32 %v2406_v38, %v2405_v37  ;;  %v2470_v36 = vld [vmem:[%s6929_s24 + $0x70] sm:$0xff]  ;;  %v2473_v37 = vld [vmem:[%s6929_s24 + $0x88] sm:$0xff]  ;;  %v2523_v38 = vld [vmem:[%s6929_s24 + $0x218] sm:$0xff] }
 0x44e   : > { %5042 = vmatpush1.bf16.msra.mxu1 %v5041_v45  ;;  %v5063_v7 = vpack.c.bf16 %v2526_v34, %v2523_v38  ;;  %v5065_v45 = vpack.c.bf16 %v2525_v43, %v2522_v42  ;;  %v2503_v38 = vld [vmem:[%s6929_s24 + $0x178] sm:$0xff] }
 0x44f   : > { %5044 = vmatprep.subr.bf16.mxu1 %v5043_v48  ;;  %v2532_v48 = vld [vmem:[%s6929_s24 + $0x260] sm:$0xff] }
 0x450   : > { %v5067_v50 = vpack.c.bf16 %v2532_v48, %v2529_v47  ;;  %v2400_v47 = vld [vmem:[%s1863_s11] sm:$0x3] }
 0x451   : > { %2408 = vadd.xlane.f32.xlu1 %v2407_v39  ;;  %v5093_v39 = vpack.c.bf16 %v2473_v37, %v2470_v36  ;;  %v2500_v37 = vld [vmem:[%s6929_s24 + $0x160] sm:$0xff]  ;;  %v2437_v55 = vrot.slane %v2400_v47, %v6821_v1 }
 0x452   : > { %5046 = vmatpush1.bf16.msra.mxu1 %v5045_v51  ;;  %v2530_v51 = vld [vmem:[%s6929_s24 + $0x250] sm:$0xff]  ;;  %v5113_v34 = vpack.c.bf16 %v2503_v38, %v2500_v37  ;;  %v2806_v37 = vld [vmem:[%s6703_s27 + $0x88] sm:$0xff]  ;;  %v2808_v38 = vld [vmem:[%s6703_s27 + $0x98] sm:$0xff] }
 0x453   : > { %5048 = vmatprep.subr.bf16.mxu1 %v5047_v54  ;;  %5094 = vmatpush3.bf16.msra.mxu0 %v5093_v39  ;;  %v5099_v54 = vpack.c.bf16 %v2533_v52, %v2530_v51  ;;  %v2428_v51 = vrot.slane %v2399_v46, %v6824_v3 }
 0x454   : > { %5096 = vmatprep.subr.bf16.mxu0 %v5095_v9 }
 0x456   : > { %5050 = vmatpush1.bf16.msra.mxu1 %v5049_v57  ;;  %v2485_v57 = vld [vmem:[%s6929_s24 + $0xe8] sm:$0xff] }
 0x457   : > { %5052 = vmatprep.subr.bf16.mxu1 %v5051_v61  ;;  %v2536_v61 = vld [vmem:[%s6929_s24 + $0x280] sm:$0xff]  ;;  %5098 = vmatpush3.bf16.msra.mxu0 %v5097_v49  ;;  %v5101_v62 = vpack.c.bf16 %v2485_v57, %v2482_v56  ;;  %v2441_v56 = vrot.slane %v2400_v47, %v6824_v3 }
 0x458   : > { %5100 = vmatprep.subr.bf16.mxu0 %v5099_v54  ;;  %v5103_v8 = vpack.c.bf16 %v2539_v4, %v2536_v61 }
 0x45a   : > { %5054 = vmatpush1.bf16.msra.mxu1 %v5053_v6  ;;  %v2537_v6 = vld [vmem:[%s6929_s24 + $0x288] sm:$0xff] }
 0x45b   : > { %5056 = vmatprep.subr.bf16.mxu1 %v5055_v15  ;;  %v2545_v15 = vld [vmem:[%s6929_s24 + $0x2c8] sm:$0xff]  ;;  %v5073_v16 = vpack.c.bf16 %v2537_v6, %v2534_v5  ;;  %5102 = vmatpush3.bf16.msra.mxu0 %v5101_v62 }
 0x45c   : > { %5104 = vmatprep.subr.bf16.mxu0 %v5103_v8  ;;  %v5107_v22 = vpack.c.bf16 %v2545_v15, %v2542_v14  ;;  %v5115_v14 = vpack.c.bf16 %v2792_v12, %v2790_v11  ;;  %v2791_v15 = vld [vmem:[%s6703_s27 + $0x10] sm:$0xff]  ;;  %v2813_v11 = vld [vmem:[%s6703_s27 + $0xc0] sm:$0xff] }
 0x45d   : > { %v2815_v12 = vld [vmem:[%s6703_s27 + $0xd0] sm:$0xff] }
 0x45e   : > { %5058 = vmatpush1.bf16.msra.mxu1 %v5057_v20  ;;  %v2543_v20 = vld [vmem:[%s6929_s24 + $0x2b8] sm:$0xff] }
 0x45f   : > { %5060 = vmatprep.subr.bf16.mxu1 %v5059_v27  ;;  %v2551_v27 = vld [vmem:[%s6929_s24 + $0x2f8] sm:$0xff]  ;;  %v5077_v28 = vpack.c.bf16 %v2543_v20, %v2540_v19  ;;  %5106 = vmatpush3.bf16.msra.mxu0 %v5105_v17  ;;  %v2793_v20 = vld [vmem:[%s6703_s27 + $0x20] sm:$0xff] }
 0x460   : > { %5108 = vmatprep.subr.bf16.mxu0 %v5107_v22  ;;  %v5111_v36 = vpack.c.bf16 %v2551_v27, %v2548_v26  ;;  %v2796_v17 = vld [vmem:[%s6703_s27 + $0x38] sm:$0xff]  ;;  %v2798_v22 = vld [vmem:[%s6703_s27 + $0x48] sm:$0xff]  ;;  %v5121_v24 = vpack.c.bf16 %v2795_v21, %v2793_v20  ;;  %v2797_v26 = vld [vmem:[%s6703_s27 + $0x40] sm:$0xff] }
 0x461   : > { %v5123_v25 = vpack.c.bf16 %v2800_v23, %v2798_v22  ;;  %v2799_v27 = vld [vmem:[%s6703_s27 + $0x50] sm:$0xff]  ;;  %v2822_v20 = vld [vmem:[%s6703_s27 + $0x108] sm:$0xff]  ;;  %v2824_v21 = vld [vmem:[%s6703_s27 + $0x118] sm:$0xff] }
 0x462   : > { %5062 = vmatpush1.bf16.msra.mxu1 %v5061_v32  ;;  %v2549_v32 = vld [vmem:[%s6929_s24 + $0x2e8] sm:$0xff]  ;;  %v5147_v22 = vpack.c.bf16 %v2824_v21, %v2822_v20  ;;  %v2821_v23 = vld [vmem:[%s6703_s27 + $0x100] sm:$0xff]  ;;  %s7608_s24 = sld [smem:[#allocation46_spill]] }
 0x463   : > { %5064 = vmatprep.subr.bf16.mxu1 %v5063_v7  ;;  %v5081_v39 = vpack.c.bf16 %v2549_v32, %v2546_v31  ;;  %5110 = vmatpush3.bf16.msra.mxu0 %v5109_v29  ;;  %v2804_v29 = vld [vmem:[%s6703_s27 + $0x78] sm:$0xff]  ;;  %v2801_v32 = vld [vmem:[%s6703_s27 + $0x60] sm:$0xff] }
 0x464   : > { %5112 = vmatprep.subr.bf16.mxu0 %v5111_v36  ;;  %v2803_v36 = vld [vmem:[%s6703_s27 + $0x70] sm:$0xff] }
 0x466   : > { %5066 = vmatpush1.bf16.msra.mxu1 %v5065_v45 }
 0x467   : > { %5068 = vmatprep.subr.bf16.mxu1 %v5067_v50  ;;  %5114 = vmatpush3.bf16.msra.mxu0 %v5113_v34  ;;  %v2424_v50 = vrot.slane %v2399_v46, %v6821_v1  ;;  %v5131_v34 = vpack.c.bf16 %v2808_v38, %v2806_v37  ;;  %v2829_v38 = vld [vmem:[%s6703_s27 + $0x140] sm:$0xff] }
 0x468   : > { %5116 = vmatprep.subr.bf16.mxu0 %v5115_v14  ;;  %v2818_v14 = vld [vmem:[%s6703_s27 + $0xe8] sm:$0xff]  ;;  %s1899_s17 = scalar_lea.vmem %s7608_s24, %s7085_s0  ;;  %s7615_s0 = sld [smem:[#allocation54_spill]] }
 0x469   : > { %s7617_s24 = sld [smem:[#allocation26_spill]] }
 0x46a   : > { %5070 = vmatpush1.bf16.msra.mxu1 %v5069_v58 }
 0x46b   : > { %5072 = vmatprep.subr.bf16.mxu1 %v5071_v2 }
 0x46e   : > { %5074 = vmatpush1.bf16.msra.mxu1 %v5073_v16  ;;  %v2794_v16 = vld [vmem:[%s6703_s27 + $0x28] sm:$0xff]  ;;  %s1923_s9 = scalar_lea.vmem %s7615_s0, %s7631_s2 }
 0x46f   : > { %5076 = vmatprep.subr.bf16.mxu1 %v5075_v18  ;;  %v5117_v18 = vpack.c.bf16 %v2791_v15, %v2789_v13  ;;  %v5119_v19 = vpack.c.bf16 %v2796_v17, %v2794_v16  ;;  %v5141_v13 = vpack.c.bf16 %v2815_v12, %v2813_v11  ;;  %v2820_v15 = vld [vmem:[%s6703_s27 + $0xf8] sm:$0xff]  ;;  %v2817_v17 = vld [vmem:[%s6703_s27 + $0xe0] sm:$0xff]  ;;  %v2851_v11 = vld [vmem:[%s6703_s27 + $0x1f0] sm:$0xff] }
 0x470   : > { %v5143_v16 = vpack.c.bf16 %v2820_v15, %v2818_v14  ;;  %v2856_v14 = vld [vmem:[%s6703_s27 + $0x218] sm:$0xff] }
 0x472   : > { %5078 = vmatpush1.bf16.msra.mxu1 %v5077_v28  ;;  %v2802_v28 = vld [vmem:[%s6703_s27 + $0x68] sm:$0xff] }
 0x473   : > { %5080 = vmatprep.subr.bf16.mxu1 %v5079_v30  ;;  %v5125_v30 = vpack.c.bf16 %v2799_v27, %v2797_v26  ;;  %v5127_v31 = vpack.c.bf16 %v2804_v29, %v2802_v28  ;;  %v2828_v27 = vld [vmem:[%s6703_s27 + $0x138] sm:$0xff]  ;;  %v2825_v28 = vld [vmem:[%s6703_s27 + $0x120] sm:$0xff]  ;;  %v2827_v29 = vld [vmem:[%s6703_s27 + $0x130] sm:$0xff] }
 0x476   : > { %5082 = vmatpush1.bf16.msra.mxu1 %v5081_v39  ;;  %v5129_v39 = vpack.c.bf16 %v2803_v36, %v2801_v32  ;;  %v2832_v32 = vld [vmem:[%s6703_s27 + $0x158] sm:$0xff]  ;;  %v5153_v36 = vpack.c.bf16 %v2827_v29, %v2825_v28 }
 0x4da   : > { %v2403_v40 = vpop.xlane.xlu1 %2402 }
 0x4db   : > { %v2404_v41 = vmul.f32 0.00625, %v2403_v40  ;;  %v2805_v40 = vld [vmem:[%s6703_s27 + $0x80] sm:$0xff] }
 0x4dd   : > { %v2411_v9 = vmul.f32 %v2404_v41, %v2404_v41  ;;  %v2414_v48 = vsub.f32 %v6960_v35, %v2404_v41  ;;  %v2415_v49 = vsub.f32 %v6958_v33, %v2404_v41  ;;  %v2807_v41 = vld [vmem:[%s6703_s27 + $0x90] sm:$0xff] }
 0x4de   : > { %v2409_v7 = vpop.xlane.xlu1 %2408 }
 0x4df   : > { %v2410_v42 = vmul.f32 0.00625, %v2409_v7  ;;  %v5133_v7 = vpack.c.bf16 %v2807_v41, %v2805_v40  ;;  %v2836_v40 = vld [vmem:[%s6703_s27 + $0x178] sm:$0xff] }
 0x4e1   : > { %v2412_v43 = vsub.f32 %v2410_v42, %v2411_v9  ;;  %v2552_v9 = vld [vmem:[%s1879_s28] sm:$0x7]  ;;  %v7090_v42 = vsub.s32 2, %v6816_v63  ;;  %s7616_s28 = sld [smem:[#allocation53_spill]] }
 0x4e3   : > { %v2413_v44 = vmax.f32 %v2412_v43, 0.0  ;;  %v2557_v43 = vrot.slane %v2552_v9, %v6821_v1  ;;  %v2565_v47 = vrot.slane %v2552_v9, %v7090_v42 }
 0x4e5   : > { %v2416_v45 = vadd.f32 1e-05, %v2413_v44  ;;  %v2561_v44 = vrot.slane %v2552_v9, %v6824_v3  ;;  %v2833_v9 = vld [vmem:[%s6703_s27 + $0x160] sm:$0xff] }
 0x4e7   : > { %5581 = vrsqrt.f32 %v2416_v45 }
 0x4f1   : > { %v5582_v52 = vpop.eup %5581 }
 0x4f2   : > { %v2418_v53 = vmul.f32 %v5582_v52, %v2414_v48  ;;  %v2419_v54 = vmul.f32 %v5582_v52, %v2415_v49 }
 0x4f4   : > { %v2432_v57 = vmul.f32 %v2428_v51, %v2419_v54  ;;  %v2431_v58 = vmul.f32 %v2424_v50, %v2418_v53 }
 0x4f6   : > { %v2445_v59 = vadd.f32 %v2441_v56, %v2432_v57  ;;  %v2444_v60 = vadd.f32 %v2437_v55, %v2431_v58 }
 0x4f8   : > { %v2449_v61 = vmul.f32 0.70710677, %v2445_v59  ;;  %v2448_v35 = vmul.f32 0.70710677, %v2444_v60  ;;  %v2447_v2 = vmul.f32 0.5, %v2445_v59  ;;  %v2446_v5 = vmul.f32 0.5, %v2444_v60 }
 0x4f9   : > { %v2810_v60 = vld [vmem:[%s6703_s27 + $0xa8] sm:$0xff] }
 0x4fa   : > { %5583 = verf.f32 %v2449_v61  ;;  %v2812_v61 = vld [vmem:[%s6703_s27 + $0xb8] sm:$0xff] }
 0x4fb   : > { %5585 = verf.f32 %v2448_v35  ;;  %v5135_v35 = vpack.c.bf16 %v2812_v61, %v2810_v60 }
 0x504   : > { %v5584_v33 = vpop.eup %5583 }
 0x505   : > { %v5586_v62 = vpop.eup %5585  ;;  %v2453_v4 = vadd.f32 1.0, %v5584_v33  ;;  %v2809_v33 = vld [vmem:[%s6703_s27 + $0xa0] sm:$0xff] }
 0x506   : > { %v2452_v6 = vadd.f32 1.0, %v5586_v62  ;;  %v2811_v62 = vld [vmem:[%s6703_s27 + $0xb0] sm:$0xff] }
 0x507   : > { %v7056_v8 = vmul.f32 %v2453_v4, %v2447_v2  ;;  %v5137_v2 = vpack.c.bf16 %v2811_v62, %v2809_v33  ;;  %v2814_v4 = vld [vmem:[%s6703_s27 + $0xc8] sm:$0xff]  ;;  %v2847_v33 = vld [vmem:[%s6703_s27 + $0x1d0] sm:$0xff] }
 0x508   : > { %v7058_v10 = vmul.f32 %v2452_v6, %v2446_v5  ;;  %v2816_v5 = vld [vmem:[%s6703_s27 + $0xd8] sm:$0xff]  ;;  %v2850_v62 = vld [vmem:[%s6703_s27 + $0x1e8] sm:$0xff] }
 0x509   : > { %2633 = vmatprep.mubr.f32.mxu1 %v7056_v8  ;;  %2704 = vmatprep.mubr.f32.mxu0 %v7056_v8  ;;  %v5139_v6 = vpack.c.bf16 %v2816_v5, %v2814_v4 }
 0x50a   : > { %2634 = vmatmul.mubr.f32.vlgmr.msra.gmra.mrb[2].mxu1 %v7058_v10  ;;  %2705 = vmatmul.mubr.f32.vlgmr.msra.gmra.mrb[4].mxu0 %v7058_v10 }
 0x50b   : > { %5118 = vmatpush1.bf16.msra.mxu0 %v5117_v18  ;;  %v2819_v18 = vld [vmem:[%s6703_s27 + $0xf0] sm:$0xff] }
 0x50c   : > { %5120 = vmatprep.subr.bf16.mxu0 %v5119_v19  ;;  %v5145_v19 = vpack.c.bf16 %v2819_v18, %v2817_v17 }
 0x50f   : > { %5122 = vmatpush1.bf16.msra.mxu0 %v5121_v24  ;;  %v2823_v24 = vld [vmem:[%s6703_s27 + $0x110] sm:$0xff] }
 0x510   : > { %5124 = vmatprep.subr.bf16.mxu0 %v5123_v25  ;;  %v2826_v25 = vld [vmem:[%s6703_s27 + $0x128] sm:$0xff]  ;;  %v5149_v26 = vpack.c.bf16 %v2823_v24, %v2821_v23  ;;  %v2710_v24 = vld [vmem:[%s1899_s17] sm:$0x7]  ;;  %s7619_s17 = sld [smem:[#allocation29_spill]] }
 0x511   : > { %v2744_v28 = vrot.slane %v2710_v24, %v6824_v3  ;;  %v2740_v29 = vrot.slane %v2710_v24, %v6821_v1 }
 0x513   : > { %5126 = vmatpush1.bf16.msra.mxu0 %v5125_v30  ;;  %v5151_v30 = vpack.c.bf16 %v2828_v27, %v2826_v25  ;;  %v2711_v25 = vld [vmem:[%s1887_s16] sm:$0x7]  ;;  %s1847_s16 = scalar_lea.vmem %s7618_s22, %s7631_s2 }
 0x514   : > { %5128 = vmatprep.subr.bf16.mxu0 %v5127_v31  ;;  %v2830_v31 = vld [vmem:[%s6703_s27 + $0x148] sm:$0xff] }
 0x515   : > { %v5155_v37 = vpack.c.bf16 %v2832_v32, %v2830_v31  ;;  %v2763_v32 = vrot.slane %v2711_v25, %v6824_v3 }
 0x517   : > { %5130 = vmatpush1.bf16.msra.mxu0 %v5129_v39  ;;  %v2831_v39 = vld [vmem:[%s6703_s27 + $0x150] sm:$0xff] }
 0x518   : > { %5132 = vmatprep.subr.bf16.mxu0 %v5131_v34  ;;  %v2834_v34 = vld [vmem:[%s6703_s27 + $0x168] sm:$0xff]  ;;  %v5157_v41 = vpack.c.bf16 %v2831_v39, %v2829_v38 }
 0x51b   : > { %5134 = vmatpush1.bf16.msra.mxu0 %v5133_v7  ;;  %v5159_v7 = vpack.c.bf16 %v2836_v40, %v2834_v34 }
 0x51c   : > { %5136 = vmatprep.subr.bf16.mxu0 %v5135_v35  ;;  %v2845_v35 = vld [vmem:[%s6703_s27 + $0x1c0] sm:$0xff] }
 0x51d   : > { %v5173_v4 = vpack.c.bf16 %v2847_v33, %v2845_v35 }
 0x51f   : > { %5138 = vmatpush1.bf16.msra.mxu0 %v5137_v2  ;;  %v2852_v2 = vld [vmem:[%s6703_s27 + $0x1f8] sm:$0xff] }
 0x520   : > { %5140 = vmatprep.subr.bf16.mxu0 %v5139_v6  ;;  %v5175_v5 = vpack.c.bf16 %v2852_v2, %v2850_v62  ;;  %v2849_v6 = vld [vmem:[%s6703_s27 + $0x1e0] sm:$0xff]  ;;  %v2767_v62 = vrot.slane %v2711_v25, %v7090_v42 }
 0x521   : > { %v5177_v12 = vpack.c.bf16 %v2851_v11, %v2849_v6  ;;  %v2866_v6 = vld [vmem:[%s6703_s27 + $0x268] sm:$0xff]  ;;  %v2868_v11 = vld [vmem:[%s6703_s27 + $0x278] sm:$0xff] }
 0x523   : > { %5142 = vmatpush1.bf16.msra.mxu0 %v5141_v13  ;;  %v2854_v13 = vld [vmem:[%s6703_s27 + $0x208] sm:$0xff] }
 0x524   : > { %5144 = vmatprep.subr.bf16.mxu0 %v5143_v16  ;;  %v5179_v15 = vpack.c.bf16 %v2856_v14, %v2854_v13  ;;  %v5191_v14 = vpack.c.bf16 %v2868_v11, %v2866_v6  ;;  %v3053_v6 = vld [vmem:[%s6706_s15 + $0x70] sm:$0xff]  ;;  %v3056_v11 = vld [vmem:[%s6706_s15 + $0x88] sm:$0xff] }
 0x527   : > { %5146 = vmatpush1.bf16.msra.mxu0 %v5145_v19 }
 0x528   : > { %5148 = vmatprep.subr.bf16.mxu0 %v5147_v22 }
 0x52b   : > { %5150 = vmatpush1.bf16.msra.mxu0 %v5149_v26 }
 0x52c   : > { %5152 = vmatprep.subr.bf16.mxu0 %v5151_v30 }
 0x52f   : > { %5154 = vmatpush1.bf16.msra.mxu0 %v5153_v36 }
 0x530   : > { %5156 = vmatprep.subr.bf16.mxu0 %v5155_v37  ;;  %v2759_v37 = vrot.slane %v2711_v25, %v6821_v1 }
 0x533   : > { %5158 = vmatpush1.bf16.msra.mxu0 %v5157_v41 }
 0x534   : > { %5160 = vmatprep.subr.bf16.mxu0 %v5159_v7  ;;  %v2853_v7 = vld [vmem:[%s6703_s27 + $0x200] sm:$0xff] }
 0x5dd   : > { %v2635_v45 = vpop.f32.mrb[2].mxu1  ;;  %v4612_v46 = vpop.f32.mrb[4].mxu0 }
 0x5de   : > { %v7095_v48 = vadd.f32 %v2635_v45, %v2557_v43  ;;  %v2637_v49 = vpop.f32.mrb[3].mxu1  ;;  %v4613_v50 = vpop.f32.mrb[5].mxu0  ;;  %v2835_v43 = vld [vmem:[%s6703_s27 + $0x170] sm:$0xff]  ;;  %v2840_v45 = vld [vmem:[%s6703_s27 + $0x198] sm:$0xff] }
 0x5df   : > { %v7097_v51 = vadd.f32 %v2637_v49, %v2561_v44  ;;  %v4614_v63 = vadd.f32 %v4613_v50, %v4612_v46  ;;  %v2838_v44 = vld [vmem:[%s6703_s27 + $0x188] sm:$0xff]  ;;  %v5161_v46 = vpack.c.bf16 %v2835_v43, %v2833_v9  ;;  %v2837_v49 = vld [vmem:[%s6703_s27 + $0x180] sm:$0xff]  ;;  %v2839_v50 = vld [vmem:[%s6703_s27 + $0x190] sm:$0xff] }
 0x5e0   : > { %v2717_v52 = vmul.f32 %v7095_v48, %v7095_v48  ;;  %v2855_v9 = vld [vmem:[%s6703_s27 + $0x210] sm:$0xff] }
 0x5e1   : > { %v2718_v53 = vmul.f32 %v7097_v51, %v7097_v51  ;;  %v7103_v54 = vadd.f32 %v4614_v63, %v2565_v47  ;;  %v2712_v55 = vadd.f32 %v7097_v51, %v7095_v48  ;;  %v5163_v47 = vpack.c.bf16 %v2840_v45, %v2838_v44  ;;  %v2842_v63 = vld [vmem:[%s6703_s27 + $0x1a8] sm:$0xff]  ;;  %5162 = vmatpush1.bf16.msra.mxu0 %v5161_v46 }
 0x5e3   : > { %v2713_v56 = vadd.f32 %v2712_v55, %v7103_v54  ;;  %v2719_v57 = vmul.f32 %v7103_v54, %v7103_v54  ;;  %v2720_v58 = vadd.f32 %v2718_v53, %v2717_v52  ;;  %v2844_v52 = vld [vmem:[%s6703_s27 + $0x1b8] sm:$0xff]  ;;  %v5165_v53 = vpack.c.bf16 %v2839_v50, %v2837_v49  ;;  %5164 = vmatprep.subr.bf16.mxu0 %v5163_v47  ;;  %v2858_v47 = vld [vmem:[%s6703_s27 + $0x228] sm:$0xff] }
 0x5e4   : > { %v5167_v55 = vpack.c.bf16 %v2844_v52, %v2842_v63  ;;  %v2860_v49 = vld [vmem:[%s6703_s27 + $0x238] sm:$0xff]  ;;  %v2748_v52 = vrot.slane %v2710_v24, %v7090_v42 }
 0x5e5   : > { %2714 = vadd.xlane.f32.xlu0 %v2713_v56  ;;  %v2721_v59 = vadd.f32 %v2720_v58, %v2719_v57  ;;  %v2841_v56 = vld [vmem:[%s6703_s27 + $0x1a0] sm:$0xff]  ;;  %v2843_v57 = vld [vmem:[%s6703_s27 + $0x1b0] sm:$0xff]  ;;  %v2846_v58 = vld [vmem:[%s6703_s27 + $0x1c8] sm:$0xff]  ;;  %5166 = vmatpush1.bf16.msra.mxu0 %v5165_v53 }
 0x5e6   : > { %v5169_v60 = vpack.c.bf16 %v2843_v57, %v2841_v56  ;;  %5168 = vmatprep.subr.bf16.mxu0 %v5167_v55  ;;  %v5181_v55 = vpack.c.bf16 %v2855_v9, %v2853_v7  ;;  %v2872_v42 = vld [vmem:[%s6703_s27 + $0x298] sm:$0xff]  ;;  %v3040_v7 = vld [vmem:[%s6706_s15 + $0x8] sm:$0xff] }
 0x5e7   : > { %2722 = vadd.xlane.f32.xlu1 %v2721_v59  ;;  %v2848_v59 = vld [vmem:[%s6703_s27 + $0x1d8] sm:$0xff] }
 0x5e8   : > { %v5171_v61 = vpack.c.bf16 %v2848_v59, %v2846_v58  ;;  %v5183_v58 = vpack.c.bf16 %v2860_v49, %v2858_v47  ;;  %v2857_v59 = vld [vmem:[%s6703_s27 + $0x220] sm:$0xff]  ;;  %v2876_v24 = vld [vmem:[%s6703_s27 + $0x2b8] sm:$0xff]  ;;  %v3041_v47 = vld [vmem:[%s6706_s15 + $0x10] sm:$0xff] }
 0x5e9   : > { %5170 = vmatpush1.bf16.msra.mxu0 %v5169_v60  ;;  %v2862_v60 = vld [vmem:[%s6703_s27 + $0x248] sm:$0xff]  ;;  %v3042_v9 = vld [vmem:[%s6706_s15 + $0x18] sm:$0xff] }
 0x5ea   : > { %5172 = vmatprep.subr.bf16.mxu0 %v5171_v61  ;;  %v2864_v61 = vld [vmem:[%s6703_s27 + $0x258] sm:$0xff]  ;;  %v3044_v49 = vld [vmem:[%s6706_s15 + $0x28] sm:$0xff] }
 0x5eb   : > { %v5187_v2 = vpack.c.bf16 %v2864_v61, %v2862_v60  ;;  %v3047_v61 = vld [vmem:[%s6706_s15 + $0x40] sm:$0xff] }
 0x5ed   : > { %5174 = vmatpush1.bf16.msra.mxu0 %v5173_v4  ;;  %v2861_v4 = vld [vmem:[%s6703_s27 + $0x240] sm:$0xff] }
 0x5ee   : > { %5176 = vmatprep.subr.bf16.mxu0 %v5175_v5  ;;  %v2863_v5 = vld [vmem:[%s6703_s27 + $0x250] sm:$0xff] }
 0x5f1   : > { %5178 = vmatpush1.bf16.msra.mxu0 %v5177_v12  ;;  %v5189_v12 = vpack.c.bf16 %v2863_v5, %v2861_v4  ;;  %v3051_v5 = vld [vmem:[%s6706_s15 + $0x60] sm:$0xff] }
 0x5f2   : > { %5180 = vmatprep.subr.bf16.mxu0 %v5179_v15  ;;  %v2865_v15 = vld [vmem:[%s6703_s27 + $0x260] sm:$0xff] }
 0x672   : > { %v2715_v16 = vpop.xlane.xlu0 %2714 }
 0x673   : > { %v2716_v17 = vmul.f32 0.003125, %v2715_v16  ;;  %v2867_v16 = vld [vmem:[%s6703_s27 + $0x270] sm:$0xff] }
 0x674   : > { %v2723_v18 = vpop.xlane.xlu1 %2722 }
 0x675   : > { %v2724_v19 = vmul.f32 0.003125, %v2723_v18  ;;  %v2725_v20 = vmul.f32 %v2716_v17, %v2716_v17  ;;  %v2728_v26 = vsub.f32 %v7095_v48, %v2716_v17  ;;  %v2729_v27 = vsub.f32 %v7097_v51, %v2716_v17 }
 0x676   : > { %v2730_v44 = vsub.f32 %v7103_v54, %v2716_v17  ;;  %v2859_v54 = vld [vmem:[%s6703_s27 + $0x230] sm:$0xff]  ;;  %v2870_v17 = vld [vmem:[%s6703_s27 + $0x288] sm:$0xff]  ;;  %v5193_v18 = vpack.c.bf16 %v2867_v16, %v2865_v15  ;;  %v3055_v15 = vld [vmem:[%s6706_s15 + $0x80] sm:$0xff] }
 0x677   : > { %v2726_v21 = vsub.f32 %v2724_v19, %v2725_v20  ;;  %v5185_v35 = vpack.c.bf16 %v2859_v54, %v2857_v59  ;;  %v5195_v20 = vpack.c.bf16 %v2872_v42, %v2870_v17  ;;  %v3050_v59 = vld [vmem:[%s6706_s15 + $0x58] sm:$0xff]  ;;  %v3057_v16 = vld [vmem:[%s6706_s15 + $0x90] sm:$0xff]  ;;  %v3060_v17 = vld [vmem:[%s6706_s15 + $0xa8] sm:$0xff] }
 0x678   : > { %v3062_v42 = vld [vmem:[%s6706_s15 + $0xb8] sm:$0xff] }
 0x679   : > { %v2727_v22 = vmax.f32 %v2726_v21, 0.0  ;;  %v2869_v21 = vld [vmem:[%s6703_s27 + $0x280] sm:$0xff] }
 0x67b   : > { %v2731_v23 = vadd.f32 1e-05, %v2727_v22  ;;  %v2871_v22 = vld [vmem:[%s6703_s27 + $0x290] sm:$0xff] }
 0x67c   : > { %v5197_v25 = vpack.c.bf16 %v2871_v22, %v2869_v21  ;;  %v3061_v21 = vld [vmem:[%s6706_s15 + $0xb0] sm:$0xff]  ;;  %v3064_v22 = vld [vmem:[%s6706_s15 + $0xc8] sm:$0xff] }
 0x67d   : > { %5587 = vrsqrt.f32 %v2731_v23  ;;  %v2874_v23 = vld [vmem:[%s6703_s27 + $0x2a8] sm:$0xff] }
 0x687   : > { %v5588_v30 = vpop.eup %5587 }
 0x688   : > { %v2734_v31 = vmul.f32 %v5588_v30, %v2729_v27  ;;  %v2733_v36 = vmul.f32 %v5588_v30, %v2728_v26  ;;  %v2735_v56 = vmul.f32 %v5588_v30, %v2730_v44  ;;  %v5199_v26 = vpack.c.bf16 %v2876_v24, %v2874_v23  ;;  %v2873_v27 = vld [vmem:[%s6703_s27 + $0x2a0] sm:$0xff]  ;;  %v2880_v30 = vld [vmem:[%s6703_s27 + $0x2d8] sm:$0xff] }
 0x689   : > { %v3066_v23 = vld [vmem:[%s6706_s15 + $0xd8] sm:$0xff] }
 0x68a   : > { %v2753_v38 = vmul.f32 %v2744_v28, %v2734_v31  ;;  %v2752_v39 = vmul.f32 %v2740_v29, %v2733_v36  ;;  %v2754_v33 = vmul.f32 %v2748_v52, %v2735_v56  ;;  %v2875_v28 = vld [vmem:[%s6703_s27 + $0x2b0] sm:$0xff]  ;;  %v2878_v29 = vld [vmem:[%s6703_s27 + $0x2c8] sm:$0xff]  ;;  %v2877_v36 = vld [vmem:[%s6703_s27 + $0x2c0] sm:$0xff] }
 0x68b   : > { %v5201_v31 = vpack.c.bf16 %v2875_v28, %v2873_v27  ;;  %v3043_v56 = vld [vmem:[%s6706_s15 + $0x20] sm:$0xff]  ;;  %v3065_v27 = vld [vmem:[%s6706_s15 + $0xd0] sm:$0xff]  ;;  %v3068_v28 = vld [vmem:[%s6706_s15 + $0xe8] sm:$0xff] }
 0x68c   : > { %v2772_v48 = vadd.f32 %v2763_v32, %v2753_v38  ;;  %v2771_v34 = vadd.f32 %v2759_v37, %v2752_v39  ;;  %v2773_v13 = vadd.f32 %v2767_v62, %v2754_v33  ;;  %v5203_v32 = vpack.c.bf16 %v2880_v30, %v2878_v29  ;;  %v2879_v37 = vld [vmem:[%s6703_s27 + $0x2d0] sm:$0xff]  ;;  %v2882_v38 = vld [vmem:[%s6703_s27 + $0x2e8] sm:$0xff]  ;;  %v2884_v39 = vld [vmem:[%s6703_s27 + $0x2f8] sm:$0xff] }
 0x68d   : > { %v3052_v33 = vld [vmem:[%s6706_s15 + $0x68] sm:$0xff]  ;;  %v3054_v62 = vld [vmem:[%s6706_s15 + $0x78] sm:$0xff] }
 0x68e   : > { %v2778_v51 = vmul.f32 0.70710677, %v2772_v48  ;;  %v2777_v40 = vmul.f32 0.70710677, %v2771_v34  ;;  %v2775_v45 = vmul.f32 0.5, %v2772_v48  ;;  %v2774_v50 = vmul.f32 0.5, %v2771_v34 }
 0x68f   : > { %v2779_v19 = vmul.f32 0.70710677, %v2773_v13  ;;  %v5205_v48 = vpack.c.bf16 %v2879_v37, %v2877_v36  ;;  %v5207_v34 = vpack.c.bf16 %v2884_v39, %v2882_v38  ;;  %v5223_v4 = vpack.c.bf16 %v3054_v62, %v3052_v33  ;;  %v3070_v29 = vld [vmem:[%s6706_s15 + $0xf8] sm:$0xff]  ;;  %v3069_v36 = vld [vmem:[%s6706_s15 + $0xf0] sm:$0xff]  ;;  %v5609_v38 = vld [vmem:[%s7598_s6] sm:$0xff] }
 0x690   : > { %5589 = verf.f32 %v2778_v51  ;;  %v2881_v51 = vld [vmem:[%s6703_s27 + $0x2e0] sm:$0xff]  ;;  %v3233_v62 = vld [vmem:[%s6713_s5 + $0x90] sm:$0xff] }
 0x691   : > { %5591 = verf.f32 %v2777_v40  ;;  %v2883_v40 = vld [vmem:[%s6703_s27 + $0x2f0] sm:$0xff]  ;;  %s7610_s27 = sld [smem:[#allocation42_spill]] }
 0x692   : > { %5593 = verf.f32 %v2779_v19  ;;  %v5231_v19 = vpack.c.bf16 %v3062_v42, %v3060_v17  ;;  %v3235_v42 = vld [vmem:[%s6713_s5 + $0xa0] sm:$0xff] }
 0x697   : > { %s1883_s21 = scalar_lea.vmem %s7610_s27, %s6814_s7  ;;  %s7620_s27 = sld [smem:[#allocation51_spill]] }
 0x698   : > { %v2885_v39 = vld [vmem:[%s1883_s21] sm:$0x3]  ;;  %s7622_s21 = sld [smem:[#allocation27_spill]] }
 0x69a   : > { %v5590_v41 = vpop.eup %5589 }
 0x69b   : > { %v5592_v43 = vpop.eup %5591  ;;  %v2784_v46 = vadd.f32 1.0, %v5590_v41 }
 0x69c   : > { %v2783_v63 = vadd.f32 1.0, %v5592_v43  ;;  %v5594_v41 = vpop.eup %5593  ;;  %v5209_v43 = vpack.c.bf16 %v2883_v40, %v2881_v51  ;;  %v2894_v51 = vrot.slane %v2885_v39, %v6824_v3 }
 0x69d   : > { %v2787_v53 = vmul.f32 %v2784_v46, %v2775_v45  ;;  %v2785_v44 = vadd.f32 1.0, %v5594_v41  ;;  %v5211_v45 = vpack.c.bf16 %v3042_v9, %v3040_v7  ;;  %v3039_v46 = vld [vmem:[%s6706_s15] sm:$0xff] }
 0x69e   : > { %v2786_v57 = vmul.f32 %v2783_v63, %v2774_v50  ;;  %v3046_v50 = vld [vmem:[%s6706_s15 + $0x38] sm:$0xff]  ;;  %v2776_v63 = vmul.f32 0.5, %v2773_v13  ;;  %v5213_v52 = vpack.c.bf16 %v3041_v47, %v3039_v46  ;;  %v5225_v13 = vpack.c.bf16 %v3053_v6, %v3051_v5 }
 0x69f   : > { %2961 = vmatprep.mubr.f32.mxu0 %v2787_v53  ;;  %v5422_v9 = vadd.f32 %v2894_v51, %v7056_v8  ;;  %v3819_v6 = vld [vmem:[%s6685_s25 + $0x98] sm:$0xff] }
 0x6a0   : > { %2962 = vmatmul.mubr.f32.vlgmr.msra.gmra.mrb[6].mxu0 %v2786_v57  ;;  %v2788_v53 = vmul.f32 %v2785_v44, %v2776_v63  ;;  %v3045_v57 = vld [vmem:[%s6706_s15 + $0x30] sm:$0xff]  ;;  %v3807_v51 = vld [vmem:[%s6685_s25 + $0x38] sm:$0xff] }
 0x6a1   : > { %5182 = vmatpush1.bf16.msra.mxu0 %v5181_v55  ;;  %3032 = vmatprep.mubr.f32.mxu0 %v6048_v0  ;;  %v5215_v55 = vpack.c.bf16 %v3046_v50, %v3044_v49  ;;  %v5217_v54 = vpack.c.bf16 %v3045_v57, %v3043_v56  ;;  %v3817_v57 = vld [vmem:[%s6685_s25 + $0x88] sm:$0xff] }
 0x6a2   : > { %5184 = vmatprep.subr.bf16.mxu0 %v5183_v58  ;;  %v3048_v58 = vld [vmem:[%s6706_s15 + $0x48] sm:$0xff] }
 0x6a3   : > { %v5219_v60 = vpack.c.bf16 %v3050_v59, %v3048_v58  ;;  %v3215_v58 = vld [vmem:[%s6713_s5] sm:$0xff]  ;;  %v3216_v59 = vld [vmem:[%s6713_s5 + $0x8] sm:$0xff] }
 0x6a5   : > { %5186 = vmatpush1.bf16.msra.mxu0 %v5185_v35  ;;  %v3049_v35 = vld [vmem:[%s6706_s15 + $0x50] sm:$0xff] }
 0x6a6   : > { %5188 = vmatprep.subr.bf16.mxu0 %v5187_v2  ;;  %v5221_v2 = vpack.c.bf16 %v3049_v35, %v3047_v61  ;;  %v3800_v61 = vld [vmem:[%s6685_s25] sm:$0xff]  ;;  %v3801_v35 = vld [vmem:[%s6685_s25 + $0x8] sm:$0xff] }
 0x6a7   : > { %v5389_v33 = vpack.c.bf16 %v3801_v35, %v3800_v61  ;;  %v3810_v61 = vld [vmem:[%s6685_s25 + $0x50] sm:$0xff]  ;;  %v3811_v35 = vld [vmem:[%s6685_s25 + $0x58] sm:$0xff] }
 0x6a9   : > { %5190 = vmatpush1.bf16.msra.mxu0 %v5189_v12  ;;  %v3058_v12 = vld [vmem:[%s6706_s15 + $0x98] sm:$0xff] }
 0x6aa   : > { %5192 = vmatprep.subr.bf16.mxu0 %v5191_v14  ;;  %v5227_v14 = vpack.c.bf16 %v3058_v12, %v3056_v11  ;;  %v3217_v11 = vld [vmem:[%s6713_s5 + $0x10] sm:$0xff]  ;;  %v3218_v12 = vld [vmem:[%s6713_s5 + $0x18] sm:$0xff] }
 0x6ad   : > { %5194 = vmatpush1.bf16.msra.mxu0 %v5193_v18  ;;  %v5229_v18 = vpack.c.bf16 %v3057_v16, %v3055_v15  ;;  %v3802_v15 = vld [vmem:[%s6685_s25 + $0x10] sm:$0xff]  ;;  %v3803_v16 = vld [vmem:[%s6685_s25 + $0x18] sm:$0xff] }
 0x6ae   : > { %5196 = vmatprep.subr.bf16.mxu0 %v5195_v20  ;;  %v3059_v20 = vld [vmem:[%s6706_s15 + $0xa0] sm:$0xff]  ;;  %v5393_v17 = vpack.c.bf16 %v3803_v16, %v3802_v15  ;;  %v3813_v16 = vld [vmem:[%s6685_s25 + $0x68] sm:$0xff] }
 0x6af   : > { %v5233_v24 = vpack.c.bf16 %v3061_v21, %v3059_v20  ;;  %v3821_v21 = vld [vmem:[%s6685_s25 + $0xa8] sm:$0xff] }
 0x6b1   : > { %5198 = vmatpush1.bf16.msra.mxu0 %v5197_v25  ;;  %v5235_v25 = vpack.c.bf16 %v3066_v23, %v3064_v22  ;;  %v3219_v22 = vld [vmem:[%s6713_s5 + $0x20] sm:$0xff]  ;;  %v3220_v23 = vld [vmem:[%s6713_s5 + $0x28] sm:$0xff] }
 0x6b2   : > { %5200 = vmatprep.subr.bf16.mxu0 %v5199_v26  ;;  %v3063_v26 = vld [vmem:[%s6706_s15 + $0xc0] sm:$0xff] }
 0x6b3   : > { %v5237_v30 = vpack.c.bf16 %v3065_v27, %v3063_v26  ;;  %v3804_v26 = vld [vmem:[%s6685_s25 + $0x20] sm:$0xff]  ;;  %v3805_v27 = vld [vmem:[%s6685_s25 + $0x28] sm:$0xff] }
 0x6b5   : > { %5202 = vmatpush1.bf16.msra.mxu0 %v5201_v31  ;;  %v5239_v31 = vpack.c.bf16 %v3070_v29, %v3068_v28  ;;  %v3237_v28 = vld [vmem:[%s6713_s5 + $0xb0] sm:$0xff]  ;;  %v5397_v29 = vpack.c.bf16 %v3805_v27, %v3804_v26  ;;  %v3815_v27 = vld [vmem:[%s6685_s25 + $0x78] sm:$0xff] }
 0x6b6   : > { %5204 = vmatprep.subr.bf16.mxu0 %v5203_v32  ;;  %v3067_v32 = vld [vmem:[%s6706_s15 + $0xe0] sm:$0xff]  ;;  %v3814_v26 = vld [vmem:[%s6685_s25 + $0x70] sm:$0xff]  ;;  %s7612_s15 = sld [smem:[#allocation47_spill]] }
 0x6b7   : > { %v5241_v37 = vpack.c.bf16 %v3069_v36, %v3067_v32  ;;  %v3823_v32 = vld [vmem:[%s6685_s25 + $0xb8] sm:$0xff] }
 0x6b9   : > { %5206 = vmatpush1.bf16.msra.mxu0 %v5205_v48  ;;  %v2890_v48 = vrot.slane %v2885_v39, %v6821_v1  ;;  %v3222_v39 = vld [vmem:[%s6713_s5 + $0x38] sm:$0xff] }
 0x6ba   : > { %5208 = vmatprep.subr.bf16.mxu0 %v5207_v34  ;;  %v3071_v34 = vld [vmem:[%s1895_s26] sm:$0x3]  ;;  %s7623_s26 = sld [smem:[#allocation28_spill]] }
 0x6bb   : > { %v3076_v40 = vrot.slane %v3071_v34, %v6821_v1  ;;  %v5419_v41 = vadd.f32 %v2890_v48, %v7058_v10  ;;  %v3080_v7 = vrot.slane %v3071_v34, %v6824_v3  ;;  %v3806_v48 = vld [vmem:[%s6685_s25 + $0x30] sm:$0xff] }
 0x6bd   : > { %5210 = vmatpush1.bf16.msra.mxu0 %v5209_v43  ;;  %v5420_v43 = vadd.f32 %v5419_v41, %v3076_v40  ;;  %v3239_v40 = vld [vmem:[%s6713_s5 + $0xc0] sm:$0xff]  ;;  %v3240_v41 = vld [vmem:[%s6713_s5 + $0xc8] sm:$0xff] }
 0x6be   : > { %5212 = vmatprep.subr.bf16.mxu0 %v5211_v45  ;;  %v5423_v45 = vadd.f32 %v5422_v9, %v3080_v7  ;;  %v5401_v7 = vpack.c.bf16 %v3807_v51, %v3806_v48  ;;  %v5259_v9 = vpack.c.bf16 %v3240_v41, %v3239_v40 }
 0x6c0   : > { %3033 = vmatmul.mubr.f32.vlgmr.msra.gmra.mrb[6].mxu0 %v2788_v53  ;;  %v3232_v53 = vld [vmem:[%s6713_s5 + $0x88] sm:$0xff] }
 0x6c1   : > { %5214 = vmatpush1.bf16.msra.mxu0 %v5213_v52  ;;  %3147 = vmatprep.mubr.f32.mxu0 %v6048_v0  ;;  %v3231_v52 = vld [vmem:[%s6713_s5 + $0x80] sm:$0xff] }
 0x6c2   : > { %5216 = vmatprep.subr.bf16.mxu0 %v5215_v55  ;;  %v3816_v55 = vld [vmem:[%s6685_s25 + $0x80] sm:$0xff]  ;;  %v5243_v56 = vpack.c.bf16 %v3232_v53, %v3231_v52  ;;  %v3241_v52 = vld [vmem:[%s6713_s5 + $0xd0] sm:$0xff]  ;;  %v3242_v53 = vld [vmem:[%s6713_s5 + $0xd8] sm:$0xff] }
 0x6c4   : > { %5244 = vmatprep.subr.bf16.mxu1 %v5243_v56 }
 0x6c5   : > { %5218 = vmatpush1.bf16.msra.mxu0 %v5217_v54  ;;  %v5387_v54 = vpack.c.bf16 %v3817_v57, %v3816_v55  ;;  %v3826_v55 = vld [vmem:[%s6685_s25 + $0xd0] sm:$0xff]  ;;  %v5263_v57 = vpack.c.bf16 %v3242_v53, %v3241_v52 }
 0x6c6   : > { %5220 = vmatprep.subr.bf16.mxu0 %v5219_v60  ;;  %v5245_v60 = vpack.c.bf16 %v3216_v59, %v3215_v58  ;;  %v3827_v58 = vld [vmem:[%s6685_s25 + $0xd8] sm:$0xff]  ;;  %v3225_v59 = vld [vmem:[%s6713_s5 + $0x50] sm:$0xff] }
 0x6c8   : > { %5246 = vmatpush3.bf16.msra.mxu1 %v5245_v60  ;;  %v5407_v60 = vpack.c.bf16 %v3827_v58, %v3826_v55 }
 0x6c9   : > { %5222 = vmatpush1.bf16.msra.mxu0 %v5221_v2  ;;  %v3234_v2 = vld [vmem:[%s6713_s5 + $0x98] sm:$0xff] }
 0x6ca   : > { %5224 = vmatprep.subr.bf16.mxu0 %v5223_v4  ;;  %v3818_v4 = vld [vmem:[%s6685_s25 + $0x90] sm:$0xff]  ;;  %v5247_v5 = vpack.c.bf16 %v3234_v2, %v3233_v62  ;;  %v3244_v62 = vld [vmem:[%s6713_s5 + $0xe8] sm:$0xff]  ;;  %v3828_v2 = vld [vmem:[%s6685_s25 + $0xe0] sm:$0xff] }
 0x6cc   : > { %5248 = vmatprep.subr.bf16.mxu1 %v5247_v5 }
 0x6cd   : > { %5226 = vmatpush1.bf16.msra.mxu0 %v5225_v13  ;;  %v5391_v13 = vpack.c.bf16 %v3819_v6, %v3818_v4  ;;  %v3829_v4 = vld [vmem:[%s6685_s25 + $0xe8] sm:$0xff]  ;;  %v5409_v6 = vpack.c.bf16 %v3811_v35, %v3810_v61 }
 0x6ce   : > { %5228 = vmatprep.subr.bf16.mxu0 %v5227_v14  ;;  %v5249_v14 = vpack.c.bf16 %v3218_v12, %v3217_v11  ;;  %v3227_v12 = vld [vmem:[%s6713_s5 + $0x60] sm:$0xff]  ;;  %v5411_v15 = vpack.c.bf16 %v3829_v4, %v3828_v2 }
 0x6d0   : > { %5250 = vmatpush3.bf16.msra.mxu1 %v5249_v14  ;;  %v3812_v14 = vld [vmem:[%s6685_s25 + $0x60] sm:$0xff] }
 0x6d1   : > { %5230 = vmatpush1.bf16.msra.mxu0 %v5229_v18  ;;  %v3236_v18 = vld [vmem:[%s6713_s5 + $0xa8] sm:$0xff] }
 0x6d2   : > { %5232 = vmatprep.subr.bf16.mxu0 %v5231_v19  ;;  %v3820_v19 = vld [vmem:[%s6685_s25 + $0xa0] sm:$0xff]  ;;  %v5251_v20 = vpack.c.bf16 %v3236_v18, %v3235_v42  ;;  %v3246_v42 = vld [vmem:[%s6713_s5 + $0xf8] sm:$0xff]  ;;  %v3830_v18 = vld [vmem:[%s6685_s25 + $0xf0] sm:$0xff] }
 0x6d4   : > { %5252 = vmatprep.subr.bf16.mxu1 %v5251_v20 }
 0x6d5   : > { %5234 = vmatpush1.bf16.msra.mxu0 %v5233_v24  ;;  %v5395_v24 = vpack.c.bf16 %v3821_v21, %v3820_v19  ;;  %v3831_v19 = vld [vmem:[%s6685_s25 + $0xf8] sm:$0xff]  ;;  %v5413_v21 = vpack.c.bf16 %v3813_v16, %v3812_v14  ;;  %v3361_v14 = vld [vmem:[%s6715_s1 + $0x10] sm:$0xff] }
 0x6d6   : > { %5236 = vmatprep.subr.bf16.mxu0 %v5235_v25  ;;  %v5253_v25 = vpack.c.bf16 %v3220_v23, %v3219_v22  ;;  %v3229_v23 = vld [vmem:[%s6713_s5 + $0x70] sm:$0xff] }
 0x6d8   : > { %5254 = vmatpush3.bf16.msra.mxu1 %v5253_v25  ;;  %v5415_v25 = vpack.c.bf16 %v3831_v19, %v3830_v18  ;;  %v3365_v19 = vld [vmem:[%s6715_s1 + $0x30] sm:$0xff] }
 0x6d9   : > { %5238 = vmatpush1.bf16.msra.mxu0 %v5237_v30  ;;  %v3238_v30 = vld [vmem:[%s6713_s5 + $0xb8] sm:$0xff] }
 0x6da   : > { %5240 = vmatprep.subr.bf16.mxu0 %v5239_v31  ;;  %v3822_v31 = vld [vmem:[%s6685_s25 + $0xb0] sm:$0xff]  ;;  %v5255_v36 = vpack.c.bf16 %v3238_v30, %v3237_v28 }
 0x6dc   : > { %5256 = vmatprep.subr.bf16.mxu1 %v5255_v36 }
 0x6dd   : > { %5242 = vmatpush1.bf16.msra.mxu0 %v5241_v37  ;;  %v5399_v37 = vpack.c.bf16 %v3823_v32, %v3822_v31 }
 0x6de   : > { %5388 = vmatprep.subr.bf16.mxu0 %v5387_v54  ;;  %v3226_v54 = vld [vmem:[%s6713_s5 + $0x58] sm:$0xff] }
 0x6df   : > { %v5265_v5 = vpack.c.bf16 %v3226_v54, %v3225_v59 }
 0x6e0   : > { %3148 = vmatmul.mubr.f32.vlgmr.msra.gmra.mrb[6].mxu0 %v5609_v38  ;;  %v3221_v38 = vld [vmem:[%s6713_s5 + $0x30] sm:$0xff] }
 0x6e1   : > { %5390 = vmatpush3.bf16.msra.mxu0 %v5389_v33  ;;  %v5257_v34 = vpack.c.bf16 %v3222_v39, %v3221_v38  ;;  %v3243_v33 = vld [vmem:[%s6713_s5 + $0xe0] sm:$0xff] }
 0x6e2   : > { %5392 = vmatprep.subr.bf16.mxu0 %v5391_v13  ;;  %v5267_v11 = vpack.c.bf16 %v3244_v62, %v3243_v33  ;;  %v3228_v13 = vld [vmem:[%s6713_s5 + $0x68] sm:$0xff] }
 0x6e3   : > { %5258 = vmatpush3.bf16.msra.mxu1 %v5257_v34  ;;  %v5269_v20 = vpack.c.bf16 %v3228_v13, %v3227_v12  ;;  %v6049_v13 = vmov 0.0|0.0  }
 0x6e4   : > { %5260 = vmatprep.subr.bf16.mxu1 %v5259_v9 }
 0x6e5   : > { %5394 = vmatpush3.bf16.msra.mxu0 %v5393_v17  ;;  %v3245_v17 = vld [vmem:[%s6713_s5 + $0xf0] sm:$0xff] }
 0x6e6   : > { %5396 = vmatprep.subr.bf16.mxu0 %v5395_v24  ;;  %v5271_v22 = vpack.c.bf16 %v3246_v42, %v3245_v17  ;;  %v3230_v24 = vld [vmem:[%s6713_s5 + $0x78] sm:$0xff]  ;;  %v3363_v17 = vld [vmem:[%s6715_s1 + $0x20] sm:$0xff]  ;;  %v3364_v42 = vld [vmem:[%s6715_s1 + $0x28] sm:$0xff] }
 0x6e7   : > { %v5273_v28 = vpack.c.bf16 %v3230_v24, %v3229_v23  ;;  %v5282_v18 = vpack.c.bf16 %v3364_v42, %v3363_v17  ;;  %v3368_v23 = vld [vmem:[%s6715_s1 + $0x48] sm:$0xff]  ;;  %v3458_v17 = vld [vmem:[%s7371_s23 + $0x30] sm:$0xff]  ;;  %v3459_v42 = vld [vmem:[%s7371_s23 + $0x38] sm:$0xff] }
 0x6e9   : > { %5398 = vmatpush3.bf16.msra.mxu0 %v5397_v29  ;;  %v5417_v29 = vpack.c.bf16 %v3815_v27, %v3814_v26  ;;  %v3370_v26 = vld [vmem:[%s6715_s1 + $0x58] sm:$0xff] }
 0x6ea   : > { %5400 = vmatprep.subr.bf16.mxu0 %v5399_v37 }
 0x6ed   : > { %5402 = vmatpush3.bf16.msra.mxu0 %v5401_v7 }
 0x7b3   : > { %v3149_v44 = vpop.f32.mrb[6].mxu0 }
 0x7b4   : > { %v7244_v46 = vadd.f32 %v5420_v43, %v3149_v44  ;;  %v3151_v47 = vpop.f32.mrb[7].mxu0  ;;  %v3824_v43 = vld [vmem:[%s6685_s25 + $0xc0] sm:$0xff]  ;;  %v3825_v44 = vld [vmem:[%s6685_s25 + $0xc8] sm:$0xff] }
 0x7b5   : > { %v7246_v49 = vadd.f32 %v5423_v45, %v3151_v47  ;;  %v3223_v45 = vld [vmem:[%s6713_s5 + $0x40] sm:$0xff]  ;;  %v5403_v47 = vpack.c.bf16 %v3825_v44, %v3824_v43 }
 0x7b6   : > { %v3164_v10 = vmul.f32 %v7244_v46, %v7244_v46 }
 0x7b7   : > { %v3160_v50 = vadd.f32 %v7246_v49, %v7244_v46  ;;  %v3165_v8 = vmul.f32 %v7246_v49, %v7246_v49  ;;  %5404 = vmatprep.subr.bf16.mxu0 %v5403_v47 }
 0x7b9   : > { %3161 = vadd.xlane.f32.xlu0 %v3160_v50  ;;  %v3166_v63 = vadd.f32 %v3165_v8, %v3164_v10  ;;  %v3224_v10 = vld [vmem:[%s6713_s5 + $0x48] sm:$0xff]  ;;  %v3808_v50 = vld [vmem:[%s6685_s25 + $0x40] sm:$0xff]  ;;  %s1891_s5 = scalar_lea.vmem %s7613_s14, %s6814_s7  ;;  %s7624_s14 = sld [smem:[#allocation55_spill]] }
 0x7ba   : > { %v3809_v8 = vld [vmem:[%s6685_s25 + $0x48] sm:$0xff]  ;;  %s1903_s25 = scalar_lea.vmem %s7612_s15, %s6814_s7  ;;  %v3159_v51 = vld [vmem:[%s1891_s5] sm:$0x3]  ;;  %s7614_s7 = sld [smem:[#allocation50_spill]] }
 0x7bb   : > { %3167 = vadd.xlane.f32.xlu1 %v3166_v63  ;;  %v5261_v63 = vpack.c.bf16 %v3224_v10, %v3223_v45  ;;  %v5405_v56 = vpack.c.bf16 %v3809_v8, %v3808_v50  ;;  %v3158_v34 = vld [vmem:[%s1903_s25] sm:$0x3]  ;;  %v3200_v47 = vrot.slane %v3159_v51, %v6824_v3  ;;  %v3196_v10 = vrot.slane %v3159_v51, %v6821_v1  ;;  %s1914_s15 = scalar_lea.vmem %s7620_s27, %s7631_s2  ;;  %s1917_s25 = scalar_lea.vmem %s7621_s3, %s7631_s2 }
 0x7bc   : > { %v3187_v7 = vrot.slane %v3158_v34, %v6824_v3  ;;  %v3183_v9 = vrot.slane %v3158_v34, %v6821_v1  ;;  %s1838_s5 = scalar_lea.vmem %s7622_s21, %s7631_s2 }
 0x7bd   : > { %5262 = vmatpush3.bf16.msra.mxu1 %v5261_v63  ;;  %5406 = vmatpush3.bf16.msra.mxu0 %v5405_v56 }
 0x7be   : > { %5264 = vmatprep.subr.bf16.mxu1 %v5263_v57  ;;  %5408 = vmatprep.subr.bf16.mxu0 %v5407_v60 }
 0x7c0   : > { %s1911_s11 = scalar_lea.vmem %s7614_s7, %s7631_s2  ;;  %s1841_s7 = scalar_lea.vmem %s7623_s26, %s7631_s2 }
 0x7c1   : > { %5266 = vmatpush3.bf16.msra.mxu1 %v5265_v5  ;;  %5410 = vmatpush3.bf16.msra.mxu0 %v5409_v6  ;;  %v4558_v61 = vld [vmem:[%s1911_s11] ss:$0 sm:$0xff]  ;;  %s4557_s11 = sshll.u32 %s7631_s2, 3 }
 0x7c2   : > { %5268 = vmatprep.subr.bf16.mxu1 %v5267_v11  ;;  %5412 = vmatprep.subr.bf16.mxu0 %v5411_v15  ;;  %v3359_v6 = vld [vmem:[%s6715_s1] sm:$0xff]  ;;  %v3360_v11 = vld [vmem:[%s6715_s1 + $0x8] sm:$0xff]  ;;  %v3362_v15 = vld [vmem:[%s6715_s1 + $0x18] sm:$0xff] }
 0x7c3   : > { %v5276_v12 = vpack.c.bf16 %v3360_v11, %v3359_v6  ;;  %v5279_v16 = vpack.c.bf16 %v3362_v15, %v3361_v14  ;;  %v3456_v6 = vld [vmem:[%s7371_s23 + $0x20] sm:$0xff]  ;;  %v3457_v11 = vld [vmem:[%s7371_s23 + $0x28] sm:$0xff]  ;;  %v3475_v14 = vld [vmem:[%s7371_s23 + $0xb8] sm:$0xff] }
 0x7c4   : > { %v5309_v15 = vpack.c.bf16 %v3457_v11, %v3456_v6  ;;  %v3571_v6 = vld [vmem:[%s6669_s18 + $0x40] sm:$0xff]  ;;  %v3572_v11 = vld [vmem:[%s6669_s18 + $0x48] sm:$0xff] }
 0x7c5   : > { %5270 = vmatpush3.bf16.msra.mxu1 %v5269_v20  ;;  %5414 = vmatpush3.bf16.msra.mxu0 %v5413_v21  ;;  %v3366_v20 = vld [vmem:[%s6715_s1 + $0x38] sm:$0xff] }
 0x7c6   : > { %5272 = vmatprep.subr.bf16.mxu1 %v5271_v22  ;;  %5416 = vmatprep.subr.bf16.mxu0 %v5415_v25  ;;  %v5285_v21 = vpack.c.bf16 %v3366_v20, %v3365_v19  ;;  %v3367_v22 = vld [vmem:[%s6715_s1 + $0x40] sm:$0xff]  ;;  %v3369_v25 = vld [vmem:[%s6715_s1 + $0x50] sm:$0xff]  ;;  %v3477_v19 = vld [vmem:[%s7371_s23 + $0xc8] sm:$0xff]  ;;  %v5313_v20 = vpack.c.bf16 %v3459_v42, %v3458_v17 }
 0x7c7   : > { %v5288_v24 = vpack.c.bf16 %v3368_v23, %v3367_v22  ;;  %v5291_v27 = vpack.c.bf16 %v3370_v26, %v3369_v25  ;;  %v3460_v22 = vld [vmem:[%s7371_s23 + $0x40] sm:$0xff]  ;;  %v3461_v23 = vld [vmem:[%s7371_s23 + $0x48] sm:$0xff]  ;;  %v3479_v25 = vld [vmem:[%s7371_s23 + $0xd8] sm:$0xff] }
 0x7c8   : > { %v5317_v26 = vpack.c.bf16 %v3461_v23, %v3460_v22  ;;  %v3573_v17 = vld [vmem:[%s6669_s18 + $0x50] sm:$0xff]  ;;  %v3574_v42 = vld [vmem:[%s6669_s18 + $0x58] sm:$0xff]  ;;  %v3575_v22 = vld [vmem:[%s6669_s18 + $0x60] sm:$0xff] }
 0x7c9   : > { %5274 = vmatpush3.bf16.msra.mxu1 %v5273_v28  ;;  %5418 = vmatpush3.bf16.msra.mxu0 %v5417_v29  ;;  %v3371_v28 = vld [vmem:[%s6715_s1 + $0x60] sm:$0xff]  ;;  %v3372_v29 = vld [vmem:[%s6715_s1 + $0x68] sm:$0xff] }
 0x7ca   : > { %5275 = vmatprep.subr.bf16.mxu1 %v6049_v13  ;;  %v3576_v23 = vld [vmem:[%s6669_s18 + $0x68] sm:$0xff] }
 0x846   : > { %v3162_v30 = vpop.xlane.xlu0 %3161 }
 0x847   : > { %v3163_v31 = vmul.f32 0.0052083335, %v3162_v30  ;;  %v5294_v30 = vpack.c.bf16 %v3372_v29, %v3371_v28  ;;  %v3462_v28 = vld [vmem:[%s7371_s23 + $0x50] sm:$0xff]  ;;  %v3463_v29 = vld [vmem:[%s7371_s23 + $0x58] sm:$0xff] }
 0x848   : > { %v3168_v32 = vpop.xlane.xlu1 %3167 }
 0x849   : > { %v3169_v36 = vmul.f32 0.0052083335, %v3168_v32  ;;  %v3170_v37 = vmul.f32 %v3163_v31, %v3163_v31  ;;  %v3173_v40 = vsub.f32 %v7244_v46, %v3163_v31  ;;  %v3174_v41 = vsub.f32 %v7246_v49, %v3163_v31  ;;  %v3373_v31 = vld [vmem:[%s6715_s1 + $0x70] sm:$0xff]  ;;  %v3374_v32 = vld [vmem:[%s6715_s1 + $0x78] sm:$0xff]  ;;  %s1920_s1 = scalar_lea.vmem %s7616_s28, %s7631_s2 }
 0x84b   : > { %v3171_v38 = vsub.f32 %v3169_v36, %v3170_v37  ;;  %v3468_v36 = vld [vmem:[%s7371_s23 + $0x80] sm:$0xff]  ;;  %v3469_v37 = vld [vmem:[%s7371_s23 + $0x88] sm:$0xff] }
 0x84d   : > { %v3172_v39 = vmax.f32 %v3171_v38, 0.0  ;;  %v5297_v38 = vpack.c.bf16 %v3374_v32, %v3373_v31  ;;  %v3481_v31 = vld [vmem:[%s7371_s23 + $0xe8] sm:$0xff]  ;;  %v5321_v32 = vpack.c.bf16 %v3463_v29, %v3462_v28  ;;  %v3577_v28 = vld [vmem:[%s6669_s18 + $0x70] sm:$0xff]  ;;  %v3578_v29 = vld [vmem:[%s6669_s18 + $0x78] sm:$0xff] }
 0x84f   : > { %v3175_v48 = vadd.f32 1e-05, %v3172_v39  ;;  %v5299_v39 = vpack.c.bf16 %v3469_v37, %v3468_v36  ;;  %v3464_v37 = vld [vmem:[%s7371_s23 + $0x60] sm:$0xff] }
 0x851   : > { %5595 = vrsqrt.f32 %v3175_v48 }
 0x85b   : > { %v5596_v43 = vpop.eup %5595 }
 0x85c   : > { %v3177_v44 = vmul.f32 %v5596_v43, %v3173_v40  ;;  %v3178_v45 = vmul.f32 %v5596_v43, %v3174_v41 }
 0x85e   : > { %v3191_v50 = vmul.f32 %v3187_v7, %v3178_v45  ;;  %v3190_v8 = vmul.f32 %v3183_v9, %v3177_v44 }
 0x860   : > { %v3204_v63 = vadd.f32 %v3200_v47, %v3191_v50  ;;  %v3203_v52 = vadd.f32 %v3196_v10, %v3190_v8  ;;  %v4559_v47 = vld [vmem:[%s1923_s9] ss:$0 sm:$0xff] }
 0x861   : > { %v4560_v50 = vld [vmem:[%s1920_s1] ss:$0 sm:$0xff] }
 0x862   : > { %v3208_v53 = vmul.f32 0.70710677, %v3204_v63  ;;  %v3207_v46 = vmul.f32 0.70710677, %v3203_v52  ;;  %v3206_v56 = vmul.f32 0.5, %v3204_v63  ;;  %v3205_v58 = vmul.f32 0.5, %v3203_v52 }
 0x864   : > { %5597 = verf.f32 %v3208_v53  ;;  %v3452_v53 = vld [vmem:[%s7371_s23] sm:$0xff] }
 0x865   : > { %5599 = verf.f32 %v3207_v46  ;;  %v3453_v46 = vld [vmem:[%s7371_s23 + $0x8] sm:$0xff] }
 0x86e   : > { %v5598_v49 = vpop.eup %5597 }
 0x86f   : > { %v5600_v55 = vpop.eup %5599  ;;  %v3212_v57 = vadd.f32 1.0, %v5598_v49 }
 0x870   : > { %v3211_v59 = vadd.f32 1.0, %v5600_v55  ;;  %v3470_v55 = vld [vmem:[%s7371_s23 + $0x90] sm:$0xff] }
 0x871   : > { %v7328_v54 = vmul.f32 %v3212_v57, %v3206_v56  ;;  %v3471_v56 = vld [vmem:[%s7371_s23 + $0x98] sm:$0xff] }
 0x872   : > { %v7330_v3 = vmul.f32 %v3211_v59, %v3205_v58  ;;  %v5301_v59 = vpack.c.bf16 %v3453_v46, %v3452_v53  ;;  %v3566_v53 = vld [vmem:[%s6669_s18 + $0x18] sm:$0xff]  ;;  %v3583_v46 = vld [vmem:[%s6669_s18 + $0xa0] sm:$0xff] }
 0x873   : > { %3318 = vmatprep.mubr.f32.mxu1 %v7328_v54  ;;  %3896 = vmatprep.mubr.f32.mxu0 %v7328_v54 }
 0x874   : > { %3319 = vmatmul.mubr.f32.vlgmr.msra.gmra.mrb[4].mxu1 %v7330_v3  ;;  %3897 = vmatmul.mubr.f32.vlgmr.msra.gmra.mrb[8].mxu0 %v7330_v3 }
 0x875   : > { %5277 = vmatpush3.bf16.msra.mxu1 %v5276_v12  ;;  %4821 = vmatprep.mubr.msk.f32.mxu1 %vm6050_vm0, %v6048_v0  ;;  %v3474_v12 = vld [vmem:[%s7371_s23 + $0xb0] sm:$0xff] }
 0x876   : > { %5278 = vmatprep.subr.bf16.mxu1 %v6049_v13 }
 0x879   : > { %5280 = vmatpush3.bf16.msra.mxu1 %v5279_v16  ;;  %v5311_v16 = vpack.c.bf16 %v3475_v14, %v3474_v12  ;;  %v3589_v12 = vld [vmem:[%s6669_s18 + $0xd0] sm:$0xff]  ;;  %v3590_v14 = vld [vmem:[%s6669_s18 + $0xd8] sm:$0xff] }
 0x87a   : > { %5281 = vmatprep.subr.bf16.mxu1 %v6049_v13 }
 0x87d   : > { %5283 = vmatpush3.bf16.msra.mxu1 %v5282_v18  ;;  %v3476_v18 = vld [vmem:[%s7371_s23 + $0xc0] sm:$0xff] }
 0x87e   : > { %5284 = vmatprep.subr.bf16.mxu1 %v6049_v13 }
 0x881   : > { %5286 = vmatpush3.bf16.msra.mxu1 %v5285_v21  ;;  %v5315_v21 = vpack.c.bf16 %v3477_v19, %v3476_v18  ;;  %v3591_v18 = vld [vmem:[%s6669_s18 + $0xe0] sm:$0xff]  ;;  %v3592_v19 = vld [vmem:[%s6669_s18 + $0xe8] sm:$0xff] }
 0x882   : > { %5287 = vmatprep.subr.bf16.mxu1 %v6049_v13 }
 0x885   : > { %5289 = vmatpush3.bf16.msra.mxu1 %v5288_v24  ;;  %v3478_v24 = vld [vmem:[%s7371_s23 + $0xd0] sm:$0xff] }
 0x886   : > { %5290 = vmatprep.subr.bf16.mxu1 %v6049_v13 }
 0x889   : > { %5292 = vmatpush3.bf16.msra.mxu1 %v5291_v27  ;;  %v5319_v27 = vpack.c.bf16 %v3479_v25, %v3478_v24  ;;  %v3593_v24 = vld [vmem:[%s6669_s18 + $0xf0] sm:$0xff]  ;;  %v3594_v25 = vld [vmem:[%s6669_s18 + $0xf8] sm:$0xff] }
 0x88a   : > { %5293 = vmatprep.subr.bf16.mxu1 %v6049_v13 }
 0x88d   : > { %5295 = vmatpush3.bf16.msra.mxu1 %v5294_v30  ;;  %v3480_v30 = vld [vmem:[%s7371_s23 + $0xe0] sm:$0xff] }
 0x88e   : > { %5296 = vmatprep.subr.bf16.mxu1 %v6049_v13  ;;  %v5323_v36 = vpack.c.bf16 %v3481_v31, %v3480_v30  ;;  %v5361_v30 = vpack.c.bf16 %v3578_v29, %v3577_v28 }
 0x891   : > { %5298 = vmatpush3.bf16.msra.mxu1 %v5297_v38  ;;  %v3465_v38 = vld [vmem:[%s7371_s23 + $0x68] sm:$0xff] }
 0x892   : > { %5300 = vmatprep.subr.bf16.mxu1 %v5299_v39  ;;  %v3482_v39 = vld [vmem:[%s7371_s23 + $0xf0] sm:$0xff] }
 0x947   : > { %v4647_v1 = vpop.f32.mrb[4].mxu1  ;;  %v4786_v60 = vpop.f32.mrb[8].mxu0 }
 0x948   : > { %v4648_v35 = vpop.f32.mrb[5].mxu1  ;;  %v4787_v33 = vpop.f32.mrb[9].mxu0 }
 0x949   : > { %v4649_v62 = vadd.f32 %v4648_v35, %v4647_v1  ;;  %v7338_v2 = vadd.f32 %v4787_v33, %v4786_v60  ;;  %v5303_v60 = vpack.c.bf16 %v3471_v56, %v3470_v55  ;;  %v3455_v35 = vld [vmem:[%s7371_s23 + $0x18] sm:$0xff]  ;;  %v3472_v33 = vld [vmem:[%s7371_s23 + $0xa0] sm:$0xff] }
 0x94b   : > { %v7340_v4 = vadd.f32 %v4649_v62, %v4558_v61  ;;  %v3454_v61 = vld [vmem:[%s7371_s23 + $0x10] sm:$0xff]  ;;  %v3473_v62 = vld [vmem:[%s7371_s23 + $0xa8] sm:$0xff] }
 0x94d   : > { %3326 = vadd.xlane.f32.xlu0 %v7340_v4  ;;  %v3329_v5 = vmul.f32 %v7340_v4, %v7340_v4 }
 0x94f   : > { %3330 = vadd.xlane.f32.xlu1 %v3329_v5  ;;  %v5307_v5 = vpack.c.bf16 %v3473_v62, %v3472_v33  ;;  %v3570_v33 = vld [vmem:[%s6669_s18 + $0x38] sm:$0xff]  ;;  %v3588_v62 = vld [vmem:[%s6669_s18 + $0xc8] sm:$0xff] }
 0x9da   : > { %v3327_v48 = vpop.xlane.xlu0 %3326 }
 0x9db   : > { %v3328_v34 = vmul.f32 0.010416667, %v3327_v48  ;;  %v3483_v48 = vld [vmem:[%s7371_s23 + $0xf8] sm:$0xff] }
 0x9dc   : > { %v3331_v51 = vpop.xlane.xlu1 %3330 }
 0x9dd   : > { %v3333_v40 = vmul.f32 %v3328_v34, %v3328_v34  ;;  %v3332_v41 = vmul.f32 0.010416667, %v3331_v51  ;;  %v3336_v44 = vsub.f32 %v7340_v4, %v3328_v34  ;;  %v5305_v4 = vpack.c.bf16 %v3455_v35, %v3454_v61  ;;  %v3569_v35 = vld [vmem:[%s6669_s18 + $0x30] sm:$0xff] }
 0x9de   : > { %v5325_v34 = vpack.c.bf16 %v3465_v38, %v3464_v37  ;;  %v5327_v51 = vpack.c.bf16 %v3483_v48, %v3482_v39 }
 0x9df   : > { %v3334_v7 = vsub.f32 %v3332_v41, %v3333_v40  ;;  %v3466_v40 = vld [vmem:[%s7371_s23 + $0x70] sm:$0xff]  ;;  %v3467_v41 = vld [vmem:[%s7371_s23 + $0x78] sm:$0xff]  ;;  %s1927_s23 = scalar_lea.vmem %s7624_s14, %s4557_s11 }
 0x9e1   : > { %v3335_v9 = vmax.f32 %v3334_v7, 0.0  ;;  %v3579_v7 = vld [vmem:[%s6669_s18 + $0x80] sm:$0xff] }
 0x9e3   : > { %v3337_v43 = vadd.f32 1e-05, %v3335_v9  ;;  %v3580_v9 = vld [vmem:[%s6669_s18 + $0x88] sm:$0xff] }
 0x9e5   : > { %5601 = vrsqrt.f32 %v3337_v43  ;;  %v5329_v43 = vpack.c.bf16 %v3467_v41, %v3466_v40  ;;  %v3709_v41 = vld [vmem:[%s6677_s12 + $0x10] sm:$0xff] }
 0x9ef   : > { %v5602_v45 = vpop.eup %5601 }
 0x9f0   : > { %v3339_v10 = vmul.f32 %v5602_v45, %v3336_v44  ;;  %v5331_v44 = vpack.c.bf16 %v3580_v9, %v3579_v7  ;;  %v3563_v45 = vld [vmem:[%s6669_s18] sm:$0xff]  ;;  %v3710_v7 = vld [vmem:[%s6677_s12 + $0x18] sm:$0xff] }
 0x9f1   : > { %v5367_v9 = vpack.c.bf16 %v3710_v7, %v3709_v41 }
 0x9f2   : > { %v3346_v8 = vmul.f32 %v4559_v47, %v3339_v10  ;;  %v3564_v47 = vld [vmem:[%s6669_s18 + $0x8] sm:$0xff]  ;;  %v3581_v10 = vld [vmem:[%s6669_s18 + $0x90] sm:$0xff] }
 0x9f4   : > { %v3353_v63 = vadd.f32 %v4560_v50, %v3346_v8  ;;  %v3582_v50 = vld [vmem:[%s6669_s18 + $0x98] sm:$0xff]  ;;  %v5333_v8 = vpack.c.bf16 %v3564_v47, %v3563_v45  ;;  %v3713_v47 = vld [vmem:[%s6677_s12 + $0x30] sm:$0xff] }
 0x9f6   : > { %v3355_v52 = vmul.f32 0.70710677, %v3353_v63  ;;  %v3354_v57 = vmul.f32 0.5, %v3353_v63  ;;  %v5335_v63 = vpack.c.bf16 %v3582_v50, %v3581_v10  ;;  %v3714_v10 = vld [vmem:[%s6677_s12 + $0x38] sm:$0xff] }
 0x9f7   : > { %v5373_v50 = vpack.c.bf16 %v3714_v10, %v3713_v47 }
 0x9f8   : > { %5603 = verf.f32 %v3355_v52  ;;  %v3565_v52 = vld [vmem:[%s6669_s18 + $0x10] sm:$0xff] }
 0x9f9   : > { %v5337_v55 = vpack.c.bf16 %v3566_v53, %v3565_v52  ;;  %v3717_v53 = vld [vmem:[%s6677_s12 + $0x50] sm:$0xff] }
 0xa02   : > { %v5604_v49 = vpop.eup %5603 }
 0xa03   : > { %v3357_v58 = vadd.f32 1.0, %v5604_v49  ;;  %v3584_v49 = vld [vmem:[%s6669_s18 + $0xa8] sm:$0xff] }
 0xa04   : > { %v5339_v56 = vpack.c.bf16 %v3584_v49, %v3583_v46  ;;  %v3718_v46 = vld [vmem:[%s6677_s12 + $0x58] sm:$0xff] }
 0xa05   : > { %v3358_v1 = vmul.f32 %v3357_v58, %v3354_v57  ;;  %v3567_v57 = vld [vmem:[%s6669_s18 + $0x20] sm:$0xff]  ;;  %v3568_v58 = vld [vmem:[%s6669_s18 + $0x28] sm:$0xff]  ;;  %v5379_v49 = vpack.c.bf16 %v3718_v46, %v3717_v53 }
 0xa07   : > { %4822 = vmatmul.mubr.f32.vlgmr.msra.gmra.mrb[6].mxu1 %v3358_v1  ;;  %v3586_v1 = vld [vmem:[%s6669_s18 + $0xb8] sm:$0xff] }
 0xa08   : > { %5302 = vmatpush3.bf16.msra.mxu1 %v5301_v59  ;;  %3548 = vmatprep.mubr.f32.mxu1 %v7328_v54  ;;  %v3585_v59 = vld [vmem:[%s6669_s18 + $0xb0] sm:$0xff] }
 0xa09   : > { %5304 = vmatprep.subr.bf16.mxu1 %v5303_v60  ;;  %v5341_v60 = vpack.c.bf16 %v3568_v58, %v3567_v57  ;;  %v5343_v61 = vpack.c.bf16 %v3586_v1, %v3585_v59  ;;  %v3721_v58 = vld [vmem:[%s6677_s12 + $0x70] sm:$0xff]  ;;  %v3722_v59 = vld [vmem:[%s6677_s12 + $0x78] sm:$0xff] }
 0xa0a   : > { %v5385_v1 = vpack.c.bf16 %v3722_v59, %v3721_v58 }
 0xa0c   : > { %5306 = vmatpush3.bf16.msra.mxu1 %v5305_v4  ;;  %v5345_v4 = vpack.c.bf16 %v3570_v33, %v3569_v35 }
 0xa0d   : > { %5308 = vmatprep.subr.bf16.mxu1 %v5307_v5 }
 0xa10   : > { %5310 = vmatpush3.bf16.msra.mxu1 %v5309_v15  ;;  %v5349_v15 = vpack.c.bf16 %v3572_v11, %v3571_v6 }
 0xa11   : > { %5312 = vmatprep.subr.bf16.mxu1 %v5311_v16  ;;  %v5351_v16 = vpack.c.bf16 %v3590_v14, %v3589_v12  ;;  %v4564_v12 = vld [vmem:[%s1847_s16] ss:$0 sm:$0xff] }
 0xa14   : > { %5314 = vmatpush3.bf16.msra.mxu1 %v5313_v20  ;;  %v5353_v20 = vpack.c.bf16 %v3574_v42, %v3573_v17 }
 0xa15   : > { %5316 = vmatprep.subr.bf16.mxu1 %v5315_v21  ;;  %v5355_v21 = vpack.c.bf16 %v3592_v19, %v3591_v18 }
 0xa18   : > { %5318 = vmatpush3.bf16.msra.mxu1 %v5317_v26  ;;  %v5357_v26 = vpack.c.bf16 %v3576_v23, %v3575_v22  ;;  %v4562_v23 = vld [vmem:[%s1917_s25] ss:$0 sm:$0xff] }
 0xa19   : > { %5320 = vmatprep.subr.bf16.mxu1 %v5319_v27  ;;  %v5359_v27 = vpack.c.bf16 %v3594_v25, %v3593_v24  ;;  %v4566_v25 = vld [vmem:[%s1838_s5] ss:$0 sm:$0xff] }
 0xa1c   : > { %5322 = vmatpush3.bf16.msra.mxu1 %v5321_v32 }
 0xa1d   : > { %5324 = vmatprep.subr.bf16.mxu1 %v5323_v36 }
 0xa20   : > { %5326 = vmatpush3.bf16.msra.mxu1 %v5325_v34 }
 0xa21   : > { %5328 = vmatprep.subr.bf16.mxu1 %v5327_v51 }
 0xa24   : > { %5330 = vmatpush3.bf16.msra.mxu1 %v5329_v43  ;;  %v3711_v43 = vld [vmem:[%s6677_s12 + $0x20] sm:$0xff] }
 0xa25   : > { %5332 = vmatprep.subr.bf16.mxu1 %v5331_v44  ;;  %v3712_v44 = vld [vmem:[%s6677_s12 + $0x28] sm:$0xff] }
 0xa26   : > { %v5370_v45 = vpack.c.bf16 %v3712_v44, %v3711_v43 }
 0xa27   : > { %3549 = vmatmul.mubr.f32.vlgmr.msra.gmra.mrb[8].mxu1 %v7330_v3 }
 0xa28   : > { %5334 = vmatpush3.bf16.msra.mxu1 %v5333_v8  ;;  %3666 = vmatprep.mubr.f32.mxu1 %v7328_v54  ;;  %v3587_v54 = vld [vmem:[%s6669_s18 + $0xc0] sm:$0xff]  ;;  %s1835_s18 = scalar_lea.vmem %s7617_s24, %s7631_s2 }
 0xa29   : > { %5336 = vmatprep.subr.bf16.mxu1 %v5335_v63  ;;  %v5347_v5 = vpack.c.bf16 %v3588_v62, %v3587_v54  ;;  %v4563_v38 = vld [vmem:[%s1835_s18] ss:$0 sm:$0xff]  ;;  %v3716_v63 = vld [vmem:[%s6677_s12 + $0x48] sm:$0xff] }
 0xa2a   : > { %v3715_v8 = vld [vmem:[%s6677_s12 + $0x40] sm:$0xff] }
 0xa2b   : > { %v5376_v52 = vpack.c.bf16 %v3716_v63, %v3715_v8 }
 0xa2c   : > { %5338 = vmatpush3.bf16.msra.mxu1 %v5337_v55  ;;  %v3719_v55 = vld [vmem:[%s6677_s12 + $0x60] sm:$0xff] }
 0xa2d   : > { %5340 = vmatprep.subr.bf16.mxu1 %v5339_v56  ;;  %v3720_v56 = vld [vmem:[%s6677_s12 + $0x68] sm:$0xff] }
 0xa2e   : > { %v5382_v57 = vpack.c.bf16 %v3720_v56, %v3719_v55 }
 0xa30   : > { %5342 = vmatpush3.bf16.msra.mxu1 %v5341_v60 }
 0xa31   : > { %5344 = vmatprep.subr.bf16.mxu1 %v5343_v61 }
 0xa34   : > { %5346 = vmatpush3.bf16.msra.mxu1 %v5345_v4 }
 0xa35   : > { %5348 = vmatprep.subr.bf16.mxu1 %v5347_v5 }
 0xa38   : > { %5350 = vmatpush3.bf16.msra.mxu1 %v5349_v15 }
 0xa39   : > { %5352 = vmatprep.subr.bf16.mxu1 %v5351_v16 }
 0xa3c   : > { %5354 = vmatpush3.bf16.msra.mxu1 %v5353_v20 }
 0xa3d   : > { %5356 = vmatprep.subr.bf16.mxu1 %v5355_v21  ;;  %v4561_v21 = vld [vmem:[%s1914_s15] ss:$0 sm:$0xff] }
 0xa40   : > { %5358 = vmatpush3.bf16.msra.mxu1 %v5357_v26 }
 0xa41   : > { %5360 = vmatprep.subr.bf16.mxu1 %v5359_v27 }
 0xa44   : > { %5362 = vmatpush3.bf16.msra.mxu1 %v5361_v30  ;;  %v4567_v30 = vld [vmem:[%s1841_s7] ss:$0 sm:$0xff] }
 0xa45   : > { %5363 = vmatprep.subr.bf16.mxu1 %v6049_v13 }
 0xa47   : > { %3667 = vmatmul.mubr.f32.vlgmr.msra.gmra.mrb[10].mxu1 %v7330_v3  ;;  %v3708_v3 = vld [vmem:[%s6677_s12 + $0x8] sm:$0xff] }
 0xa48   : > { %4856 = vmatprep.mubr.msk.f32.mxu1 %vm6050_vm0, %v6048_v0  ;;  %v3707_v0 = vld [vmem:[%s6677_s12] sm:$0xff]  ;;  %s1844_s12 = scalar_lea.vmem %s7619_s17, %s7631_s2 }
 0xa49   : > { %v5364_v40 = vpack.c.bf16 %v3708_v3, %v3707_v0  ;;  %v4565_v14 = vld [vmem:[%s1844_s12] ss:$0 sm:$0xff] }
 0xa4b   : > { %5365 = vmatpush3.bf16.msra.mxu1 %v5364_v40 }
 0xa4c   : > { %5366 = vmatprep.subr.bf16.mxu1 %v6049_v13 }
 0xa4f   : > { %5368 = vmatpush3.bf16.msra.mxu1 %v5367_v9 }
 0xa50   : > { %5369 = vmatprep.subr.bf16.mxu1 %v6049_v13 }
 0xa53   : > { %5371 = vmatpush3.bf16.msra.mxu1 %v5370_v45 }
 0xa54   : > { %5372 = vmatprep.subr.bf16.mxu1 %v6049_v13 }
 0xa57   : > { %5374 = vmatpush3.bf16.msra.mxu1 %v5373_v50 }
 0xa58   : > { %5375 = vmatprep.subr.bf16.mxu1 %v6049_v13 }
 0xa5b   : > { %5377 = vmatpush3.bf16.msra.mxu1 %v5376_v52 }
 0xa5c   : > { %5378 = vmatprep.subr.bf16.mxu1 %v6049_v13 }
 0xa5f   : > { %5380 = vmatpush3.bf16.msra.mxu1 %v5379_v49 }
 0xa60   : > { %5381 = vmatprep.subr.bf16.mxu1 %v6049_v13 }
 0xa63   : > { %5383 = vmatpush3.bf16.msra.mxu1 %v5382_v57 }
 0xa64   : > { %5384 = vmatprep.subr.bf16.mxu1 %v6049_v13 }
 0xa67   : > { %5386 = vmatpush3.bf16.msra.mxu1 %v5385_v1 }
 0xafa   : > { %v4699_v31 = vpop.f32.mrb[8].mxu1 }
 0xafb   : > { %v4700_v32 = vpop.f32.mrb[9].mxu1 }
 0xafc   : > { %v7450_v36 = vadd.f32 %v4700_v32, %v4699_v31 }
 0xafe   : > { %v5425_v22 = vadd.f32 %v7450_v36, %v4561_v21 }
 0xb00   : > { %v5426_v24 = vadd.f32 %v5425_v22, %v4562_v23 }
 0xb02   : > { %v5427_v26 = vadd.f32 %v5426_v24, %v4566_v25 }
 0xb1a   : > { %v4734_v37 = vpop.f32.mrb[10].mxu1 }
 0xb1b   : > { %v4735_v39 = vpop.f32.mrb[11].mxu1 }
 0xb1c   : > { %v4736_v48 = vadd.f32 %v4735_v39, %v4734_v37 }
 0xb1e   : > { %v3669_v34 = vadd.f32 %v4736_v48, %v4563_v38 }
 0xb20   : > { %3674 = vadd.xlane.f32.xlu0 %v3669_v34  ;;  %v3677_v51 = vmul.f32 %v3669_v34, %v3669_v34 }
 0xb22   : > { %3678 = vadd.xlane.f32.xlu1 %v3677_v51 }
 0xbad   : > { %v3675_v60 = vpop.xlane.xlu0 %3674 }
 0xbae   : > { %v3676_v61 = vmul.f32 0.010416667, %v3675_v60 }
 0xbaf   : > { %v3679_v35 = vpop.xlane.xlu1 %3678 }
 0xbb0   : > { %v3681_v33 = vmul.f32 %v3676_v61, %v3676_v61  ;;  %v3680_v54 = vmul.f32 0.010416667, %v3679_v35  ;;  %v3684_v6 = vsub.f32 %v3669_v34, %v3676_v61 }
 0xbb2   : > { %v3682_v62 = vsub.f32 %v3680_v54, %v3681_v33 }
 0xbb4   : > { %v3683_v4 = vmax.f32 %v3682_v62, 0.0 }
 0xbb6   : > { %v3685_v5 = vadd.f32 1e-05, %v3683_v4 }
 0xbb8   : > { %5605 = vrsqrt.f32 %v3685_v5 }
 0xbc2   : > { %v5606_v11 = vpop.eup %5605 }
 0xbc3   : > { %v3687_v13 = vmul.f32 %v5606_v11, %v3684_v6 }
 0xbc5   : > { %v3694_v15 = vmul.f32 %v4564_v12, %v3687_v13 }
 0xbc7   : > { %v3701_v16 = vadd.f32 %v4565_v14, %v3694_v15 }
 0xbc9   : > { %v3703_v17 = vmul.f32 0.70710677, %v3701_v16  ;;  %v3702_v18 = vmul.f32 0.5, %v3701_v16 }
 0xbcb   : > { %5607 = verf.f32 %v3703_v17 }
 0xbd5   : > { %v5608_v42 = vpop.eup %5607 }
 0xbd6   : > { %v3705_v19 = vadd.f32 1.0, %v5608_v42 }
 0xbd8   : > { %v3706_v20 = vmul.f32 %v3705_v19, %v3702_v18 }
 0xbda   : > { %4857 = vmatmul.mubr.f32.vlgmr.msra.gmra.mrb[6].mxu1 %v3706_v20 }
 0xcad   : > { %v3796_v27 = vpop.f32.mrb[6].mxu1 }
 0xcae   : > { %v5428_v28 = vadd.f32 %v5427_v26, %v3796_v27  ;;  %v4858_v29 = vpop.f32.mrb[7].mxu1 }
 0xcb0   : > { %v5429_v31 = vadd.f32 %v5428_v28, %v7338_v2 }
 0xcb2   : > { %v5430_v32 = vadd.f32 %v5429_v31, %v4567_v30 }
 0xcb4   : > { %3912 = vst [vmem:[%s1927_s23] sm:$0xff] %v5430_v32 }
 0xcb5 PF: > { %s7625_s0 = sld [smem:[#allocation58_spill]]  ;;  %s7626_s28 = sld [smem:[#allocation56_spill]] }
 0xcb6   : > { %s7627_s11 = sld [smem:[#allocation59_spill]]  ;;  %s7628_s7 = smov %s5986_s10 }
 0xcbb   : > { %p100_p4 = scmp.ge.s32.totalorder %s7625_s0, 4   ;;  %s7629_s10 = smov %s7626_s28 }
 0xcbd   :  { %102 = sbr.rel (!%p100_p4) target bundleno = 88 (0x58), region = 440 }
 0xcc4   :  { %3932 = vsyncpa [#allocation3], 1 }
 0xcc5   :  { %3934 = vsyncpa [#allocation3 + $0x1], 1 }
 0xcc6   :  { %3935 = vsyncpa [#allocation5], 1 }
 0xcc7   :  { %3937 = vsyncpa [#allocation5 + $0x1], 1 }
 0xcc8   :  { %3938 = vsyncpa [#allocation8], 1 }
 0xcc9   :  { %3940 = vsyncpa [#allocation8 + $0x1], 1 }
 0xcca   :  { %3941 = vsyncpa [#allocation11], 1 }
 0xccb   :  { %3943 = vsyncpa [#allocation11 + $0x1], 1 }
 0xccc   :  { %3944 = vsyncpa [#allocation14], 1 }
 0xccd   :  { %3946 = vsyncpa [#allocation14 + $0x1], 1 }
 0xcce   :  { %3947 = vsyncpa [#allocation17], 1 }
 0xccf   :  { %3949 = vsyncpa [#allocation17 + $0x1], 1 }

</bundles_post_ra>
